<compile_context>
chip_gen: v6e
topology: v6e:2x2x1
jax: 0.10.0
libtpu: 0.0.40
codegen_flags: <defaults>
</compile_context>

<pallas_src>
import functools

import jax
import jax.numpy as jnp
from jax import lax
from jax.experimental import pallas as pl
from jax.experimental.pallas import tpu as pltpu

C1 = 0.01 ** 2
C2 = 0.03 ** 2


def _ssim_kernel(x_ref, y_ref, out_ref, *, H, W):
    # x_ref / y_ref : (TB, H, W) unpadded image planes (VMEM)
    # out_ref       : (TB, H, W) SSIM loss planes (VMEM)
    x = x_ref[...].astype(jnp.float32)
    y = y_ref[...].astype(jnp.float32)
    TB = x.shape[0]

    lane = lax.broadcasted_iota(jnp.int32, (TB, H, W), 2)
    is_first_col = lane == 0
    is_last_col = lane == (W - 1)

    def hpool(a):
        # 3-tap horizontal sum with reflection padding (col -1 -> 1,
        # col W -> W-2).  Interior columns come from XLU rolls; the roll
        # wrap-around only contaminates the two boundary columns, which are
        # overwritten with the exact reflected values.
        s = pltpu.roll(a, shift=1, axis=2) + a + pltpu.roll(a, shift=W - 1, axis=2)
        b_first = a[:, :, 0:1] + 2.0 * a[:, :, 1:2]              # column 0
        b_last = a[:, :, W - 1:W] + 2.0 * a[:, :, W - 2:W - 1]   # column W-1
        s = jnp.where(is_first_col, b_first, s)
        s = jnp.where(is_last_col, b_last, s)
        return s

    def vpool(h):
        # 3-tap vertical sum with reflection padding (row -1 -> 1,
        # row H -> H-2), built directly from sublane slices.
        up = jnp.concatenate([h[:, 1:2, :], h[:, :H - 1, :]], axis=1)
        dn = jnp.concatenate([h[:, 1:, :], h[:, H - 2:H - 1, :]], axis=1)
        return up + h + dn

    def pool3x3(a):
        # Reflection-padded 3x3, stride-1 average pool (separable).
        return vpool(hpool(a)) * (1.0 / 9.0)

    mu_x = pool3x3(x)
    mu_y = pool3x3(y)
    sigma_x = pool3x3(x * x) - mu_x * mu_x
    sigma_y = pool3x3(y * y) - mu_y * mu_y
    sigma_xy = pool3x3(x * y) - mu_x * mu_y

    ssim_n = (2.0 * mu_x * mu_y + C1) * (2.0 * sigma_xy + C2)
    ssim_d = (mu_x * mu_x + mu_y * mu_y + C1) * (sigma_x + sigma_y + C2)

    # Exact divide kept (approx reciprocal would cost ~1e-4 abs error vs the
    # PyTorch reference).
    loss = (1.0 - ssim_n / ssim_d) * 0.5
    out_ref[...] = jnp.clip(loss, 0.0, 1.0).astype(out_ref.dtype)


def ssim_loss(x, y, *, block_planes=None):
    """SSIM loss, equivalent to the PyTorch SSIM module forward.

    x, y: (N, C, H, W) float arrays. Returns (N, C, H, W).
    """
    N, C, H, W = x.shape
    assert y.shape == x.shape
    assert H >= 2 and W >= 2, "ReflectionPad2d(1) requires H >= 2 and W >= 2"

    P = N * C
    xf = x.reshape(P, H, W)   # metadata-only reshape, no HBM pass
    yf = y.reshape(P, H, W)

    if block_planes is None:
        # ~12 full-block f32 temporaries live in the kernel plus the
        # double-buffered 2 inputs + 1 output; keep the footprint under ~8 MiB
        # so it fits the smallest (v5e, 16 MiB) default scoped-VMEM budget.
        bytes_per_plane = 18 * H * W * 4
        tb = max(1, (8 * 1024 * 1024) // bytes_per_plane)
        tb = int(min(tb, P, 256))
    else:
        tb = int(min(block_planes, P))
    # TODO(synk): for very large H*W (single plane >> a few MiB, e.g. 1080p on
    # v7x's 64 MiB VMEM) add row tiling with a 1-row halo instead of keeping a
    # whole plane resident; also consider packing planes along the lane axis
    # when W << 128 to get lane-dense stores.

    grid = (pl.cdiv(P, tb),)
    kernel = functools.partial(_ssim_kernel, H=H, W=W)

    out = pl.pallas_call(
        kernel,
        out_shape=jax.ShapeDtypeStruct((P, H, W), x.dtype),
        grid=grid,
        in_specs=[
            pl.BlockSpec((tb, H, W), lambda i: (i, 0, 0)),
            pl.BlockSpec((tb, H, W), lambda i: (i, 0, 0)),
        ],
        out_specs=pl.BlockSpec((tb, H, W), lambda i: (i, 0, 0)),
        compiler_params=pltpu.CompilerParams(
            dimension_semantics=("parallel",),
        ),
    )(xf, yf)

    return out.reshape(N, C, H, W)


def _ssim_ref(x, y):
    """Pure-JAX reference matching the PyTorch module, for sanity check."""
    pad_cfg = ((0, 0), (0, 0), (1, 1), (1, 1))
    xp = jnp.pad(x, pad_cfg, mode="reflect")
    yp = jnp.pad(y, pad_cfg, mode="reflect")
    H, W = x.shape[2], x.shape[3]

    def pool(a):
        out = 0.0
        for di in range(3):
            for dj in range(3):
                out = out + a[:, :, di:di + H, dj:dj + W]
        return out / 9.0

    mu_x = pool(xp)
    mu_y = pool(yp)
    sigma_x = pool(xp * xp) - mu_x ** 2
    sigma_y = pool(yp * yp) - mu_y ** 2
    sigma_xy = pool(xp * yp) - mu_x * mu_y
    n = (2 * mu_x * mu_y + C1) * (2 * sigma_xy + C2)
    d = (mu_x ** 2 + mu_y ** 2 + C1) * (sigma_x + sigma_y + C2)
    return jnp.clip((1 - n / d) / 2, 0.0, 1.0)


if __name__ == "__main__":
    key = jax.random.PRNGKey(0)
    kx, ky = jax.random.split(key)
    N, C, H, W = 2, 4, 16, 16
    x = jax.random.uniform(kx, (N, C, H, W), dtype=jnp.float32)
    y = jax.random.uniform(ky, (N, C, H, W), dtype=jnp.float32)

    out = jax.block_until_ready(ssim_loss(x, y))
    ref = jax.block_until_ready(_ssim_ref(x, y))

    assert out.shape == (N, C, H, W)
    assert jnp.max(jnp.abs(out - ref)) < 1e-5

    print("KERNEL_OK")
</pallas_src>

<mosaic_0001>
module attributes {stable_mosaic.version = 11 : i64} {
  func.func @_ssim_kernel(%arg0: i32, %arg1: memref<8x16x16xf32, #tpu.memory_space<vmem>>, %arg2: memref<8x16x16xf32, #tpu.memory_space<vmem>>, %arg3: memref<8x16x16xf32, #tpu.memory_space<vmem>>) attributes {dimension_semantics = [#tpu.dimension_semantics<parallel>], iteration_bounds = array<i64: 1>, scalar_prefetch = 0 : i64, scratch_operands = 0 : i64, tpu.core_type = #tpu.core_type<tc>, window_params = [{transform_indices = @transform_0, window_bounds = array<i64: 8, 16, 16>}, {transform_indices = @transform_1, window_bounds = array<i64: 8, 16, 16>}, {transform_indices = @transform_2, window_bounds = array<i64: 8, 16, 16>}]} {
    %c0 = arith.constant 0 : index
    %c0_0 = arith.constant 0 : index
    %c0_1 = arith.constant 0 : index
    %0 = vector.load %arg1[%c0, %c0_0, %c0_1] : memref<8x16x16xf32, #tpu.memory_space<vmem>>, vector<8x16x16xf32>
    %c0_2 = arith.constant 0 : index
    %c0_3 = arith.constant 0 : index
    %c0_4 = arith.constant 0 : index
    %1 = vector.load %arg2[%c0_2, %c0_3, %c0_4] : memref<8x16x16xf32, #tpu.memory_space<vmem>>, vector<8x16x16xf32>
    %2 = tpu.iota {dimensions = array<i32: 2>} : vector<8x16x16xi32>
    %c0_i32 = arith.constant 0 : i32
    %3 = vector.broadcast %c0_i32 : i32 to vector<8x16x16xi32>
    %4 = arith.cmpi eq, %2, %3 : vector<8x16x16xi32>
    %c15_i32 = arith.constant 15 : i32
    %5 = vector.broadcast %c15_i32 : i32 to vector<8x16x16xi32>
    %6 = arith.cmpi eq, %2, %5 : vector<8x16x16xi32>
    %c1_i32 = arith.constant 1 : i32
    %7 = tpu.dynamic_rotate %0 by %c1_i32 dim 2 : vector<8x16x16xf32>, i32 -> vector<8x16x16xf32>
    %8 = arith.addf %7, %0 : vector<8x16x16xf32>
    %c15_i32_5 = arith.constant 15 : i32
    %9 = tpu.dynamic_rotate %0 by %c15_i32_5 dim 2 : vector<8x16x16xf32>, i32 -> vector<8x16x16xf32>
    %10 = arith.addf %8, %9 : vector<8x16x16xf32>
    %11 = vector.extract_strided_slice %0 {offsets = [0, 0, 0], sizes = [8, 16, 1], strides = [1, 1, 1]} : vector<8x16x16xf32> to vector<8x16x1xf32>
    %12 = vector.extract_strided_slice %0 {offsets = [0, 0, 1], sizes = [8, 16, 1], strides = [1, 1, 1]} : vector<8x16x16xf32> to vector<8x16x1xf32>
    %cst = arith.constant 2.000000e+00 : f32
    %13 = vector.broadcast %cst : f32 to vector<8x16x1xf32>
    %14 = arith.mulf %13, %12 : vector<8x16x1xf32>
    %15 = arith.addf %11, %14 : vector<8x16x1xf32>
    %16 = vector.extract_strided_slice %0 {offsets = [0, 0, 15], sizes = [8, 16, 1], strides = [1, 1, 1]} : vector<8x16x16xf32> to vector<8x16x1xf32>
    %17 = vector.extract_strided_slice %0 {offsets = [0, 0, 14], sizes = [8, 16, 1], strides = [1, 1, 1]} : vector<8x16x16xf32> to vector<8x16x1xf32>
    %cst_6 = arith.constant 2.000000e+00 : f32
    %18 = vector.broadcast %cst_6 : f32 to vector<8x16x1xf32>
    %19 = arith.mulf %18, %17 : vector<8x16x1xf32>
    %20 = arith.addf %16, %19 : vector<8x16x1xf32>
    %21 = vector.shape_cast %15 : vector<8x16x1xf32> to vector<8x16x1xf32>
    %22 = vector.broadcast %21 : vector<8x16x1xf32> to vector<8x16x16xf32>
    %23 = arith.select %4, %22, %10 : vector<8x16x16xi1>, vector<8x16x16xf32>
    %24 = vector.shape_cast %20 : vector<8x16x1xf32> to vector<8x16x1xf32>
    %25 = vector.broadcast %24 : vector<8x16x1xf32> to vector<8x16x16xf32>
    %26 = arith.select %6, %25, %23 : vector<8x16x16xi1>, vector<8x16x16xf32>
    %27 = vector.extract_strided_slice %26 {offsets = [0, 1, 0], sizes = [8, 1, 16], strides = [1, 1, 1]} : vector<8x16x16xf32> to vector<8x1x16xf32>
    %28 = vector.extract_strided_slice %26 {offsets = [0, 0, 0], sizes = [8, 15, 16], strides = [1, 1, 1]} : vector<8x16x16xf32> to vector<8x15x16xf32>
    %29 = tpu.concatenate %27, %28 in 1 : vector<8x1x16xf32>, vector<8x15x16xf32> -> vector<8x16x16xf32>
    %30 = vector.extract_strided_slice %26 {offsets = [0, 1, 0], sizes = [8, 15, 16], strides = [1, 1, 1]} : vector<8x16x16xf32> to vector<8x15x16xf32>
    %31 = vector.extract_strided_slice %26 {offsets = [0, 14, 0], sizes = [8, 1, 16], strides = [1, 1, 1]} : vector<8x16x16xf32> to vector<8x1x16xf32>
    %32 = tpu.concatenate %30, %31 in 1 : vector<8x15x16xf32>, vector<8x1x16xf32> -> vector<8x16x16xf32>
    %33 = arith.addf %29, %26 : vector<8x16x16xf32>
    %34 = arith.addf %33, %32 : vector<8x16x16xf32>
    %cst_7 = arith.constant 0.111111112 : f32
    %35 = vector.broadcast %cst_7 : f32 to vector<8x16x16xf32>
    %36 = arith.mulf %34, %35 : vector<8x16x16xf32>
    %c1_i32_8 = arith.constant 1 : i32
    %37 = tpu.dynamic_rotate %1 by %c1_i32_8 dim 2 : vector<8x16x16xf32>, i32 -> vector<8x16x16xf32>
    %38 = arith.addf %37, %1 : vector<8x16x16xf32>
    %c15_i32_9 = arith.constant 15 : i32
    %39 = tpu.dynamic_rotate %1 by %c15_i32_9 dim 2 : vector<8x16x16xf32>, i32 -> vector<8x16x16xf32>
    %40 = arith.addf %38, %39 : vector<8x16x16xf32>
    %41 = vector.extract_strided_slice %1 {offsets = [0, 0, 0], sizes = [8, 16, 1], strides = [1, 1, 1]} : vector<8x16x16xf32> to vector<8x16x1xf32>
    %42 = vector.extract_strided_slice %1 {offsets = [0, 0, 1], sizes = [8, 16, 1], strides = [1, 1, 1]} : vector<8x16x16xf32> to vector<8x16x1xf32>
    %cst_10 = arith.constant 2.000000e+00 : f32
    %43 = vector.broadcast %cst_10 : f32 to vector<8x16x1xf32>
    %44 = arith.mulf %43, %42 : vector<8x16x1xf32>
    %45 = arith.addf %41, %44 : vector<8x16x1xf32>
    %46 = vector.extract_strided_slice %1 {offsets = [0, 0, 15], sizes = [8, 16, 1], strides = [1, 1, 1]} : vector<8x16x16xf32> to vector<8x16x1xf32>
    %47 = vector.extract_strided_slice %1 {offsets = [0, 0, 14], sizes = [8, 16, 1], strides = [1, 1, 1]} : vector<8x16x16xf32> to vector<8x16x1xf32>
    %cst_11 = arith.constant 2.000000e+00 : f32
    %48 = vector.broadcast %cst_11 : f32 to vector<8x16x1xf32>
    %49 = arith.mulf %48, %47 : vector<8x16x1xf32>
    %50 = arith.addf %46, %49 : vector<8x16x1xf32>
    %51 = vector.shape_cast %45 : vector<8x16x1xf32> to vector<8x16x1xf32>
    %52 = vector.broadcast %51 : vector<8x16x1xf32> to vector<8x16x16xf32>
    %53 = arith.select %4, %52, %40 : vector<8x16x16xi1>, vector<8x16x16xf32>
    %54 = vector.shape_cast %50 : vector<8x16x1xf32> to vector<8x16x1xf32>
    %55 = vector.broadcast %54 : vector<8x16x1xf32> to vector<8x16x16xf32>
    %56 = arith.select %6, %55, %53 : vector<8x16x16xi1>, vector<8x16x16xf32>
    %57 = vector.extract_strided_slice %56 {offsets = [0, 1, 0], sizes = [8, 1, 16], strides = [1, 1, 1]} : vector<8x16x16xf32> to vector<8x1x16xf32>
    %58 = vector.extract_strided_slice %56 {offsets = [0, 0, 0], sizes = [8, 15, 16], strides = [1, 1, 1]} : vector<8x16x16xf32> to vector<8x15x16xf32>
    %59 = tpu.concatenate %57, %58 in 1 : vector<8x1x16xf32>, vector<8x15x16xf32> -> vector<8x16x16xf32>
    %60 = vector.extract_strided_slice %56 {offsets = [0, 1, 0], sizes = [8, 15, 16], strides = [1, 1, 1]} : vector<8x16x16xf32> to vector<8x15x16xf32>
    %61 = vector.extract_strided_slice %56 {offsets = [0, 14, 0], sizes = [8, 1, 16], strides = [1, 1, 1]} : vector<8x16x16xf32> to vector<8x1x16xf32>
    %62 = tpu.concatenate %60, %61 in 1 : vector<8x15x16xf32>, vector<8x1x16xf32> -> vector<8x16x16xf32>
    %63 = arith.addf %59, %56 : vector<8x16x16xf32>
    %64 = arith.addf %63, %62 : vector<8x16x16xf32>
    %cst_12 = arith.constant 0.111111112 : f32
    %65 = vector.broadcast %cst_12 : f32 to vector<8x16x16xf32>
    %66 = arith.mulf %64, %65 : vector<8x16x16xf32>
    %67 = arith.mulf %0, %0 : vector<8x16x16xf32>
    %c1_i32_13 = arith.constant 1 : i32
    %68 = tpu.dynamic_rotate %67 by %c1_i32_13 dim 2 : vector<8x16x16xf32>, i32 -> vector<8x16x16xf32>
    %69 = arith.addf %68, %67 : vector<8x16x16xf32>
    %c15_i32_14 = arith.constant 15 : i32
    %70 = tpu.dynamic_rotate %67 by %c15_i32_14 dim 2 : vector<8x16x16xf32>, i32 -> vector<8x16x16xf32>
    %71 = arith.addf %69, %70 : vector<8x16x16xf32>
    %72 = vector.extract_strided_slice %67 {offsets = [0, 0, 0], sizes = [8, 16, 1], strides = [1, 1, 1]} : vector<8x16x16xf32> to vector<8x16x1xf32>
    %73 = vector.extract_strided_slice %67 {offsets = [0, 0, 1], sizes = [8, 16, 1], strides = [1, 1, 1]} : vector<8x16x16xf32> to vector<8x16x1xf32>
    %cst_15 = arith.constant 2.000000e+00 : f32
    %74 = vector.broadcast %cst_15 : f32 to vector<8x16x1xf32>
    %75 = arith.mulf %74, %73 : vector<8x16x1xf32>
    %76 = arith.addf %72, %75 : vector<8x16x1xf32>
    %77 = vector.extract_strided_slice %67 {offsets = [0, 0, 15], sizes = [8, 16, 1], strides = [1, 1, 1]} : vector<8x16x16xf32> to vector<8x16x1xf32>
    %78 = vector.extract_strided_slice %67 {offsets = [0, 0, 14], sizes = [8, 16, 1], strides = [1, 1, 1]} : vector<8x16x16xf32> to vector<8x16x1xf32>
    %cst_16 = arith.constant 2.000000e+00 : f32
    %79 = vector.broadcast %cst_16 : f32 to vector<8x16x1xf32>
    %80 = arith.mulf %79, %78 : vector<8x16x1xf32>
    %81 = arith.addf %77, %80 : vector<8x16x1xf32>
    %82 = vector.shape_cast %76 : vector<8x16x1xf32> to vector<8x16x1xf32>
    %83 = vector.broadcast %82 : vector<8x16x1xf32> to vector<8x16x16xf32>
    %84 = arith.select %4, %83, %71 : vector<8x16x16xi1>, vector<8x16x16xf32>
    %85 = vector.shape_cast %81 : vector<8x16x1xf32> to vector<8x16x1xf32>
    %86 = vector.broadcast %85 : vector<8x16x1xf32> to vector<8x16x16xf32>
    %87 = arith.select %6, %86, %84 : vector<8x16x16xi1>, vector<8x16x16xf32>
    %88 = vector.extract_strided_slice %87 {offsets = [0, 1, 0], sizes = [8, 1, 16], strides = [1, 1, 1]} : vector<8x16x16xf32> to vector<8x1x16xf32>
    %89 = vector.extract_strided_slice %87 {offsets = [0, 0, 0], sizes = [8, 15, 16], strides = [1, 1, 1]} : vector<8x16x16xf32> to vector<8x15x16xf32>
    %90 = tpu.concatenate %88, %89 in 1 : vector<8x1x16xf32>, vector<8x15x16xf32> -> vector<8x16x16xf32>
    %91 = vector.extract_strided_slice %87 {offsets = [0, 1, 0], sizes = [8, 15, 16], strides = [1, 1, 1]} : vector<8x16x16xf32> to vector<8x15x16xf32>
    %92 = vector.extract_strided_slice %87 {offsets = [0, 14, 0], sizes = [8, 1, 16], strides = [1, 1, 1]} : vector<8x16x16xf32> to vector<8x1x16xf32>
    %93 = tpu.concatenate %91, %92 in 1 : vector<8x15x16xf32>, vector<8x1x16xf32> -> vector<8x16x16xf32>
    %94 = arith.addf %90, %87 : vector<8x16x16xf32>
    %95 = arith.addf %94, %93 : vector<8x16x16xf32>
    %cst_17 = arith.constant 0.111111112 : f32
    %96 = vector.broadcast %cst_17 : f32 to vector<8x16x16xf32>
    %97 = arith.mulf %95, %96 : vector<8x16x16xf32>
    %98 = arith.mulf %36, %36 : vector<8x16x16xf32>
    %99 = arith.subf %97, %98 : vector<8x16x16xf32>
    %100 = arith.mulf %1, %1 : vector<8x16x16xf32>
    %c1_i32_18 = arith.constant 1 : i32
    %101 = tpu.dynamic_rotate %100 by %c1_i32_18 dim 2 : vector<8x16x16xf32>, i32 -> vector<8x16x16xf32>
    %102 = arith.addf %101, %100 : vector<8x16x16xf32>
    %c15_i32_19 = arith.constant 15 : i32
    %103 = tpu.dynamic_rotate %100 by %c15_i32_19 dim 2 : vector<8x16x16xf32>, i32 -> vector<8x16x16xf32>
    %104 = arith.addf %102, %103 : vector<8x16x16xf32>
    %105 = vector.extract_strided_slice %100 {offsets = [0, 0, 0], sizes = [8, 16, 1], strides = [1, 1, 1]} : vector<8x16x16xf32> to vector<8x16x1xf32>
    %106 = vector.extract_strided_slice %100 {offsets = [0, 0, 1], sizes = [8, 16, 1], strides = [1, 1, 1]} : vector<8x16x16xf32> to vector<8x16x1xf32>
    %cst_20 = arith.constant 2.000000e+00 : f32
    %107 = vector.broadcast %cst_20 : f32 to vector<8x16x1xf32>
    %108 = arith.mulf %107, %106 : vector<8x16x1xf32>
    %109 = arith.addf %105, %108 : vector<8x16x1xf32>
    %110 = vector.extract_strided_slice %100 {offsets = [0, 0, 15], sizes = [8, 16, 1], strides = [1, 1, 1]} : vector<8x16x16xf32> to vector<8x16x1xf32>
    %111 = vector.extract_strided_slice %100 {offsets = [0, 0, 14], sizes = [8, 16, 1], strides = [1, 1, 1]} : vector<8x16x16xf32> to vector<8x16x1xf32>
    %cst_21 = arith.constant 2.000000e+00 : f32
    %112 = vector.broadcast %cst_21 : f32 to vector<8x16x1xf32>
    %113 = arith.mulf %112, %111 : vector<8x16x1xf32>
    %114 = arith.addf %110, %113 : vector<8x16x1xf32>
    %115 = vector.shape_cast %109 : vector<8x16x1xf32> to vector<8x16x1xf32>
    %116 = vector.broadcast %115 : vector<8x16x1xf32> to vector<8x16x16xf32>
    %117 = arith.select %4, %116, %104 : vector<8x16x16xi1>, vector<8x16x16xf32>
    %118 = vector.shape_cast %114 : vector<8x16x1xf32> to vector<8x16x1xf32>
    %119 = vector.broadcast %118 : vector<8x16x1xf32> to vector<8x16x16xf32>
    %120 = arith.select %6, %119, %117 : vector<8x16x16xi1>, vector<8x16x16xf32>
    %121 = vector.extract_strided_slice %120 {offsets = [0, 1, 0], sizes = [8, 1, 16], strides = [1, 1, 1]} : vector<8x16x16xf32> to vector<8x1x16xf32>
    %122 = vector.extract_strided_slice %120 {offsets = [0, 0, 0], sizes = [8, 15, 16], strides = [1, 1, 1]} : vector<8x16x16xf32> to vector<8x15x16xf32>
    %123 = tpu.concatenate %121, %122 in 1 : vector<8x1x16xf32>, vector<8x15x16xf32> -> vector<8x16x16xf32>
    %124 = vector.extract_strided_slice %120 {offsets = [0, 1, 0], sizes = [8, 15, 16], strides = [1, 1, 1]} : vector<8x16x16xf32> to vector<8x15x16xf32>
    %125 = vector.extract_strided_slice %120 {offsets = [0, 14, 0], sizes = [8, 1, 16], strides = [1, 1, 1]} : vector<8x16x16xf32> to vector<8x1x16xf32>
    %126 = tpu.concatenate %124, %125 in 1 : vector<8x15x16xf32>, vector<8x1x16xf32> -> vector<8x16x16xf32>
    %127 = arith.addf %123, %120 : vector<8x16x16xf32>
    %128 = arith.addf %127, %126 : vector<8x16x16xf32>
    %cst_22 = arith.constant 0.111111112 : f32
    %129 = vector.broadcast %cst_22 : f32 to vector<8x16x16xf32>
    %130 = arith.mulf %128, %129 : vector<8x16x16xf32>
    %131 = arith.mulf %66, %66 : vector<8x16x16xf32>
    %132 = arith.subf %130, %131 : vector<8x16x16xf32>
    %133 = arith.mulf %0, %1 : vector<8x16x16xf32>
    %c1_i32_23 = arith.constant 1 : i32
    %134 = tpu.dynamic_rotate %133 by %c1_i32_23 dim 2 : vector<8x16x16xf32>, i32 -> vector<8x16x16xf32>
    %135 = arith.addf %134, %133 : vector<8x16x16xf32>
    %c15_i32_24 = arith.constant 15 : i32
    %136 = tpu.dynamic_rotate %133 by %c15_i32_24 dim 2 : vector<8x16x16xf32>, i32 -> vector<8x16x16xf32>
    %137 = arith.addf %135, %136 : vector<8x16x16xf32>
    %138 = vector.extract_strided_slice %133 {offsets = [0, 0, 0], sizes = [8, 16, 1], strides = [1, 1, 1]} : vector<8x16x16xf32> to vector<8x16x1xf32>
    %139 = vector.extract_strided_slice %133 {offsets = [0, 0, 1], sizes = [8, 16, 1], strides = [1, 1, 1]} : vector<8x16x16xf32> to vector<8x16x1xf32>
    %cst_25 = arith.constant 2.000000e+00 : f32
    %140 = vector.broadcast %cst_25 : f32 to vector<8x16x1xf32>
    %141 = arith.mulf %140, %139 : vector<8x16x1xf32>
    %142 = arith.addf %138, %141 : vector<8x16x1xf32>
    %143 = vector.extract_strided_slice %133 {offsets = [0, 0, 15], sizes = [8, 16, 1], strides = [1, 1, 1]} : vector<8x16x16xf32> to vector<8x16x1xf32>
    %144 = vector.extract_strided_slice %133 {offsets = [0, 0, 14], sizes = [8, 16, 1], strides = [1, 1, 1]} : vector<8x16x16xf32> to vector<8x16x1xf32>
    %cst_26 = arith.constant 2.000000e+00 : f32
    %145 = vector.broadcast %cst_26 : f32 to vector<8x16x1xf32>
    %146 = arith.mulf %145, %144 : vector<8x16x1xf32>
    %147 = arith.addf %143, %146 : vector<8x16x1xf32>
    %148 = vector.shape_cast %142 : vector<8x16x1xf32> to vector<8x16x1xf32>
    %149 = vector.broadcast %148 : vector<8x16x1xf32> to vector<8x16x16xf32>
    %150 = arith.select %4, %149, %137 : vector<8x16x16xi1>, vector<8x16x16xf32>
    %151 = vector.shape_cast %147 : vector<8x16x1xf32> to vector<8x16x1xf32>
    %152 = vector.broadcast %151 : vector<8x16x1xf32> to vector<8x16x16xf32>
    %153 = arith.select %6, %152, %150 : vector<8x16x16xi1>, vector<8x16x16xf32>
    %154 = vector.extract_strided_slice %153 {offsets = [0, 1, 0], sizes = [8, 1, 16], strides = [1, 1, 1]} : vector<8x16x16xf32> to vector<8x1x16xf32>
    %155 = vector.extract_strided_slice %153 {offsets = [0, 0, 0], sizes = [8, 15, 16], strides = [1, 1, 1]} : vector<8x16x16xf32> to vector<8x15x16xf32>
    %156 = tpu.concatenate %154, %155 in 1 : vector<8x1x16xf32>, vector<8x15x16xf32> -> vector<8x16x16xf32>
    %157 = vector.extract_strided_slice %153 {offsets = [0, 1, 0], sizes = [8, 15, 16], strides = [1, 1, 1]} : vector<8x16x16xf32> to vector<8x15x16xf32>
    %158 = vector.extract_strided_slice %153 {offsets = [0, 14, 0], sizes = [8, 1, 16], strides = [1, 1, 1]} : vector<8x16x16xf32> to vector<8x1x16xf32>
    %159 = tpu.concatenate %157, %158 in 1 : vector<8x15x16xf32>, vector<8x1x16xf32> -> vector<8x16x16xf32>
    %160 = arith.addf %156, %153 : vector<8x16x16xf32>
    %161 = arith.addf %160, %159 : vector<8x16x16xf32>
    %cst_27 = arith.constant 0.111111112 : f32
    %162 = vector.broadcast %cst_27 : f32 to vector<8x16x16xf32>
    %163 = arith.mulf %161, %162 : vector<8x16x16xf32>
    %164 = arith.mulf %36, %66 : vector<8x16x16xf32>
    %165 = arith.subf %163, %164 : vector<8x16x16xf32>
    %cst_28 = arith.constant 2.000000e+00 : f32
    %166 = vector.broadcast %cst_28 : f32 to vector<8x16x16xf32>
    %167 = arith.mulf %166, %36 : vector<8x16x16xf32>
    %168 = arith.mulf %167, %66 : vector<8x16x16xf32>
    %cst_29 = arith.constant 9.99999974E-5 : f32
    %169 = vector.broadcast %cst_29 : f32 to vector<8x16x16xf32>
    %170 = arith.addf %168, %169 : vector<8x16x16xf32>
    %cst_30 = arith.constant 2.000000e+00 : f32
    %171 = vector.broadcast %cst_30 : f32 to vector<8x16x16xf32>
    %172 = arith.mulf %171, %165 : vector<8x16x16xf32>
    %cst_31 = arith.constant 8.99999984E-4 : f32
    %173 = vector.broadcast %cst_31 : f32 to vector<8x16x16xf32>
    %174 = arith.addf %172, %173 : vector<8x16x16xf32>
    %175 = arith.mulf %170, %174 : vector<8x16x16xf32>
    %176 = arith.mulf %36, %36 : vector<8x16x16xf32>
    %177 = arith.mulf %66, %66 : vector<8x16x16xf32>
    %178 = arith.addf %176, %177 : vector<8x16x16xf32>
    %cst_32 = arith.constant 9.99999974E-5 : f32
    %179 = vector.broadcast %cst_32 : f32 to vector<8x16x16xf32>
    %180 = arith.addf %178, %179 : vector<8x16x16xf32>
    %181 = arith.addf %99, %132 : vector<8x16x16xf32>
    %cst_33 = arith.constant 8.99999984E-4 : f32
    %182 = vector.broadcast %cst_33 : f32 to vector<8x16x16xf32>
    %183 = arith.addf %181, %182 : vector<8x16x16xf32>
    %184 = arith.mulf %180, %183 : vector<8x16x16xf32>
    %185 = arith.divf %175, %184 : vector<8x16x16xf32>
    %cst_34 = arith.constant 1.000000e+00 : f32
    %186 = vector.broadcast %cst_34 : f32 to vector<8x16x16xf32>
    %187 = arith.subf %186, %185 : vector<8x16x16xf32>
    %cst_35 = arith.constant 5.000000e-01 : f32
    %188 = vector.broadcast %cst_35 : f32 to vector<8x16x16xf32>
    %189 = arith.mulf %187, %188 : vector<8x16x16xf32>
    %cst_36 = arith.constant 0.000000e+00 : f32
    %cst_37 = arith.constant 1.000000e+00 : f32
    %190 = vector.broadcast %cst_36 : f32 to vector<8x16x16xf32>
    %191 = arith.maximumf %190, %189 : vector<8x16x16xf32>
    %192 = vector.broadcast %cst_37 : f32 to vector<8x16x16xf32>
    %193 = arith.minimumf %192, %191 : vector<8x16x16xf32>
    %c0_38 = arith.constant 0 : index
    %c0_39 = arith.constant 0 : index
    %c0_40 = arith.constant 0 : index
    %194 = vector.load %arg3[%c0_38, %c0_39, %c0_40] : memref<8x16x16xf32, #tpu.memory_space<vmem>>, vector<8x16x16xf32>
    tpu.vector_store %arg3[%c0_38, %c0_39, %c0_40], %193 {strides = array<i32>} : memref<8x16x16xf32, #tpu.memory_space<vmem>>, vector<8x16x16xf32>,
    return
  }
  func.func @transform_0(%arg0: i32) -> (i32, i32, i32) {
    %c0_i32 = arith.constant 0 : i32
    %c0_i32_0 = arith.constant 0 : i32
    %c0_i32_1 = arith.constant 0 : i32
    return %arg0, %c0_i32, %c0_i32_0 : i32, i32, i32
  }
  func.func @transform_1(%arg0: i32) -> (i32, i32, i32) {
    %c0_i32 = arith.constant 0 : i32
    %c0_i32_0 = arith.constant 0 : i32
    %c0_i32_1 = arith.constant 0 : i32
    return %arg0, %c0_i32, %c0_i32_0 : i32, i32, i32
  }
  func.func @transform_2(%arg0: i32) -> (i32, i32, i32) {
    %c0_i32 = arith.constant 0 : i32
    %c0_i32_0 = arith.constant 0 : i32
    %c0_i32_1 = arith.constant 0 : i32
    return %arg0, %c0_i32, %c0_i32_0 : i32, i32, i32
  }
}

</mosaic_0001>

<bundles_post_ra>
// kernel: tpu_custom_call.1
= control target key start
LH: loop header
LB: loop body
LE: loop exit
PB: predicated region body
PF: predicated region fallthrough
CT: control target
= control target key end

     0   :  { %7 = vsyncpa [#allocation3], 0  ;;  %s9800_s0 = inlined_call_operand.hbm [shape: f32[8,16,16], index: 0, kind: input, shape index: {}]   ;;  %s9801_s1 = inlined_call_operand.hbm [shape: f32[8,16,16], index: 1, kind: input, shape index: {}]   ;;  %s9802_s2 = inlined_call_operand.hbm [shape: f32[8,16,16], index: 2, kind: output, shape index: {}]  }
   0x1   :  { %8 = vsyncpa [#allocation6], 0 }
   0x2   :  { %9 = vsyncpa [#allocation4], 0  ;;  %s4948_s9 = smov [#allocation2]  }
   0x3   :  { %s15_s10 = sshll.u32 %s4948_s9, 4  ;;  %s16_s10 = int_to_ptr.vmem [resolvable:$true] %s15_s10 }
   0x4   :  { %s4890_s11 = scalar_lea.vmem %s16_s10, 2048  ;;  %p4895_p1 = scmp.lt.s32.totalorder %s16_s10, %s16_s10 }
   0x5   :  { %p4891_p0 = scmp.ne.s32.totalorder %s16_s10, %s4890_s11  ;;  %p4896_p2 = scmp.lt.s32.totalorder %s4890_s11, %s4890_s11 }
   0x7   :  { %p4897_p3 = por %p4896_p2, %p4895_p1 }
   0x9   :  { %p4898_p4 = pnand %p4897_p3, %p4891_p0 }
   0xb   :  { %4901 = shalt.err (!%p4898_p4)
}
   0xc   :  { %s4949_s12 = smov 128   ;;  %s4950_s13 = smov 8  }
   0xd   :  { %21 = dma.hbm_to_vmem [thread:$0]  %s9800_s0, 2048, %s16_s10, [#allocation3], %s4949_s12, %s4949_s12, %s4950_s13  }
   0xe   :  { %s4951_s16 = smov [#allocation5]  }
   0xf   :  { %s27_s17 = sshll.u32 %s4951_s16, 4  ;;  %s28_s17 = int_to_ptr.vmem [resolvable:$true] %s27_s17 }
  0x10   :  { %s4910_s18 = scalar_lea.vmem %s28_s17, 2048  ;;  %p4915_p6 = scmp.lt.s32.totalorder %s28_s17, %s28_s17 }
  0x11   :  { %p4911_p5 = scmp.ne.s32.totalorder %s28_s17, %s4910_s18  ;;  %p4916_p7 = scmp.lt.s32.totalorder %s4910_s18, %s4910_s18 }
  0x13   :  { %p4917_p8 = por %p4916_p7, %p4915_p6 }
  0x15   :  { %p4918_p9 = pnand %p4917_p8, %p4911_p5 }
  0x17   :  { %4921 = shalt.err (!%p4918_p9)
}
  0x18   :  { %33 = dma.hbm_to_vmem [thread:$0]  %s9801_s1, 2048, %s28_s17, [#allocation6], %s4949_s12, %s4949_s12, %s4950_s13  }
  0x19   :  { %4942 = dma.done.wait [#allocation3], 2048  }
  0x1a   :  { %4943 = vsyncadd [#allocation3], 4294965248 }
  0x1b   :  { %4944 = dma.done.wait [#allocation6], 2048  }
  0x1c   :  { %4945 = vsyncadd [#allocation6], 4294965248  ;;  %v4988_v0 = vld [vmem:[#allocation2] sm:$0xff]  ;;  %v4990_v1 = vld [vmem:[#allocation2 + $0x10] sm:$0xff]  ;;  %s4952_s0 = smov 16   ;;  %s4953_s1 = smov 15  }
  0x1d   :  { %77 = vrot.lane.b32.xlu0 %v4988_v0, %s4952_s0  ;;  %83 = vrot.lane.b32.xlu1 %v4990_v1, %s4952_s0  ;;  %v4996_v2 = vld [vmem:[#allocation2 + $0x8] sm:$0xff]  ;;  %v4998_v3 = vld [vmem:[#allocation2 + $0x18] sm:$0xff]  ;;  %v5004_v4 = vld [vmem:[#allocation2 + $0x20] sm:$0xff]  ;;  %v9805_v16 = vmov 0   ;;  %v5090_v18 = vmul.f32 2.0, %v4988_v0  ;;  %s4955_s21 = smov 127  }
  0x1e   :  { %v5006_v5 = vld [vmem:[#allocation2 + $0x28] sm:$0xff]  ;;  %v5012_v6 = vld [vmem:[#allocation2 + $0x30] sm:$0xff]  ;;  %v5014_v7 = vld [vmem:[#allocation2 + $0x38] sm:$0xff]  ;;  %4783 = vset.pattern.permute.xlu0 %v9805_v16  ;;  %4784 = vset.pattern.permute.xlu1 %v9805_v16  ;;  %v5087_v17 = vmul.f32 2.0, %v4996_v2  ;;  %v5097_v19 = vmul.f32 2.0, %v4998_v3  ;;  %v5100_v20 = vmul.f32 2.0, %v4990_v1 }
  0x1f   :  { %v5020_v8 = vld [vmem:[#allocation2 + $0x40] sm:$0xff]  ;;  %v5022_v9 = vld [vmem:[#allocation2 + $0x48] sm:$0xff]  ;;  %v5028_v10 = vld [vmem:[#allocation2 + $0x50] sm:$0xff]  ;;  %v5105_v21 = vmul.f32 2.0, %v5006_v5  ;;  %v5110_v22 = vmul.f32 2.0, %v5004_v4  ;;  %v5115_v23 = vmul.f32 2.0, %v5014_v7 }
  0x20   :  { %v5030_v11 = vld [vmem:[#allocation2 + $0x58] sm:$0xff]  ;;  %v5036_v12 = vld [vmem:[#allocation2 + $0x60] sm:$0xff]  ;;  %v5038_v13 = vld [vmem:[#allocation2 + $0x68] sm:$0xff]  ;;  %v5120_v24 = vmul.f32 2.0, %v5012_v6  ;;  %v5125_v25 = vmul.f32 2.0, %v5022_v9  ;;  %v5130_v26 = vmul.f32 2.0, %v5020_v8 }
  0x21   :  { %80 = vrot.lane.b32.xlu0 %v4996_v2, %s4952_s0  ;;  %86 = vrot.lane.b32.xlu1 %v4998_v3, %s4952_s0  ;;  %v5044_v14 = vld [vmem:[#allocation2 + $0x70] sm:$0xff]  ;;  %v5046_v15 = vld [vmem:[#allocation2 + $0x78] sm:$0xff]  ;;  %v5135_v27 = vmul.f32 2.0, %v5030_v11  ;;  %v5140_v28 = vmul.f32 2.0, %v5028_v10  ;;  %v5145_v29 = vmul.f32 2.0, %v5038_v13  ;;  %v5150_v30 = vmul.f32 2.0, %v5036_v12 }
  0x22   :  { %v5155_v31 = vmul.f32 2.0, %v5046_v15  ;;  %v5160_v32 = vmul.f32 2.0, %v5044_v14  ;;  %vm76_vm0 = vcmask 1047680   ;;  %s4956_s22 = smov 1   ;;  %s4958_s23 = smov 14   ;;  %vm830_vm3 = vcmask 1046528  }
  0x23   :  { %s4959_s24 = smov 113   ;;  %vm781_vm4 = vcmask 1040384   ;;  %vm4735_vm5 = vcmask 130048   ;;  %s4960_s25 = smov [#allocation7]  }
  0x24   :  { %s4757_s26 = sshll.u32 %s4960_s25, 4  ;;  %s4758_s26 = int_to_ptr.vmem [resolvable:$true] %s4757_s26 }
  0x25   :  { %89 = vrot.lane.b32.xlu0 %v5004_v4, %s4952_s0  ;;  %92 = vrot.lane.b32.xlu1 %v5006_v5, %s4952_s0  ;;  %s4922_s27 = scalar_lea.vmem %s4758_s26, 2048  ;;  %p4927_p11 = scmp.lt.s32.totalorder %s4758_s26, %s4758_s26 }
  0x26   :  { %p4923_p10 = scmp.ne.s32.totalorder %s4758_s26, %s4922_s27  ;;  %p4928_p12 = scmp.lt.s32.totalorder %s4922_s27, %s4922_s27 }
  0x28   :  { %p4929_p13 = por %p4928_p12, %p4927_p11 }
  0x29   :  { %95 = vrot.lane.b32.xlu0 %v5012_v6, %s4952_s0  ;;  %98 = vrot.lane.b32.xlu1 %v5014_v7, %s4952_s0 }
  0x2a   :  { %p4930_p0 = pnand %p4929_p13, %p4923_p10 }
  0x2d   :  { %101 = vrot.lane.b32.xlu0 %v5020_v8, %s4952_s0  ;;  %104 = vrot.lane.b32.xlu1 %v5022_v9, %s4952_s0 }
  0x31   :  { %107 = vrot.lane.b32.xlu0 %v5028_v10, %s4952_s0  ;;  %110 = vrot.lane.b32.xlu1 %v5030_v11, %s4952_s0 }
  0x35   :  { %113 = vrot.lane.b32.xlu0 %v5036_v12, %s4952_s0  ;;  %116 = vrot.lane.b32.xlu1 %v5038_v13, %s4952_s0 }
  0x39   :  { %119 = vrot.lane.b32.xlu0 %v5044_v14, %s4952_s0  ;;  %122 = vrot.lane.b32.xlu1 %v5046_v15, %s4952_s0 }
  0x3d   :  { %191 = vrot.lane.b32.xlu1 %v4996_v2, %s4953_s1  ;;  %189 = vrot.lane.b32.xlu0 %v4988_v0, %s4953_s1 }
  0x41   :  { %195 = vrot.lane.b32.xlu1 %v4998_v3, %s4953_s1  ;;  %193 = vrot.lane.b32.xlu0 %v4990_v1, %s4953_s1 }
  0x45   :  { %199 = vrot.lane.b32.xlu1 %v5006_v5, %s4953_s1  ;;  %197 = vrot.lane.b32.xlu0 %v5004_v4, %s4953_s1 }
  0x49   :  { %203 = vrot.lane.b32.xlu1 %v5014_v7, %s4953_s1  ;;  %201 = vrot.lane.b32.xlu0 %v5012_v6, %s4953_s1 }
  0x4d   :  { %207 = vrot.lane.b32.xlu1 %v5022_v9, %s4953_s1  ;;  %205 = vrot.lane.b32.xlu0 %v5020_v8, %s4953_s1 }
  0x51   :  { %211 = vrot.lane.b32.xlu1 %v5030_v11, %s4953_s1  ;;  %209 = vrot.lane.b32.xlu0 %v5028_v10, %s4953_s1 }
  0x55   :  { %215 = vrot.lane.b32.xlu1 %v5038_v13, %s4953_s1  ;;  %213 = vrot.lane.b32.xlu0 %v5036_v12, %s4953_s1 }
  0x59   :  { %219 = vrot.lane.b32.xlu1 %v5046_v15, %s4953_s1  ;;  %217 = vrot.lane.b32.xlu0 %v5044_v14, %s4953_s1 }
  0x5d   :  { %367 = vrot.lane.b32.xlu1 %v5087_v17, %s4955_s21  ;;  %365 = vrot.lane.b32.xlu0 %v5090_v18, %s4955_s21 }
  0x61   :  { %371 = vrot.lane.b32.xlu1 %v5097_v19, %s4955_s21  ;;  %369 = vrot.lane.b32.xlu0 %v5100_v20, %s4955_s21 }
  0x65   :  { %375 = vrot.lane.b32.xlu1 %v5105_v21, %s4955_s21  ;;  %373 = vrot.lane.b32.xlu0 %v5110_v22, %s4955_s21 }
  0x69   :  { %379 = vrot.lane.b32.xlu1 %v5115_v23, %s4955_s21  ;;  %377 = vrot.lane.b32.xlu0 %v5120_v24, %s4955_s21 }
  0x6d   :  { %383 = vrot.lane.b32.xlu1 %v5125_v25, %s4955_s21  ;;  %381 = vrot.lane.b32.xlu0 %v5130_v26, %s4955_s21 }
  0x71   :  { %387 = vrot.lane.b32.xlu1 %v5135_v27, %s4955_s21  ;;  %385 = vrot.lane.b32.xlu0 %v5140_v28, %s4955_s21 }
  0x75   :  { %391 = vrot.lane.b32.xlu1 %v5145_v29, %s4955_s21  ;;  %389 = vrot.lane.b32.xlu0 %v5150_v30, %s4955_s21 }
  0x79   :  { %395 = vrot.lane.b32.xlu1 %v5155_v31, %s4955_s21  ;;  %393 = vrot.lane.b32.xlu0 %v5160_v32, %s4955_s21 }
  0x8f   :  { %v78_v33 = vpop.permute.xlu0 %77  ;;  %v84_v34 = vpop.permute.xlu1 %83 }
  0x90   :  { %v79_v35 = vsel %vm76_vm0, %v78_v33, %v4988_v0  ;;  %v85_v36 = vsel %vm76_vm0, %v84_v34, %v4990_v1 }
  0x91   :  { %125 = vrot.lane.b32.xlu0 %v79_v35, %s4952_s0 }
  0x93   :  { %v81_v37 = vpop.permute.xlu0 %80  ;;  %v87_v38 = vpop.permute.xlu1 %86 }
  0x94   :  { %v82_v39 = vsel %vm76_vm0, %v81_v37, %v4996_v2  ;;  %v88_v40 = vsel %vm76_vm0, %v87_v38, %v4998_v3 }
  0x95   :  { %127 = vrot.lane.b32.xlu1 %v82_v39, %s4952_s0  ;;  %129 = vrot.lane.b32.xlu0 %v85_v36, %s4952_s0 }
  0x97   :  { %v90_v41 = vpop.permute.xlu0 %89  ;;  %v93_v42 = vpop.permute.xlu1 %92 }
  0x98   :  { %v91_v43 = vsel %vm76_vm0, %v90_v41, %v5004_v4  ;;  %v94_v44 = vsel %vm76_vm0, %v93_v42, %v5006_v5 }
  0x99   :  { %131 = vrot.lane.b32.xlu1 %v88_v40, %s4952_s0  ;;  %133 = vrot.lane.b32.xlu0 %v91_v43, %s4952_s0 }
  0x9b   :  { %v96_v45 = vpop.permute.xlu0 %95  ;;  %v99_v46 = vpop.permute.xlu1 %98 }
  0x9c   :  { %v97_v47 = vsel %vm76_vm0, %v96_v45, %v5012_v6  ;;  %v100_v48 = vsel %vm76_vm0, %v99_v46, %v5014_v7 }
  0x9d   :  { %135 = vrot.lane.b32.xlu1 %v94_v44, %s4952_s0  ;;  %137 = vrot.lane.b32.xlu0 %v97_v47, %s4952_s0 }
  0x9f   :  { %v102_v49 = vpop.permute.xlu0 %101  ;;  %v105_v50 = vpop.permute.xlu1 %104 }
  0xa0   :  { %v103_v51 = vsel %vm76_vm0, %v102_v49, %v5020_v8  ;;  %v106_v52 = vsel %vm76_vm0, %v105_v50, %v5022_v9 }
  0xa1   :  { %139 = vrot.lane.b32.xlu1 %v100_v48, %s4952_s0  ;;  %141 = vrot.lane.b32.xlu0 %v103_v51, %s4952_s0 }
  0xa3   :  { %v108_v53 = vpop.permute.xlu0 %107  ;;  %v111_v54 = vpop.permute.xlu1 %110 }
  0xa4   :  { %v109_v55 = vsel %vm76_vm0, %v108_v53, %v5028_v10  ;;  %v112_v56 = vsel %vm76_vm0, %v111_v54, %v5030_v11 }
  0xa5   :  { %143 = vrot.lane.b32.xlu1 %v106_v52, %s4952_s0  ;;  %145 = vrot.lane.b32.xlu0 %v109_v55, %s4952_s0 }
  0xa7   :  { %v114_v57 = vpop.permute.xlu0 %113  ;;  %v117_v58 = vpop.permute.xlu1 %116 }
  0xa8   :  { %v115_v59 = vsel %vm76_vm0, %v114_v57, %v5036_v12  ;;  %v118_v60 = vsel %vm76_vm0, %v117_v58, %v5038_v13 }
  0xa9   :  { %147 = vrot.lane.b32.xlu1 %v112_v56, %s4952_s0  ;;  %149 = vrot.lane.b32.xlu0 %v115_v59, %s4952_s0 }
  0xab   :  { %v120_v61 = vpop.permute.xlu0 %119  ;;  %v123_v62 = vpop.permute.xlu1 %122 }
  0xac   :  { %v121_v63 = vsel %vm76_vm0, %v120_v61, %v5044_v14  ;;  %v124_v33 = vsel %vm76_vm0, %v123_v62, %v5046_v15 }
  0xad   :  { %151 = vrot.lane.b32.xlu1 %v118_v60, %s4952_s0  ;;  %153 = vrot.lane.b32.xlu0 %v121_v63, %s4952_s0 }
  0xaf   :  { %v5213_v34 = vpop.permute.xlu1 %191  ;;  %v5215_v35 = vpop.permute.xlu0 %189 }
  0xb1   :  { %155 = vrot.lane.b32.xlu1 %v124_v33, %s4952_s0  ;;  %429 = vrot.lane.b32.xlu0 %v5090_v18, %s4956_s22 }
  0xb3   :  { %v5220_v36 = vpop.permute.xlu1 %195  ;;  %v5222_v37 = vpop.permute.xlu0 %193 }
  0xb5   :  { %431 = vrot.lane.b32.xlu1 %v5087_v17, %s4956_s22  ;;  %433 = vrot.lane.b32.xlu0 %v5100_v20, %s4956_s22 }
  0xb7   :  { %v5228_v38 = vpop.permute.xlu1 %199  ;;  %v5230_v39 = vpop.permute.xlu0 %197 }
  0xb9   :  { %435 = vrot.lane.b32.xlu1 %v5097_v19, %s4956_s22  ;;  %437 = vrot.lane.b32.xlu0 %v5110_v22, %s4956_s22 }
  0xbb   :  { %v5236_v18 = vpop.permute.xlu1 %203  ;;  %v5238_v40 = vpop.permute.xlu0 %201 }
  0xbd   :  { %439 = vrot.lane.b32.xlu1 %v5105_v21, %s4956_s22  ;;  %441 = vrot.lane.b32.xlu0 %v5120_v24, %s4956_s22 }
  0xbf   :  { %v5244_v17 = vpop.permute.xlu1 %207  ;;  %v5246_v20 = vpop.permute.xlu0 %205 }
  0xc1   :  { %443 = vrot.lane.b32.xlu1 %v5115_v23, %s4956_s22  ;;  %445 = vrot.lane.b32.xlu0 %v5130_v26, %s4956_s22 }
  0xc3   :  { %v5252_v19 = vpop.permute.xlu1 %211  ;;  %v5254_v22 = vpop.permute.xlu0 %209 }
  0xc5   :  { %449 = vrot.lane.b32.xlu0 %v5140_v28, %s4956_s22  ;;  %447 = vrot.lane.b32.xlu1 %v5125_v25, %s4956_s22 }
  0xc7   :  { %v5260_v21 = vpop.permute.xlu1 %215  ;;  %v5262_v24 = vpop.permute.xlu0 %213 }
  0xc9   :  { %453 = vrot.lane.b32.xlu0 %v5150_v30, %s4956_s22  ;;  %451 = vrot.lane.b32.xlu1 %v5135_v27, %s4956_s22 }
  0xcb   :  { %v5268_v23 = vpop.permute.xlu1 %219  ;;  %v5270_v26 = vpop.permute.xlu0 %217 }
  0xcc   :  { %9964 = vst [vmem:[#allocation11_spill] sm:$0xff] %v5270_v26 }
  0xcd   :  { %457 = vrot.lane.b32.xlu0 %v5160_v32, %s4956_s22  ;;  %455 = vrot.lane.b32.xlu1 %v5145_v29, %s4956_s22 }
  0xcf   :  { %v368_v25 = vpop.permute.xlu1 %367  ;;  %v366_v28 = vpop.permute.xlu0 %365 }
  0xd0   :  { %v413_v41 = vadd.f32 %v366_v28, %v4988_v0  ;;  %v414_v42 = vadd.f32 %v368_v25, %v4996_v2  ;;  %v9803_v28 = vmov 15  }
  0xd1   :  { %459 = vrot.lane.b32.xlu1 %v5155_v31, %s4956_s22 }
  0xd2   :  { %495 = vperm.xlu0 %4783, %v413_v41  }
  0xd3   :  { %v372_v27 = vpop.permute.xlu1 %371  ;;  %v370_v30 = vpop.permute.xlu0 %369 }
  0xd4   :  { %v416_v43 = vadd.f32 %v372_v27, %v4998_v3  ;;  %v415_v32 = vadd.f32 %v370_v30, %v4990_v1 }
  0xd5   :  { %500 = vperm.xlu1 %4784, %v414_v42  }
  0xd6   :  { %510 = vperm.xlu0 %4783, %v416_v43  }
  0xd7   :  { %v376_v44 = vpop.permute.xlu1 %375  ;;  %v374_v29 = vpop.permute.xlu0 %373 }
  0xd8   :  { %v418_v45 = vadd.f32 %v376_v44, %v5006_v5  ;;  %v417_v46 = vadd.f32 %v374_v29, %v5004_v4 }
  0xd9   :  { %505 = vperm.xlu1 %4784, %v415_v32  }
  0xda   :  { %520 = vperm.xlu0 %4783, %v418_v45  }
  0xdb   :  { %v380_v47 = vpop.permute.xlu1 %379  ;;  %v378_v48 = vpop.permute.xlu0 %377 }
  0xdc   :  { %v420_v31 = vadd.f32 %v380_v47, %v5014_v7  ;;  %v419_v49 = vadd.f32 %v378_v48, %v5012_v6 }
  0xdd   :  { %515 = vperm.xlu1 %4784, %v417_v46  }
  0xde   :  { %530 = vperm.xlu0 %4783, %v420_v31  }
  0xdf   :  { %v384_v50 = vpop.permute.xlu1 %383  ;;  %v382_v51 = vpop.permute.xlu0 %381 }
  0xe0   :  { %v422_v52 = vadd.f32 %v384_v50, %v5022_v9  ;;  %v421_v53 = vadd.f32 %v382_v51, %v5020_v8 }
  0xe1   :  { %525 = vperm.xlu1 %4784, %v419_v49  }
  0xe2   :  { %540 = vperm.xlu0 %4783, %v422_v52  }
  0xe3   :  { %v388_v54 = vpop.permute.xlu1 %387  ;;  %v386_v55 = vpop.permute.xlu0 %385 }
  0xe4   :  { %v424_v56 = vadd.f32 %v388_v54, %v5030_v11  ;;  %v423_v57 = vadd.f32 %v386_v55, %v5028_v10 }
  0xe5   :  { %535 = vperm.xlu1 %4784, %v421_v53  }
  0xe6   :  { %550 = vperm.xlu0 %4783, %v424_v56  }
  0xe7   :  { %v392_v58 = vpop.permute.xlu1 %391  ;;  %v390_v59 = vpop.permute.xlu0 %389 }
  0xe8   :  { %v426_v60 = vadd.f32 %v392_v58, %v5038_v13  ;;  %v425_v61 = vadd.f32 %v390_v59, %v5036_v12 }
  0xe9   :  { %545 = vperm.xlu1 %4784, %v423_v57  }
  0xea   :  { %560 = vperm.xlu0 %4783, %v426_v60  }
  0xeb   :  { %v396_v62 = vpop.permute.xlu1 %395  ;;  %v394_v63 = vpop.permute.xlu0 %393 }
  0xec   :  { %v428_v33 = vadd.f32 %v396_v62, %v5046_v15  ;;  %v427_v25 = vadd.f32 %v394_v63, %v5044_v14 }
  0xed   :  { %555 = vperm.xlu1 %4784, %v425_v61   ;;  %v5355_v61 = vld [vmem:[#allocation5 + $0x20] sm:$0xff] }
  0xee   :  { %570 = vperm.xlu0 %4783, %v428_v33   ;;  %v5362_v33 = vld [vmem:[#allocation5 + $0x30] sm:$0xff] }
  0xf1   :  { %565 = vperm.xlu1 %4784, %v427_v25  }
  0xf5   :  { %4785 = vset.pattern.permute.xlu1 %v9803_v28 }
 0x103   :  { %v126_v41 = vpop.permute.xlu0 %125 }
 0x104   :  { %v5297_v42 = vsel %vm76_vm0, %v126_v41, %v4988_v0 }
 0x105   :  { %269 = vrot.lane.b32.xlu0 %v5297_v42, %s4958_s23 }
 0x107   :  { %v128_v27 = vpop.permute.xlu1 %127  ;;  %v130_v30 = vpop.permute.xlu0 %129 }
 0x108   :  { %v5303_v43 = vsel %vm76_vm0, %v130_v30, %v4990_v1  ;;  %v5369_v30 = vld [vmem:[#allocation5 + $0x40] sm:$0xff] }
 0x109   :  { %273 = vrot.lane.b32.xlu0 %v5303_v43, %s4958_s23 }
 0x10b   :  { %v132_v32 = vpop.permute.xlu1 %131  ;;  %v134_v44 = vpop.permute.xlu0 %133 }
 0x10c   :  { %v5309_v29 = vsel %vm76_vm0, %v134_v44, %v5004_v4 }
 0x10d   :  { %277 = vrot.lane.b32.xlu0 %v5309_v29, %s4958_s23 }
 0x10f   :  { %v136_v45 = vpop.permute.xlu1 %135  ;;  %v138_v46 = vpop.permute.xlu0 %137 }
 0x110   :  { %v5315_v47 = vsel %vm76_vm0, %v138_v46, %v5012_v6 }
 0x111   :  { %281 = vrot.lane.b32.xlu0 %v5315_v47, %s4958_s23 }
 0x113   :  { %v140_v48 = vpop.permute.xlu1 %139  ;;  %v142_v31 = vpop.permute.xlu0 %141 }
 0x114   :  { %v5321_v49 = vsel %vm76_vm0, %v142_v31, %v5020_v8 }
 0x115   :  { %285 = vrot.lane.b32.xlu0 %v5321_v49, %s4958_s23 }
 0x117   :  { %v144_v4 = vpop.permute.xlu1 %143  ;;  %v146_v50 = vpop.permute.xlu0 %145 }
 0x118   :  { %v5327_v51 = vsel %vm76_vm0, %v146_v50, %v5028_v10  ;;  %v5343_v10 = vld [vmem:[#allocation5] sm:$0xff]  ;;  %v5376_v50 = vld [vmem:[#allocation5 + $0x50] sm:$0xff] }
 0x119   :  { %289 = vrot.lane.b32.xlu0 %v5327_v51, %s4958_s23  ;;  %9966 = vst [vmem:[#allocation13_spill] sm:$0xff] %v5343_v10 }
 0x11b   :  { %v148_v6 = vpop.permute.xlu1 %147  ;;  %v150_v52 = vpop.permute.xlu0 %149 }
 0x11c   :  { %v5333_v53 = vsel %vm76_vm0, %v150_v52, %v5036_v12  ;;  %v5348_v12 = vld [vmem:[#allocation5 + $0x10] sm:$0xff]  ;;  %v5380_v52 = vsel %vm76_vm0, %v128_v27, %v4996_v2  ;;  %v5402_v27 = vsel %vm76_vm0, %v136_v45, %v5006_v5  ;;  %v5426_v45 = vsel %vm76_vm0, %v148_v6, %v5030_v11 }
 0x11d   :  { %293 = vrot.lane.b32.xlu0 %v5333_v53, %s4958_s23  ;;  %v5398_v2 = vld [vmem:[#allocation5 + $0x70] sm:$0xff] }
 0x11f   :  { %v152_v8 = vpop.permute.xlu1 %151  ;;  %v154_v54 = vpop.permute.xlu0 %153 }
 0x120   :  { %v5339_v55 = vsel %vm76_vm0, %v154_v54, %v5044_v14  ;;  %v5386_v54 = vld [vmem:[#allocation5 + $0x60] sm:$0xff] }
 0x121   :  { %9965 = vst [vmem:[#allocation12_spill] sm:$0xff] %v5339_v55  ;;  %297 = vrot.lane.b32.xlu0 %v5339_v55, %s4958_s23 }
 0x123   :  { %v156_v56 = vpop.permute.xlu1 %155  ;;  %v430_v57 = vpop.permute.xlu0 %429 }
 0x124   :  { %v477_v58 = vadd.f32 %v430_v57, %v4988_v0 }
 0x125   :  { %927 = vrot.lane.b32.xlu0 %v5343_v10, %s4952_s0 }
 0x126   :  { %655 = vperm.xlu1 %4785, %v477_v58   ;;  %v5392_v58 = vsel %vm76_vm0, %v132_v32, %v4998_v3 }
 0x127   :  { %v5350_v59 = vpop.permute.xlu1 %431  ;;  %v434_v60 = vpop.permute.xlu0 %433 }
 0x128   :  { %9967 = vst [vmem:[#allocation14_spill] sm:$0xff] %v5350_v59  ;;  %v479_v14 = vadd.f32 %v434_v60, %v4990_v1 }
 0x129   :  { %933 = vrot.lane.b32.xlu0 %v5348_v12, %s4952_s0 }
 0x12a   :  { %665 = vperm.xlu1 %4785, %v479_v14  }
 0x12b   :  { %v436_v62 = vpop.permute.xlu1 %435  ;;  %v5357_v63 = vpop.permute.xlu0 %437 }
 0x12c   :  { %9968 = vst [vmem:[#allocation15_spill] sm:$0xff] %v5357_v63  ;;  %v480_v0 = vadd.f32 %v436_v62, %v4998_v3  ;;  %v5412_v3 = vsel %vm76_vm0, %v140_v48, %v5014_v7  ;;  %v5434_v48 = vsel %vm76_vm0, %v152_v8, %v5038_v13 }
 0x12d   :  { %939 = vrot.lane.b32.xlu0 %v5355_v61, %s4952_s0 }
 0x12e   :  { %670 = vperm.xlu1 %4785, %v480_v0  }
 0x12f   :  { %v440_v25 = vpop.permute.xlu1 %439  ;;  %v5364_v41 = vpop.permute.xlu0 %441 }
 0x130   :  { %9969 = vst [vmem:[#allocation16_spill] sm:$0xff] %v5364_v41  ;;  %v482_v1 = vadd.f32 %v440_v25, %v5006_v5  ;;  %v5420_v5 = vsel %vm76_vm0, %v144_v4, %v5022_v9  ;;  %v5442_v4 = vsel %vm76_vm0, %v156_v56, %v5046_v15 }
 0x131   :  { %945 = vrot.lane.b32.xlu0 %v5362_v33, %s4952_s0 }
 0x132   :  { %680 = vperm.xlu1 %4785, %v482_v1  }
 0x133   :  { %v444_v44 = vpop.permute.xlu1 %443  ;;  %v5374_v31 = vpop.permute.xlu0 %445 }
 0x134   :  { %v484_v46 = vadd.f32 %v444_v44, %v5014_v7  ;;  %9970 = vst [vmem:[#allocation17_spill] sm:$0xff] %v5374_v31 }
 0x135   :  { %951 = vrot.lane.b32.xlu0 %v5369_v30, %s4952_s0 }
 0x136   :  { %690 = vperm.xlu1 %4785, %v484_v46  }
 0x137   :  { %v5388_v57 = vpop.permute.xlu0 %449  ;;  %v448_v7 = vpop.permute.xlu1 %447 }
 0x138   :  { %9971 = vst [vmem:[#allocation18_spill] sm:$0xff] %v5388_v57  ;;  %v486_v25 = vadd.f32 %v448_v7, %v5022_v9  ;;  %v5458_v9 = vld [vmem:[#allocation5 + $0x8] sm:$0xff]  ;;  %v5464_v7 = vld [vmem:[#allocation5 + $0x18] sm:$0xff] }
 0x139   :  { %957 = vrot.lane.b32.xlu0 %v5376_v50, %s4952_s0 }
 0x13a   :  { %271 = vrot.lane.b32.xlu1 %v5380_v52, %s4958_s23 }
 0x13b   :  { %v5406_v60 = vpop.permute.xlu0 %453  ;;  %v452_v6 = vpop.permute.xlu1 %451 }
 0x13c   :  { %9972 = vst [vmem:[#allocation19_spill] sm:$0xff] %v5406_v60  ;;  %v488_v8 = vadd.f32 %v452_v6, %v5030_v11  ;;  %v5469_v6 = vld [vmem:[#allocation5 + $0x28] sm:$0xff] }
 0x13d   :  { %963 = vrot.lane.b32.xlu0 %v5386_v54, %s4952_s0 }
 0x13e   :  { %275 = vrot.lane.b32.xlu1 %v5392_v58, %s4958_s23 }
 0x13f   :  { %v5416_v32 = vpop.permute.xlu0 %457  ;;  %v456_v44 = vpop.permute.xlu1 %455 }
 0x140   :  { %9973 = vst [vmem:[#allocation20_spill] sm:$0xff] %v5416_v32  ;;  %v490_v46 = vadd.f32 %v456_v44, %v5038_v13  ;;  %v9981_v13 = vmov 0   ;;  %v5483_v44 = vld [vmem:[#allocation5 + $0x48] sm:$0xff] }
 0x141   :  { %969 = vrot.lane.b32.xlu0 %v5398_v2, %s4952_s0 }
 0x142   :  { %279 = vrot.lane.b32.xlu1 %v5402_v27, %s4958_s23 }
 0x143   :  { %v460_v56 = vpop.permute.xlu1 %459 }
 0x144   :  { %v492_v16 = vadd.f32 %v460_v56, %v5046_v15 }
 0x146   :  { %283 = vrot.lane.b32.xlu1 %v5412_v3, %s4958_s23 }
 0x14a   :  { %287 = vrot.lane.b32.xlu1 %v5420_v5, %s4958_s23 }
 0x14d   :  { %v5428_v14 = vpop.permute.xlu0 %495 }
 0x14e   :  { %9974 = vst [vmem:[#allocation21_spill] sm:$0xff] %v5428_v14  ;;  %291 = vrot.lane.b32.xlu1 %v5426_v45, %s4958_s23 }
 0x151   :  { %v5436_v62 = vpop.permute.xlu0 %510 }
 0x152   :  { %9975 = vst [vmem:[#allocation22_spill] sm:$0xff] %v5436_v62  ;;  %295 = vrot.lane.b32.xlu1 %v5434_v48, %s4958_s23 }
 0x155   :  { %v5444_v0 = vpop.permute.xlu0 %520 }
 0x156   :  { %9976 = vst [vmem:[#allocation23_spill] sm:$0xff] %v5444_v0  ;;  %299 = vrot.lane.b32.xlu1 %v5442_v4, %s4958_s23 }
 0x159   :  { %v5449_v1 = vpop.permute.xlu0 %530 }
 0x15a   :  { %9977 = vst [vmem:[#allocation24_spill] sm:$0xff] %v5449_v1  ;;  %700 = vperm.xlu1 %4785, %v486_v25   ;;  %v5477_v25 = vld [vmem:[#allocation5 + $0x38] sm:$0xff] }
 0x15b   :  { %v5505_v1 = vld [vmem:[#allocation5 + $0x78] sm:$0xff] }
 0x15d   :  { %v5453_v28 = vpop.permute.xlu0 %540 }
 0x15e   :  { %710 = vperm.xlu1 %4785, %v488_v8   ;;  %9978 = vst [vmem:[#allocation25_spill] sm:$0xff] %v5453_v28 }
 0x161   :  { %v5456_v14 = vpop.permute.xlu0 %550 }
 0x162   :  { %720 = vperm.xlu1 %4785, %v490_v46   ;;  %9979 = vst [vmem:[#allocation26_spill] sm:$0xff] %v5456_v14  ;;  %v5499_v14 = vld [vmem:[#allocation5 + $0x68] sm:$0xff] }
 0x165   :  { %v5462_v11 = vpop.permute.xlu0 %560 }
 0x166   :  { %730 = vperm.xlu1 %4785, %v492_v16   ;;  %9980 = vst [vmem:[#allocation27_spill] sm:$0xff] %v5462_v11  ;;  %v5475_v16 = vpop.permute.xlu1 %500 }
 0x167   :  { %9983 = vst [vmem:[#allocation29_spill] sm:$0xff] %v5475_v16 }
 0x169   :  { %v5471_v15 = vpop.permute.xlu0 %570 }
 0x16a   :  { %930 = vrot.lane.b32.xlu1 %v5458_v9, %s4952_s0  ;;  %9982 = vst [vmem:[#allocation28_spill] sm:$0xff] %v5471_v15  ;;  %v5485_v46 = vpop.permute.xlu1 %505  ;;  %v5491_v15 = vld [vmem:[#allocation5 + $0x58] sm:$0xff] }
 0x16b   :  { %4786 = vset.pattern.permute.xlu1 %v9981_v13  ;;  %9984 = vst [vmem:[#allocation30_spill] sm:$0xff] %v5485_v46 }
 0x16e   :  { %936 = vrot.lane.b32.xlu1 %v5464_v7, %s4952_s0  ;;  %v5495_v16 = vpop.permute.xlu1 %515 }
 0x16f   :  { %9985 = vst [vmem:[#allocation31_spill] sm:$0xff] %v5495_v16 }
 0x172   :  { %942 = vrot.lane.b32.xlu1 %v5469_v6, %s4952_s0  ;;  %v5507_v0 = vpop.permute.xlu1 %525 }
 0x173   :  { %9986 = vst [vmem:[#allocation32_spill] sm:$0xff] %v5507_v0 }
 0x176   :  { %948 = vrot.lane.b32.xlu1 %v5477_v25, %s4952_s0  ;;  %v5513_v62 = vpop.permute.xlu1 %535 }
 0x177   :  { %v5481_v8 = vpop.permute.xlu0 %269  ;;  %9987 = vst [vmem:[#allocation33_spill] sm:$0xff] %v5513_v62 }
 0x17a   :  { %954 = vrot.lane.b32.xlu1 %v5483_v44, %s4952_s0  ;;  %v5519_v60 = vpop.permute.xlu1 %545 }
 0x17b   :  { %v5489_v56 = vpop.permute.xlu0 %273  ;;  %9988 = vst [vmem:[#allocation34_spill] sm:$0xff] %v5519_v60 }
 0x17e   :  { %960 = vrot.lane.b32.xlu1 %v5491_v15, %s4952_s0  ;;  %v5523_v31 = vpop.permute.xlu1 %555 }
 0x17f   :  { %v5497_v11 = vpop.permute.xlu0 %277  ;;  %9990 = vst [vmem:[#allocation36_spill] sm:$0xff] %v5523_v31 }
 0x182   :  { %966 = vrot.lane.b32.xlu1 %v5499_v14, %s4952_s0  ;;  %v5530_v59 = vpop.permute.xlu1 %565 }
 0x183   :  { %v5503_v28 = vpop.permute.xlu0 %281  ;;  %9991 = vst [vmem:[#allocation37_spill] sm:$0xff] %v5530_v59 }
 0x186   :  { %972 = vrot.lane.b32.xlu1 %v5505_v1, %s4952_s0 }
 0x187   :  { %v5511_v46 = vpop.permute.xlu0 %285 }
 0x18b   :  { %v5515_v16 = vpop.permute.xlu0 %289 }
 0x18f   :  { %v5517_v32 = vpop.permute.xlu0 %293 }
 0x193   :  { %v5521_v57 = vpop.permute.xlu0 %297 }
 0x194   :  { %9989 = vst [vmem:[#allocation35_spill] sm:$0xff] %v5521_v57 }
 0x197   :  { %v928_v41 = vpop.permute.xlu0 %927 }
 0x198   :  { %v929_v0 = vsel %vm76_vm0, %v928_v41, %v5343_v10 }
 0x199   :  { %975 = vrot.lane.b32.xlu0 %v929_v0, %s4952_s0 }
 0x19b   :  { %v934_v63 = vpop.permute.xlu0 %933 }
 0x19c   :  { %v935_v62 = vsel %vm76_vm0, %v934_v63, %v5348_v12 }
 0x19d   :  { %979 = vrot.lane.b32.xlu0 %v935_v62, %s4952_s0 }
 0x19f   :  { %v940_v13 = vpop.permute.xlu0 %939 }
 0x1a0   :  { %v941_v60 = vsel %vm76_vm0, %v940_v13, %v5355_v61 }
 0x1a1   :  { %v5535_v57 = vpop.permute.xlu1 %655  ;;  %983 = vrot.lane.b32.xlu0 %v941_v60, %s4952_s0 }
 0x1a2   :  { %9992 = vst [vmem:[#allocation38_spill] sm:$0xff] %v5535_v57 }
 0x1a3   :  { %v946_v31 = vpop.permute.xlu0 %945 }
 0x1a4   :  { %v947_v41 = vsel %vm76_vm0, %v946_v31, %v5362_v33 }
 0x1a5   :  { %v5540_v0 = vpop.permute.xlu1 %665  ;;  %987 = vrot.lane.b32.xlu0 %v947_v41, %s4952_s0 }
 0x1a6   :  { %9993 = vst [vmem:[#allocation39_spill] sm:$0xff] %v5540_v0 }
 0x1a7   :  { %v952_v63 = vpop.permute.xlu0 %951 }
 0x1a8   :  { %v953_v62 = vsel %vm76_vm0, %v952_v63, %v5369_v30 }
 0x1a9   :  { %v5545_v59 = vpop.permute.xlu1 %670  ;;  %991 = vrot.lane.b32.xlu0 %v953_v62, %s4952_s0 }
 0x1aa   :  { %9994 = vst [vmem:[#allocation40_spill] sm:$0xff] %v5545_v59 }
 0x1ab   :  { %v958_v13 = vpop.permute.xlu0 %957 }
 0x1ac   :  { %v959_v60 = vsel %vm76_vm0, %v958_v13, %v5376_v50 }
 0x1ad   :  { %v5550_v57 = vpop.permute.xlu1 %680  ;;  %995 = vrot.lane.b32.xlu0 %v959_v60, %s4952_s0  ;;  %v238_v60 = vadd.f32 %v5213_v34, %v5380_v52  ;;  %v244_v52 = vadd.f32 %v5236_v18, %v5412_v3  ;;  %v250_v18 = vadd.f32 %v5260_v21, %v5434_v48 }
 0x1ae   :  { %9995 = vst [vmem:[#allocation41_spill] sm:$0xff] %v5550_v57 }
 0x1af   :  { %v964_v31 = vpop.permute.xlu0 %963 }
 0x1b0   :  { %v965_v41 = vsel %vm76_vm0, %v964_v31, %v5386_v54 }
 0x1b1   :  { %v5555_v0 = vpop.permute.xlu1 %690  ;;  %999 = vrot.lane.b32.xlu0 %v965_v41, %s4952_s0  ;;  %v240_v41 = vadd.f32 %v5220_v36, %v5392_v58  ;;  %v246_v36 = vadd.f32 %v5244_v17, %v5420_v5 }
 0x1b2   :  { %9996 = vst [vmem:[#allocation42_spill] sm:$0xff] %v5555_v0 }
 0x1b3   :  { %v970_v63 = vpop.permute.xlu0 %969 }
 0x1b4   :  { %v971_v62 = vsel %vm76_vm0, %v970_v63, %v5398_v2 }
 0x1b5   :  { %v272_v59 = vpop.permute.xlu1 %271  ;;  %1003 = vrot.lane.b32.xlu0 %v971_v62, %s4952_s0  ;;  %v242_v62 = vadd.f32 %v5228_v38, %v5402_v27  ;;  %v248_v38 = vadd.f32 %v5252_v19, %v5426_v45 }
 0x1b6   :  { %v318_v31 = vadd.f32 %v272_v59, %v238_v60 }
 0x1b9   :  { %v276_v13 = vpop.permute.xlu1 %275  ;;  %1039 = vrot.lane.b32.xlu0 %v5343_v10, %s4953_s1 }
 0x1ba   :  { %v320_v63 = vadd.f32 %v276_v13, %v240_v41 }
 0x1bd   :  { %v280_v57 = vpop.permute.xlu1 %279  ;;  %1043 = vrot.lane.b32.xlu0 %v5348_v12, %s4953_s1 }
 0x1be   :  { %v322_v34 = vadd.f32 %v280_v57, %v242_v62 }
 0x1c1   :  { %v284_v0 = vpop.permute.xlu1 %283  ;;  %591 = vrot.lane.b32.xlu0 %v318_v31, %s4959_s24 }
 0x1c2   :  { %v324_v59 = vadd.f32 %v284_v0, %v244_v52 }
 0x1c5   :  { %v288_v26 = vpop.permute.xlu1 %287  ;;  %595 = vrot.lane.b32.xlu0 %v320_v63, %s4959_s24 }
 0x1c6   :  { %v326_v13 = vadd.f32 %v288_v26, %v246_v36 }
 0x1c9   :  { %v292_v55 = vpop.permute.xlu1 %291  ;;  %599 = vrot.lane.b32.xlu0 %v322_v34, %s4959_s24 }
 0x1ca   :  { %v328_v57 = vadd.f32 %v292_v55, %v248_v38  ;;  %v237_v38 = vadd.f32 %v5215_v35, %v5297_v42  ;;  %v241_v42 = vadd.f32 %v5230_v39, %v5309_v29 }
 0x1cd   :  { %v296_v58 = vpop.permute.xlu1 %295  ;;  %603 = vrot.lane.b32.xlu0 %v324_v59, %s4959_s24 }
 0x1ce   :  { %v330_v0 = vadd.f32 %v296_v58, %v250_v18  ;;  %v239_v18 = vadd.f32 %v5222_v37, %v5303_v43  ;;  %v321_v43 = vadd.f32 %v5497_v11, %v241_v42  ;;  %v245_v11 = vadd.f32 %v5246_v20, %v5321_v49 }
 0x1cf   :  { %v1197_v42 = vmul.f32 2.0, %v5398_v2 }
 0x1d0   :  { %v319_v35 = vadd.f32 %v5489_v56, %v239_v18 }
 0x1d1   :  { %v300_v27 = vpop.permute.xlu1 %299  ;;  %607 = vrot.lane.b32.xlu0 %v326_v13, %s4959_s24 }
 0x1d5   :  { %v5584_v3 = vpop.permute.xlu1 %700  ;;  %611 = vrot.lane.b32.xlu0 %v328_v57, %s4959_s24  ;;  %v317_v57 = vadd.f32 %v5481_v8, %v237_v38 }
 0x1d6   :  { %9997 = vst [vmem:[#allocation43_spill] sm:$0xff] %v5584_v3 }
 0x1d9   :  { %v5587_v17 = vpop.permute.xlu1 %710  ;;  %615 = vrot.lane.b32.xlu0 %v330_v0, %s4959_s24 }
 0x1da   :  { %9998 = vst [vmem:[#allocation44_spill] sm:$0xff] %v5587_v17 }
 0x1dd   :  { %v5590_v26 = vpop.permute.xlu1 %720  ;;  %1047 = vrot.lane.b32.xlu0 %v5355_v61, %s4953_s1 }
 0x1de   :  { %9999 = vst [vmem:[#allocation45_spill] sm:$0xff] %v5590_v26 }
 0x1e1   :  { %v5594_v19 = vpop.permute.xlu1 %730  ;;  %1051 = vrot.lane.b32.xlu0 %v5362_v33, %s4953_s1 }
 0x1e2   :  { %10000 = vst [vmem:[#allocation46_spill] sm:$0xff] %v5594_v19  ;;  %v1194_v19 = vmul.f32 2.0, %v5491_v15 }
 0x1e5   :  { %v931_v21 = vpop.permute.xlu1 %930  ;;  %1055 = vrot.lane.b32.xlu0 %v5369_v30, %s4953_s1 }
 0x1e6   :  { %v932_v55 = vsel %vm76_vm0, %v931_v21, %v5458_v9 }
 0x1e7   :  { %977 = vrot.lane.b32.xlu1 %v932_v55, %s4952_s0  ;;  %v252_v55 = vadd.f32 %v5268_v23, %v5442_v4  ;;  %v243_v23 = vadd.f32 %v5238_v40, %v5315_v47  ;;  %v325_v40 = vadd.f32 %v5511_v46, %v245_v11  ;;  %v247_v47 = vadd.f32 %v5254_v22, %v5327_v51 }
 0x1e8   :  { %v249_v46 = vadd.f32 %v5262_v24, %v5333_v53 }
 0x1e9   :  { %v937_v5 = vpop.permute.xlu1 %936  ;;  %1059 = vrot.lane.b32.xlu0 %v5376_v50, %s4953_s1  ;;  %v332_v8 = vadd.f32 %v300_v27, %v252_v55  ;;  %v323_v39 = vadd.f32 %v5503_v28, %v243_v23  ;;  %v327_v20 = vadd.f32 %v5515_v16, %v247_v47  ;;  %v10001_v16 = vld [vmem:[#allocation12_spill] sm:$0xff]  ;;  %v1195_v55 = vmul.f32 2.0, %v5386_v54 }
 0x1ea   :  { %v938_v45 = vsel %vm76_vm0, %v937_v5, %v5464_v7  ;;  %v329_v22 = vadd.f32 %v5517_v32, %v249_v46 }
 0x1eb   :  { %981 = vrot.lane.b32.xlu1 %v938_v45, %s4952_s0 }
 0x1ed   :  { %v943_v48 = vpop.permute.xlu1 %942  ;;  %1063 = vrot.lane.b32.xlu0 %v5386_v54, %s4953_s1 }
 0x1ee   :  { %v944_v60 = vsel %vm76_vm0, %v943_v48, %v5469_v6  ;;  %v10002_v48 = vld [vmem:[#allocation11_spill] sm:$0xff] }
 0x1ef   :  { %985 = vrot.lane.b32.xlu1 %v944_v60, %s4952_s0  ;;  %v251_v60 = vadd.f32 %v10002_v48, %v10001_v16 }
 0x1f1   :  { %v949_v31 = vpop.permute.xlu1 %948  ;;  %1067 = vrot.lane.b32.xlu0 %v5398_v2, %s4953_s1 }
 0x1f2   :  { %v950_v41 = vsel %vm76_vm0, %v949_v31, %v5477_v25 }
 0x1f3   :  { %989 = vrot.lane.b32.xlu1 %v950_v41, %s4952_s0  ;;  %v10003_v41 = vld [vmem:[#allocation35_spill] sm:$0xff] }
 0x1f4   :  { %v331_v24 = vadd.f32 %v10003_v41, %v251_v60 }
 0x1f5   :  { %v955_v63 = vpop.permute.xlu1 %954 }
 0x1f6   :  { %v956_v62 = vsel %vm76_vm0, %v955_v63, %v5483_v44 }
 0x1f7   :  { %993 = vrot.lane.b32.xlu1 %v956_v62, %s4952_s0 }
 0x1f9   :  { %v961_v34 = vpop.permute.xlu1 %960 }
 0x1fa   :  { %v962_v52 = vsel %vm76_vm0, %v961_v34, %v5491_v15  ;;  %v1183_v34 = vmul.f32 2.0, %v5343_v10 }
 0x1fb   :  { %997 = vrot.lane.b32.xlu1 %v962_v52, %s4952_s0 }
 0x1fd   :  { %v967_v59 = vpop.permute.xlu1 %966 }
 0x1fe   :  { %v968_v36 = vsel %vm76_vm0, %v967_v59, %v5499_v14  ;;  %v1185_v59 = vmul.f32 2.0, %v5348_v12 }
 0x1ff   :  { %1001 = vrot.lane.b32.xlu1 %v968_v36, %s4952_s0 }
 0x201   :  { %v973_v58 = vpop.permute.xlu1 %972 }
 0x202   :  { %v974_v13 = vsel %vm76_vm0, %v973_v58, %v5505_v1  ;;  %v1187_v58 = vmul.f32 2.0, %v5355_v61 }
 0x203   :  { %1005 = vrot.lane.b32.xlu1 %v974_v13, %s4952_s0  ;;  %v1189_v13 = vmul.f32 2.0, %v5362_v33 }
 0x207   :  { %1041 = vrot.lane.b32.xlu1 %v5458_v9, %s4953_s1 }
 0x20b   :  { %589 = vrot.lane.b32.xlu1 %v317_v57, %s4959_s24  ;;  %v976_v0 = vpop.permute.xlu0 %975  ;;  %v1191_v57 = vmul.f32 2.0, %v5369_v30 }
 0x20c   :  { %v5640_v21 = vsel %vm76_vm0, %v976_v0, %v5343_v10  ;;  %v1193_v0 = vmul.f32 2.0, %v5376_v50 }
 0x20d   :  { %1119 = vrot.lane.b32.xlu0 %v5640_v21, %s4958_s23 }
 0x20f   :  { %593 = vrot.lane.b32.xlu1 %v319_v35, %s4959_s24  ;;  %v980_v37 = vpop.permute.xlu0 %979 }
 0x210   :  { %v5654_v5 = vsel %vm76_vm0, %v980_v37, %v5348_v12 }
 0x211   :  { %619 = vrot.lane.b32.xlu0 %v332_v8, %s4959_s24 }
 0x213   :  { %597 = vrot.lane.b32.xlu1 %v321_v43, %s4959_s24  ;;  %v984_v4 = vpop.permute.xlu0 %983 }
 0x214   :  { %v5664_v29 = vsel %vm76_vm0, %v984_v4, %v5355_v61 }
 0x215   :  { %1123 = vrot.lane.b32.xlu0 %v5654_v5, %s4958_s23 }
 0x217   :  { %601 = vrot.lane.b32.xlu1 %v323_v39, %s4959_s24  ;;  %v988_v56 = vpop.permute.xlu0 %987 }
 0x218   :  { %v5674_v28 = vsel %vm76_vm0, %v988_v56, %v5362_v33 }
 0x219   :  { %1127 = vrot.lane.b32.xlu0 %v5664_v29, %s4958_s23 }
 0x21b   :  { %605 = vrot.lane.b32.xlu1 %v325_v40, %s4959_s24  ;;  %v992_v27 = vpop.permute.xlu0 %991 }
 0x21c   :  { %v5684_v49 = vsel %vm76_vm0, %v992_v27, %v5369_v30 }
 0x21d   :  { %1131 = vrot.lane.b32.xlu0 %v5674_v28, %s4958_s23 }
 0x21f   :  { %609 = vrot.lane.b32.xlu1 %v327_v20, %s4959_s24  ;;  %v996_v45 = vpop.permute.xlu0 %995 }
 0x220   :  { %v5694_v51 = vsel %vm76_vm0, %v996_v45, %v5376_v50 }
 0x221   :  { %1135 = vrot.lane.b32.xlu0 %v5684_v49, %s4958_s23 }
 0x223   :  { %613 = vrot.lane.b32.xlu1 %v329_v22, %s4959_s24  ;;  %v1000_v31 = vpop.permute.xlu0 %999 }
 0x224   :  { %v5704_v53 = vsel %vm76_vm0, %v1000_v31, %v5386_v54 }
 0x225   :  { %1139 = vrot.lane.b32.xlu0 %v5694_v51, %s4958_s23  ;;  %10004 = vst [vmem:[#allocation12_spill] sm:$0xff] %v5704_v53 }
 0x227   :  { %617 = vrot.lane.b32.xlu1 %v331_v24, %s4959_s24  ;;  %v1004_v32 = vpop.permute.xlu0 %1003 }
 0x228   :  { %v5711_v63 = vsel %vm76_vm0, %v1004_v32, %v5398_v2 }
 0x229   :  { %1143 = vrot.lane.b32.xlu0 %v5704_v53, %s4958_s23  ;;  %10005 = vst [vmem:[#allocation11_spill] sm:$0xff] %v5711_v63 }
 0x22b   :  { %1045 = vrot.lane.b32.xlu1 %v5464_v7, %s4953_s1  ;;  %v5715_v62 = vpop.permute.xlu0 %1039 }
 0x22d   :  { %1147 = vrot.lane.b32.xlu0 %v5711_v63, %s4958_s23 }
 0x22f   :  { %1049 = vrot.lane.b32.xlu1 %v5469_v6, %s4953_s1  ;;  %v5722_v52 = vpop.permute.xlu0 %1043 }
 0x231   :  { %1215 = vrot.lane.b32.xlu0 %v1183_v34, %s4955_s21 }
 0x233   :  { %1053 = vrot.lane.b32.xlu1 %v5477_v25, %s4953_s1  ;;  %v5728_v36 = vpop.permute.xlu0 %591 }
 0x234   :  { %10006 = vst [vmem:[#allocation35_spill] sm:$0xff] %v5728_v36 }
 0x235   :  { %1219 = vrot.lane.b32.xlu0 %v1185_v59, %s4955_s21 }
 0x237   :  { %1057 = vrot.lane.b32.xlu1 %v5483_v44, %s4953_s1  ;;  %v5736_v38 = vpop.permute.xlu0 %595 }
 0x238   :  { %10007 = vst [vmem:[#allocation47_spill] sm:$0xff] %v5736_v38 }
 0x239   :  { %1223 = vrot.lane.b32.xlu0 %v1187_v58, %s4955_s21 }
 0x23b   :  { %1061 = vrot.lane.b32.xlu1 %v5491_v15, %s4953_s1  ;;  %v5744_v18 = vpop.permute.xlu0 %599 }
 0x23c   :  { %10008 = vst [vmem:[#allocation48_spill] sm:$0xff] %v5744_v18 }
 0x23d   :  { %1227 = vrot.lane.b32.xlu0 %v1189_v13, %s4955_s21 }
 0x23f   :  { %1065 = vrot.lane.b32.xlu1 %v5499_v14, %s4953_s1  ;;  %v5752_v35 = vpop.permute.xlu0 %603 }
 0x240   :  { %10009 = vst [vmem:[#allocation49_spill] sm:$0xff] %v5752_v35 }
 0x241   :  { %1231 = vrot.lane.b32.xlu0 %v1191_v57, %s4955_s21 }
 0x243   :  { %1069 = vrot.lane.b32.xlu1 %v5505_v1, %s4953_s1  ;;  %v5756_v8 = vpop.permute.xlu0 %607 }
 0x244   :  { %10010 = vst [vmem:[#allocation50_spill] sm:$0xff] %v5756_v8 }
 0x245   :  { %1235 = vrot.lane.b32.xlu0 %v1193_v0, %s4955_s21 }
 0x247   :  { %v5760_v37 = vpop.permute.xlu0 %611 }
 0x248   :  { %10011 = vst [vmem:[#allocation51_spill] sm:$0xff] %v5760_v37 }
 0x249   :  { %1239 = vrot.lane.b32.xlu0 %v1195_v55, %s4955_s21 }
 0x24b   :  { %v5763_v43 = vpop.permute.xlu0 %615 }
 0x24c   :  { %10012 = vst [vmem:[#allocation52_spill] sm:$0xff] %v5763_v43 }
 0x24d   :  { %1243 = vrot.lane.b32.xlu0 %v1197_v42, %s4955_s21 }
 0x24f   :  { %v5772_v11 = vpop.permute.xlu0 %1047 }
 0x251   :  { %1279 = vrot.lane.b32.xlu0 %v1183_v34, %s4956_s22 }
 0x253   :  { %v5788_v27 = vpop.permute.xlu0 %1051 }
 0x255   :  { %1283 = vrot.lane.b32.xlu0 %v1185_v59, %s4956_s22 }
 0x257   :  { %v5797_v22 = vpop.permute.xlu0 %1055 }
 0x259   :  { %v978_v23 = vpop.permute.xlu1 %977  ;;  %1287 = vrot.lane.b32.xlu0 %v1187_v58, %s4956_s22  ;;  %v1184_v58 = vmul.f32 2.0, %v5458_v9 }
 0x25a   :  { %v5768_v4 = vsel %vm76_vm0, %v978_v23, %v5458_v9  ;;  %v1188_v23 = vmul.f32 2.0, %v5469_v6 }
 0x25b   :  { %1121 = vrot.lane.b32.xlu1 %v5768_v4, %s4958_s23  ;;  %v5811_v31 = vpop.permute.xlu0 %1059 }
 0x25d   :  { %v982_v39 = vpop.permute.xlu1 %981  ;;  %1291 = vrot.lane.b32.xlu0 %v1189_v13, %s4956_s22 }
 0x25e   :  { %v5777_v56 = vsel %vm76_vm0, %v982_v39, %v5464_v7 }
 0x25f   :  { %1125 = vrot.lane.b32.xlu1 %v5777_v56, %s4958_s23  ;;  %v5821_v32 = vpop.permute.xlu0 %1063 }
 0x260   :  { %10014 = vst [vmem:[#allocation54_spill] sm:$0xff] %v5821_v32 }
 0x261   :  { %v986_v40 = vpop.permute.xlu1 %985  ;;  %1295 = vrot.lane.b32.xlu0 %v1191_v57, %s4956_s22 }
 0x262   :  { %v5784_v47 = vsel %vm76_vm0, %v986_v40, %v5469_v6 }
 0x263   :  { %1129 = vrot.lane.b32.xlu1 %v5784_v47, %s4958_s23  ;;  %v5832_v57 = vpop.permute.xlu0 %1067 }
 0x264   :  { %10016 = vst [vmem:[#allocation56_spill] sm:$0xff] %v5832_v57 }
 0x265   :  { %v990_v20 = vpop.permute.xlu1 %989  ;;  %1299 = vrot.lane.b32.xlu0 %v1193_v0, %s4956_s22  ;;  %v1186_v0 = vmul.f32 2.0, %v5464_v7 }
 0x266   :  { %v5793_v46 = vsel %vm76_vm0, %v990_v20, %v5477_v25  ;;  %v1190_v20 = vmul.f32 2.0, %v5477_v25 }
 0x267   :  { %1133 = vrot.lane.b32.xlu1 %v5793_v46, %s4958_s23 }
 0x269   :  { %v994_v45 = vpop.permute.xlu1 %993  ;;  %1303 = vrot.lane.b32.xlu0 %v1195_v55, %s4956_s22 }
 0x26a   :  { %v5802_v16 = vsel %vm76_vm0, %v994_v45, %v5483_v44 }
 0x26b   :  { %1137 = vrot.lane.b32.xlu1 %v5802_v16, %s4958_s23 }
 0x26d   :  { %v998_v48 = vpop.permute.xlu1 %997  ;;  %1307 = vrot.lane.b32.xlu0 %v1197_v42, %s4956_s22 }
 0x26e   :  { %v5809_v60 = vsel %vm76_vm0, %v998_v48, %v5491_v15 }
 0x26f   :  { %1141 = vrot.lane.b32.xlu1 %v5809_v60, %s4958_s23 }
 0x271   :  { %v1002_v41 = vpop.permute.xlu1 %1001 }
 0x272   :  { %v5817_v24 = vsel %vm76_vm0, %v1002_v41, %v5499_v14  ;;  %v1192_v41 = vmul.f32 2.0, %v5483_v44 }
 0x273   :  { %10013 = vst [vmem:[#allocation53_spill] sm:$0xff] %v5817_v24  ;;  %1145 = vrot.lane.b32.xlu1 %v5817_v24, %s4958_s23 }
 0x275   :  { %v1006_v34 = vpop.permute.xlu1 %1005 }
 0x276   :  { %v5825_v59 = vsel %vm76_vm0, %v1006_v34, %v5505_v1 }
 0x277   :  { %10015 = vst [vmem:[#allocation55_spill] sm:$0xff] %v5825_v59  ;;  %1149 = vrot.lane.b32.xlu1 %v5825_v59, %s4958_s23 }
 0x279   :  { %v5830_v13 = vpop.permute.xlu1 %1041 }
 0x27b   :  { %1217 = vrot.lane.b32.xlu1 %v1184_v58, %s4955_s21 }
 0x27d   :  { %v5836_v55 = vpop.permute.xlu1 %589 }
 0x27e   :  { %10017 = vst [vmem:[#allocation57_spill] sm:$0xff] %v5836_v55 }
 0x27f   :  { %1221 = vrot.lane.b32.xlu1 %v1186_v0, %s4955_s21  ;;  %v5839_v42 = vpop.permute.xlu0 %1119 }
 0x281   :  { %v5842_v39 = vpop.permute.xlu1 %593 }
 0x282   :  { %10018 = vst [vmem:[#allocation58_spill] sm:$0xff] %v5842_v39 }
 0x283   :  { %1225 = vrot.lane.b32.xlu1 %v1188_v23, %s4955_s21  ;;  %v5845_v40 = vpop.permute.xlu0 %619 }
 0x284   :  { %10019 = vst [vmem:[#allocation59_spill] sm:$0xff] %v5845_v40 }
 0x285   :  { %v5848_v45 = vpop.permute.xlu1 %597 }
 0x286   :  { %10020 = vst [vmem:[#allocation60_spill] sm:$0xff] %v5848_v45  ;;  %v1196_v45 = vmul.f32 2.0, %v5499_v14 }
 0x287   :  { %1229 = vrot.lane.b32.xlu1 %v1190_v20, %s4955_s21  ;;  %v5851_v48 = vpop.permute.xlu0 %1123 }
 0x289   :  { %v5854_v34 = vpop.permute.xlu1 %601 }
 0x28a   :  { %10021 = vst [vmem:[#allocation61_spill] sm:$0xff] %v5854_v34  ;;  %v1198_v34 = vmul.f32 2.0, %v5505_v1 }
 0x28b   :  { %1233 = vrot.lane.b32.xlu1 %v1192_v41, %s4955_s21  ;;  %v5857_v36 = vpop.permute.xlu0 %1127 }
 0x28d   :  { %v5860_v26 = vpop.permute.xlu1 %605 }
 0x28e   :  { %10022 = vst [vmem:[#allocation62_spill] sm:$0xff] %v5860_v26 }
 0x28f   :  { %1237 = vrot.lane.b32.xlu1 %v1194_v19, %s4955_s21  ;;  %v5863_v17 = vpop.permute.xlu0 %1131 }
 0x291   :  { %v5866_v40 = vpop.permute.xlu1 %609 }
 0x292   :  { %10023 = vst [vmem:[#allocation63_spill] sm:$0xff] %v5866_v40 }
 0x293   :  { %1241 = vrot.lane.b32.xlu1 %v1196_v45, %s4955_s21  ;;  %v5869_v43 = vpop.permute.xlu0 %1135 }
 0x295   :  { %v5875_v3 = vpop.permute.xlu1 %613 }
 0x296   :  { %10024 = vst [vmem:[#allocation64_spill] sm:$0xff] %v5875_v3 }
 0x297   :  { %1245 = vrot.lane.b32.xlu1 %v1198_v34, %s4955_s21  ;;  %v5873_v37 = vpop.permute.xlu0 %1139 }
 0x299   :  { %v5880_v55 = vpop.permute.xlu1 %617 }
 0x29a   :  { %10026 = vst [vmem:[#allocation66_spill] sm:$0xff] %v5880_v55 }
 0x29b   :  { %v5877_v26 = vpop.permute.xlu0 %1143  ;;  %1281 = vrot.lane.b32.xlu1 %v1184_v58, %s4956_s22 }
 0x29c   :  { %10025 = vst [vmem:[#allocation65_spill] sm:$0xff] %v5877_v26 }
 0x29d   :  { %v5887_v18 = vpop.permute.xlu1 %1045 }
 0x29f   :  { %v5882_v8 = vpop.permute.xlu0 %1147  ;;  %1285 = vrot.lane.b32.xlu1 %v1186_v0, %s4956_s22 }
 0x2a0   :  { %10027 = vst [vmem:[#allocation67_spill] sm:$0xff] %v5882_v8 }
 0x2a1   :  { %v5890_v3 = vpop.permute.xlu1 %1049 }
 0x2a3   :  { %v1216_v40 = vpop.permute.xlu0 %1215  ;;  %1289 = vrot.lane.b32.xlu1 %v1188_v23, %s4956_s22 }
 0x2a4   :  { %v1263_v35 = vadd.f32 %v1216_v40, %v5343_v10 }
 0x2a5   :  { %v5894_v58 = vpop.permute.xlu1 %1053 }
 0x2a6   :  { %1345 = vperm.xlu0 %4783, %v1263_v35  }
 0x2a7   :  { %1293 = vrot.lane.b32.xlu1 %v1190_v20, %s4956_s22 }
 0x2a9   :  { %v5897_v0 = vpop.permute.xlu1 %1057 }
 0x2ab   :  { %1297 = vrot.lane.b32.xlu1 %v1192_v41, %s4956_s22 }
 0x2ad   :  { %v5900_v23 = vpop.permute.xlu1 %1061 }
 0x2af   :  { %1301 = vrot.lane.b32.xlu1 %v1194_v19, %s4956_s22 }
 0x2b1   :  { %v5902_v40 = vpop.permute.xlu1 %1065 }
 0x2b2   :  { %10028 = vst [vmem:[#allocation68_spill] sm:$0xff] %v5902_v40 }
 0x2b3   :  { %1305 = vrot.lane.b32.xlu1 %v1196_v45, %s4956_s22  ;;  %v1220_v45 = vpop.permute.xlu0 %1219 }
 0x2b4   :  { %v1265_v63 = vadd.f32 %v1220_v45, %v5348_v12 }
 0x2b5   :  { %v5904_v35 = vpop.permute.xlu1 %1069 }
 0x2b6   :  { %10029 = vst [vmem:[#allocation69_spill] sm:$0xff] %v5904_v35 }
 0x2b7   :  { %1309 = vrot.lane.b32.xlu1 %v1198_v34, %s4956_s22  ;;  %v1224_v8 = vpop.permute.xlu0 %1223 }
 0x2b8   :  { %v1267_v24 = vadd.f32 %v1224_v8, %v5355_v61 }
 0x2bb   :  { %v1228_v35 = vpop.permute.xlu0 %1227 }
 0x2bf   :  { %v1232_v32 = vpop.permute.xlu0 %1231 }
 0x2c3   :  { %v1236_v45 = vpop.permute.xlu0 %1235 }
 0x2cd   :  { %v1122_v20 = vpop.permute.xlu1 %1121 }
 0x2d1   :  { %v1126_v55 = vpop.permute.xlu1 %1125 }
 0x2d5   :  { %v5906_v39 = vpop.permute.xlu1 %1129 }
 0x2d9   :  { %v5908_v41 = vpop.permute.xlu1 %1133 }
 0x2dd   :  { %v5910_v19 = vpop.permute.xlu1 %1137 }
 0x2e1   :  { %v5912_v38 = vpop.permute.xlu1 %1141 }
 0x2e5   :  { %v5914_v10 = vpop.permute.xlu1 %1145 }
 0x2e6   :  { %10030 = vst [vmem:[#allocation70_spill] sm:$0xff] %v5914_v10 }
 0x2e9   :  { %v5916_v34 = vpop.permute.xlu1 %1149 }
 0x2ea   :  { %10031 = vst [vmem:[#allocation71_spill] sm:$0xff] %v5916_v34  ;;  %v1269_v34 = vadd.f32 %v1228_v35, %v5362_v33 }
 0x2ed   :  { %v1218_v59 = vpop.permute.xlu1 %1217 }
 0x2ee   :  { %v1264_v57 = vadd.f32 %v1218_v59, %v5458_v9 }
 0x2f0   :  { %1350 = vperm.xlu1 %4786, %v1264_v57   ;;  %v1271_v57 = vadd.f32 %v1232_v32, %v5369_v30 }
 0x2f1   :  { %v1222_v26 = vpop.permute.xlu1 %1221 }
 0x2f2   :  { %v1266_v40 = vadd.f32 %v1222_v26, %v5464_v7 }
 0x2f4   :  { %1360 = vperm.xlu0 %4783, %v1266_v40   ;;  %1355 = vperm.xlu1 %4786, %v1265_v63   ;;  %v1273_v63 = vadd.f32 %v1236_v45, %v5376_v50  ;;  %v1089_v45 = vadd.f32 %v5722_v52, %v5654_v5 }
 0x2f5   :  { %v1226_v53 = vpop.permute.xlu1 %1225 }
 0x2f6   :  { %v1268_v10 = vadd.f32 %v1226_v53, %v5469_v6  ;;  %v1240_v53 = vpop.permute.xlu0 %1239 }
 0x2f7   :  { %v1275_v33 = vadd.f32 %v1240_v53, %v5386_v54  ;;  %v10045_v53 = vld [vmem:[#allocation71_spill] sm:$0xff] }
 0x2f8   :  { %1370 = vperm.xlu0 %4783, %v1268_v10   ;;  %1365 = vperm.xlu1 %4786, %v1267_v24  }
 0x2f9   :  { %v1230_v9 = vpop.permute.xlu1 %1229 }
 0x2fa   :  { %v1270_v59 = vadd.f32 %v1230_v9, %v5477_v25  ;;  %v1244_v32 = vpop.permute.xlu0 %1243  ;;  %v1088_v9 = vadd.f32 %v5830_v13, %v5768_v4  ;;  %v1091_v4 = vadd.f32 %v5772_v11, %v5664_v29  ;;  %v1092_v13 = vadd.f32 %v5890_v3, %v5784_v47 }
 0x2fb   :  { %v1277_v40 = vadd.f32 %v1244_v32, %v5398_v2  ;;  %v1090_v2 = vadd.f32 %v5887_v18, %v5777_v56  ;;  %v1093_v18 = vadd.f32 %v5788_v27, %v5674_v28  ;;  %v1094_v56 = vadd.f32 %v5894_v58, %v5793_v46  ;;  %v10039_v58 = vld [vmem:[#allocation70_spill] sm:$0xff] }
 0x2fc   :  { %1380 = vperm.xlu0 %4783, %v1270_v59   ;;  %1375 = vperm.xlu1 %4786, %v1269_v34   ;;  %v1087_v34 = vadd.f32 %v5715_v62, %v5640_v21  ;;  %v1168_v59 = vadd.f32 %v1122_v20, %v1088_v9  ;;  %v1169_v21 = vadd.f32 %v5851_v48, %v1089_v45  ;;  %v10041_v20 = vld [vmem:[#allocation56_spill] sm:$0xff] }
 0x2fd   :  { %v1234_v26 = vpop.permute.xlu1 %1233  ;;  %v1170_v62 = vadd.f32 %v1126_v55, %v1090_v2  ;;  %v1171_v5 = vadd.f32 %v5857_v36, %v1091_v4  ;;  %v1172_v52 = vadd.f32 %v5906_v39, %v1092_v13  ;;  %v1173_v3 = vadd.f32 %v5863_v17, %v1093_v18  ;;  %v10037_v39 = vld [vmem:[#allocation68_spill] sm:$0xff] }
 0x2fe   :  { %v1272_v61 = vadd.f32 %v1234_v26, %v5483_v44  ;;  %v1167_v54 = vadd.f32 %v5839_v42, %v1087_v34  ;;  %v1174_v29 = vadd.f32 %v5908_v41, %v1094_v56  ;;  %v1095_v11 = vadd.f32 %v5797_v22, %v5684_v49  ;;  %v10036_v42 = vld [vmem:[#allocation53_spill] sm:$0xff]  ;;  %v10042_v41 = vld [vmem:[#allocation55_spill] sm:$0xff]  ;;  %v1280_v26 = vpop.permute.xlu0 %1279 }
 0x2ff   :  { %v1096_v36 = vadd.f32 %v5897_v0, %v5802_v16  ;;  %v1097_v17 = vadd.f32 %v5811_v31, %v5694_v51  ;;  %v1098_v46 = vadd.f32 %v5900_v23, %v5809_v60  ;;  %v10034_v16 = vld [vmem:[#allocation12_spill] sm:$0xff]  ;;  %v1100_v48 = vadd.f32 %v10037_v39, %v10036_v42  ;;  %v10038_v60 = vld [vmem:[#allocation65_spill] sm:$0xff]  ;;  %v10040_v23 = vld [vmem:[#allocation11_spill] sm:$0xff] }
 0x300   :  { %1390 = vperm.xlu0 %4783, %v1272_v61   ;;  %1385 = vperm.xlu1 %4786, %v1271_v57   ;;  %v10032_v57 = vmov 15   ;;  %v1175_v28 = vadd.f32 %v5869_v43, %v1095_v11  ;;  %v10035_v43 = vld [vmem:[#allocation54_spill] sm:$0xff]  ;;  %v10044_v61 = vld [vmem:[#allocation67_spill] sm:$0xff] }
 0x301   :  { %v1238_v8 = vpop.permute.xlu1 %1237  ;;  %v1176_v47 = vadd.f32 %v5910_v19, %v1096_v36  ;;  %v1177_v49 = vadd.f32 %v5873_v37, %v1097_v17  ;;  %v1178_v22 = vadd.f32 %v5912_v38, %v1098_v46  ;;  %v1099_v55 = vadd.f32 %v10035_v43, %v10034_v16  ;;  %v10043_v38 = vld [vmem:[#allocation69_spill] sm:$0xff]  ;;  %v4835_v46 = vld [vmem:[#allocation2 + $0x8] sm:$0xff]  ;;  %v4838_v39 = vld [vmem:[#allocation2 + $0x38] sm:$0xff] }
 0x302   :  { %v1274_v10 = vadd.f32 %v1238_v8, %v5491_v15  ;;  %v1180_v0 = vadd.f32 %v10039_v58, %v1100_v48  ;;  %v1101_v37 = vadd.f32 %v10041_v20, %v10040_v23  ;;  %v1102_v19 = vadd.f32 %v10043_v38, %v10042_v41  ;;  %v4834_v36 = vld [vmem:[#allocation2 + $0x70] sm:$0xff]  ;;  %v4840_v58 = vld [vmem:[#allocation2 + $0x58] sm:$0xff]  ;;  %v4841_v20 = vld [vmem:[#allocation2 + $0x68] sm:$0xff] }
 0x303   :  { %v1179_v31 = vadd.f32 %v10038_v60, %v1099_v55  ;;  %v10058_v43 = vmov 0   ;;  %v6060_v48 = vmul.f32 %v4838_v39, %v4838_v39  ;;  %v4839_v60 = vld [vmem:[#allocation2 + $0x48] sm:$0xff] }
 0x304   :  { %1400 = vperm.xlu0 %4783, %v1274_v10   ;;  %1395 = vperm.xlu1 %4786, %v1273_v63   ;;  %v1181_v63 = vadd.f32 %v10044_v61, %v1101_v37  ;;  %v1182_v8 = vadd.f32 %v10045_v53, %v1102_v19  ;;  %v6076_v37 = vmul.f32 %v4841_v20, %v4841_v20  ;;  %v4842_v19 = vld [vmem:[#allocation2 + $0x78] sm:$0xff] }
 0x305   :  { %v1242_v24 = vpop.permute.xlu1 %1241 }
 0x306   :  { %v1276_v30 = vadd.f32 %v1242_v24, %v5499_v14 }
 0x308   :  { %1410 = vperm.xlu0 %4783, %v1276_v30   ;;  %1405 = vperm.xlu1 %4786, %v1275_v33   ;;  %v10046_v33 = vld [vmem:[#allocation13_spill] sm:$0xff]  ;;  %v4827_v30 = vld [vmem:[#allocation2] sm:$0xff] }
 0x309   :  { %v1246_v35 = vpop.permute.xlu1 %1245  ;;  %v1327_v24 = vadd.f32 %v1280_v26, %v10046_v33  ;;  %v5999_v32 = vmul.f32 %v4827_v30, %v4827_v30  ;;  %v6084_v26 = vmul.f32 %v4842_v19, %v4842_v19 }
 0x30a   :  { %v1278_v50 = vadd.f32 %v1246_v35, %v5505_v1 }
 0x30b   :  { %10047 = vst [vmem:[#allocation12_spill] sm:$0xff] %v5999_v32 }
 0x30c   :  { %1420 = vperm.xlu0 %4783, %v1278_v50   ;;  %1415 = vperm.xlu1 %4786, %v1277_v40   ;;  %v1284_v40 = vpop.permute.xlu0 %1283  ;;  %v4828_v50 = vld [vmem:[#allocation2 + $0x10] sm:$0xff] }
 0x30d   :  { %v5970_v27 = vpop.permute.xlu1 %1281  ;;  %v1329_v35 = vadd.f32 %v1284_v40, %v5348_v12  ;;  %v6004_v34 = vmul.f32 %v4828_v50, %v4828_v50 }
 0x30e   :  { %10033 = vst [vmem:[#allocation72_spill] sm:$0xff] %v5970_v27 }
 0x310   :  { %1441 = vrot.lane.b32.xlu0 %v1168_v59, %s4959_s24  ;;  %1439 = vrot.lane.b32.xlu1 %v1167_v54, %s4959_s24  ;;  %v4829_v59 = vld [vmem:[#allocation2 + $0x20] sm:$0xff]  ;;  %v6031_v11 = vpop.permute.xlu0 %1287 }
 0x311   :  { %4787 = vset.pattern.permute.xlu1 %v10032_v57  ;;  %v1286_v51 = vpop.permute.xlu1 %1285  ;;  %v6009_v45 = vmul.f32 %v4829_v59, %v4829_v59  ;;  %10053 = vst [vmem:[#allocation11_spill] sm:$0xff] %v6031_v11 }
 0x312   :  { %v1330_v54 = vadd.f32 %v1286_v51, %v5464_v7  ;;  %v4831_v7 = vld [vmem:[#allocation2 + $0x40] sm:$0xff] }
 0x313   :  { %10048 = vst [vmem:[#allocation54_spill] sm:$0xff] %v6009_v45  ;;  %v6019_v13 = vmul.f32 %v4831_v7, %v4831_v7 }
 0x314   :  { %1445 = vrot.lane.b32.xlu0 %v1170_v62, %s4959_s24  ;;  %1443 = vrot.lane.b32.xlu1 %v1169_v21, %s4959_s24  ;;  %v4830_v21 = vld [vmem:[#allocation2 + $0x30] sm:$0xff]  ;;  %v6041_v17 = vpop.permute.xlu0 %1291 }
 0x315   :  { %v1290_v10 = vpop.permute.xlu1 %1289  ;;  %v6014_v62 = vmul.f32 %v4830_v21, %v4830_v21  ;;  %10050 = vst [vmem:[#allocation68_spill] sm:$0xff] %v6019_v13  ;;  %10055 = vst [vmem:[#allocation55_spill] sm:$0xff] %v6041_v17 }
 0x316   :  { %v1332_v12 = vadd.f32 %v1290_v10, %v5469_v6  ;;  %v4832_v6 = vld [vmem:[#allocation2 + $0x50] sm:$0xff] }
 0x317   :  { %10049 = vst [vmem:[#allocation53_spill] sm:$0xff] %v6014_v62  ;;  %v6024_v18 = vmul.f32 %v4832_v6, %v4832_v6 }
 0x318   :  { %1449 = vrot.lane.b32.xlu0 %v1172_v52, %s4959_s24  ;;  %1447 = vrot.lane.b32.xlu1 %v1171_v5, %s4959_s24 }
 0x319   :  { %v1294_v9 = vpop.permute.xlu1 %1293  ;;  %10051 = vst [vmem:[#allocation65_spill] sm:$0xff] %v6024_v18 }
 0x31a   :  { %v1334_v4 = vadd.f32 %v1294_v9, %v5477_v25 }
 0x31c   :  { %1453 = vrot.lane.b32.xlu0 %v1174_v29, %s4959_s24  ;;  %1451 = vrot.lane.b32.xlu1 %v1173_v3, %s4959_s24  ;;  %v4833_v3 = vld [vmem:[#allocation2 + $0x60] sm:$0xff] }
 0x31d   :  { %v1298_v2 = vpop.permute.xlu1 %1297  ;;  %v6029_v29 = vmul.f32 %v4833_v3, %v4833_v3 }
 0x31e   :  { %v1336_v52 = vadd.f32 %v1298_v2, %v5483_v44 }
 0x31f   :  { %10052 = vst [vmem:[#allocation70_spill] sm:$0xff] %v6029_v29 }
 0x320   :  { %1457 = vrot.lane.b32.xlu0 %v1176_v47, %s4959_s24  ;;  %1455 = vrot.lane.b32.xlu1 %v1175_v28, %s4959_s24  ;;  %v6036_v28 = vmul.f32 %v4834_v36, %v4834_v36 }
 0x321   :  { %v1302_v5 = vpop.permute.xlu1 %1301 }
 0x322   :  { %v1338_v25 = vadd.f32 %v1302_v5, %v5491_v15  ;;  %10054 = vst [vmem:[#allocation56_spill] sm:$0xff] %v6036_v28 }
 0x324   :  { %1461 = vrot.lane.b32.xlu0 %v1178_v22, %s4959_s24  ;;  %1459 = vrot.lane.b32.xlu1 %v1177_v49, %s4959_s24  ;;  %v6043_v49 = vmul.f32 %v4835_v46, %v4835_v46  ;;  %v4836_v22 = vld [vmem:[#allocation2 + $0x18] sm:$0xff] }
 0x325   :  { %v1306_v56 = vpop.permute.xlu1 %1305  ;;  %v6049_v16 = vmul.f32 %v4836_v22, %v4836_v22 }
 0x326   :  { %v1340_v44 = vadd.f32 %v1306_v56, %v5499_v14  ;;  %10056 = vst [vmem:[#allocation69_spill] sm:$0xff] %v6043_v49  ;;  %v6045_v14 = vpop.permute.xlu0 %1295 }
 0x327   :  { %10057 = vst [vmem:[#allocation67_spill] sm:$0xff] %v6045_v14 }
 0x328   :  { %1465 = vrot.lane.b32.xlu0 %v1180_v0, %s4959_s24  ;;  %1463 = vrot.lane.b32.xlu1 %v1179_v31, %s4959_s24  ;;  %v6066_v31 = vmul.f32 %v4839_v60, %v4839_v60  ;;  %v6070_v0 = vmul.f32 %v4840_v58, %v4840_v58 }
 0x329   :  { %v1310_v47 = vpop.permute.xlu1 %1309 }
 0x32a   :  { %v1342_v15 = vadd.f32 %v1310_v47, %v5505_v1  ;;  %v4837_v1 = vld [vmem:[#allocation2 + $0x28] sm:$0xff]  ;;  %v6056_v42 = vpop.permute.xlu0 %1299 }
 0x32b   :  { %v6054_v55 = vmul.f32 %v4837_v1, %v4837_v1  ;;  %10059 = vst [vmem:[#allocation71_spill] sm:$0xff] %v6056_v42 }
 0x32c   :  { %1469 = vrot.lane.b32.xlu0 %v1182_v8, %s4959_s24  ;;  %1467 = vrot.lane.b32.xlu1 %v1181_v63, %s4959_s24 }
 0x32e   :  { %v6062_v51 = vpop.permute.xlu0 %1303 }
 0x32f   :  { %10060 = vst [vmem:[#allocation13_spill] sm:$0xff] %v6062_v51 }
 0x330   :  { %1505 = vperm.xlu1 %4787, %v1327_v24   ;;  %1791 = vrot.lane.b32.xlu0 %v5999_v32, %s4952_s0 }
 0x332   :  { %v6072_v23 = vpop.permute.xlu0 %1307 }
 0x333   :  { %10061 = vst [vmem:[#allocation73_spill] sm:$0xff] %v6072_v23 }
 0x334   :  { %1515 = vperm.xlu1 %4787, %v1329_v35   ;;  %1797 = vrot.lane.b32.xlu0 %v6004_v34, %s4952_s0 }
 0x336   :  { %v6078_v41 = vpop.permute.xlu0 %1345 }
 0x337   :  { %10062 = vst [vmem:[#allocation74_spill] sm:$0xff] %v6078_v41 }
 0x338   :  { %1520 = vperm.xlu1 %4787, %v1330_v54   ;;  %1803 = vrot.lane.b32.xlu0 %v6009_v45, %s4952_s0 }
 0x33c   :  { %1530 = vperm.xlu1 %4787, %v1332_v12   ;;  %1809 = vrot.lane.b32.xlu0 %v6014_v62, %s4952_s0 }
 0x340   :  { %1540 = vperm.xlu1 %4787, %v1334_v4   ;;  %1815 = vrot.lane.b32.xlu0 %v6019_v13, %s4952_s0 }
 0x344   :  { %1550 = vperm.xlu1 %4787, %v1336_v52   ;;  %1821 = vrot.lane.b32.xlu0 %v6024_v18, %s4952_s0 }
 0x348   :  { %1560 = vperm.xlu1 %4787, %v1338_v25   ;;  %1827 = vrot.lane.b32.xlu0 %v6029_v29, %s4952_s0 }
 0x34c   :  { %1570 = vperm.xlu1 %4787, %v1340_v44   ;;  %1833 = vrot.lane.b32.xlu0 %v6036_v28, %s4952_s0 }
 0x350   :  { %1580 = vperm.xlu1 %4787, %v1342_v15  }
 0x354   :  { %1794 = vrot.lane.b32.xlu1 %v6043_v49, %s4952_s0 }
 0x355   :  { %4788 = vset.pattern.permute.xlu1 %v10058_v43 }
 0x358   :  { %1800 = vrot.lane.b32.xlu1 %v6049_v16, %s4952_s0 }
 0x35c   :  { %1806 = vrot.lane.b32.xlu1 %v6054_v55, %s4952_s0 }
 0x360   :  { %1812 = vrot.lane.b32.xlu1 %v6060_v48, %s4952_s0 }
 0x364   :  { %1818 = vrot.lane.b32.xlu1 %v6066_v31, %s4952_s0 }
 0x368   :  { %1824 = vrot.lane.b32.xlu1 %v6070_v0, %s4952_s0 }
 0x36b   :  { %v6080_v38 = vpop.permute.xlu1 %1350 }
 0x36c   :  { %10063 = vst [vmem:[#allocation75_spill] sm:$0xff] %v6080_v38  ;;  %1830 = vrot.lane.b32.xlu1 %v6076_v37, %s4952_s0 }
 0x36f   :  { %v6086_v61 = vpop.permute.xlu1 %1355  ;;  %v6088_v63 = vpop.permute.xlu0 %1360 }
 0x370   :  { %10064 = vst [vmem:[#allocation76_spill] sm:$0xff] %v6086_v61  ;;  %10065 = vst [vmem:[#allocation77_spill] sm:$0xff] %v6088_v63  ;;  %1836 = vrot.lane.b32.xlu1 %v6084_v26, %s4952_s0 }
 0x373   :  { %v6092_v53 = vpop.permute.xlu1 %1365  ;;  %v6094_v8 = vpop.permute.xlu0 %1370 }
 0x374   :  { %10066 = vst [vmem:[#allocation78_spill] sm:$0xff] %v6092_v53  ;;  %10067 = vst [vmem:[#allocation79_spill] sm:$0xff] %v6094_v8 }
 0x377   :  { %v6096_v10 = vpop.permute.xlu1 %1375  ;;  %v6098_v33 = vpop.permute.xlu0 %1380 }
 0x378   :  { %10068 = vst [vmem:[#allocation80_spill] sm:$0xff] %v6096_v10  ;;  %10069 = vst [vmem:[#allocation81_spill] sm:$0xff] %v6098_v33 }
 0x37b   :  { %v6100_v24 = vpop.permute.xlu1 %1385  ;;  %v6102_v30 = vpop.permute.xlu0 %1390 }
 0x37c   :  { %10070 = vst [vmem:[#allocation82_spill] sm:$0xff] %v6100_v24  ;;  %10071 = vst [vmem:[#allocation83_spill] sm:$0xff] %v6102_v30 }
 0x37f   :  { %v6104_v40 = vpop.permute.xlu1 %1395  ;;  %v6106_v35 = vpop.permute.xlu0 %1400 }
 0x380   :  { %10072 = vst [vmem:[#allocation84_spill] sm:$0xff] %v6104_v40  ;;  %10073 = vst [vmem:[#allocation85_spill] sm:$0xff] %v6106_v35 }
 0x383   :  { %v6108_v50 = vpop.permute.xlu1 %1405  ;;  %v6110_v9 = vpop.permute.xlu0 %1410 }
 0x384   :  { %10074 = vst [vmem:[#allocation86_spill] sm:$0xff] %v6108_v50  ;;  %10075 = vst [vmem:[#allocation87_spill] sm:$0xff] %v6110_v9 }
 0x387   :  { %v6112_v54 = vpop.permute.xlu1 %1415  ;;  %v6114_v59 = vpop.permute.xlu0 %1420 }
 0x388   :  { %10076 = vst [vmem:[#allocation88_spill] sm:$0xff] %v6112_v54  ;;  %10077 = vst [vmem:[#allocation89_spill] sm:$0xff] %v6114_v59 }
 0x38b   :  { %v6116_v2 = vpop.permute.xlu1 %1439  ;;  %v6118_v12 = vpop.permute.xlu0 %1441 }
 0x38c   :  { %10078 = vst [vmem:[#allocation90_spill] sm:$0xff] %v6116_v2  ;;  %10079 = vst [vmem:[#allocation91_spill] sm:$0xff] %v6118_v12  ;;  %v2048_v12 = vmul.f32 2.0, %v6043_v49 }
 0x38f   :  { %v6120_v21 = vpop.permute.xlu1 %1443  ;;  %v6122_v4 = vpop.permute.xlu0 %1445 }
 0x390   :  { %10080 = vst [vmem:[#allocation92_spill] sm:$0xff] %v6120_v21  ;;  %10081 = vst [vmem:[#allocation93_spill] sm:$0xff] %v6122_v4 }
 0x393   :  { %v6124_v7 = vpop.permute.xlu1 %1447  ;;  %v6126_v5 = vpop.permute.xlu0 %1449 }
 0x394   :  { %10082 = vst [vmem:[#allocation94_spill] sm:$0xff] %v6124_v7  ;;  %10083 = vst [vmem:[#allocation95_spill] sm:$0xff] %v6126_v5 }
 0x397   :  { %v6128_v52 = vpop.permute.xlu1 %1451  ;;  %v6130_v6 = vpop.permute.xlu0 %1453 }
 0x398   :  { %10084 = vst [vmem:[#allocation96_spill] sm:$0xff] %v6128_v52  ;;  %10085 = vst [vmem:[#allocation97_spill] sm:$0xff] %v6130_v6 }
 0x39b   :  { %v6132_v56 = vpop.permute.xlu1 %1455  ;;  %v6134_v25 = vpop.permute.xlu0 %1457 }
 0x39c   :  { %10086 = vst [vmem:[#allocation98_spill] sm:$0xff] %v6132_v56  ;;  %10087 = vst [vmem:[#allocation99_spill] sm:$0xff] %v6134_v25 }
 0x39f   :  { %v6136_v3 = vpop.permute.xlu1 %1459  ;;  %v6138_v44 = vpop.permute.xlu0 %1461 }
 0x3a0   :  { %10088 = vst [vmem:[#allocation100_spill] sm:$0xff] %v6136_v3  ;;  %10089 = vst [vmem:[#allocation101_spill] sm:$0xff] %v6138_v44  ;;  %v2049_v44 = vmul.f32 2.0, %v6004_v34 }
 0x3a3   :  { %v6140_v36 = vpop.permute.xlu1 %1463  ;;  %v6142_v47 = vpop.permute.xlu0 %1465 }
 0x3a4   :  { %10090 = vst [vmem:[#allocation102_spill] sm:$0xff] %v6140_v36  ;;  %10091 = vst [vmem:[#allocation103_spill] sm:$0xff] %v6142_v47 }
 0x3a7   :  { %v6144_v15 = vpop.permute.xlu1 %1467  ;;  %v6146_v46 = vpop.permute.xlu0 %1469 }
 0x3a8   :  { %10092 = vst [vmem:[#allocation104_spill] sm:$0xff] %v6144_v15  ;;  %10093 = vst [vmem:[#allocation105_spill] sm:$0xff] %v6146_v46 }
 0x3ab   :  { %v6148_v22 = vpop.permute.xlu1 %1505  ;;  %v1792_v1 = vpop.permute.xlu0 %1791 }
 0x3ac   :  { %10094 = vst [vmem:[#allocation106_spill] sm:$0xff] %v6148_v22  ;;  %v1793_v39 = vsel %vm76_vm0, %v1792_v1, %v5999_v32 }
 0x3ad   :  { %1839 = vrot.lane.b32.xlu0 %v1793_v39, %s4952_s0 }
 0x3af   :  { %v6153_v60 = vpop.permute.xlu1 %1515  ;;  %v1798_v58 = vpop.permute.xlu0 %1797 }
 0x3b0   :  { %10095 = vst [vmem:[#allocation107_spill] sm:$0xff] %v6153_v60  ;;  %v1799_v20 = vsel %vm76_vm0, %v1798_v58, %v6004_v34 }
 0x3b1   :  { %1843 = vrot.lane.b32.xlu0 %v1799_v20, %s4952_s0 }
 0x3b3   :  { %v6158_v19 = vpop.permute.xlu1 %1520  ;;  %v1804_v59 = vpop.permute.xlu0 %1803 }
 0x3b4   :  { %10096 = vst [vmem:[#allocation108_spill] sm:$0xff] %v6158_v19  ;;  %v1805_v46 = vsel %vm76_vm0, %v1804_v59, %v6009_v45 }
 0x3b5   :  { %1847 = vrot.lane.b32.xlu0 %v1805_v46, %s4952_s0 }
 0x3b7   :  { %v6163_v54 = vpop.permute.xlu1 %1530  ;;  %v1810_v1 = vpop.permute.xlu0 %1809 }
 0x3b8   :  { %10097 = vst [vmem:[#allocation109_spill] sm:$0xff] %v6163_v54  ;;  %v1811_v39 = vsel %vm76_vm0, %v1810_v1, %v6014_v62 }
 0x3b9   :  { %1851 = vrot.lane.b32.xlu0 %v1811_v39, %s4952_s0 }
 0x3bb   :  { %v6168_v15 = vpop.permute.xlu1 %1540  ;;  %v1816_v58 = vpop.permute.xlu0 %1815 }
 0x3bc   :  { %10098 = vst [vmem:[#allocation110_spill] sm:$0xff] %v6168_v15  ;;  %v1817_v20 = vsel %vm76_vm0, %v1816_v58, %v6019_v13 }
 0x3bd   :  { %1855 = vrot.lane.b32.xlu0 %v1817_v20, %s4952_s0 }
 0x3bf   :  { %v6173_v9 = vpop.permute.xlu1 %1550  ;;  %v1822_v59 = vpop.permute.xlu0 %1821 }
 0x3c0   :  { %10099 = vst [vmem:[#allocation111_spill] sm:$0xff] %v6173_v9  ;;  %v1823_v46 = vsel %vm76_vm0, %v1822_v59, %v6024_v18 }
 0x3c1   :  { %1859 = vrot.lane.b32.xlu0 %v1823_v46, %s4952_s0 }
 0x3c3   :  { %v6178_v47 = vpop.permute.xlu1 %1560  ;;  %v1828_v1 = vpop.permute.xlu0 %1827 }
 0x3c4   :  { %10100 = vst [vmem:[#allocation112_spill] sm:$0xff] %v6178_v47  ;;  %v1829_v39 = vsel %vm76_vm0, %v1828_v1, %v6029_v29 }
 0x3c5   :  { %1863 = vrot.lane.b32.xlu0 %v1829_v39, %s4952_s0 }
 0x3c7   :  { %v6183_v50 = vpop.permute.xlu1 %1570  ;;  %v1834_v58 = vpop.permute.xlu0 %1833 }
 0x3c8   :  { %10101 = vst [vmem:[#allocation113_spill] sm:$0xff] %v6183_v50  ;;  %v1835_v20 = vsel %vm76_vm0, %v1834_v58, %v6036_v28 }
 0x3c9   :  { %1867 = vrot.lane.b32.xlu0 %v1835_v20, %s4952_s0 }
 0x3cb   :  { %v6188_v9 = vpop.permute.xlu1 %1580 }
 0x3cc   :  { %10102 = vst [vmem:[#allocation114_spill] sm:$0xff] %v6188_v9 }
 0x3cd   :  { %1903 = vrot.lane.b32.xlu0 %v5999_v32, %s4953_s1 }
 0x3cf   :  { %v1795_v59 = vpop.permute.xlu1 %1794 }
 0x3d0   :  { %v1796_v46 = vsel %vm76_vm0, %v1795_v59, %v6043_v49 }
 0x3d1   :  { %1841 = vrot.lane.b32.xlu1 %v1796_v46, %s4952_s0  ;;  %1907 = vrot.lane.b32.xlu0 %v6004_v34, %s4953_s1 }
 0x3d3   :  { %v1801_v1 = vpop.permute.xlu1 %1800 }
 0x3d4   :  { %v1802_v39 = vsel %vm76_vm0, %v1801_v1, %v6049_v16 }
 0x3d5   :  { %1845 = vrot.lane.b32.xlu1 %v1802_v39, %s4952_s0  ;;  %1911 = vrot.lane.b32.xlu0 %v6009_v45, %s4953_s1 }
 0x3d7   :  { %v1807_v58 = vpop.permute.xlu1 %1806 }
 0x3d8   :  { %v1808_v20 = vsel %vm76_vm0, %v1807_v58, %v6054_v55 }
 0x3d9   :  { %1849 = vrot.lane.b32.xlu1 %v1808_v20, %s4952_s0  ;;  %1915 = vrot.lane.b32.xlu0 %v6014_v62, %s4953_s1 }
 0x3db   :  { %v1813_v59 = vpop.permute.xlu1 %1812 }
 0x3dc   :  { %v1814_v46 = vsel %vm76_vm0, %v1813_v59, %v6060_v48 }
 0x3dd   :  { %1853 = vrot.lane.b32.xlu1 %v1814_v46, %s4952_s0  ;;  %1919 = vrot.lane.b32.xlu0 %v6019_v13, %s4953_s1 }
 0x3df   :  { %v1819_v1 = vpop.permute.xlu1 %1818 }
 0x3e0   :  { %v1820_v39 = vsel %vm76_vm0, %v1819_v1, %v6066_v31 }
 0x3e1   :  { %1857 = vrot.lane.b32.xlu1 %v1820_v39, %s4952_s0  ;;  %1923 = vrot.lane.b32.xlu0 %v6024_v18, %s4953_s1 }
 0x3e3   :  { %v1825_v58 = vpop.permute.xlu1 %1824 }
 0x3e4   :  { %v1826_v20 = vsel %vm76_vm0, %v1825_v58, %v6070_v0 }
 0x3e5   :  { %1861 = vrot.lane.b32.xlu1 %v1826_v20, %s4952_s0  ;;  %1927 = vrot.lane.b32.xlu0 %v6029_v29, %s4953_s1 }
 0x3e7   :  { %v1831_v59 = vpop.permute.xlu1 %1830 }
 0x3e8   :  { %v1832_v46 = vsel %vm76_vm0, %v1831_v59, %v6076_v37 }
 0x3e9   :  { %1865 = vrot.lane.b32.xlu1 %v1832_v46, %s4952_s0  ;;  %1931 = vrot.lane.b32.xlu0 %v6036_v28, %s4953_s1 }
 0x3eb   :  { %v1837_v1 = vpop.permute.xlu1 %1836 }
 0x3ec   :  { %v1838_v39 = vsel %vm76_vm0, %v1837_v1, %v6084_v26 }
 0x3ed   :  { %1869 = vrot.lane.b32.xlu1 %v1838_v39, %s4952_s0 }
 0x3f1   :  { %1905 = vrot.lane.b32.xlu1 %v6043_v49, %s4953_s1 }
 0x3f5   :  { %1909 = vrot.lane.b32.xlu1 %v6049_v16, %s4953_s1 }
 0x3f9   :  { %1913 = vrot.lane.b32.xlu1 %v6054_v55, %s4953_s1 }
 0x3fd   :  { %1917 = vrot.lane.b32.xlu1 %v6060_v48, %s4953_s1 }
 0x401   :  { %1921 = vrot.lane.b32.xlu1 %v6066_v31, %s4953_s1 }
 0x405   :  { %1925 = vrot.lane.b32.xlu1 %v6070_v0, %s4953_s1 }
 0x409   :  { %1929 = vrot.lane.b32.xlu1 %v6076_v37, %s4953_s1 }
 0x40d   :  { %1933 = vrot.lane.b32.xlu1 %v6084_v26, %s4953_s1 }
 0x41f   :  { %v1840_v58 = vpop.permute.xlu0 %1839 }
 0x420   :  { %v6248_v20 = vsel %vm76_vm0, %v1840_v58, %v5999_v32 }
 0x421   :  { %1983 = vrot.lane.b32.xlu0 %v6248_v20, %s4958_s23 }
 0x423   :  { %v1844_v59 = vpop.permute.xlu0 %1843 }
 0x424   :  { %v6254_v46 = vsel %vm76_vm0, %v1844_v59, %v6004_v34 }
 0x425   :  { %1987 = vrot.lane.b32.xlu0 %v6254_v46, %s4958_s23 }
 0x427   :  { %v1848_v1 = vpop.permute.xlu0 %1847 }
 0x428   :  { %v6260_v39 = vsel %vm76_vm0, %v1848_v1, %v6009_v45 }
 0x429   :  { %1991 = vrot.lane.b32.xlu0 %v6260_v39, %s4958_s23 }
 0x42b   :  { %v1852_v58 = vpop.permute.xlu0 %1851 }
 0x42c   :  { %v6266_v9 = vsel %vm76_vm0, %v1852_v58, %v6014_v62 }
 0x42d   :  { %1995 = vrot.lane.b32.xlu0 %v6266_v9, %s4958_s23 }
 0x42f   :  { %v1856_v59 = vpop.permute.xlu0 %1855 }
 0x430   :  { %v6272_v50 = vsel %vm76_vm0, %v1856_v59, %v6019_v13 }
 0x431   :  { %1999 = vrot.lane.b32.xlu0 %v6272_v50, %s4958_s23 }
 0x433   :  { %v1860_v1 = vpop.permute.xlu0 %1859 }
 0x434   :  { %v6278_v47 = vsel %vm76_vm0, %v1860_v1, %v6024_v18  ;;  %v2047_v1 = vmul.f32 2.0, %v5999_v32 }
 0x435   :  { %2003 = vrot.lane.b32.xlu0 %v6278_v47, %s4958_s23 }
 0x437   :  { %v1864_v58 = vpop.permute.xlu0 %1863 }
 0x438   :  { %v6284_v36 = vsel %vm76_vm0, %v1864_v58, %v6029_v29 }
 0x439   :  { %10103 = vst [vmem:[#allocation115_spill] sm:$0xff] %v6284_v36  ;;  %2007 = vrot.lane.b32.xlu0 %v6284_v36, %s4958_s23 }
 0x43b   :  { %v1868_v59 = vpop.permute.xlu0 %1867 }
 0x43c   :  { %v6290_v35 = vsel %vm76_vm0, %v1868_v59, %v6036_v28  ;;  %v2051_v59 = vmul.f32 2.0, %v6009_v45 }
 0x43d   :  { %10104 = vst [vmem:[#allocation116_spill] sm:$0xff] %v6290_v35  ;;  %2011 = vrot.lane.b32.xlu0 %v6290_v35, %s4958_s23 }
 0x43f   :  { %v6360_v54 = vpop.permute.xlu0 %1903 }
 0x441   :  { %2079 = vrot.lane.b32.xlu0 %v2047_v1, %s4955_s21 }
 0x443   :  { %v1842_v40 = vpop.permute.xlu1 %1841  ;;  %v6368_v8 = vpop.permute.xlu0 %1907 }
 0x444   :  { %v6299_v58 = vsel %vm76_vm0, %v1842_v40, %v6043_v49  ;;  %v2053_v40 = vmul.f32 2.0, %v6014_v62 }
 0x445   :  { %1985 = vrot.lane.b32.xlu1 %v6299_v58, %s4958_s23  ;;  %2083 = vrot.lane.b32.xlu0 %v2049_v44, %s4955_s21 }
 0x447   :  { %v1846_v3 = vpop.permute.xlu1 %1845  ;;  %v6373_v5 = vpop.permute.xlu0 %1911 }
 0x448   :  { %v6307_v30 = vsel %vm76_vm0, %v1846_v3, %v6049_v16  ;;  %v2055_v3 = vmul.f32 2.0, %v6019_v13 }
 0x449   :  { %1989 = vrot.lane.b32.xlu1 %v6307_v30, %s4958_s23  ;;  %2087 = vrot.lane.b32.xlu0 %v2051_v59, %s4955_s21 }
 0x44b   :  { %v1850_v25 = vpop.permute.xlu1 %1849  ;;  %v6381_v22 = vpop.permute.xlu0 %1915 }
 0x44c   :  { %v6315_v24 = vsel %vm76_vm0, %v1850_v25, %v6054_v55  ;;  %v2057_v25 = vmul.f32 2.0, %v6024_v18 }
 0x44d   :  { %1993 = vrot.lane.b32.xlu1 %v6315_v24, %s4958_s23  ;;  %2091 = vrot.lane.b32.xlu0 %v2053_v40, %s4955_s21 }
 0x44f   :  { %v1854_v56 = vpop.permute.xlu1 %1853  ;;  %v6386_v41 = vpop.permute.xlu0 %1919 }
 0x450   :  { %v6323_v10 = vsel %vm76_vm0, %v1854_v56, %v6060_v48  ;;  %v2059_v56 = vmul.f32 2.0, %v6029_v29 }
 0x451   :  { %1997 = vrot.lane.b32.xlu1 %v6323_v10, %s4958_s23  ;;  %2095 = vrot.lane.b32.xlu0 %v2055_v3, %s4955_s21 }
 0x453   :  { %v1858_v52 = vpop.permute.xlu1 %1857  ;;  %v6392_v2 = vpop.permute.xlu0 %1923 }
 0x454   :  { %v6331_v15 = vsel %vm76_vm0, %v1858_v52, %v6066_v31  ;;  %v2061_v52 = vmul.f32 2.0, %v6036_v28 }
 0x455   :  { %2001 = vrot.lane.b32.xlu1 %v6331_v15, %s4958_s23  ;;  %2099 = vrot.lane.b32.xlu0 %v2057_v25, %s4955_s21 }
 0x457   :  { %v1862_v53 = vpop.permute.xlu1 %1861 }
 0x458   :  { %v6339_v7 = vsel %vm76_vm0, %v1862_v53, %v6070_v0 }
 0x459   :  { %2005 = vrot.lane.b32.xlu1 %v6339_v7, %s4958_s23  ;;  %2103 = vrot.lane.b32.xlu0 %v2059_v56, %s4955_s21 }
 0x45b   :  { %v1866_v33 = vpop.permute.xlu1 %1865 }
 0x45c   :  { %v6347_v6 = vsel %vm76_vm0, %v1866_v33, %v6076_v37  ;;  %v2050_v33 = vmul.f32 2.0, %v6049_v16 }
 0x45d   :  { %10105 = vst [vmem:[#allocation117_spill] sm:$0xff] %v6347_v6  ;;  %2009 = vrot.lane.b32.xlu1 %v6347_v6, %s4958_s23  ;;  %2107 = vrot.lane.b32.xlu0 %v2061_v52, %s4955_s21 }
 0x45f   :  { %v1870_v38 = vpop.permute.xlu1 %1869 }
 0x460   :  { %v6354_v53 = vsel %vm76_vm0, %v1870_v38, %v6084_v26  ;;  %v2052_v38 = vmul.f32 2.0, %v6054_v55 }
 0x461   :  { %10106 = vst [vmem:[#allocation118_spill] sm:$0xff] %v6354_v53  ;;  %2013 = vrot.lane.b32.xlu1 %v6354_v53, %s4958_s23  ;;  %2143 = vrot.lane.b32.xlu0 %v2047_v1, %s4956_s22  ;;  %v2054_v1 = vmul.f32 2.0, %v6060_v48 }
 0x463   :  { %v6397_v19 = vpop.permute.xlu1 %1905 }
 0x465   :  { %2081 = vrot.lane.b32.xlu1 %v2048_v12, %s4955_s21  ;;  %2147 = vrot.lane.b32.xlu0 %v2049_v44, %s4956_s22  ;;  %v2056_v44 = vmul.f32 2.0, %v6066_v31 }
 0x467   :  { %v6403_v60 = vpop.permute.xlu1 %1909 }
 0x469   :  { %2085 = vrot.lane.b32.xlu1 %v2050_v33, %s4955_s21  ;;  %2151 = vrot.lane.b32.xlu0 %v2051_v59, %s4956_s22  ;;  %v2058_v59 = vmul.f32 2.0, %v6070_v0 }
 0x46b   :  { %v6408_v63 = vpop.permute.xlu1 %1913 }
 0x46d   :  { %2089 = vrot.lane.b32.xlu1 %v2052_v38, %s4955_s21  ;;  %2155 = vrot.lane.b32.xlu0 %v2053_v40, %s4956_s22  ;;  %v2060_v40 = vmul.f32 2.0, %v6076_v37 }
 0x46f   :  { %v6414_v4 = vpop.permute.xlu1 %1917 }
 0x471   :  { %2093 = vrot.lane.b32.xlu1 %v2054_v1, %s4955_s21  ;;  %2159 = vrot.lane.b32.xlu0 %v2055_v3, %s4956_s22  ;;  %v2062_v3 = vmul.f32 2.0, %v6084_v26 }
 0x473   :  { %v6421_v61 = vpop.permute.xlu1 %1921 }
 0x475   :  { %2097 = vrot.lane.b32.xlu1 %v2056_v44, %s4955_s21  ;;  %2163 = vrot.lane.b32.xlu0 %v2057_v25, %s4956_s22  ;;  %v6395_v25 = vpop.permute.xlu0 %1927 }
 0x476   :  { %10107 = vst [vmem:[#allocation119_spill] sm:$0xff] %v6395_v25 }
 0x477   :  { %v6426_v21 = vpop.permute.xlu1 %1925 }
 0x479   :  { %2101 = vrot.lane.b32.xlu1 %v2058_v59, %s4955_s21  ;;  %2167 = vrot.lane.b32.xlu0 %v2059_v56, %s4956_s22  ;;  %v6401_v56 = vpop.permute.xlu0 %1931 }
 0x47a   :  { %10108 = vst [vmem:[#allocation120_spill] sm:$0xff] %v6401_v56 }
 0x47d   :  { %2105 = vrot.lane.b32.xlu1 %v2060_v40, %s4955_s21  ;;  %2171 = vrot.lane.b32.xlu0 %v2061_v52, %s4956_s22 }
 0x481   :  { %2109 = vrot.lane.b32.xlu1 %v2062_v3, %s4955_s21 }
 0x485   :  { %2145 = vrot.lane.b32.xlu1 %v2048_v12, %s4956_s22 }
 0x489   :  { %2149 = vrot.lane.b32.xlu1 %v2050_v33, %s4956_s22 }
 0x48d   :  { %2153 = vrot.lane.b32.xlu1 %v2052_v38, %s4956_s22 }
 0x491   :  { %2157 = vrot.lane.b32.xlu1 %v2054_v1, %s4956_s22 }
 0x493   :  { %v6406_v52 = vpop.permute.xlu0 %1983 }
 0x495   :  { %2161 = vrot.lane.b32.xlu1 %v2056_v44, %s4956_s22 }
 0x497   :  { %v6411_v12 = vpop.permute.xlu0 %1987 }
 0x499   :  { %2165 = vrot.lane.b32.xlu1 %v2058_v59, %s4956_s22  ;;  %v6432_v59 = vpop.permute.xlu1 %1929 }
 0x49a   :  { %10111 = vst [vmem:[#allocation123_spill] sm:$0xff] %v6432_v59 }
 0x49b   :  { %v6416_v33 = vpop.permute.xlu0 %1991 }
 0x49d   :  { %2169 = vrot.lane.b32.xlu1 %v2060_v40, %s4956_s22  ;;  %v6436_v42 = vpop.permute.xlu1 %1933 }
 0x49e   :  { %10113 = vst [vmem:[#allocation125_spill] sm:$0xff] %v6436_v42 }
 0x49f   :  { %v6419_v38 = vpop.permute.xlu0 %1995 }
 0x4a1   :  { %2173 = vrot.lane.b32.xlu1 %v2062_v3, %s4956_s22 }
 0x4a3   :  { %v6424_v1 = vpop.permute.xlu0 %1999 }
 0x4a7   :  { %v6428_v44 = vpop.permute.xlu0 %2003 }
 0x4a8   :  { %10109 = vst [vmem:[#allocation121_spill] sm:$0xff] %v6428_v44 }
 0x4ab   :  { %v6430_v23 = vpop.permute.xlu0 %2007 }
 0x4ac   :  { %10110 = vst [vmem:[#allocation122_spill] sm:$0xff] %v6430_v23 }
 0x4af   :  { %v6434_v51 = vpop.permute.xlu0 %2011 }
 0x4b0   :  { %10112 = vst [vmem:[#allocation124_spill] sm:$0xff] %v6434_v51 }
 0x4b3   :  { %v2080_v40 = vpop.permute.xlu0 %2079 }
 0x4b4   :  { %v2127_v14 = vadd.f32 %v2080_v40, %v5999_v32 }
 0x4b6   :  { %2209 = vperm.xlu0 %4783, %v2127_v14  }
 0x4b7   :  { %v1986_v17 = vpop.permute.xlu1 %1985  ;;  %v2084_v56 = vpop.permute.xlu0 %2083 }
 0x4b8   :  { %v2129_v40 = vadd.f32 %v2084_v56, %v6004_v34 }
 0x4bb   :  { %v1990_v3 = vpop.permute.xlu1 %1989  ;;  %v2088_v51 = vpop.permute.xlu0 %2087 }
 0x4bc   :  { %v2131_v36 = vadd.f32 %v2088_v51, %v6009_v45 }
 0x4bf   :  { %v6439_v11 = vpop.permute.xlu1 %1993  ;;  %v2092_v59 = vpop.permute.xlu0 %2091 }
 0x4c3   :  { %v6441_v27 = vpop.permute.xlu1 %1997  ;;  %v2096_v25 = vpop.permute.xlu0 %2095 }
 0x4c7   :  { %v6443_v43 = vpop.permute.xlu1 %2001 }
 0x4cb   :  { %v6445_v53 = vpop.permute.xlu1 %2005 }
 0x4cc   :  { %10114 = vst [vmem:[#allocation126_spill] sm:$0xff] %v6445_v53 }
 0x4cf   :  { %v6447_v35 = vpop.permute.xlu1 %2009 }
 0x4d0   :  { %10115 = vst [vmem:[#allocation127_spill] sm:$0xff] %v6447_v35 }
 0x4d3   :  { %v6449_v23 = vpop.permute.xlu1 %2013 }
 0x4d4   :  { %10116 = vst [vmem:[#allocation128_spill] sm:$0xff] %v6449_v23  ;;  %v2133_v23 = vadd.f32 %v2092_v59, %v6014_v62 }
 0x4d7   :  { %v2082_v42 = vpop.permute.xlu1 %2081 }
 0x4d8   :  { %v2128_v14 = vadd.f32 %v2082_v42, %v6043_v49  ;;  %v2100_v42 = vpop.permute.xlu0 %2099 }
 0x4d9   :  { %v2137_v51 = vadd.f32 %v2100_v42, %v6024_v18  ;;  %v1951_v42 = vadd.f32 %v6360_v54, %v6248_v20  ;;  %v1955_v20 = vadd.f32 %v6373_v5, %v6260_v39  ;;  %v1959_v5 = vadd.f32 %v6386_v41, %v6272_v50  ;;  %v10118_v41 = vld [vmem:[#allocation121_spill] sm:$0xff]  ;;  %v10119_v50 = vld [vmem:[#allocation126_spill] sm:$0xff]  ;;  %v10120_v39 = vld [vmem:[#allocation115_spill] sm:$0xff] }
 0x4da   :  { %2214 = vperm.xlu1 %4788, %v2128_v14  }
 0x4db   :  { %v2086_v32 = vpop.permute.xlu1 %2085 }
 0x4dc   :  { %v2130_v6 = vadd.f32 %v2086_v32, %v6049_v16  ;;  %v2135_v32 = vadd.f32 %v2096_v25, %v6019_v13 }
 0x4de   :  { %2224 = vperm.xlu0 %4783, %v2130_v6   ;;  %2219 = vperm.xlu1 %4788, %v2129_v40   ;;  %v2104_v40 = vpop.permute.xlu0 %2103 }
 0x4df   :  { %v2090_v53 = vpop.permute.xlu1 %2089 }
 0x4e0   :  { %v2132_v35 = vadd.f32 %v2090_v53, %v6054_v55  ;;  %v2139_v53 = vadd.f32 %v2104_v40, %v6029_v29 }
 0x4e2   :  { %2234 = vperm.xlu0 %4783, %v2132_v35   ;;  %2229 = vperm.xlu1 %4788, %v2131_v36   ;;  %v2108_v59 = vpop.permute.xlu0 %2107 }
 0x4e3   :  { %v2094_v44 = vpop.permute.xlu1 %2093  ;;  %v2141_v25 = vadd.f32 %v2108_v59, %v6036_v28 }
 0x4e4   :  { %v2134_v14 = vadd.f32 %v2094_v44, %v6060_v48 }
 0x4e6   :  { %2244 = vperm.xlu0 %4783, %v2134_v14   ;;  %2239 = vperm.xlu1 %4788, %v2133_v23  }
 0x4e7   :  { %v2098_v56 = vpop.permute.xlu1 %2097 }
 0x4e8   :  { %v2136_v6 = vadd.f32 %v2098_v56, %v6066_v31  ;;  %v1952_v56 = vadd.f32 %v6397_v19, %v6299_v58  ;;  %v10121_v58 = vld [vmem:[#allocation119_spill] sm:$0xff] }
 0x4ea   :  { %2254 = vperm.xlu0 %4783, %v2136_v6   ;;  %2249 = vperm.xlu1 %4788, %v2135_v32   ;;  %v2031_v6 = vadd.f32 %v6406_v52, %v1951_v42  ;;  %v2032_v40 = vadd.f32 %v1986_v17, %v1952_v56  ;;  %v1956_v17 = vadd.f32 %v6408_v63, %v6315_v24 }
 0x4eb   :  { %v2102_v35 = vpop.permute.xlu1 %2101  ;;  %v1963_v52 = vadd.f32 %v10121_v58, %v10120_v39  ;;  %v6597_v39 = vld [vmem:[#allocation5 + $0x70] sm:$0xff] }
 0x4ec   :  { %v2138_v36 = vadd.f32 %v2102_v35, %v6070_v0  ;;  %v1954_v35 = vadd.f32 %v6403_v60, %v6307_v30  ;;  %v2036_v30 = vadd.f32 %v6439_v11, %v1956_v17  ;;  %v1957_v60 = vadd.f32 %v6381_v22, %v6266_v9 }
 0x4ed   :  { %v1960_v11 = vadd.f32 %v6421_v61, %v6331_v15  ;;  %v1961_v22 = vadd.f32 %v6392_v2, %v6278_v47  ;;  %v10125_v47 = vld [vmem:[#allocation127_spill] sm:$0xff] }
 0x4ee   :  { %2264 = vperm.xlu0 %4783, %v2138_v36   ;;  %2259 = vperm.xlu1 %4788, %v2137_v51   ;;  %v1953_v51 = vadd.f32 %v6368_v8, %v6254_v46  ;;  %v2034_v19 = vadd.f32 %v1990_v3, %v1954_v35  ;;  %v2035_v8 = vadd.f32 %v6416_v33, %v1955_v20  ;;  %v10127_v3 = vld [vmem:[#allocation120_spill] sm:$0xff]  ;;  %v6541_v20 = vld [vmem:[#allocation5 + $0x10] sm:$0xff] }
 0x4ef   :  { %v2106_v44 = vpop.permute.xlu1 %2105  ;;  %v1958_v46 = vadd.f32 %v6414_v4, %v6323_v10  ;;  %v2037_v63 = vadd.f32 %v6419_v38, %v1957_v60  ;;  %v2039_v10 = vadd.f32 %v6424_v1, %v1959_v5  ;;  %v2040_v9 = vadd.f32 %v6443_v43, %v1960_v11  ;;  %v10122_v43 = vld [vmem:[#allocation117_spill] sm:$0xff]  ;;  %v10126_v1 = vld [vmem:[#allocation116_spill] sm:$0xff]  ;;  %10135 = vst [vmem:[#allocation115_spill] sm:$0xff] %v6541_v20  ;;  %v6550_v60 = vld [vmem:[#allocation5 + $0x20] sm:$0xff] }
 0x4f0   :  { %v2140_v23 = vadd.f32 %v2106_v44, %v6076_v37  ;;  %v2033_v54 = vadd.f32 %v6411_v12, %v1953_v51  ;;  %v2041_v61 = vadd.f32 %v10118_v41, %v1961_v22  ;;  %v10123_v12 = vld [vmem:[#allocation123_spill] sm:$0xff]  ;;  %v1965_v36 = vadd.f32 %v10127_v3, %v10126_v1  ;;  %v10129_v44 = vld [vmem:[#allocation125_spill] sm:$0xff]  ;;  %10136 = vst [vmem:[#allocation119_spill] sm:$0xff] %v6550_v60  ;;  %v6637_v1 = vld [vmem:[#allocation5 + $0x38] sm:$0xff] }
 0x4f1   :  { %v2038_v24 = vadd.f32 %v6441_v27, %v1958_v46  ;;  %v1962_v27 = vadd.f32 %v6426_v21, %v6339_v7  ;;  %v1964_v33 = vadd.f32 %v10123_v12, %v10122_v43  ;;  %v10124_v21 = vld [vmem:[#allocation122_spill] sm:$0xff]  ;;  %v6532_v51 = vld [vmem:[#allocation5] sm:$0xff]  ;;  %v6545_v17 = vmul.f32 %v6541_v20, %v6541_v20  ;;  %v6577_v22 = vld [vmem:[#allocation5 + $0x50] sm:$0xff]  ;;  %10155 = vst [vmem:[#allocation136_spill] sm:$0xff] %v6637_v1 }
 0x4f2   :  { %2274 = vperm.xlu0 %4783, %v2140_v23   ;;  %2269 = vperm.xlu1 %4788, %v2139_v53   ;;  %v2043_v7 = vadd.f32 %v10124_v21, %v1963_v52  ;;  %v10128_v53 = vld [vmem:[#allocation118_spill] sm:$0xff]  ;;  %v2144_v23 = vpop.permute.xlu0 %2143  ;;  %10133 = vst [vmem:[#allocation121_spill] sm:$0xff] %v6532_v51  ;;  %v6536_v35 = vmul.f32 %v6532_v51, %v6532_v51  ;;  %v6568_v11 = vld [vmem:[#allocation5 + $0x40] sm:$0xff]  ;;  %10141 = vst [vmem:[#allocation116_spill] sm:$0xff] %v6577_v22  ;;  %v10152_v21 = vmov 0  }
 0x4f3   :  { %v2110_v14 = vpop.permute.xlu1 %2109  ;;  %v2042_v15 = vadd.f32 %v10119_v50, %v1962_v27  ;;  %v2044_v38 = vadd.f32 %v10125_v47, %v1964_v33  ;;  %v1966_v59 = vadd.f32 %v10129_v44, %v10128_v53  ;;  %10139 = vst [vmem:[#allocation122_spill] sm:$0xff] %v6568_v11  ;;  %v6641_v3 = vmul.f32 %v6637_v1, %v6637_v1  ;;  %v6647_v53 = vld [vmem:[#allocation5 + $0x48] sm:$0xff] }
 0x4f4   :  { %v2142_v32 = vadd.f32 %v2110_v14, %v6084_v26  ;;  %10134 = vst [vmem:[#allocation126_spill] sm:$0xff] %v6536_v35  ;;  %10157 = vst [vmem:[#allocation138_spill] sm:$0xff] %v6647_v53  ;;  %v6651_v44 = vmul.f32 %v6647_v53, %v6647_v53 }
 0x4f6   :  { %2284 = vperm.xlu0 %4783, %v2142_v32   ;;  %2279 = vperm.xlu1 %4788, %v2141_v25   ;;  %v10130_v25 = vld [vmem:[#allocation124_spill] sm:$0xff] }
 0x4f7   :  { %v6503_v4 = vpop.permute.xlu1 %2145  ;;  %v2045_v14 = vadd.f32 %v10130_v25, %v1965_v36  ;;  %v10131_v32 = vld [vmem:[#allocation128_spill] sm:$0xff] }
 0x4f8   :  { %10117 = vst [vmem:[#allocation129_spill] sm:$0xff] %v6503_v4  ;;  %v2046_v42 = vadd.f32 %v10131_v32, %v1966_v59  ;;  %10146 = vst [vmem:[#allocation128_spill] sm:$0xff] %v6597_v39  ;;  %v6655_v59 = vld [vmem:[#allocation5 + $0x58] sm:$0xff] }
 0x4f9   :  { %10158 = vst [vmem:[#allocation139_spill] sm:$0xff] %v6655_v59 }
 0x4fa   :  { %2305 = vrot.lane.b32.xlu0 %v2032_v40, %s4959_s24  ;;  %2303 = vrot.lane.b32.xlu1 %v2031_v6, %s4959_s24  ;;  %v10132_v6 = vld [vmem:[#allocation12_spill] sm:$0xff] }
 0x4fb   :  { %4789 = vset.pattern.permute.xlu1 %v10032_v57  ;;  %v2150_v2 = vpop.permute.xlu1 %2149  ;;  %v2191_v40 = vadd.f32 %v2144_v23, %v10132_v6  ;;  %v6659_v23 = vmul.f32 %v6655_v59, %v6655_v59  ;;  %v6677_v6 = vld [vmem:[#allocation5 + $0x78] sm:$0xff] }
 0x4fc   :  { %10163 = vst [vmem:[#allocation144_spill] sm:$0xff] %v6677_v6 }
 0x4fe   :  { %2309 = vrot.lane.b32.xlu0 %v2034_v19, %s4959_s24  ;;  %2307 = vrot.lane.b32.xlu1 %v2033_v54, %s4959_s24  ;;  %v2148_v54 = vpop.permute.xlu0 %2147 }
 0x4ff   :  { %v2154_v56 = vpop.permute.xlu1 %2153  ;;  %v2193_v19 = vadd.f32 %v2148_v54, %v6004_v34  ;;  %v6554_v34 = vmul.f32 %v6550_v60, %v6550_v60 }
 0x502   :  { %2313 = vrot.lane.b32.xlu0 %v2036_v30, %s4959_s24  ;;  %2311 = vrot.lane.b32.xlu1 %v2035_v8, %s4959_s24  ;;  %v2194_v30 = vadd.f32 %v2150_v2, %v6049_v16  ;;  %v6592_v50 = vpop.permute.xlu0 %2151  ;;  %v6618_v2 = vld [vmem:[#allocation5 + $0x18] sm:$0xff] }
 0x503   :  { %v2158_v8 = vpop.permute.xlu1 %2157  ;;  %10145 = vst [vmem:[#allocation124_spill] sm:$0xff] %v6592_v50  ;;  %10151 = vst [vmem:[#allocation133_spill] sm:$0xff] %v6618_v2 }
 0x504   :  { %v2198_v5 = vadd.f32 %v2158_v8, %v6060_v48  ;;  %v6581_v48 = vmul.f32 %v6577_v22, %v6577_v22 }
 0x506   :  { %2317 = vrot.lane.b32.xlu0 %v2038_v24, %s4959_s24  ;;  %2315 = vrot.lane.b32.xlu1 %v2037_v63, %s4959_s24  ;;  %v2196_v63 = vadd.f32 %v2154_v56, %v6054_v55  ;;  %v6559_v24 = vld [vmem:[#allocation5 + $0x30] sm:$0xff]  ;;  %v6572_v55 = vmul.f32 %v6568_v11, %v6568_v11  ;;  %10142 = vst [vmem:[#allocation120_spill] sm:$0xff] %v6581_v48  ;;  %v6606_v43 = vpop.permute.xlu0 %2155 }
 0x507   :  { %v2162_v46 = vpop.permute.xlu1 %2161  ;;  %10137 = vst [vmem:[#allocation117_spill] sm:$0xff] %v6559_v24  ;;  %v6563_v16 = vmul.f32 %v6559_v24, %v6559_v24  ;;  %10148 = vst [vmem:[#allocation130_spill] sm:$0xff] %v6606_v43 }
 0x508   :  { %10140 = vst [vmem:[#allocation127_spill] sm:$0xff] %v6572_v55 }
 0x509   :  { %10138 = vst [vmem:[#allocation123_spill] sm:$0xff] %v6563_v16 }
 0x50a   :  { %2321 = vrot.lane.b32.xlu0 %v2040_v9, %s4959_s24  ;;  %2319 = vrot.lane.b32.xlu1 %v2039_v10, %s4959_s24  ;;  %v2200_v9 = vadd.f32 %v2162_v46, %v6066_v31  ;;  %v6614_v33 = vpop.permute.xlu0 %2159 }
 0x50b   :  { %v2166_v10 = vpop.permute.xlu1 %2165  ;;  %10150 = vst [vmem:[#allocation132_spill] sm:$0xff] %v6614_v33 }
 0x50c   :  { %v2202_v41 = vadd.f32 %v2166_v10, %v6070_v0  ;;  %v6601_v0 = vmul.f32 %v6597_v39, %v6597_v39 }
 0x50e   :  { %2325 = vrot.lane.b32.xlu0 %v2042_v15, %s4959_s24  ;;  %2323 = vrot.lane.b32.xlu1 %v2041_v61, %s4959_s24  ;;  %v6586_v61 = vld [vmem:[#allocation5 + $0x60] sm:$0xff]  ;;  %10147 = vst [vmem:[#allocation12_spill] sm:$0xff] %v6601_v0 }
 0x50f   :  { %v2170_v27 = vpop.permute.xlu1 %2169  ;;  %10143 = vst [vmem:[#allocation118_spill] sm:$0xff] %v6586_v61  ;;  %v6590_v31 = vmul.f32 %v6586_v61, %v6586_v61 }
 0x510   :  { %v2204_v15 = vadd.f32 %v2170_v27, %v6076_v37  ;;  %v6608_v37 = vld [vmem:[#allocation5 + $0x8] sm:$0xff] }
 0x511   :  { %10144 = vst [vmem:[#allocation125_spill] sm:$0xff] %v6590_v31  ;;  %10149 = vst [vmem:[#allocation131_spill] sm:$0xff] %v6608_v37  ;;  %v6612_v12 = vmul.f32 %v6608_v37, %v6608_v37 }
 0x512   :  { %2329 = vrot.lane.b32.xlu0 %v2044_v38, %s4959_s24  ;;  %2327 = vrot.lane.b32.xlu1 %v2043_v7, %s4959_s24  ;;  %v6627_v7 = vld [vmem:[#allocation5 + $0x28] sm:$0xff]  ;;  %v6633_v38 = vpop.permute.xlu0 %2163 }
 0x513   :  { %v2174_v58 = vpop.permute.xlu1 %2173  ;;  %10153 = vst [vmem:[#allocation134_spill] sm:$0xff] %v6627_v7  ;;  %v6631_v47 = vmul.f32 %v6627_v7, %v6627_v7  ;;  %10154 = vst [vmem:[#allocation135_spill] sm:$0xff] %v6633_v38  ;;  %v2944_v50 = vmul.f32 2.0, %v6612_v12 }
 0x514   :  { %v2206_v52 = vadd.f32 %v2174_v58, %v6084_v26  ;;  %v6622_v26 = vmul.f32 %v6618_v2, %v6618_v2 }
 0x516   :  { %2333 = vrot.lane.b32.xlu0 %v2046_v42, %s4959_s24  ;;  %2331 = vrot.lane.b32.xlu1 %v2045_v14, %s4959_s24  ;;  %v6643_v36 = vpop.permute.xlu0 %2167  ;;  %v6665_v14 = vld [vmem:[#allocation5 + $0x68] sm:$0xff] }
 0x517   :  { %10156 = vst [vmem:[#allocation137_spill] sm:$0xff] %v6643_v36  ;;  %10160 = vst [vmem:[#allocation141_spill] sm:$0xff] %v6665_v14  ;;  %v6669_v32 = vmul.f32 %v6665_v14, %v6665_v14 }
 0x51a   :  { %2369 = vperm.xlu1 %4789, %v2191_v40   ;;  %2687 = vrot.lane.b32.xlu0 %v6536_v35, %s4952_s0  ;;  %v6661_v25 = vpop.permute.xlu0 %2171  ;;  %v6681_v40 = vmul.f32 %v6677_v6, %v6677_v6 }
 0x51b   :  { %10159 = vst [vmem:[#allocation140_spill] sm:$0xff] %v6661_v25 }
 0x51e   :  { %2379 = vperm.xlu1 %4789, %v2193_v19   ;;  %2693 = vrot.lane.b32.xlu0 %v6545_v17, %s4952_s0 }
 0x522   :  { %2384 = vperm.xlu1 %4789, %v2194_v30   ;;  %2699 = vrot.lane.b32.xlu0 %v6554_v34, %s4952_s0 }
 0x526   :  { %2394 = vperm.xlu1 %4789, %v2196_v63   ;;  %2705 = vrot.lane.b32.xlu0 %v6563_v16, %s4952_s0 }
 0x52a   :  { %2404 = vperm.xlu1 %4789, %v2198_v5   ;;  %2711 = vrot.lane.b32.xlu0 %v6572_v55, %s4952_s0 }
 0x52e   :  { %2414 = vperm.xlu1 %4789, %v2200_v9   ;;  %2717 = vrot.lane.b32.xlu0 %v6581_v48, %s4952_s0 }
 0x531   :  { %v6671_v42 = vpop.permute.xlu0 %2209 }
 0x532   :  { %2424 = vperm.xlu1 %4789, %v2202_v41   ;;  %2723 = vrot.lane.b32.xlu0 %v6590_v31, %s4952_s0  ;;  %10161 = vst [vmem:[#allocation142_spill] sm:$0xff] %v6671_v42 }
 0x536   :  { %2434 = vperm.xlu1 %4789, %v2204_v15   ;;  %2729 = vrot.lane.b32.xlu0 %v6601_v0, %s4952_s0 }
 0x53a   :  { %2444 = vperm.xlu1 %4789, %v2206_v52  }
 0x53e   :  { %2690 = vrot.lane.b32.xlu1 %v6612_v12, %s4952_s0 }
 0x53f   :  { %4790 = vset.pattern.permute.xlu1 %v10152_v21 }
 0x542   :  { %2696 = vrot.lane.b32.xlu1 %v6622_v26, %s4952_s0 }
 0x546   :  { %2702 = vrot.lane.b32.xlu1 %v6631_v47, %s4952_s0 }
 0x54a   :  { %2708 = vrot.lane.b32.xlu1 %v6641_v3, %s4952_s0 }
 0x54e   :  { %2714 = vrot.lane.b32.xlu1 %v6651_v44, %s4952_s0 }
 0x552   :  { %2720 = vrot.lane.b32.xlu1 %v6659_v23, %s4952_s0 }
 0x555   :  { %v6673_v56 = vpop.permute.xlu1 %2214 }
 0x556   :  { %10162 = vst [vmem:[#allocation143_spill] sm:$0xff] %v6673_v56  ;;  %2726 = vrot.lane.b32.xlu1 %v6669_v32, %s4952_s0 }
 0x559   :  { %v6683_v54 = vpop.permute.xlu1 %2219  ;;  %v6685_v19 = vpop.permute.xlu0 %2224 }
 0x55a   :  { %10164 = vst [vmem:[#allocation145_spill] sm:$0xff] %v6683_v54  ;;  %10165 = vst [vmem:[#allocation146_spill] sm:$0xff] %v6685_v19  ;;  %2732 = vrot.lane.b32.xlu1 %v6681_v40, %s4952_s0  ;;  %v2945_v54 = vmul.f32 2.0, %v6545_v17 }
 0x55d   :  { %v6689_v8 = vpop.permute.xlu1 %2229  ;;  %v6691_v30 = vpop.permute.xlu0 %2234 }
 0x55e   :  { %10166 = vst [vmem:[#allocation147_spill] sm:$0xff] %v6689_v8  ;;  %10167 = vst [vmem:[#allocation148_spill] sm:$0xff] %v6691_v30 }
 0x561   :  { %v6693_v46 = vpop.permute.xlu1 %2239  ;;  %v6695_v63 = vpop.permute.xlu0 %2244 }
 0x562   :  { %10168 = vst [vmem:[#allocation149_spill] sm:$0xff] %v6693_v46  ;;  %10169 = vst [vmem:[#allocation150_spill] sm:$0xff] %v6695_v63 }
 0x565   :  { %v6697_v5 = vpop.permute.xlu1 %2249  ;;  %v6699_v10 = vpop.permute.xlu0 %2254 }
 0x566   :  { %10170 = vst [vmem:[#allocation151_spill] sm:$0xff] %v6697_v5  ;;  %10171 = vst [vmem:[#allocation152_spill] sm:$0xff] %v6699_v10 }
 0x569   :  { %v6701_v9 = vpop.permute.xlu1 %2259  ;;  %v6703_v27 = vpop.permute.xlu0 %2264 }
 0x56a   :  { %10172 = vst [vmem:[#allocation153_spill] sm:$0xff] %v6701_v9  ;;  %10173 = vst [vmem:[#allocation154_spill] sm:$0xff] %v6703_v27 }
 0x56d   :  { %v6705_v41 = vpop.permute.xlu1 %2269  ;;  %v6707_v15 = vpop.permute.xlu0 %2274 }
 0x56e   :  { %10174 = vst [vmem:[#allocation155_spill] sm:$0xff] %v6705_v41  ;;  %10175 = vst [vmem:[#allocation156_spill] sm:$0xff] %v6707_v15 }
 0x571   :  { %v6709_v58 = vpop.permute.xlu1 %2279  ;;  %v6711_v52 = vpop.permute.xlu0 %2284 }
 0x572   :  { %10176 = vst [vmem:[#allocation157_spill] sm:$0xff] %v6709_v58  ;;  %10177 = vst [vmem:[#allocation158_spill] sm:$0xff] %v6711_v52 }
 0x575   :  { %v6713_v30 = vpop.permute.xlu1 %2303  ;;  %v6715_v46 = vpop.permute.xlu0 %2305 }
 0x576   :  { %10178 = vst [vmem:[#allocation159_spill] sm:$0xff] %v6713_v30  ;;  %10179 = vst [vmem:[#allocation160_spill] sm:$0xff] %v6715_v46 }
 0x579   :  { %v6717_v63 = vpop.permute.xlu1 %2307  ;;  %v6719_v5 = vpop.permute.xlu0 %2309 }
 0x57a   :  { %10180 = vst [vmem:[#allocation161_spill] sm:$0xff] %v6717_v63  ;;  %10181 = vst [vmem:[#allocation162_spill] sm:$0xff] %v6719_v5 }
 0x57d   :  { %v6721_v10 = vpop.permute.xlu1 %2311  ;;  %v6723_v9 = vpop.permute.xlu0 %2313 }
 0x57e   :  { %10182 = vst [vmem:[#allocation163_spill] sm:$0xff] %v6721_v10  ;;  %10183 = vst [vmem:[#allocation164_spill] sm:$0xff] %v6723_v9 }
 0x581   :  { %v6725_v27 = vpop.permute.xlu1 %2315  ;;  %v6727_v41 = vpop.permute.xlu0 %2317 }
 0x582   :  { %10184 = vst [vmem:[#allocation165_spill] sm:$0xff] %v6725_v27  ;;  %10185 = vst [vmem:[#allocation166_spill] sm:$0xff] %v6727_v41 }
 0x585   :  { %v6729_v15 = vpop.permute.xlu1 %2319  ;;  %v6731_v58 = vpop.permute.xlu0 %2321 }
 0x586   :  { %10186 = vst [vmem:[#allocation167_spill] sm:$0xff] %v6729_v15  ;;  %10187 = vst [vmem:[#allocation168_spill] sm:$0xff] %v6731_v58 }
 0x589   :  { %v6733_v52 = vpop.permute.xlu1 %2323  ;;  %v6735_v8 = vpop.permute.xlu0 %2325 }
 0x58a   :  { %10188 = vst [vmem:[#allocation169_spill] sm:$0xff] %v6733_v52  ;;  %10189 = vst [vmem:[#allocation170_spill] sm:$0xff] %v6735_v8 }
 0x58d   :  { %v6737_v56 = vpop.permute.xlu1 %2327  ;;  %v6739_v46 = vpop.permute.xlu0 %2329 }
 0x58e   :  { %10190 = vst [vmem:[#allocation171_spill] sm:$0xff] %v6737_v56  ;;  %10191 = vst [vmem:[#allocation172_spill] sm:$0xff] %v6739_v46 }
 0x591   :  { %v6741_v42 = vpop.permute.xlu1 %2331  ;;  %v6743_v10 = vpop.permute.xlu0 %2333 }
 0x592   :  { %10192 = vst [vmem:[#allocation173_spill] sm:$0xff] %v6741_v42  ;;  %10193 = vst [vmem:[#allocation174_spill] sm:$0xff] %v6743_v10 }
 0x595   :  { %v6745_v9 = vpop.permute.xlu1 %2369  ;;  %v2688_v27 = vpop.permute.xlu0 %2687 }
 0x596   :  { %10194 = vst [vmem:[#allocation175_spill] sm:$0xff] %v6745_v9  ;;  %v2689_v15 = vsel %vm76_vm0, %v2688_v27, %v6536_v35 }
 0x597   :  { %2735 = vrot.lane.b32.xlu0 %v2689_v15, %s4952_s0 }
 0x599   :  { %v6750_v58 = vpop.permute.xlu1 %2379  ;;  %v2694_v52 = vpop.permute.xlu0 %2693 }
 0x59a   :  { %10195 = vst [vmem:[#allocation176_spill] sm:$0xff] %v6750_v58  ;;  %v2695_v56 = vsel %vm76_vm0, %v2694_v52, %v6545_v17 }
 0x59b   :  { %2739 = vrot.lane.b32.xlu0 %v2695_v56, %s4952_s0 }
 0x59d   :  { %v6755_v46 = vpop.permute.xlu1 %2384  ;;  %v2700_v42 = vpop.permute.xlu0 %2699 }
 0x59e   :  { %10196 = vst [vmem:[#allocation177_spill] sm:$0xff] %v6755_v46  ;;  %v2701_v10 = vsel %vm76_vm0, %v2700_v42, %v6554_v34 }
 0x59f   :  { %2743 = vrot.lane.b32.xlu0 %v2701_v10, %s4952_s0 }
 0x5a1   :  { %v6760_v8 = vpop.permute.xlu1 %2394  ;;  %v2706_v27 = vpop.permute.xlu0 %2705 }
 0x5a2   :  { %10197 = vst [vmem:[#allocation178_spill] sm:$0xff] %v6760_v8  ;;  %v2707_v15 = vsel %vm76_vm0, %v2706_v27, %v6563_v16 }
 0x5a3   :  { %2747 = vrot.lane.b32.xlu0 %v2707_v15, %s4952_s0 }
 0x5a5   :  { %v6765_v41 = vpop.permute.xlu1 %2404  ;;  %v2712_v52 = vpop.permute.xlu0 %2711 }
 0x5a6   :  { %10198 = vst [vmem:[#allocation179_spill] sm:$0xff] %v6765_v41  ;;  %v2713_v56 = vsel %vm76_vm0, %v2712_v52, %v6572_v55 }
 0x5a7   :  { %2751 = vrot.lane.b32.xlu0 %v2713_v56, %s4952_s0 }
 0x5a9   :  { %v6770_v9 = vpop.permute.xlu1 %2414  ;;  %v2718_v42 = vpop.permute.xlu0 %2717 }
 0x5aa   :  { %10199 = vst [vmem:[#allocation180_spill] sm:$0xff] %v6770_v9  ;;  %v2719_v10 = vsel %vm76_vm0, %v2718_v42, %v6581_v48 }
 0x5ab   :  { %2755 = vrot.lane.b32.xlu0 %v2719_v10, %s4952_s0 }
 0x5ad   :  { %v6775_v8 = vpop.permute.xlu1 %2424  ;;  %v2724_v27 = vpop.permute.xlu0 %2723 }
 0x5ae   :  { %10200 = vst [vmem:[#allocation181_spill] sm:$0xff] %v6775_v8  ;;  %v2725_v15 = vsel %vm76_vm0, %v2724_v27, %v6590_v31 }
 0x5af   :  { %2759 = vrot.lane.b32.xlu0 %v2725_v15, %s4952_s0 }
 0x5b1   :  { %v6780_v41 = vpop.permute.xlu1 %2434  ;;  %v2730_v52 = vpop.permute.xlu0 %2729 }
 0x5b2   :  { %10201 = vst [vmem:[#allocation182_spill] sm:$0xff] %v6780_v41  ;;  %v2731_v56 = vsel %vm76_vm0, %v2730_v52, %v6601_v0 }
 0x5b3   :  { %2763 = vrot.lane.b32.xlu0 %v2731_v56, %s4952_s0 }
 0x5b5   :  { %v6785_v9 = vpop.permute.xlu1 %2444 }
 0x5b6   :  { %10202 = vst [vmem:[#allocation183_spill] sm:$0xff] %v6785_v9 }
 0x5b7   :  { %2799 = vrot.lane.b32.xlu0 %v6536_v35, %s4953_s1 }
 0x5b9   :  { %v2691_v42 = vpop.permute.xlu1 %2690 }
 0x5ba   :  { %v2692_v10 = vsel %vm76_vm0, %v2691_v42, %v6612_v12 }
 0x5bb   :  { %2737 = vrot.lane.b32.xlu1 %v2692_v10, %s4952_s0  ;;  %2803 = vrot.lane.b32.xlu0 %v6545_v17, %s4953_s1 }
 0x5bd   :  { %v2697_v27 = vpop.permute.xlu1 %2696 }
 0x5be   :  { %v2698_v15 = vsel %vm76_vm0, %v2697_v27, %v6622_v26 }
 0x5bf   :  { %2741 = vrot.lane.b32.xlu1 %v2698_v15, %s4952_s0  ;;  %2807 = vrot.lane.b32.xlu0 %v6554_v34, %s4953_s1 }
 0x5c1   :  { %v2703_v52 = vpop.permute.xlu1 %2702 }
 0x5c2   :  { %v2704_v56 = vsel %vm76_vm0, %v2703_v52, %v6631_v47 }
 0x5c3   :  { %2745 = vrot.lane.b32.xlu1 %v2704_v56, %s4952_s0  ;;  %2811 = vrot.lane.b32.xlu0 %v6563_v16, %s4953_s1 }
 0x5c5   :  { %v2709_v42 = vpop.permute.xlu1 %2708 }
 0x5c6   :  { %v2710_v10 = vsel %vm76_vm0, %v2709_v42, %v6641_v3 }
 0x5c7   :  { %2749 = vrot.lane.b32.xlu1 %v2710_v10, %s4952_s0  ;;  %2815 = vrot.lane.b32.xlu0 %v6572_v55, %s4953_s1 }
 0x5c9   :  { %v2715_v27 = vpop.permute.xlu1 %2714 }
 0x5ca   :  { %v2716_v15 = vsel %vm76_vm0, %v2715_v27, %v6651_v44 }
 0x5cb   :  { %2753 = vrot.lane.b32.xlu1 %v2716_v15, %s4952_s0  ;;  %2819 = vrot.lane.b32.xlu0 %v6581_v48, %s4953_s1 }
 0x5cd   :  { %v2721_v52 = vpop.permute.xlu1 %2720 }
 0x5ce   :  { %v2722_v56 = vsel %vm76_vm0, %v2721_v52, %v6659_v23 }
 0x5cf   :  { %2757 = vrot.lane.b32.xlu1 %v2722_v56, %s4952_s0  ;;  %2823 = vrot.lane.b32.xlu0 %v6590_v31, %s4953_s1 }
 0x5d1   :  { %v2727_v42 = vpop.permute.xlu1 %2726 }
 0x5d2   :  { %v2728_v10 = vsel %vm76_vm0, %v2727_v42, %v6669_v32 }
 0x5d3   :  { %2761 = vrot.lane.b32.xlu1 %v2728_v10, %s4952_s0  ;;  %2827 = vrot.lane.b32.xlu0 %v6601_v0, %s4953_s1 }
 0x5d5   :  { %v2733_v27 = vpop.permute.xlu1 %2732 }
 0x5d6   :  { %v2734_v15 = vsel %vm76_vm0, %v2733_v27, %v6681_v40 }
 0x5d7   :  { %2765 = vrot.lane.b32.xlu1 %v2734_v15, %s4952_s0 }
 0x5db   :  { %2801 = vrot.lane.b32.xlu1 %v6612_v12, %s4953_s1 }
 0x5df   :  { %2805 = vrot.lane.b32.xlu1 %v6622_v26, %s4953_s1 }
 0x5e3   :  { %2809 = vrot.lane.b32.xlu1 %v6631_v47, %s4953_s1 }
 0x5e7   :  { %2813 = vrot.lane.b32.xlu1 %v6641_v3, %s4953_s1 }
 0x5eb   :  { %2817 = vrot.lane.b32.xlu1 %v6651_v44, %s4953_s1 }
 0x5ef   :  { %2821 = vrot.lane.b32.xlu1 %v6659_v23, %s4953_s1 }
 0x5f3   :  { %2825 = vrot.lane.b32.xlu1 %v6669_v32, %s4953_s1 }
 0x5f7   :  { %2829 = vrot.lane.b32.xlu1 %v6681_v40, %s4953_s1 }
 0x609   :  { %v2736_v52 = vpop.permute.xlu0 %2735 }
 0x60a   :  { %v6845_v56 = vsel %vm76_vm0, %v2736_v52, %v6536_v35 }
 0x60b   :  { %2879 = vrot.lane.b32.xlu0 %v6845_v56, %s4958_s23 }
 0x60d   :  { %v2740_v42 = vpop.permute.xlu0 %2739 }
 0x60e   :  { %v6851_v10 = vsel %vm76_vm0, %v2740_v42, %v6545_v17 }
 0x60f   :  { %2883 = vrot.lane.b32.xlu0 %v6851_v10, %s4958_s23 }
 0x611   :  { %v2744_v27 = vpop.permute.xlu0 %2743 }
 0x612   :  { %v6857_v15 = vsel %vm76_vm0, %v2744_v27, %v6554_v34 }
 0x613   :  { %2887 = vrot.lane.b32.xlu0 %v6857_v15, %s4958_s23 }
 0x615   :  { %v2748_v52 = vpop.permute.xlu0 %2747 }
 0x616   :  { %v6863_v9 = vsel %vm76_vm0, %v2748_v52, %v6563_v16 }
 0x617   :  { %2891 = vrot.lane.b32.xlu0 %v6863_v9, %s4958_s23 }
 0x619   :  { %v2752_v42 = vpop.permute.xlu0 %2751 }
 0x61a   :  { %v6869_v41 = vsel %vm76_vm0, %v2752_v42, %v6572_v55 }
 0x61b   :  { %2895 = vrot.lane.b32.xlu0 %v6869_v41, %s4958_s23 }
 0x61d   :  { %v2756_v27 = vpop.permute.xlu0 %2755 }
 0x61e   :  { %v6875_v8 = vsel %vm76_vm0, %v2756_v27, %v6581_v48  ;;  %v2943_v27 = vmul.f32 2.0, %v6536_v35 }
 0x61f   :  { %2899 = vrot.lane.b32.xlu0 %v6875_v8, %s4958_s23 }
 0x621   :  { %v2760_v52 = vpop.permute.xlu0 %2759 }
 0x622   :  { %v6881_v30 = vsel %vm76_vm0, %v2760_v52, %v6590_v31 }
 0x623   :  { %10203 = vst [vmem:[#allocation184_spill] sm:$0xff] %v6881_v30  ;;  %2903 = vrot.lane.b32.xlu0 %v6881_v30, %s4958_s23 }
 0x625   :  { %v2764_v42 = vpop.permute.xlu0 %2763 }
 0x626   :  { %v6887_v58 = vsel %vm76_vm0, %v2764_v42, %v6601_v0  ;;  %v2947_v42 = vmul.f32 2.0, %v6554_v34 }
 0x627   :  { %10204 = vst [vmem:[#allocation185_spill] sm:$0xff] %v6887_v58  ;;  %2907 = vrot.lane.b32.xlu0 %v6887_v58, %s4958_s23 }
 0x629   :  { %v6957_v45 = vpop.permute.xlu0 %2799 }
 0x62b   :  { %2975 = vrot.lane.b32.xlu0 %v2943_v27, %s4955_s21 }
 0x62d   :  { %v2738_v63 = vpop.permute.xlu1 %2737  ;;  %v6965_v4 = vpop.permute.xlu0 %2803 }
 0x62e   :  { %v6896_v52 = vsel %vm76_vm0, %v2738_v63, %v6612_v12  ;;  %v2949_v63 = vmul.f32 2.0, %v6563_v16 }
 0x62f   :  { %2881 = vrot.lane.b32.xlu1 %v6896_v52, %s4958_s23  ;;  %2979 = vrot.lane.b32.xlu0 %v2945_v54, %s4955_s21 }
 0x631   :  { %v2742_v46 = vpop.permute.xlu1 %2741  ;;  %v6970_v49 = vpop.permute.xlu0 %2807 }
 0x632   :  { %v6904_v19 = vsel %vm76_vm0, %v2742_v46, %v6622_v26  ;;  %v2951_v46 = vmul.f32 2.0, %v6572_v55 }
 0x633   :  { %2885 = vrot.lane.b32.xlu1 %v6904_v19, %s4958_s23  ;;  %2983 = vrot.lane.b32.xlu0 %v2947_v42, %s4955_s21 }
 0x635   :  { %v2746_v5 = vpop.permute.xlu1 %2745  ;;  %v6978_v6 = vpop.permute.xlu0 %2811 }
 0x636   :  { %v6912_v25 = vsel %vm76_vm0, %v2746_v5, %v6631_v47  ;;  %v2953_v5 = vmul.f32 2.0, %v6581_v48 }
 0x637   :  { %2889 = vrot.lane.b32.xlu1 %v6912_v25, %s4958_s23  ;;  %2987 = vrot.lane.b32.xlu0 %v2949_v63, %s4955_s21 }
 0x639   :  { %v2750_v28 = vpop.permute.xlu1 %2749  ;;  %v6983_v14 = vpop.permute.xlu0 %2815 }
 0x63a   :  { %v6920_v36 = vsel %vm76_vm0, %v2750_v28, %v6641_v3  ;;  %v2955_v28 = vmul.f32 2.0, %v6590_v31 }
 0x63b   :  { %2893 = vrot.lane.b32.xlu1 %v6920_v36, %s4958_s23  ;;  %2991 = vrot.lane.b32.xlu0 %v2951_v46, %s4955_s21 }
 0x63d   :  { %v2754_v29 = vpop.permute.xlu1 %2753  ;;  %v6989_v59 = vpop.permute.xlu0 %2819 }
 0x63e   :  { %v6928_v38 = vsel %vm76_vm0, %v2754_v29, %v6651_v44  ;;  %v2957_v29 = vmul.f32 2.0, %v6601_v0 }
 0x63f   :  { %2897 = vrot.lane.b32.xlu1 %v6928_v38, %s4958_s23  ;;  %2995 = vrot.lane.b32.xlu0 %v2953_v5, %s4955_s21 }
 0x641   :  { %v2758_v18 = vpop.permute.xlu1 %2757 }
 0x642   :  { %v6936_v33 = vsel %vm76_vm0, %v2758_v18, %v6659_v23 }
 0x643   :  { %2901 = vrot.lane.b32.xlu1 %v6936_v33, %s4958_s23  ;;  %2999 = vrot.lane.b32.xlu0 %v2955_v28, %s4955_s21 }
 0x645   :  { %v2762_v13 = vpop.permute.xlu1 %2761 }
 0x646   :  { %v6944_v43 = vsel %vm76_vm0, %v2762_v13, %v6669_v32  ;;  %v2946_v13 = vmul.f32 2.0, %v6622_v26 }
 0x647   :  { %10205 = vst [vmem:[#allocation186_spill] sm:$0xff] %v6944_v43  ;;  %2905 = vrot.lane.b32.xlu1 %v6944_v43, %s4958_s23  ;;  %3003 = vrot.lane.b32.xlu0 %v2957_v29, %s4955_s21 }
 0x649   :  { %v2766_v62 = vpop.permute.xlu1 %2765 }
 0x64a   :  { %v6951_v18 = vsel %vm76_vm0, %v2766_v62, %v6681_v40  ;;  %v2948_v62 = vmul.f32 2.0, %v6631_v47 }
 0x64b   :  { %10206 = vst [vmem:[#allocation187_spill] sm:$0xff] %v6951_v18  ;;  %2909 = vrot.lane.b32.xlu1 %v6951_v18, %s4958_s23  ;;  %3039 = vrot.lane.b32.xlu0 %v2943_v27, %s4956_s22  ;;  %v2950_v27 = vmul.f32 2.0, %v6641_v3 }
 0x64d   :  { %v6994_v53 = vpop.permute.xlu1 %2801 }
 0x64f   :  { %2977 = vrot.lane.b32.xlu1 %v2944_v50, %s4955_s21  ;;  %3043 = vrot.lane.b32.xlu0 %v2945_v54, %s4956_s22  ;;  %v2952_v54 = vmul.f32 2.0, %v6651_v44 }
 0x651   :  { %v7000_v1 = vpop.permute.xlu1 %2805 }
 0x653   :  { %2981 = vrot.lane.b32.xlu1 %v2946_v13, %s4955_s21  ;;  %3047 = vrot.lane.b32.xlu0 %v2947_v42, %s4956_s22  ;;  %v2954_v42 = vmul.f32 2.0, %v6659_v23 }
 0x655   :  { %v7005_v7 = vpop.permute.xlu1 %2809 }
 0x657   :  { %2985 = vrot.lane.b32.xlu1 %v2948_v62, %s4955_s21  ;;  %3051 = vrot.lane.b32.xlu0 %v2949_v63, %s4956_s22  ;;  %v2956_v63 = vmul.f32 2.0, %v6669_v32 }
 0x659   :  { %v7011_v21 = vpop.permute.xlu1 %2813 }
 0x65b   :  { %2989 = vrot.lane.b32.xlu1 %v2950_v27, %s4955_s21  ;;  %3055 = vrot.lane.b32.xlu0 %v2951_v46, %s4956_s22  ;;  %v2958_v46 = vmul.f32 2.0, %v6681_v40 }
 0x65d   :  { %v7018_v2 = vpop.permute.xlu1 %2817 }
 0x65f   :  { %2993 = vrot.lane.b32.xlu1 %v2952_v54, %s4955_s21  ;;  %3059 = vrot.lane.b32.xlu0 %v2953_v5, %s4956_s22  ;;  %v6992_v5 = vpop.permute.xlu0 %2823 }
 0x660   :  { %10207 = vst [vmem:[#allocation188_spill] sm:$0xff] %v6992_v5 }
 0x661   :  { %v7023_v37 = vpop.permute.xlu1 %2821 }
 0x663   :  { %2997 = vrot.lane.b32.xlu1 %v2954_v42, %s4955_s21  ;;  %3063 = vrot.lane.b32.xlu0 %v2955_v28, %s4956_s22  ;;  %v6998_v28 = vpop.permute.xlu0 %2827 }
 0x664   :  { %10208 = vst [vmem:[#allocation189_spill] sm:$0xff] %v6998_v28 }
 0x667   :  { %3001 = vrot.lane.b32.xlu1 %v2956_v63, %s4955_s21  ;;  %3067 = vrot.lane.b32.xlu0 %v2957_v29, %s4956_s22 }
 0x66b   :  { %3005 = vrot.lane.b32.xlu1 %v2958_v46, %s4955_s21 }
 0x66f   :  { %3041 = vrot.lane.b32.xlu1 %v2944_v50, %s4956_s22 }
 0x673   :  { %3045 = vrot.lane.b32.xlu1 %v2946_v13, %s4956_s22 }
 0x677   :  { %3049 = vrot.lane.b32.xlu1 %v2948_v62, %s4956_s22 }
 0x67b   :  { %3053 = vrot.lane.b32.xlu1 %v2950_v27, %s4956_s22 }
 0x67d   :  { %v7003_v29 = vpop.permute.xlu0 %2879 }
 0x67f   :  { %3057 = vrot.lane.b32.xlu1 %v2952_v54, %s4956_s22 }
 0x681   :  { %v7008_v50 = vpop.permute.xlu0 %2883 }
 0x683   :  { %3061 = vrot.lane.b32.xlu1 %v2954_v42, %s4956_s22  ;;  %v7029_v42 = vpop.permute.xlu1 %2825 }
 0x684   :  { %10211 = vst [vmem:[#allocation192_spill] sm:$0xff] %v7029_v42 }
 0x685   :  { %v7013_v13 = vpop.permute.xlu0 %2887 }
 0x687   :  { %3065 = vrot.lane.b32.xlu1 %v2956_v63, %s4956_s22  ;;  %v7033_v22 = vpop.permute.xlu1 %2829 }
 0x688   :  { %10213 = vst [vmem:[#allocation194_spill] sm:$0xff] %v7033_v22 }
 0x689   :  { %v7016_v62 = vpop.permute.xlu0 %2891 }
 0x68b   :  { %3069 = vrot.lane.b32.xlu1 %v2958_v46, %s4956_s22 }
 0x68d   :  { %v7021_v27 = vpop.permute.xlu0 %2895 }
 0x691   :  { %v7025_v54 = vpop.permute.xlu0 %2899 }
 0x692   :  { %10209 = vst [vmem:[#allocation190_spill] sm:$0xff] %v7025_v54 }
 0x695   :  { %v7027_v39 = vpop.permute.xlu0 %2903 }
 0x696   :  { %10210 = vst [vmem:[#allocation191_spill] sm:$0xff] %v7027_v39 }
 0x699   :  { %v7031_v61 = vpop.permute.xlu0 %2907 }
 0x69a   :  { %10212 = vst [vmem:[#allocation193_spill] sm:$0xff] %v7031_v61 }
 0x69d   :  { %v2976_v63 = vpop.permute.xlu0 %2975 }
 0x69e   :  { %v3023_v11 = vadd.f32 %v2976_v63, %v6536_v35 }
 0x6a0   :  { %3105 = vperm.xlu0 %4783, %v3023_v11  }
 0x6a1   :  { %v2882_v24 = vpop.permute.xlu1 %2881  ;;  %v2980_v28 = vpop.permute.xlu0 %2979 }
 0x6a2   :  { %v3025_v63 = vadd.f32 %v2980_v28, %v6545_v17 }
 0x6a5   :  { %v2886_v46 = vpop.permute.xlu1 %2885  ;;  %v2984_v61 = vpop.permute.xlu0 %2983 }
 0x6a6   :  { %v3027_v30 = vadd.f32 %v2984_v61, %v6554_v34 }
 0x6a9   :  { %v7036_v60 = vpop.permute.xlu1 %2889  ;;  %v2988_v42 = vpop.permute.xlu0 %2987 }
 0x6ad   :  { %v7038_v20 = vpop.permute.xlu1 %2893  ;;  %v2992_v5 = vpop.permute.xlu0 %2991 }
 0x6b1   :  { %v7040_v51 = vpop.permute.xlu1 %2897 }
 0x6b5   :  { %v7042_v18 = vpop.permute.xlu1 %2901 }
 0x6b6   :  { %10214 = vst [vmem:[#allocation195_spill] sm:$0xff] %v7042_v18 }
 0x6b9   :  { %v7044_v58 = vpop.permute.xlu1 %2905 }
 0x6ba   :  { %10215 = vst [vmem:[#allocation196_spill] sm:$0xff] %v7044_v58 }
 0x6bd   :  { %v7046_v39 = vpop.permute.xlu1 %2909 }
 0x6be   :  { %10216 = vst [vmem:[#allocation197_spill] sm:$0xff] %v7046_v39  ;;  %v3029_v39 = vadd.f32 %v2988_v42, %v6563_v16 }
 0x6c1   :  { %v2978_v22 = vpop.permute.xlu1 %2977 }
 0x6c2   :  { %v3024_v11 = vadd.f32 %v2978_v22, %v6612_v12  ;;  %v2996_v22 = vpop.permute.xlu0 %2995 }
 0x6c3   :  { %v3033_v61 = vadd.f32 %v2996_v22, %v6581_v48  ;;  %v2847_v22 = vadd.f32 %v6957_v45, %v6845_v56  ;;  %v2851_v56 = vadd.f32 %v6970_v49, %v6857_v15  ;;  %v10219_v15 = vld [vmem:[#allocation184_spill] sm:$0xff] }
 0x6c4   :  { %3110 = vperm.xlu1 %4790, %v3024_v11  }
 0x6c5   :  { %v2982_v35 = vpop.permute.xlu1 %2981 }
 0x6c6   :  { %v3026_v43 = vadd.f32 %v2982_v35, %v6622_v26  ;;  %v3031_v35 = vadd.f32 %v2992_v5, %v6572_v55 }
 0x6c8   :  { %3120 = vperm.xlu0 %4783, %v3026_v43   ;;  %3115 = vperm.xlu1 %4790, %v3025_v63   ;;  %v3000_v63 = vpop.permute.xlu0 %2999 }
 0x6c9   :  { %v2986_v18 = vpop.permute.xlu1 %2985 }
 0x6ca   :  { %v3028_v58 = vadd.f32 %v2986_v18, %v6631_v47  ;;  %v3035_v18 = vadd.f32 %v3000_v63, %v6590_v31 }
 0x6cc   :  { %3130 = vperm.xlu0 %4783, %v3028_v58   ;;  %3125 = vperm.xlu1 %4790, %v3027_v30   ;;  %v3004_v42 = vpop.permute.xlu0 %3003 }
 0x6cd   :  { %v2990_v54 = vpop.permute.xlu1 %2989  ;;  %v3037_v5 = vadd.f32 %v3004_v42, %v6601_v0 }
 0x6ce   :  { %v3030_v11 = vadd.f32 %v2990_v54, %v6641_v3 }
 0x6d0   :  { %3140 = vperm.xlu0 %4783, %v3030_v11   ;;  %3135 = vperm.xlu1 %4790, %v3029_v39  }
 0x6d1   :  { %v2994_v28 = vpop.permute.xlu1 %2993 }
 0x6d2   :  { %v3032_v43 = vadd.f32 %v2994_v28, %v6651_v44  ;;  %v2848_v28 = vadd.f32 %v6994_v53, %v6896_v52  ;;  %v10220_v52 = vld [vmem:[#allocation188_spill] sm:$0xff] }
 0x6d4   :  { %3150 = vperm.xlu0 %4783, %v3032_v43   ;;  %3145 = vperm.xlu1 %4790, %v3031_v35   ;;  %v2927_v43 = vadd.f32 %v7003_v29, %v2847_v22  ;;  %v2928_v63 = vadd.f32 %v2882_v24, %v2848_v28  ;;  %v2852_v24 = vadd.f32 %v7005_v7, %v6912_v25 }
 0x6d5   :  { %v2998_v58 = vpop.permute.xlu1 %2997  ;;  %v2855_v25 = vadd.f32 %v6983_v14, %v6869_v41  ;;  %v10218_v14 = vld [vmem:[#allocation195_spill] sm:$0xff]  ;;  %v2859_v29 = vadd.f32 %v10220_v52, %v10219_v15  ;;  %v10237_v15 = vld [vmem:[#allocation116_spill] sm:$0xff] }
 0x6d6   :  { %v3034_v30 = vadd.f32 %v2998_v58, %v6659_v23  ;;  %v2850_v58 = vadd.f32 %v7000_v1, %v6904_v19  ;;  %v2932_v1 = vadd.f32 %v7036_v60, %v2852_v24  ;;  %v2853_v19 = vadd.f32 %v6978_v6, %v6863_v9  ;;  %v4860_v24 = vld [vmem:[#allocation2 + $0x10] sm:$0xff] }
 0x6d7   :  { %v2856_v60 = vadd.f32 %v7018_v2, %v6928_v38  ;;  %v2857_v9 = vadd.f32 %v6989_v59, %v6875_v8  ;;  %v10217_v2 = vld [vmem:[#allocation190_spill] sm:$0xff]  ;;  %v10224_v8 = vld [vmem:[#allocation196_spill] sm:$0xff] }
 0x6d8   :  { %3160 = vperm.xlu0 %4783, %v3034_v30   ;;  %3155 = vperm.xlu1 %4790, %v3033_v61   ;;  %v2849_v61 = vadd.f32 %v6965_v4, %v6851_v10  ;;  %v2930_v53 = vadd.f32 %v2886_v46, %v2850_v58  ;;  %v2931_v4 = vadd.f32 %v7013_v13, %v2851_v56  ;;  %v10226_v46 = vld [vmem:[#allocation189_spill] sm:$0xff] }
 0x6d9   :  { %v3002_v54 = vpop.permute.xlu1 %3001  ;;  %v2854_v10 = vadd.f32 %v7011_v21, %v6920_v36  ;;  %v2933_v49 = vadd.f32 %v7016_v62, %v2853_v19  ;;  %v2935_v21 = vadd.f32 %v7021_v27, %v2855_v25  ;;  %v2936_v36 = vadd.f32 %v7040_v51, %v2856_v60  ;;  %v10221_v51 = vld [vmem:[#allocation186_spill] sm:$0xff]  ;;  %v10225_v27 = vld [vmem:[#allocation185_spill] sm:$0xff] }
 0x6da   :  { %v3036_v39 = vadd.f32 %v3002_v54, %v6669_v32  ;;  %v2929_v45 = vadd.f32 %v7008_v50, %v2849_v61  ;;  %v2937_v38 = vadd.f32 %v10217_v2, %v2857_v9  ;;  %v10222_v50 = vld [vmem:[#allocation192_spill] sm:$0xff]  ;;  %v2861_v30 = vadd.f32 %v10226_v46, %v10225_v27  ;;  %v10228_v54 = vld [vmem:[#allocation194_spill] sm:$0xff]  ;;  %v4859_v61 = vld [vmem:[#allocation2] sm:$0xff] }
 0x6db   :  { %v2934_v7 = vadd.f32 %v7038_v20, %v2854_v10  ;;  %v2858_v20 = vadd.f32 %v7023_v37, %v6936_v33  ;;  %v2860_v13 = vadd.f32 %v10222_v50, %v10221_v51  ;;  %v10223_v37 = vld [vmem:[#allocation191_spill] sm:$0xff]  ;;  %v10232_v58 = vld [vmem:[#allocation121_spill] sm:$0xff]  ;;  %v10236_v2 = vld [vmem:[#allocation122_spill] sm:$0xff] }
 0x6dc   :  { %3170 = vperm.xlu0 %4783, %v3036_v39   ;;  %3165 = vperm.xlu1 %4790, %v3035_v18   ;;  %v2939_v33 = vadd.f32 %v10223_v37, %v2859_v29  ;;  %v10227_v18 = vld [vmem:[#allocation187_spill] sm:$0xff]  ;;  %v3040_v39 = vpop.permute.xlu0 %3039  ;;  %v10238_v50 = vld [vmem:[#allocation118_spill] sm:$0xff]  ;;  %v7188_v37 = vld [vmem:[#allocation2 + $0x70] sm:$0xff] }
 0x6dd   :  { %v3006_v11 = vpop.permute.xlu1 %3005  ;;  %v2938_v41 = vadd.f32 %v10218_v14, %v2858_v20  ;;  %v2940_v62 = vadd.f32 %v10224_v8, %v2860_v13  ;;  %v2862_v42 = vadd.f32 %v10228_v54, %v10227_v18  ;;  %v7159_v20 = vld [vmem:[#allocation2 + $0x40] sm:$0xff]  ;;  %v4868_v54 = vld [vmem:[#allocation2 + $0x18] sm:$0xff] }
 0x6de   :  { %v3038_v35 = vadd.f32 %v3006_v11, %v6681_v40  ;;  %v7177_v51 = vld [vmem:[#allocation2 + $0x60] sm:$0xff] }
 0x6df   :  { %v10241_v46 = vld [vmem:[#allocation131_spill] sm:$0xff] }
 0x6e0   :  { %3180 = vperm.xlu0 %4783, %v3038_v35   ;;  %3175 = vperm.xlu1 %4790, %v3037_v5   ;;  %v10229_v5 = vld [vmem:[#allocation193_spill] sm:$0xff] }
 0x6e1   :  { %v7100_v6 = vpop.permute.xlu1 %3041  ;;  %v2941_v11 = vadd.f32 %v10229_v5, %v2861_v30  ;;  %v10230_v35 = vld [vmem:[#allocation197_spill] sm:$0xff]  ;;  %v4869_v5 = vld [vmem:[#allocation2 + $0x28] sm:$0xff] }
 0x6e2   :  { %v2942_v22 = vadd.f32 %v10230_v35, %v2862_v42  ;;  %v10243_v42 = vld [vmem:[#allocation133_spill] sm:$0xff] }
 0x6e4   :  { %3201 = vrot.lane.b32.xlu0 %v2928_v63, %s4959_s24  ;;  %3199 = vrot.lane.b32.xlu1 %v2927_v43, %s4959_s24  ;;  %v10231_v43 = vld [vmem:[#allocation126_spill] sm:$0xff] }
 0x6e5   :  { %4791 = vset.pattern.permute.xlu1 %v10032_v57  ;;  %v3046_v59 = vpop.permute.xlu1 %3045  ;;  %v3087_v63 = vadd.f32 %v3040_v39, %v10231_v43  ;;  %v10244_v39 = vmov 0   ;;  %v10247_v43 = vld [vmem:[#allocation136_spill] sm:$0xff] }
 0x6e6   :  { %v3090_v10 = vadd.f32 %v3046_v59, %v6622_v26 }
 0x6e8   :  { %3205 = vrot.lane.b32.xlu0 %v2930_v53, %s4959_s24  ;;  %3203 = vrot.lane.b32.xlu1 %v2929_v45, %s4959_s24  ;;  %v7130_v45 = vmul.f32 %v4859_v61, %v10232_v58  ;;  %v3044_v53 = vpop.permute.xlu0 %3043  ;;  %v4871_v58 = vld [vmem:[#allocation2 + $0x48] sm:$0xff] }
 0x6e9   :  { %v3050_v28 = vpop.permute.xlu1 %3049  ;;  %v3089_v56 = vadd.f32 %v3044_v53, %v6545_v17  ;;  %v10249_v53 = vld [vmem:[#allocation138_spill] sm:$0xff] }
 0x6ea   :  { %v3092_v60 = vadd.f32 %v3050_v28, %v6631_v47  ;;  %v7163_v47 = vmul.f32 %v7159_v20, %v10236_v2  ;;  %v4870_v28 = vld [vmem:[#allocation2 + $0x38] sm:$0xff] }
 0x6eb   :  { %v4874_v2 = vld [vmem:[#allocation2 + $0x78] sm:$0xff] }
 0x6ec   :  { %3209 = vrot.lane.b32.xlu0 %v2932_v1, %s4959_s24  ;;  %3207 = vrot.lane.b32.xlu1 %v2931_v4, %s4959_s24  ;;  %v10233_v4 = vld [vmem:[#allocation115_spill] sm:$0xff]  ;;  %v7183_v13 = vpop.permute.xlu0 %3047 }
 0x6ed   :  { %v7136_v1 = vmul.f32 %v4860_v24, %v10233_v4  ;;  %v3054_v19 = vpop.permute.xlu1 %3053  ;;  %v4872_v24 = vld [vmem:[#allocation2 + $0x58] sm:$0xff]  ;;  %v10250_v4 = vld [vmem:[#allocation139_spill] sm:$0xff] }
 0x6ee   :  { %v3094_v9 = vadd.f32 %v3054_v19, %v6641_v3  ;;  %v7235_v19 = vmul.f32 %v4872_v24, %v10250_v4 }
 0x6f0   :  { %3213 = vrot.lane.b32.xlu0 %v2934_v7, %s4959_s24  ;;  %3211 = vrot.lane.b32.xlu1 %v2933_v49, %s4959_s24  ;;  %v7141_v49 = vld [vmem:[#allocation2 + $0x20] sm:$0xff]  ;;  %v7197_v27 = vpop.permute.xlu0 %3051 }
 0x6f1   :  { %v10234_v7 = vld [vmem:[#allocation119_spill] sm:$0xff]  ;;  %v3058_v25 = vpop.permute.xlu1 %3057  ;;  %10240 = vst [vmem:[#allocation190_spill] sm:$0xff] %v7197_v27 }
 0x6f2   :  { %v7145_v17 = vmul.f32 %v7141_v49, %v10234_v7  ;;  %v3096_v14 = vadd.f32 %v3058_v25, %v6651_v44  ;;  %v7181_v44 = vmul.f32 %v7177_v51, %v10238_v50  ;;  %v4873_v7 = vld [vmem:[#allocation2 + $0x68] sm:$0xff]  ;;  %v10252_v25 = vld [vmem:[#allocation141_spill] sm:$0xff] }
 0x6f4   :  { %3217 = vrot.lane.b32.xlu0 %v2936_v36, %s4959_s24  ;;  %3215 = vrot.lane.b32.xlu1 %v2935_v21, %s4959_s24  ;;  %v7150_v21 = vld [vmem:[#allocation2 + $0x30] sm:$0xff]  ;;  %v7205_v18 = vpop.permute.xlu0 %3055 }
 0x6f5   :  { %v10235_v36 = vld [vmem:[#allocation117_spill] sm:$0xff]  ;;  %10242 = vst [vmem:[#allocation195_spill] sm:$0xff] %v7205_v18 }
 0x6f6   :  { %v7154_v26 = vmul.f32 %v7150_v21, %v10235_v36 }
 0x6f8   :  { %3221 = vrot.lane.b32.xlu0 %v2938_v41, %s4959_s24  ;;  %3219 = vrot.lane.b32.xlu1 %v2937_v38, %s4959_s24  ;;  %v3062_v38 = vpop.permute.xlu1 %3061  ;;  %v7168_v41 = vld [vmem:[#allocation2 + $0x50] sm:$0xff] }
 0x6f9   :  { %v7172_v3 = vmul.f32 %v7168_v41, %v10237_v15  ;;  %v3098_v29 = vadd.f32 %v3062_v38, %v6659_v23  ;;  %v10239_v23 = vld [vmem:[#allocation128_spill] sm:$0xff] }
 0x6fa   :  { %v10255_v38 = vld [vmem:[#allocation144_spill] sm:$0xff] }
 0x6fc   :  { %3225 = vrot.lane.b32.xlu0 %v2940_v62, %s4959_s24  ;;  %3223 = vrot.lane.b32.xlu1 %v2939_v33, %s4959_s24  ;;  %v3066_v52 = vpop.permute.xlu1 %3065  ;;  %v7192_v33 = vmul.f32 %v7188_v37, %v10239_v23 }
 0x6fd   :  { %v3100_v59 = vadd.f32 %v3066_v52, %v6669_v32  ;;  %v7199_v32 = vld [vmem:[#allocation2 + $0x8] sm:$0xff] }
 0x6fe   :  { %v7203_v30 = vmul.f32 %v7199_v32, %v10241_v46 }
 0x700   :  { %3229 = vrot.lane.b32.xlu0 %v2942_v22, %s4959_s24  ;;  %3227 = vrot.lane.b32.xlu1 %v2941_v11, %s4959_s24  ;;  %v3070_v8 = vpop.permute.xlu1 %3069  ;;  %v10245_v11 = vld [vmem:[#allocation134_spill] sm:$0xff]  ;;  %v7218_v22 = vpop.permute.xlu0 %3059 }
 0x701   :  { %v3102_v62 = vadd.f32 %v3070_v8, %v6681_v40  ;;  %v7210_v40 = vmul.f32 %v4868_v54, %v10243_v42  ;;  %v7216_v35 = vmul.f32 %v4869_v5, %v10245_v11  ;;  %10246 = vst [vmem:[#allocation184_spill] sm:$0xff] %v7218_v22 }
 0x704   :  { %3265 = vperm.xlu1 %4791, %v3087_v63   ;;  %3583 = vrot.lane.b32.xlu0 %v7130_v45, %s4952_s0  ;;  %v7223_v63 = vmul.f32 %v4870_v28, %v10247_v43  ;;  %v7225_v61 = vpop.permute.xlu0 %3063 }
 0x705   :  { %10248 = vst [vmem:[#allocation188_spill] sm:$0xff] %v7225_v61 }
 0x708   :  { %3275 = vperm.xlu1 %4791, %v3089_v56   ;;  %3589 = vrot.lane.b32.xlu0 %v7136_v1, %s4952_s0  ;;  %v7230_v56 = vmul.f32 %v4871_v58, %v10249_v53 }
 0x70c   :  { %3280 = vperm.xlu1 %4791, %v3090_v10   ;;  %3595 = vrot.lane.b32.xlu0 %v7145_v17, %s4952_s0  ;;  %v7237_v10 = vpop.permute.xlu0 %3067 }
 0x70d   :  { %10251 = vst [vmem:[#allocation186_spill] sm:$0xff] %v7237_v10 }
 0x710   :  { %3290 = vperm.xlu1 %4791, %v3092_v60   ;;  %3601 = vrot.lane.b32.xlu0 %v7154_v26, %s4952_s0  ;;  %v7242_v60 = vmul.f32 %v4873_v7, %v10252_v25 }
 0x714   :  { %3300 = vperm.xlu1 %4791, %v3094_v9   ;;  %3607 = vrot.lane.b32.xlu0 %v7163_v47, %s4952_s0 }
 0x718   :  { %3310 = vperm.xlu1 %4791, %v3096_v14   ;;  %3613 = vrot.lane.b32.xlu0 %v7172_v3, %s4952_s0  ;;  %v7251_v14 = vmul.f32 %v4874_v2, %v10255_v38 }
 0x71b   :  { %v7244_v36 = vpop.permute.xlu0 %3105 }
 0x71c   :  { %3320 = vperm.xlu1 %4791, %v3098_v29   ;;  %3619 = vrot.lane.b32.xlu0 %v7181_v44, %s4952_s0  ;;  %10253 = vst [vmem:[#allocation192_spill] sm:$0xff] %v7244_v36 }
 0x720   :  { %3330 = vperm.xlu1 %4791, %v3100_v59   ;;  %3625 = vrot.lane.b32.xlu0 %v7192_v33, %s4952_s0 }
 0x724   :  { %3340 = vperm.xlu1 %4791, %v3102_v62  }
 0x728   :  { %3586 = vrot.lane.b32.xlu1 %v7203_v30, %s4952_s0 }
 0x729   :  { %4792 = vset.pattern.permute.xlu1 %v10244_v39 }
 0x72c   :  { %3592 = vrot.lane.b32.xlu1 %v7210_v40, %s4952_s0 }
 0x730   :  { %3598 = vrot.lane.b32.xlu1 %v7216_v35, %s4952_s0 }
 0x734   :  { %3604 = vrot.lane.b32.xlu1 %v7223_v63, %s4952_s0 }
 0x738   :  { %3610 = vrot.lane.b32.xlu1 %v7230_v56, %s4952_s0 }
 0x73c   :  { %3616 = vrot.lane.b32.xlu1 %v7235_v19, %s4952_s0 }
 0x73f   :  { %v7246_v9 = vpop.permute.xlu1 %3110 }
 0x740   :  { %10254 = vst [vmem:[#allocation191_spill] sm:$0xff] %v7246_v9  ;;  %3622 = vrot.lane.b32.xlu1 %v7242_v60, %s4952_s0 }
 0x743   :  { %v7253_v15 = vpop.permute.xlu1 %3115  ;;  %v7255_v52 = vpop.permute.xlu0 %3120 }
 0x744   :  { %10256 = vst [vmem:[#allocation196_spill] sm:$0xff] %v7253_v15  ;;  %3628 = vrot.lane.b32.xlu1 %v7251_v14, %s4952_s0 }
 0x747   :  { %v7259_v29 = vpop.permute.xlu1 %3125  ;;  %v7261_v50 = vpop.permute.xlu0 %3130 }
 0x748   :  { %10257 = vst [vmem:[#allocation185_spill] sm:$0xff] %v7259_v29  ;;  %10258 = vst [vmem:[#allocation189_spill] sm:$0xff] %v7261_v50 }
 0x74b   :  { %v7263_v59 = vpop.permute.xlu1 %3135  ;;  %v7265_v23 = vpop.permute.xlu0 %3140 }
 0x74c   :  { %10259 = vst [vmem:[#allocation187_spill] sm:$0xff] %v7263_v59  ;;  %10260 = vst [vmem:[#allocation194_spill] sm:$0xff] %v7265_v23 }
 0x74f   :  { %v7267_v8 = vpop.permute.xlu1 %3145  ;;  %v7269_v62 = vpop.permute.xlu0 %3150 }
 0x750   :  { %10261 = vst [vmem:[#allocation193_spill] sm:$0xff] %v7267_v8  ;;  %10262 = vst [vmem:[#allocation197_spill] sm:$0xff] %v7269_v62 }
 0x753   :  { %v7271_v46 = vpop.permute.xlu1 %3155  ;;  %v7273_v54 = vpop.permute.xlu0 %3160 }
 0x754   :  { %10263 = vst [vmem:[#allocation126_spill] sm:$0xff] %v7271_v46  ;;  %10264 = vst [vmem:[#allocation121_spill] sm:$0xff] %v7273_v54 }
 0x757   :  { %v7275_v42 = vpop.permute.xlu1 %3165  ;;  %v7277_v39 = vpop.permute.xlu0 %3170 }
 0x758   :  { %10265 = vst [vmem:[#allocation115_spill] sm:$0xff] %v7275_v42  ;;  %10266 = vst [vmem:[#allocation119_spill] sm:$0xff] %v7277_v39 }
 0x75b   :  { %v7279_v5 = vpop.permute.xlu1 %3175  ;;  %v7281_v11 = vpop.permute.xlu0 %3180 }
 0x75c   :  { %10267 = vst [vmem:[#allocation117_spill] sm:$0xff] %v7279_v5  ;;  %10268 = vst [vmem:[#allocation122_spill] sm:$0xff] %v7281_v11 }
 0x75f   :  { %v7283_v28 = vpop.permute.xlu1 %3199  ;;  %v7285_v43 = vpop.permute.xlu0 %3201 }
 0x760   :  { %10269 = vst [vmem:[#allocation116_spill] sm:$0xff] %v7283_v28  ;;  %10270 = vst [vmem:[#allocation118_spill] sm:$0xff] %v7285_v43  ;;  %v3840_v28 = vmul.f32 2.0, %v7203_v30 }
 0x763   :  { %v7287_v58 = vpop.permute.xlu1 %3203  ;;  %v7289_v53 = vpop.permute.xlu0 %3205 }
 0x767   :  { %v7291_v24 = vpop.permute.xlu1 %3207  ;;  %v7293_v4 = vpop.permute.xlu0 %3209 }
 0x768   :  { %10271 = vst [vmem:[#allocation128_spill] sm:$0xff] %v7291_v24  ;;  %10272 = vst [vmem:[#allocation131_spill] sm:$0xff] %v7293_v4 }
 0x76b   :  { %v7295_v7 = vpop.permute.xlu1 %3211  ;;  %v7297_v25 = vpop.permute.xlu0 %3213 }
 0x76c   :  { %10273 = vst [vmem:[#allocation133_spill] sm:$0xff] %v7295_v7  ;;  %10274 = vst [vmem:[#allocation134_spill] sm:$0xff] %v7297_v25 }
 0x76f   :  { %v7299_v2 = vpop.permute.xlu1 %3215  ;;  %v7301_v38 = vpop.permute.xlu0 %3217 }
 0x770   :  { %10275 = vst [vmem:[#allocation136_spill] sm:$0xff] %v7299_v2  ;;  %10276 = vst [vmem:[#allocation138_spill] sm:$0xff] %v7301_v38 }
 0x773   :  { %v7303_v5 = vpop.permute.xlu1 %3219  ;;  %v7305_v42 = vpop.permute.xlu0 %3221 }
 0x774   :  { %10277 = vst [vmem:[#allocation139_spill] sm:$0xff] %v7303_v5  ;;  %10278 = vst [vmem:[#allocation141_spill] sm:$0xff] %v7305_v42 }
 0x777   :  { %v7307_v11 = vpop.permute.xlu1 %3223  ;;  %v7309_v39 = vpop.permute.xlu0 %3225 }
 0x778   :  { %10279 = vst [vmem:[#allocation144_spill] sm:$0xff] %v7307_v11  ;;  %10280 = vst [vmem:[#allocation198_spill] sm:$0xff] %v7309_v39 }
 0x77b   :  { %v7311_v54 = vpop.permute.xlu1 %3227  ;;  %v7313_v46 = vpop.permute.xlu0 %3229 }
 0x77c   :  { %10281 = vst [vmem:[#allocation199_spill] sm:$0xff] %v7311_v54  ;;  %10282 = vst [vmem:[#allocation200_spill] sm:$0xff] %v7313_v46 }
 0x77f   :  { %v7315_v62 = vpop.permute.xlu1 %3265  ;;  %v3584_v8 = vpop.permute.xlu0 %3583 }
 0x780   :  { %10283 = vst [vmem:[#allocation201_spill] sm:$0xff] %v7315_v62  ;;  %v3585_v2 = vsel %vm76_vm0, %v3584_v8, %v7130_v45 }
 0x781   :  { %3631 = vrot.lane.b32.xlu0 %v3585_v2, %s4952_s0 }
 0x783   :  { %v7320_v38 = vpop.permute.xlu1 %3275  ;;  %v3590_v5 = vpop.permute.xlu0 %3589 }
 0x784   :  { %10284 = vst [vmem:[#allocation202_spill] sm:$0xff] %v7320_v38  ;;  %v3591_v11 = vsel %vm76_vm0, %v3590_v5, %v7136_v1 }
 0x785   :  { %3635 = vrot.lane.b32.xlu0 %v3591_v11, %s4952_s0 }
 0x787   :  { %v7325_v39 = vpop.permute.xlu1 %3280  ;;  %v3596_v54 = vpop.permute.xlu0 %3595 }
 0x788   :  { %v3597_v46 = vsel %vm76_vm0, %v3596_v54, %v7145_v17 }
 0x789   :  { %3639 = vrot.lane.b32.xlu0 %v3597_v46, %s4952_s0 }
 0x78b   :  { %v7330_v42 = vpop.permute.xlu1 %3290  ;;  %v3602_v8 = vpop.permute.xlu0 %3601 }
 0x78c   :  { %10285 = vst [vmem:[#allocation203_spill] sm:$0xff] %v7330_v42  ;;  %v3603_v2 = vsel %vm76_vm0, %v3602_v8, %v7154_v26 }
 0x78d   :  { %3643 = vrot.lane.b32.xlu0 %v3603_v2, %s4952_s0 }
 0x78f   :  { %v7335_v23 = vpop.permute.xlu1 %3300  ;;  %v3608_v5 = vpop.permute.xlu0 %3607 }
 0x790   :  { %10286 = vst [vmem:[#allocation204_spill] sm:$0xff] %v7335_v23  ;;  %v3609_v11 = vsel %vm76_vm0, %v3608_v5, %v7163_v47 }
 0x791   :  { %3647 = vrot.lane.b32.xlu0 %v3609_v11, %s4952_s0 }
 0x793   :  { %v7340_v25 = vpop.permute.xlu1 %3310  ;;  %v3614_v54 = vpop.permute.xlu0 %3613 }
 0x794   :  { %10287 = vst [vmem:[#allocation205_spill] sm:$0xff] %v7340_v25  ;;  %v3615_v46 = vsel %vm76_vm0, %v3614_v54, %v7172_v3 }
 0x795   :  { %3651 = vrot.lane.b32.xlu0 %v3615_v46, %s4952_s0 }
 0x797   :  { %v7345_v42 = vpop.permute.xlu1 %3320  ;;  %v3620_v8 = vpop.permute.xlu0 %3619 }
 0x798   :  { %10288 = vst [vmem:[#allocation206_spill] sm:$0xff] %v7345_v42  ;;  %v3621_v2 = vsel %vm76_vm0, %v3620_v8, %v7181_v44 }
 0x799   :  { %3655 = vrot.lane.b32.xlu0 %v3621_v2, %s4952_s0 }
 0x79b   :  { %v7350_v23 = vpop.permute.xlu1 %3330  ;;  %v3626_v5 = vpop.permute.xlu0 %3625 }
 0x79c   :  { %10289 = vst [vmem:[#allocation207_spill] sm:$0xff] %v7350_v23  ;;  %v3627_v11 = vsel %vm76_vm0, %v3626_v5, %v7192_v33 }
 0x79d   :  { %3659 = vrot.lane.b32.xlu0 %v3627_v11, %s4952_s0 }
 0x79f   :  { %v7355_v25 = vpop.permute.xlu1 %3340 }
 0x7a0   :  { %10290 = vst [vmem:[#allocation208_spill] sm:$0xff] %v7355_v25 }
 0x7a1   :  { %3695 = vrot.lane.b32.xlu0 %v7130_v45, %s4953_s1 }
 0x7a3   :  { %v3587_v54 = vpop.permute.xlu1 %3586 }
 0x7a4   :  { %v3588_v46 = vsel %vm76_vm0, %v3587_v54, %v7203_v30 }
 0x7a5   :  { %3633 = vrot.lane.b32.xlu1 %v3588_v46, %s4952_s0  ;;  %3699 = vrot.lane.b32.xlu0 %v7136_v1, %s4953_s1 }
 0x7a7   :  { %v3593_v8 = vpop.permute.xlu1 %3592 }
 0x7a8   :  { %v3594_v2 = vsel %vm76_vm0, %v3593_v8, %v7210_v40 }
 0x7a9   :  { %3637 = vrot.lane.b32.xlu1 %v3594_v2, %s4952_s0  ;;  %3703 = vrot.lane.b32.xlu0 %v7145_v17, %s4953_s1 }
 0x7ab   :  { %v3599_v5 = vpop.permute.xlu1 %3598 }
 0x7ac   :  { %v3600_v11 = vsel %vm76_vm0, %v3599_v5, %v7216_v35 }
 0x7ad   :  { %3641 = vrot.lane.b32.xlu1 %v3600_v11, %s4952_s0  ;;  %3707 = vrot.lane.b32.xlu0 %v7154_v26, %s4953_s1 }
 0x7af   :  { %v3605_v54 = vpop.permute.xlu1 %3604 }
 0x7b0   :  { %v3606_v46 = vsel %vm76_vm0, %v3605_v54, %v7223_v63 }
 0x7b1   :  { %3645 = vrot.lane.b32.xlu1 %v3606_v46, %s4952_s0  ;;  %3711 = vrot.lane.b32.xlu0 %v7163_v47, %s4953_s1 }
 0x7b3   :  { %v3611_v8 = vpop.permute.xlu1 %3610 }
 0x7b4   :  { %v3612_v2 = vsel %vm76_vm0, %v3611_v8, %v7230_v56 }
 0x7b5   :  { %3649 = vrot.lane.b32.xlu1 %v3612_v2, %s4952_s0  ;;  %3715 = vrot.lane.b32.xlu0 %v7172_v3, %s4953_s1 }
 0x7b7   :  { %v3617_v5 = vpop.permute.xlu1 %3616 }
 0x7b8   :  { %v3618_v11 = vsel %vm76_vm0, %v3617_v5, %v7235_v19 }
 0x7b9   :  { %3653 = vrot.lane.b32.xlu1 %v3618_v11, %s4952_s0  ;;  %3719 = vrot.lane.b32.xlu0 %v7181_v44, %s4953_s1 }
 0x7bb   :  { %v3623_v54 = vpop.permute.xlu1 %3622 }
 0x7bc   :  { %v3624_v46 = vsel %vm76_vm0, %v3623_v54, %v7242_v60 }
 0x7bd   :  { %3657 = vrot.lane.b32.xlu1 %v3624_v46, %s4952_s0  ;;  %3723 = vrot.lane.b32.xlu0 %v7192_v33, %s4953_s1 }
 0x7bf   :  { %v3629_v8 = vpop.permute.xlu1 %3628 }
 0x7c0   :  { %v3630_v2 = vsel %vm76_vm0, %v3629_v8, %v7251_v14 }
 0x7c1   :  { %3661 = vrot.lane.b32.xlu1 %v3630_v2, %s4952_s0 }
 0x7c5   :  { %3697 = vrot.lane.b32.xlu1 %v7203_v30, %s4953_s1 }
 0x7c9   :  { %3701 = vrot.lane.b32.xlu1 %v7210_v40, %s4953_s1 }
 0x7cd   :  { %3705 = vrot.lane.b32.xlu1 %v7216_v35, %s4953_s1 }
 0x7d1   :  { %3709 = vrot.lane.b32.xlu1 %v7223_v63, %s4953_s1 }
 0x7d5   :  { %3713 = vrot.lane.b32.xlu1 %v7230_v56, %s4953_s1 }
 0x7d9   :  { %3717 = vrot.lane.b32.xlu1 %v7235_v19, %s4953_s1 }
 0x7dd   :  { %3721 = vrot.lane.b32.xlu1 %v7242_v60, %s4953_s1 }
 0x7e1   :  { %3725 = vrot.lane.b32.xlu1 %v7251_v14, %s4953_s1 }
 0x7f3   :  { %v3632_v5 = vpop.permute.xlu0 %3631 }
 0x7f4   :  { %v7415_v11 = vsel %vm76_vm0, %v3632_v5, %v7130_v45 }
 0x7f5   :  { %3775 = vrot.lane.b32.xlu0 %v7415_v11, %s4958_s23 }
 0x7f7   :  { %v3636_v54 = vpop.permute.xlu0 %3635 }
 0x7f8   :  { %v7421_v46 = vsel %vm76_vm0, %v3636_v54, %v7136_v1 }
 0x7f9   :  { %10291 = vst [vmem:[#allocation209_spill] sm:$0xff] %v7421_v46  ;;  %3779 = vrot.lane.b32.xlu0 %v7421_v46, %s4958_s23 }
 0x7fb   :  { %v3640_v8 = vpop.permute.xlu0 %3639 }
 0x7fc   :  { %v7427_v2 = vsel %vm76_vm0, %v3640_v8, %v7145_v17 }
 0x7fd   :  { %10292 = vst [vmem:[#allocation210_spill] sm:$0xff] %v7427_v2  ;;  %3783 = vrot.lane.b32.xlu0 %v7427_v2, %s4958_s23 }
 0x7ff   :  { %v3644_v5 = vpop.permute.xlu0 %3643 }
 0x800   :  { %v7433_v25 = vsel %vm76_vm0, %v3644_v5, %v7154_v26 }
 0x801   :  { %10293 = vst [vmem:[#allocation211_spill] sm:$0xff] %v7433_v25  ;;  %3787 = vrot.lane.b32.xlu0 %v7433_v25, %s4958_s23 }
 0x803   :  { %v3648_v54 = vpop.permute.xlu0 %3647 }
 0x804   :  { %v7439_v46 = vsel %vm76_vm0, %v3648_v54, %v7163_v47 }
 0x805   :  { %10294 = vst [vmem:[#allocation212_spill] sm:$0xff] %v7439_v46  ;;  %3791 = vrot.lane.b32.xlu0 %v7439_v46, %s4958_s23 }
 0x807   :  { %v3652_v8 = vpop.permute.xlu0 %3651 }
 0x808   :  { %v7445_v2 = vsel %vm76_vm0, %v3652_v8, %v7172_v3  ;;  %v3839_v8 = vmul.f32 2.0, %v7130_v45 }
 0x809   :  { %10295 = vst [vmem:[#allocation213_spill] sm:$0xff] %v7445_v2  ;;  %3795 = vrot.lane.b32.xlu0 %v7445_v2, %s4958_s23  ;;  %v3841_v2 = vmul.f32 2.0, %v7136_v1 }
 0x80b   :  { %v3656_v5 = vpop.permute.xlu0 %3655 }
 0x80c   :  { %v7451_v25 = vsel %vm76_vm0, %v3656_v5, %v7181_v44 }
 0x80d   :  { %10296 = vst [vmem:[#allocation214_spill] sm:$0xff] %v7451_v25  ;;  %3799 = vrot.lane.b32.xlu0 %v7451_v25, %s4958_s23 }
 0x80f   :  { %v3660_v54 = vpop.permute.xlu0 %3659 }
 0x810   :  { %v7457_v46 = vsel %vm76_vm0, %v3660_v54, %v7192_v33  ;;  %v3843_v54 = vmul.f32 2.0, %v7145_v17 }
 0x811   :  { %10297 = vst [vmem:[#allocation215_spill] sm:$0xff] %v7457_v46  ;;  %3803 = vrot.lane.b32.xlu0 %v7457_v46, %s4958_s23 }
 0x813   :  { %v7527_v10 = vpop.permute.xlu0 %3695 }
 0x815   :  { %3871 = vrot.lane.b32.xlu0 %v3839_v8, %s4955_s21 }
 0x817   :  { %v3634_v23 = vpop.permute.xlu1 %3633  ;;  %v7535_v0 = vpop.permute.xlu0 %3699 }
 0x818   :  { %v7466_v5 = vsel %vm76_vm0, %v3634_v23, %v7203_v30  ;;  %v3845_v23 = vmul.f32 2.0, %v7154_v26  ;;  %10298 = vst [vmem:[#allocation216_spill] sm:$0xff] %v7535_v0 }
 0x819   :  { %3777 = vrot.lane.b32.xlu1 %v7466_v5, %s4958_s23  ;;  %3875 = vrot.lane.b32.xlu0 %v3841_v2, %s4955_s21 }
 0x81b   :  { %v3638_v25 = vpop.permute.xlu1 %3637  ;;  %v7540_v61 = vpop.permute.xlu0 %3703 }
 0x81c   :  { %v7474_v46 = vsel %vm76_vm0, %v3638_v25, %v7210_v40  ;;  %v3847_v25 = vmul.f32 2.0, %v7163_v47  ;;  %10299 = vst [vmem:[#allocation217_spill] sm:$0xff] %v7540_v61 }
 0x81d   :  { %3781 = vrot.lane.b32.xlu1 %v7474_v46, %s4958_s23  ;;  %3879 = vrot.lane.b32.xlu0 %v3843_v54, %s4955_s21 }
 0x81f   :  { %v3642_v42 = vpop.permute.xlu1 %3641  ;;  %v7548_v0 = vpop.permute.xlu0 %3707 }
 0x820   :  { %v7482_v59 = vsel %vm76_vm0, %v3642_v42, %v7216_v35  ;;  %v3849_v42 = vmul.f32 2.0, %v7172_v3  ;;  %10300 = vst [vmem:[#allocation218_spill] sm:$0xff] %v7548_v0 }
 0x821   :  { %3785 = vrot.lane.b32.xlu1 %v7482_v59, %s4958_s23  ;;  %3883 = vrot.lane.b32.xlu0 %v3845_v23, %s4955_s21 }
 0x823   :  { %v3646_v7 = vpop.permute.xlu1 %3645  ;;  %v7553_v61 = vpop.permute.xlu0 %3711 }
 0x824   :  { %v7490_v50 = vsel %vm76_vm0, %v3646_v7, %v7223_v63  ;;  %v3851_v7 = vmul.f32 2.0, %v7181_v44  ;;  %10301 = vst [vmem:[#allocation219_spill] sm:$0xff] %v7553_v61 }
 0x825   :  { %3789 = vrot.lane.b32.xlu1 %v7490_v50, %s4958_s23  ;;  %3887 = vrot.lane.b32.xlu0 %v3847_v25, %s4955_s21 }
 0x827   :  { %v3650_v4 = vpop.permute.xlu1 %3649  ;;  %v7559_v31 = vpop.permute.xlu0 %3715 }
 0x828   :  { %v7498_v29 = vsel %vm76_vm0, %v3650_v4, %v7230_v56  ;;  %v3853_v4 = vmul.f32 2.0, %v7192_v33  ;;  %10302 = vst [vmem:[#allocation220_spill] sm:$0xff] %v7559_v31 }
 0x829   :  { %3793 = vrot.lane.b32.xlu1 %v7498_v29, %s4958_s23  ;;  %3891 = vrot.lane.b32.xlu0 %v3849_v42, %s4955_s21 }
 0x82b   :  { %v3654_v24 = vpop.permute.xlu1 %3653 }
 0x82c   :  { %v7506_v9 = vsel %vm76_vm0, %v3654_v24, %v7235_v19 }
 0x82d   :  { %3797 = vrot.lane.b32.xlu1 %v7506_v9, %s4958_s23  ;;  %3895 = vrot.lane.b32.xlu0 %v3851_v7, %s4955_s21 }
 0x82f   :  { %v3658_v43 = vpop.permute.xlu1 %3657 }
 0x830   :  { %v7514_v62 = vsel %vm76_vm0, %v3658_v43, %v7242_v60  ;;  %v3842_v43 = vmul.f32 2.0, %v7210_v40 }
 0x831   :  { %3801 = vrot.lane.b32.xlu1 %v7514_v62, %s4958_s23  ;;  %3899 = vrot.lane.b32.xlu0 %v3853_v4, %s4955_s21 }
 0x833   :  { %v3662_v36 = vpop.permute.xlu1 %3661 }
 0x834   :  { %v7521_v24 = vsel %vm76_vm0, %v3662_v36, %v7251_v14  ;;  %v3844_v36 = vmul.f32 2.0, %v7216_v35 }
 0x835   :  { %3805 = vrot.lane.b32.xlu1 %v7521_v24, %s4958_s23  ;;  %3935 = vrot.lane.b32.xlu0 %v3839_v8, %s4956_s22  ;;  %v3846_v8 = vmul.f32 2.0, %v7223_v63 }
 0x837   :  { %v3698_v0 = vpop.permute.xlu1 %3697 }
 0x839   :  { %3873 = vrot.lane.b32.xlu1 %v3840_v28, %s4955_s21  ;;  %3939 = vrot.lane.b32.xlu0 %v3841_v2, %s4956_s22  ;;  %v3848_v2 = vmul.f32 2.0, %v7230_v56 }
 0x83b   :  { %v3702_v61 = vpop.permute.xlu1 %3701 }
 0x83d   :  { %3877 = vrot.lane.b32.xlu1 %v3842_v43, %s4955_s21  ;;  %3943 = vrot.lane.b32.xlu0 %v3843_v54, %s4956_s22  ;;  %v3850_v54 = vmul.f32 2.0, %v7235_v19 }
 0x841   :  { %3881 = vrot.lane.b32.xlu1 %v3844_v36, %s4955_s21  ;;  %3947 = vrot.lane.b32.xlu0 %v3845_v23, %s4956_s22  ;;  %v3852_v23 = vmul.f32 2.0, %v7242_v60 }
 0x845   :  { %3885 = vrot.lane.b32.xlu1 %v3846_v8, %s4955_s21  ;;  %3951 = vrot.lane.b32.xlu0 %v3847_v25, %s4956_s22  ;;  %v3854_v25 = vmul.f32 2.0, %v7251_v14 }
 0x849   :  { %3889 = vrot.lane.b32.xlu1 %v3848_v2, %s4955_s21  ;;  %3955 = vrot.lane.b32.xlu0 %v3849_v42, %s4956_s22  ;;  %v7562_v42 = vpop.permute.xlu0 %3719 }
 0x84a   :  { %10303 = vst [vmem:[#allocation221_spill] sm:$0xff] %v7562_v42 }
 0x84d   :  { %3893 = vrot.lane.b32.xlu1 %v3850_v54, %s4955_s21  ;;  %3959 = vrot.lane.b32.xlu0 %v3851_v7, %s4956_s22  ;;  %v7566_v7 = vpop.permute.xlu0 %3723 }
 0x84e   :  { %10304 = vst [vmem:[#allocation222_spill] sm:$0xff] %v7566_v7 }
 0x851   :  { %3897 = vrot.lane.b32.xlu1 %v3852_v23, %s4955_s21  ;;  %3963 = vrot.lane.b32.xlu0 %v3853_v4, %s4956_s22  ;;  %v3706_v4 = vpop.permute.xlu1 %3705 }
 0x855   :  { %3901 = vrot.lane.b32.xlu1 %v3854_v25, %s4955_s21 }
 0x859   :  { %3937 = vrot.lane.b32.xlu1 %v3840_v28, %s4956_s22  ;;  %v3710_v28 = vpop.permute.xlu1 %3709 }
 0x85d   :  { %3941 = vrot.lane.b32.xlu1 %v3842_v43, %s4956_s22 }
 0x861   :  { %3945 = vrot.lane.b32.xlu1 %v3844_v36, %s4956_s22  ;;  %v3714_v36 = vpop.permute.xlu1 %3713 }
 0x865   :  { %3949 = vrot.lane.b32.xlu1 %v3846_v8, %s4956_s22  ;;  %v3718_v7 = vpop.permute.xlu1 %3717 }
 0x867   :  { %v7569_v22 = vpop.permute.xlu0 %3775 }
 0x869   :  { %3953 = vrot.lane.b32.xlu1 %v3848_v2, %s4956_s22 }
 0x86b   :  { %v7572_v31 = vpop.permute.xlu0 %3779 }
 0x86c   :  { %10305 = vst [vmem:[#allocation223_spill] sm:$0xff] %v7572_v31  ;;  %v3722_v31 = vpop.permute.xlu1 %3721 }
 0x86d   :  { %3957 = vrot.lane.b32.xlu1 %v3850_v54, %s4956_s22 }
 0x86f   :  { %v7575_v42 = vpop.permute.xlu0 %3783 }
 0x870   :  { %10306 = vst [vmem:[#allocation224_spill] sm:$0xff] %v7575_v42  ;;  %v3726_v54 = vpop.permute.xlu1 %3725 }
 0x871   :  { %3961 = vrot.lane.b32.xlu1 %v3852_v23, %s4956_s22  ;;  %v3744_v23 = vadd.f32 %v3698_v0, %v7466_v5  ;;  %v3752_v0 = vadd.f32 %v3714_v36, %v7498_v29 }
 0x873   :  { %v7578_v43 = vpop.permute.xlu0 %3787 }
 0x874   :  { %10307 = vst [vmem:[#allocation225_spill] sm:$0xff] %v7578_v43 }
 0x875   :  { %3965 = vrot.lane.b32.xlu1 %v3854_v25, %s4956_s22  ;;  %v3746_v25 = vadd.f32 %v3702_v61, %v7474_v46  ;;  %v3754_v61 = vadd.f32 %v3718_v7, %v7506_v9 }
 0x877   :  { %v7581_v8 = vpop.permute.xlu0 %3791 }
 0x878   :  { %10308 = vst [vmem:[#allocation226_spill] sm:$0xff] %v7581_v8 }
 0x87b   :  { %v7583_v48 = vpop.permute.xlu0 %3795 }
 0x87c   :  { %10309 = vst [vmem:[#allocation227_spill] sm:$0xff] %v7583_v48 }
 0x87f   :  { %v7585_v2 = vpop.permute.xlu0 %3799 }
 0x880   :  { %10310 = vst [vmem:[#allocation228_spill] sm:$0xff] %v7585_v2  ;;  %v3748_v2 = vadd.f32 %v3706_v4, %v7482_v59  ;;  %v3756_v59 = vadd.f32 %v3722_v31, %v7514_v62 }
 0x883   :  { %v7587_v18 = vpop.permute.xlu0 %3803 }
 0x884   :  { %10311 = vst [vmem:[#allocation229_spill] sm:$0xff] %v7587_v18  ;;  %v3750_v18 = vadd.f32 %v3710_v28, %v7490_v50 }
 0x887   :  { %v3872_v55 = vpop.permute.xlu0 %3871 }
 0x888   :  { %v3919_v42 = vadd.f32 %v3872_v55, %v7130_v45 }
 0x88a   :  { %4001 = vperm.xlu0 %4783, %v3919_v42  }
 0x88b   :  { %v3778_v43 = vpop.permute.xlu1 %3777 }
 0x88c   :  { %v7591_v27 = vadd.f32 %v3778_v43, %v3744_v23  ;;  %v3876_v43 = vpop.permute.xlu0 %3875 }
 0x88d   :  { %v3921_v9 = vadd.f32 %v3876_v43, %v7136_v1 }
 0x88f   :  { %v3782_v8 = vpop.permute.xlu1 %3781 }
 0x890   :  { %v7594_v16 = vadd.f32 %v3782_v8, %v3746_v25  ;;  %v3880_v50 = vpop.permute.xlu0 %3879 }
 0x891   :  { %v3923_v62 = vadd.f32 %v3880_v50, %v7145_v17 }
 0x893   :  { %v3786_v48 = vpop.permute.xlu1 %3785 }
 0x894   :  { %v7597_v38 = vadd.f32 %v3786_v48, %v3748_v2  ;;  %v3884_v36 = vpop.permute.xlu0 %3883 }
 0x897   :  { %v3790_v15 = vpop.permute.xlu1 %3789 }
 0x898   :  { %v7600_v55 = vadd.f32 %v3790_v15, %v3750_v18  ;;  %v3758_v18 = vadd.f32 %v3726_v54, %v7521_v24  ;;  %v3888_v31 = vpop.permute.xlu0 %3887  ;;  %v3925_v54 = vadd.f32 %v3884_v36, %v7154_v26 }
 0x89b   :  { %v3794_v5 = vpop.permute.xlu1 %3793 }
 0x89c   :  { %v7603_v42 = vadd.f32 %v3794_v5, %v3752_v0  ;;  %v3892_v5 = vpop.permute.xlu0 %3891 }
 0x89d   :  { %v3929_v50 = vadd.f32 %v3892_v5, %v7172_v3 }
 0x89f   :  { %v3798_v46 = vpop.permute.xlu1 %3797 }
 0x8a0   :  { %v7606_v8 = vadd.f32 %v3798_v46, %v3754_v61  ;;  %v3927_v46 = vadd.f32 %v3888_v31, %v7163_v47 }
 0x8a3   :  { %v3802_v48 = vpop.permute.xlu1 %3801 }
 0x8a4   :  { %v7609_v4 = vadd.f32 %v3802_v48, %v3756_v59  ;;  %v3896_v48 = vpop.permute.xlu0 %3895 }
 0x8a7   :  { %v3806_v15 = vpop.permute.xlu1 %3805 }
 0x8a8   :  { %v7612_v28 = vadd.f32 %v3806_v15, %v3758_v18 }
 0x8ab   :  { %v3874_v29 = vpop.permute.xlu1 %3873 }
 0x8ac   :  { %v3920_v2 = vadd.f32 %v3874_v29, %v7203_v30  ;;  %v3931_v29 = vadd.f32 %v3896_v48, %v7181_v44 }
 0x8ae   :  { %4006 = vperm.xlu1 %4792, %v3920_v2   ;;  %v3900_v2 = vpop.permute.xlu0 %3899 }
 0x8af   :  { %v3878_v7 = vpop.permute.xlu1 %3877 }
 0x8b0   :  { %v3922_v23 = vadd.f32 %v3878_v7, %v7210_v40  ;;  %v3933_v7 = vadd.f32 %v3900_v2, %v7192_v33  ;;  %v10317_v2 = vld [vmem:[#allocation19_spill] sm:$0xff] }
 0x8b2   :  { %4016 = vperm.xlu0 %4783, %v3922_v23   ;;  %4011 = vperm.xlu1 %4792, %v3921_v9  }
 0x8b3   :  { %v3882_v25 = vpop.permute.xlu1 %3881 }
 0x8b4   :  { %v3924_v24 = vadd.f32 %v3882_v25, %v7216_v35  ;;  %v3743_v25 = vadd.f32 %v7527_v10, %v7415_v11  ;;  %v10313_v11 = vld [vmem:[#allocation15_spill] sm:$0xff] }
 0x8b6   :  { %4026 = vperm.xlu0 %4783, %v3924_v24   ;;  %4021 = vperm.xlu1 %4792, %v3923_v62   ;;  %v3936_v62 = vpop.permute.xlu0 %3935 }
 0x8b7   :  { %v3886_v0 = vpop.permute.xlu1 %3885 }
 0x8b8   :  { %v3926_v61 = vadd.f32 %v3886_v0, %v7223_v63  ;;  %v10312_v0 = vld [vmem:[#allocation14_spill] sm:$0xff] }
 0x8b9   :  { %v478_v5 = vadd.f32 %v7199_v32, %v10312_v0  ;;  %v10314_v32 = vld [vmem:[#allocation16_spill] sm:$0xff] }
 0x8ba   :  { %4036 = vperm.xlu0 %4783, %v3926_v61   ;;  %4031 = vperm.xlu1 %4792, %v3925_v54   ;;  %v3823_v54 = vadd.f32 %v7569_v22, %v3743_v25  ;;  %v3983_v61 = vadd.f32 %v3936_v62, %v7130_v45  ;;  %v483_v48 = vadd.f32 %v7150_v21, %v10314_v32  ;;  %v4876_v25 = vld [vmem:[#allocation5 + $0x20] sm:$0xff]  ;;  %v10324_v32 = vld [vmem:[#allocation13_spill] sm:$0xff] }
 0x8bb   :  { %v3890_v43 = vpop.permute.xlu1 %3889 }
 0x8bc   :  { %v3928_v59 = vadd.f32 %v3890_v43, %v7230_v56  ;;  %v481_v43 = vadd.f32 %v7141_v49, %v10313_v11 }
 0x8be   :  { %4046 = vperm.xlu0 %4783, %v3928_v59   ;;  %4041 = vperm.xlu1 %4792, %v3927_v46   ;;  %v3940_v46 = vpop.permute.xlu0 %3939 }
 0x8bf   :  { %v3894_v18 = vpop.permute.xlu1 %3893  ;;  %v3985_v22 = vadd.f32 %v3940_v46, %v7136_v1  ;;  %v4878_v46 = vld [vmem:[#allocation5 + $0x40] sm:$0xff] }
 0x8c0   :  { %v3930_v15 = vadd.f32 %v3894_v18, %v7235_v19  ;;  %v10315_v18 = vld [vmem:[#allocation17_spill] sm:$0xff] }
 0x8c2   :  { %4056 = vperm.xlu0 %4783, %v3930_v15   ;;  %4051 = vperm.xlu1 %4792, %v3929_v50  }
 0x8c3   :  { %v3898_v36 = vpop.permute.xlu1 %3897 }
 0x8c4   :  { %v3932_v9 = vadd.f32 %v3898_v36, %v7242_v60 }
 0x8c6   :  { %4066 = vperm.xlu0 %4783, %v3932_v9   ;;  %4061 = vperm.xlu1 %4792, %v3931_v29   ;;  %v10316_v29 = vld [vmem:[#allocation18_spill] sm:$0xff] }
 0x8c7   :  { %v3902_v23 = vpop.permute.xlu1 %3901  ;;  %v487_v1 = vadd.f32 %v7168_v41, %v10316_v29  ;;  %v4875_v41 = vld [vmem:[#allocation5 + $0x8] sm:$0xff] }
 0x8c8   :  { %v3934_v31 = vadd.f32 %v3902_v23, %v7251_v14  ;;  %v10330_v29 = vld [vmem:[#allocation48_spill] sm:$0xff] }
 0x8ca   :  { %4076 = vperm.xlu0 %4783, %v3934_v31   ;;  %4071 = vperm.xlu1 %4792, %v3933_v7   ;;  %v10319_v31 = vld [vmem:[#allocation72_spill] sm:$0xff] }
 0x8cb   :  { %v7631_v24 = vpop.permute.xlu1 %3937 }
 0x8ce   :  { %4793 = vset.pattern.permute.xlu0 %v10032_v57  ;;  %4095 = vrot.lane.b32.xlu1 %v3823_v54, %s4959_s24  ;;  %v10320_v54 = vld [vmem:[#allocation11_spill] sm:$0xff] }
 0x8cf   :  { %660 = vperm.xlu0 %4793, %v478_v5   ;;  %4794 = vset.pattern.permute.xlu1 %v10032_v57  ;;  %v3942_v10 = vpop.permute.xlu1 %3941  ;;  %v485_v57 = vadd.f32 %v7159_v20, %v10315_v18  ;;  %v10318_v20 = vld [vmem:[#allocation20_spill] sm:$0xff]  ;;  %v10321_v5 = vld [vmem:[#allocation55_spill] sm:$0xff]  ;;  %v10327_v18 = vld [vmem:[#allocation58_spill] sm:$0xff] }
 0x8d0   :  { %v3986_v50 = vadd.f32 %v3942_v10, %v7210_v40  ;;  %v489_v40 = vadd.f32 %v7177_v51, %v10317_v2  ;;  %v10322_v10 = vld [vmem:[#allocation67_spill] sm:$0xff]  ;;  %v10332_v2 = vld [vmem:[#allocation73_spill] sm:$0xff] }
 0x8d1   :  { %v1335_v11 = vadd.f32 %v4878_v46, %v10322_v10  ;;  %v10341_v46 = vld [vmem:[#allocation42_spill] sm:$0xff] }
 0x8d2   :  { %4161 = vperm.xlu1 %4794, %v3983_v61  }
 0x8d3   :  { %675 = vperm.xlu0 %4793, %v481_v43   ;;  %v3946_v59 = vpop.permute.xlu1 %3945  ;;  %v4879_v43 = vld [vmem:[#allocation5 + $0x50] sm:$0xff] }
 0x8d4   :  { %v3988_v15 = vadd.f32 %v3946_v59, %v7216_v35  ;;  %v491_v35 = vadd.f32 %v7188_v37, %v10318_v20  ;;  %v4877_v37 = vld [vmem:[#allocation5 + $0x30] sm:$0xff] }
 0x8d5   :  { %v1333_v61 = vadd.f32 %v4877_v37, %v10321_v5  ;;  %v10340_v37 = vld [vmem:[#allocation25_spill] sm:$0xff] }
 0x8d6   :  { %4171 = vperm.xlu1 %4794, %v3985_v22   ;;  %v10323_v22 = vld [vmem:[#allocation71_spill] sm:$0xff] }
 0x8d7   :  { %685 = vperm.xlu0 %4793, %v483_v48   ;;  %v3950_v45 = vpop.permute.xlu1 %3949  ;;  %v1337_v59 = vadd.f32 %v4879_v43, %v10323_v22  ;;  %v10342_v43 = vld [vmem:[#allocation57_spill] sm:$0xff] }
 0x8d8   :  { %v3990_v36 = vadd.f32 %v3950_v45, %v7223_v63  ;;  %v1328_v63 = vadd.f32 %v4875_v41, %v10319_v31  ;;  %v10326_v45 = vld [vmem:[#allocation22_spill] sm:$0xff]  ;;  %v10335_v41 = vld [vmem:[#allocation49_spill] sm:$0xff]  ;;  %v10336_v31 = vld [vmem:[#allocation24_spill] sm:$0xff] }
 0x8da   :  { %4176 = vperm.xlu1 %4794, %v3986_v50   ;;  %v10325_v50 = vld [vmem:[#allocation47_spill] sm:$0xff] }
 0x8db   :  { %695 = vperm.xlu0 %4793, %v485_v57   ;;  %v3954_v49 = vpop.permute.xlu1 %3953  ;;  %v10328_v57 = vld [vmem:[#allocation30_spill] sm:$0xff] }
 0x8dc   :  { %v3992_v9 = vadd.f32 %v3954_v49, %v7230_v56  ;;  %v1331_v56 = vadd.f32 %v4876_v25, %v10320_v54  ;;  %v10337_v25 = vld [vmem:[#allocation69_spill] sm:$0xff] }
 0x8dd   :  { %v10338_v54 = vld [vmem:[#allocation129_spill] sm:$0xff] }
 0x8de   :  { %4186 = vperm.xlu1 %4794, %v3988_v15   ;;  %v10329_v15 = vld [vmem:[#allocation40_spill] sm:$0xff] }
 0x8df   :  { %705 = vperm.xlu0 %4793, %v487_v1   ;;  %v3958_v21 = vpop.permute.xlu1 %3957  ;;  %v10331_v1 = vld [vmem:[#allocation23_spill] sm:$0xff] }
 0x8e0   :  { %v3994_v23 = vadd.f32 %v3958_v21, %v7235_v19  ;;  %v72_v19 = vlaneseq  ;;  %v4881_v21 = vld [vmem:[#allocation5 + $0x70] sm:$0xff] }
 0x8e2   :  { %4196 = vperm.xlu1 %4794, %v3990_v36  }
 0x8e3   :  { %715 = vperm.xlu0 %4793, %v489_v40   ;;  %v3962_v7 = vpop.permute.xlu1 %3961  ;;  %v1341_v40 = vadd.f32 %v4881_v21, %v10332_v2  ;;  %v10352_v21 = vld [vmem:[#allocation51_spill] sm:$0xff]  ;;  %v10353_v2 = vld [vmem:[#allocation26_spill] sm:$0xff] }
 0x8e4   :  { %v3996_v62 = vadd.f32 %v3962_v7, %v7242_v60  ;;  %v7666_v60 = vand.u32 127, %v72_v19  ;;  %v10334_v7 = vld [vmem:[#allocation41_spill] sm:$0xff] }
 0x8e6   :  { %4206 = vperm.xlu1 %4794, %v3992_v9   ;;  %vm74_vm1 = vcmp.eq.s32.totalorder %v7666_v60, 0  ;;  %vm75_vm2 = vcmp.eq.s32.totalorder %v7666_v60, 15  ;;  %v10333_v9 = vld [vmem:[#allocation39_spill] sm:$0xff] }
 0x8e7   :  { %725 = vperm.xlu0 %4793, %v491_v35   ;;  %v3966_v51 = vpop.permute.xlu1 %3965  ;;  %v642_v36 = vsel %vm74_vm1, %v10331_v1, %v10330_v29  ;;  %v10351_v29 = vld [vmem:[#allocation77_spill] sm:$0xff] }
 0x8e8   :  { %v3998_v0 = vadd.f32 %v3966_v51, %v7251_v14  ;;  %v4880_v14 = vld [vmem:[#allocation5 + $0x60] sm:$0xff] }
 0x8e9   :  { %v1339_v48 = vadd.f32 %v4880_v14, %v10324_v32  ;;  %v10344_v14 = vld [vmem:[#allocation54_spill] sm:$0xff]  ;;  %v10345_v32 = vld [vmem:[#allocation124_spill] sm:$0xff] }
 0x8ea   :  { %4216 = vperm.xlu1 %4794, %v3994_v23   ;;  %v7700_v23 = vsel %vm75_vm2, %v10334_v7, %v642_v36  ;;  %v10355_v7 = vld [vmem:[#allocation108_spill] sm:$0xff] }
 0x8eb   :  { %1510 = vperm.xlu0 %4793, %v1328_v63   ;;  %v644_v63 = vsel %vm74_vm1, %v10336_v31, %v10335_v41  ;;  %v9869_v19 = vrot.slane %v7700_v23, 7 }
 0x8ec   :  { %v7721_v10 = vsel %vm75_vm2, %v10341_v46, %v644_v63  ;;  %v10356_v63 = vld [vmem:[#allocation52_spill] sm:$0xff]  ;;  %v10359_v46 = vld [vmem:[#allocation59_spill] sm:$0xff] }
 0x8ed   :  { %v9868_v36 = vrot.slane %v7721_v10, 7 }
 0x8ee   :  { %4226 = vperm.xlu1 %4794, %v3996_v62  }
 0x8ef   :  { %1525 = vperm.xlu0 %4793, %v1331_v56   ;;  %v2192_v56 = vadd.f32 %v10338_v54, %v10337_v25  ;;  %v10358_v54 = vld [vmem:[#allocation38_spill] sm:$0xff] }
 0x8f2   :  { %4236 = vperm.xlu1 %4794, %v3998_v0   ;;  %v10339_v0 = vld [vmem:[#allocation50_spill] sm:$0xff] }
 0x8f3   :  { %1535 = vperm.xlu0 %4793, %v1333_v61   ;;  %v646_v5 = vsel %vm74_vm1, %v10340_v37, %v10339_v0 }
 0x8f6   :  { %4101 = vrot.lane.b32.xlu1 %v7594_v16, %s4959_s24  ;;  %v640_v16 = vsel %vm74_vm1, %v10326_v45, %v10325_v50  ;;  %v10346_v50 = vld [vmem:[#allocation43_spill] sm:$0xff] }
 0x8f7   :  { %1545 = vperm.xlu0 %4793, %v1335_v11   ;;  %v736_v49 = vsel %vm75_vm2, %v10329_v15, %v640_v16  ;;  %v9867_v11 = vrot.slane %v7700_v23, 1  ;;  %v7734_v45 = vsel %vm75_vm2, %v10346_v50, %v646_v5  ;;  %v10350_v15 = vld [vmem:[#allocation93_spill] sm:$0xff]  ;;  %v10363_v50 = vld [vmem:[#allocation44_spill] sm:$0xff] }
 0x8f8   :  { %v786_v20 = vrot.slane %v736_v49, 7  ;;  %v833_v35 = vrot.slane %v736_v49, 1  ;;  %10347 = vst [vmem:[#allocation14_spill] sm:$0xff] %v7734_v45  ;;  %v1490_v1 = vsel %vm74_vm1, %v10351_v29, %v10350_v15  ;;  %v9865_v37 = vrot.slane %v7734_v45, 7 }
 0x8f9   :  { %v1586_v41 = vsel %vm75_vm2, %v10355_v7, %v1490_v1  ;;  %v9864_v29 = vrot.slane %v7734_v45, 1 }
 0x8fa   :  { %4105 = vrot.lane.b32.xlu1 %v7597_v38, %s4959_s24  ;;  %v639_v38 = vsel %vm74_vm1, %v10328_v57, %v10327_v18  ;;  %v872_v61 = vsel %vm830_vm3, %v833_v35, %v786_v20  ;;  %v10348_v18 = vld [vmem:[#allocation92_spill] sm:$0xff] }
 0x8fb   :  { %1555 = vperm.xlu0 %4793, %v1337_v59   ;;  %v10349_v57 = vld [vmem:[#allocation76_spill] sm:$0xff] }
 0x8fe   :  { %4109 = vrot.lane.b32.xlu1 %v7600_v55, %s4959_s24  ;;  %v735_v55 = vsel %vm75_vm2, %v10333_v9, %v639_v38  ;;  %v1489_v38 = vsel %vm74_vm1, %v10349_v57, %v10348_v18  ;;  %v10354_v9 = vld [vmem:[#allocation107_spill] sm:$0xff] }
 0x8ff   :  { %1565 = vperm.xlu0 %4793, %v1339_v48   ;;  %v758_v62 = vrot.slane %v735_v55, 1  ;;  %v785_v51 = vrot.slane %v735_v55, 7  ;;  %v2195_v48 = vadd.f32 %v10345_v32, %v10344_v14  ;;  %v10361_v14 = vld [vmem:[#allocation53_spill] sm:$0xff]  ;;  %v10362_v32 = vld [vmem:[#allocation130_spill] sm:$0xff] }
 0x901   :  { %v823_v59 = vsel %vm781_vm4, %v758_v62, %v785_v51  ;;  %v787_v16 = vsel %vm781_vm4, %v785_v51, %v786_v20  ;;  %v1585_v20 = vsel %vm75_vm2, %v10354_v9, %v1489_v38  ;;  %v10357_v51 = vld [vmem:[#allocation27_spill] sm:$0xff]  ;;  %v1635_v38 = vrot.slane %v1586_v41, 7 }
 0x902   :  { %4113 = vrot.lane.b32.xlu1 %v7603_v42, %s4959_s24  ;;  %v7708_v42 = vpop.permute.xlu0 %3943  ;;  %v650_v25 = vsel %vm74_vm1, %v10357_v51, %v10356_v63  ;;  %v881_v0 = vadd.f32 %v823_v59, %v735_v55  ;;  %v882_v5 = vadd.f32 %v787_v16, %v736_v49  ;;  %v1608_v57 = vrot.slane %v1585_v20, 1  ;;  %v10365_v49 = vld [vmem:[#allocation45_spill] sm:$0xff]  ;;  %v10369_v63 = vld [vmem:[#allocation68_spill] sm:$0xff] }
 0x903   :  { %1575 = vperm.xlu0 %4793, %v1341_v40   ;;  %v648_v40 = vsel %vm74_vm1, %v10353_v2, %v10352_v21  ;;  %v7787_v55 = vsel %vm75_vm2, %v10365_v49, %v650_v25  ;;  %v834_v15 = vsel %vm830_vm3, %v758_v62, %v833_v35  ;;  %v10367_v21 = vld [vmem:[#allocation46_spill] sm:$0xff]  ;;  %v10370_v51 = vld [vmem:[#allocation132_spill] sm:$0xff] }
 0x904   :  { %v7780_v18 = vsel %vm75_vm2, %v10363_v50, %v648_v40  ;;  %10366 = vst [vmem:[#allocation16_spill] sm:$0xff] %v7787_v55  ;;  %v897_v1 = vadd.f32 %v881_v0, %v834_v15  ;;  %v898_v7 = vadd.f32 %v882_v5, %v872_v61  ;;  %v2199_v25 = vadd.f32 %v10370_v51, %v10369_v63  ;;  %v10373_v51 = vld [vmem:[#allocation65_spill] sm:$0xff] }
 0x905   :  { %10364 = vst [vmem:[#allocation15_spill] sm:$0xff] %v7780_v18  ;;  %v9863_v40 = vrot.slane %v7780_v18, 7  ;;  %v9860_v9 = vrot.slane %v7780_v18, 1  ;;  %v9859_v35 = vrot.slane %v7787_v55, 7  ;;  %v9858_v62 = vrot.slane %v7787_v55, 1  ;;  %v10425_v55 = vld [vmem:[#allocation84_spill] sm:$0xff] }
 0x906   :  { %4117 = vrot.lane.b32.xlu1 %v7606_v8, %s4959_s24  ;;  %v10343_v8 = vld [vmem:[#allocation21_spill] sm:$0xff]  ;;  %v7758_v31 = vpop.permute.xlu0 %3947  ;;  %v914_v15 = vmul.f32 0.11111111, %v898_v7  ;;  %v10379_v7 = vld [vmem:[#allocation60_spill] sm:$0xff] }
 0x907   :  { %2374 = vperm.xlu0 %4793, %v2192_v56   ;;  %v637_v22 = vsel %vm74_vm1, %v10343_v8, %v10342_v43  ;;  %v10360_v43 = vld [vmem:[#allocation28_spill] sm:$0xff]  ;;  %v10440_v18 = vld [vmem:[#allocation89_spill] sm:$0xff] }
 0x908   :  { %v7768_v56 = vsel %vm75_vm2, %v10358_v54, %v637_v22  ;;  %v652_v8 = vsel %vm74_vm1, %v10360_v43, %v10359_v46  ;;  %v1634_v22 = vrot.slane %v1585_v20, 7  ;;  %v10371_v43 = vld [vmem:[#allocation35_spill] sm:$0xff] }
 0x909   :  { %v9870_v59 = vrot.slane %v7768_v56, 1  ;;  %v9871_v16 = vrot.slane %v7768_v56, 7  ;;  %v7796_v2 = vsel %vm75_vm2, %v10367_v21, %v652_v8  ;;  %v10372_v8 = vld [vmem:[#allocation29_spill] sm:$0xff] }
 0x90a   :  { %4121 = vrot.lane.b32.xlu1 %v7609_v4, %s4959_s24  ;;  %v9866_v4 = vrot.slane %v7721_v10, 1  ;;  %10368 = vst [vmem:[#allocation17_spill] sm:$0xff] %v7796_v2  ;;  %v7802_v54 = vpop.permute.xlu0 %3951  ;;  %v1672_v0 = vsel %vm781_vm4, %v1608_v57, %v1634_v22  ;;  %v1636_v46 = vsel %vm781_vm4, %v1634_v22, %v1635_v38  ;;  %v9862_v5 = vrot.slane %v7796_v2, 7 }
 0x90b   :  { %2389 = vperm.xlu0 %4793, %v2195_v48   ;;  %v2197_v48 = vadd.f32 %v10362_v32, %v10361_v14  ;;  %v7812_v14 = vsel %vm74_vm1, %v10372_v8, %v10371_v43  ;;  %v822_v61 = vsel %vm781_vm4, %v9870_v59, %v9871_v16  ;;  %v9861_v32 = vrot.slane %v7796_v2, 1  ;;  %v10404_v16 = vld [vmem:[#allocation91_spill] sm:$0xff]  ;;  %v10414_v2 = vld [vmem:[#allocation56_spill] sm:$0xff] }
 0x90c   :  { %v7833_v50 = vsel %vm830_vm3, %v9866_v4, %v9868_v36  ;;  %v7835_v22 = vmul.f32 0.11111111, %v897_v1  ;;  %v1729_v21 = vadd.f32 %v1672_v0, %v1585_v20  ;;  %v1730_v63 = vadd.f32 %v1636_v46, %v1586_v41  ;;  %v10380_v0 = vld [vmem:[#allocation31_spill] sm:$0xff]  ;;  %v10389_v4 = vld [vmem:[#allocation62_spill] sm:$0xff] }
 0x90d   :  { %v7845_v8 = vsel %vm830_vm3, %v9864_v29, %v9865_v37  ;;  %v7852_v1 = vsel %vm830_vm3, %v9860_v9, %v9863_v40  ;;  %v7859_v20 = vsel %vm830_vm3, %v9858_v62, %v9859_v35  ;;  %v7875_v46 = vsel %vm74_vm1, %v10380_v0, %v10379_v7  ;;  %v10385_v7 = vld [vmem:[#allocation106_spill] sm:$0xff]  ;;  %v10388_v29 = vld [vmem:[#allocation137_spill] sm:$0xff] }
 0x90e   :  { %4125 = vrot.lane.b32.xlu1 %v7612_v28, %s4959_s24  ;;  %v1681_v28 = vrot.slane %v1586_v41, 1  ;;  %10375 = vst [vmem:[#allocation18_spill] sm:$0xff] %v7845_v8  ;;  %10376 = vst [vmem:[#allocation19_spill] sm:$0xff] %v7852_v1  ;;  %v7862_v41 = vadd.f32 %v822_v61, %v7768_v56  ;;  %v7881_v35 = vpop.permute.xlu0 %3955  ;;  %v7885_v9 = vmul.f32 %v7835_v22, %v7835_v22  ;;  %v10392_v36 = vld [vmem:[#allocation34_spill] sm:$0xff]  ;;  %v10439_v8 = vld [vmem:[#allocation105_spill] sm:$0xff] }
 0x90f   :  { %2399 = vperm.xlu0 %4793, %v2197_v48   ;;  %v7826_v48 = vsel %vm830_vm3, %v9867_v11, %v9869_v19  ;;  %10377 = vst [vmem:[#allocation20_spill] sm:$0xff] %v7859_v20  ;;  %v10390_v11 = vld [vmem:[#allocation33_spill] sm:$0xff]  ;;  %v10416_v20 = vld [vmem:[#allocation96_spill] sm:$0xff] }
 0x910   :  { %v1682_v49 = vsel %vm830_vm3, %v1608_v57, %v1681_v28  ;;  %v7869_v57 = vsel %vm830_vm3, %v9861_v32, %v9862_v5  ;;  %v10383_v32 = vld [vmem:[#allocation61_spill] sm:$0xff]  ;;  %v10384_v5 = vld [vmem:[#allocation32_spill] sm:$0xff] }
 0x911   :  { %10378 = vst [vmem:[#allocation72_spill] sm:$0xff] %v7869_v57  ;;  %v1745_v61 = vadd.f32 %v1729_v21, %v1682_v49  ;;  %v7891_v40 = vsel %vm74_vm1, %v10384_v5, %v10383_v32  ;;  %v1720_v49 = vsel %vm830_vm3, %v1681_v28, %v1635_v38  ;;  %v4465_v21 = vmul.f32 2.0, %v7835_v22  ;;  %v10391_v32 = vld [vmem:[#allocation63_spill] sm:$0xff] }
 0x912   :  { %v7906_v5 = vsel %vm74_vm1, %v10390_v11, %v10389_v4  ;;  %v10394_v38 = vld [vmem:[#allocation95_spill] sm:$0xff]  ;;  %v10396_v11 = vld [vmem:[#allocation109_spill] sm:$0xff] }
 0x913   :  { %2409 = vperm.xlu0 %4793, %v2199_v25   ;;  %v10374_v25 = vld [vmem:[#allocation135_spill] sm:$0xff] }
 0x914   :  { %v2201_v43 = vadd.f32 %v10374_v25, %v10373_v51  ;;  %v10381_v51 = vld [vmem:[#allocation90_spill] sm:$0xff]  ;;  %v10395_v28 = vld [vmem:[#allocation79_spill] sm:$0xff] }
 0x915   :  { %v10382_v25 = vld [vmem:[#allocation74_spill] sm:$0xff] }
 0x916   :  { %v1487_v62 = vsel %vm74_vm1, %v10382_v25, %v10381_v51  ;;  %v1746_v51 = vadd.f32 %v1730_v63, %v1720_v49  ;;  %v10387_v25 = vld [vmem:[#allocation70_spill] sm:$0xff]  ;;  %v1492_v63 = vsel %vm74_vm1, %v10395_v28, %v10394_v38  ;;  %v10402_v28 = vld [vmem:[#allocation37_spill] sm:$0xff] }
 0x917   :  { %2419 = vperm.xlu0 %4793, %v2201_v43   ;;  %v7896_v0 = vsel %vm75_vm2, %v10385_v7, %v1487_v62  ;;  %v4466_v43 = vmul.f32 2.0, %v914_v15  ;;  %v2203_v37 = vadd.f32 %v10388_v29, %v10387_v25  ;;  %v7912_v62 = vsel %vm74_vm1, %v10392_v36, %v10391_v32  ;;  %v10398_v36 = vld [vmem:[#allocation64_spill] sm:$0xff]  ;;  %v10401_v38 = vld [vmem:[#allocation66_spill] sm:$0xff] }
 0x918   :  { %10386 = vst [vmem:[#allocation11_spill] sm:$0xff] %v7896_v0  ;;  %10393 = vst [vmem:[#allocation55_spill] sm:$0xff] %v7912_v62  ;;  %v7918_v7 = vmul.f32 %v914_v15, %v914_v15  ;;  %v1761_v25 = vmul.f32 0.11111111, %v1745_v61  ;;  %v7925_v4 = vsel %vm75_vm2, %v10396_v11, %v1492_v63  ;;  %v10399_v32 = vld [vmem:[#allocation36_spill] sm:$0xff]  ;;  %v7937_v59 = vsel %vm74_vm1, %v10402_v28, %v10401_v38  ;;  %v10405_v61 = vld [vmem:[#allocation75_spill] sm:$0xff] }
 0x919   :  { %10397 = vst [vmem:[#allocation67_spill] sm:$0xff] %v7925_v4  ;;  %v7931_v19 = vsel %vm74_vm1, %v10399_v32, %v10398_v36  ;;  %10403 = vst [vmem:[#allocation13_spill] sm:$0xff] %v7937_v59  ;;  %v7943_v29 = vsel %vm74_vm1, %v10405_v61, %v10404_v16  ;;  %v10407_v63 = vld [vmem:[#allocation97_spill] sm:$0xff]  ;;  %v10409_v49 = vld [vmem:[#allocation94_spill] sm:$0xff]  ;;  %v1762_v57 = vmul.f32 0.11111111, %v1746_v51 }
 0x91a   :  { %10400 = vst [vmem:[#allocation71_spill] sm:$0xff] %v7931_v19  ;;  %10406 = vst [vmem:[#allocation47_spill] sm:$0xff] %v7943_v29  ;;  %v10410_v36 = vld [vmem:[#allocation78_spill] sm:$0xff]  ;;  %v10415_v16 = vld [vmem:[#allocation140_spill] sm:$0xff]  ;;  %v7962_v29 = vpop.permute.xlu0 %3959  ;;  %v7999_v1 = vmul.f32 %v1761_v25, %v1761_v25 }
 0x91b   :  { %2429 = vperm.xlu0 %4793, %v2203_v37   ;;  %v10408_v37 = vld [vmem:[#allocation81_spill] sm:$0xff]  ;;  %v7953_v32 = vsel %vm74_vm1, %v10410_v36, %v10409_v49  ;;  %v10412_v38 = vld [vmem:[#allocation110_spill] sm:$0xff]  ;;  %v2205_v61 = vadd.f32 %v10415_v16, %v10414_v2  ;;  %v10417_v59 = vld [vmem:[#allocation80_spill] sm:$0xff] }
 0x91c   :  { %v1494_v11 = vsel %vm74_vm1, %v10408_v37, %v10407_v63  ;;  %10411 = vst [vmem:[#allocation22_spill] sm:$0xff] %v7953_v32  ;;  %v7968_v63 = vsel %vm74_vm1, %v10417_v59, %v10416_v20  ;;  %v10419_v37 = vld [vmem:[#allocation98_spill] sm:$0xff]  ;;  %v10423_v2 = vld [vmem:[#allocation83_spill] sm:$0xff]  ;;  %v10424_v32 = vld [vmem:[#allocation100_spill] sm:$0xff]  ;;  %v10427_v20 = vrot.slane %v7896_v0, 7 }
 0x91d   :  { %v7958_v28 = vsel %vm75_vm2, %v10412_v38, %v1494_v11  ;;  %10418 = vst [vmem:[#allocation30_spill] sm:$0xff] %v7968_v63  ;;  %v10420_v49 = vld [vmem:[#allocation82_spill] sm:$0xff]  ;;  %v10422_v38 = vld [vmem:[#allocation99_spill] sm:$0xff]  ;;  %v7986_v59 = vsel %vm74_vm1, %v10425_v55, %v10424_v32  ;;  %v4481_v11 = vmul.f32 %v4465_v21, %v1761_v25  ;;  %v10429_v36 = vld [vmem:[#allocation101_spill] sm:$0xff] }
 0x91e   :  { %10413 = vst [vmem:[#allocation58_spill] sm:$0xff] %v7958_v28  ;;  %v7974_v51 = vsel %vm74_vm1, %v10420_v49, %v10419_v37  ;;  %v1496_v16 = vsel %vm74_vm1, %v10423_v2, %v10422_v38  ;;  %10426 = vst [vmem:[#allocation48_spill] sm:$0xff] %v7986_v59  ;;  %v10428_v37 = vrot.slane %v7896_v0, 1  ;;  %v10431_v55 = vld [vmem:[#allocation102_spill] sm:$0xff]  ;;  %v10435_v21 = vld [vmem:[#allocation87_spill] sm:$0xff] }
 0x91f   :  { %10421 = vst [vmem:[#allocation40_spill] sm:$0xff] %v7974_v51  ;;  %2439 = vperm.xlu0 %4793, %v2205_v61   ;;  %v10430_v51 = vld [vmem:[#allocation85_spill] sm:$0xff]  ;;  %v10432_v32 = vld [vmem:[#allocation86_spill] sm:$0xff]  ;;  %v10437_v2 = vld [vmem:[#allocation88_spill] sm:$0xff] }
 0x920   :  { %v1671_v49 = vsel %vm781_vm4, %v10428_v37, %v10427_v20  ;;  %v1498_v63 = vsel %vm74_vm1, %v10430_v51, %v10429_v36  ;;  %v8005_v59 = vsel %vm74_vm1, %v10432_v32, %v10431_v55  ;;  %v10434_v20 = vld [vmem:[#allocation103_spill] sm:$0xff]  ;;  %v3088_v51 = vadd.f32 %v7100_v6, %v6612_v12  ;;  %v10436_v37 = vld [vmem:[#allocation104_spill] sm:$0xff] }
 0x921   :  { %10433 = vst [vmem:[#allocation23_spill] sm:$0xff] %v8005_v59  ;;  %v1500_v61 = vsel %vm74_vm1, %v10435_v21, %v10434_v20  ;;  %v8013_v36 = vmul.f32 %v1762_v57, %v1762_v57  ;;  %v8019_v38 = vsel %vm74_vm1, %v10437_v2, %v10436_v37  ;;  %v1502_v55 = vsel %vm74_vm1, %v10440_v18, %v10439_v8  ;;  %v10447_v37 = vld [vmem:[#allocation111_spill] sm:$0xff]  ;;  %v8044_v18 = vpop.permute.xlu0 %3963  ;;  %v10504_v19 = vld [vmem:[#allocation184_spill] sm:$0xff] }
 0x922   :  { %10438 = vst [vmem:[#allocation73_spill] sm:$0xff] %v8019_v38  ;;  %v8026_v32 = vadd.f32 %v1671_v49, %v7896_v0  ;;  %v10442_v20 = vrot.slane %v7925_v4, 7  ;;  %v10443_v12 = vrot.slane %v7925_v4, 1  ;;  %v8035_v21 = vmul.f32 %v1762_v57, %v914_v15  ;;  %v10452_v15 = vld [vmem:[#allocation112_spill] sm:$0xff]  ;;  %v10490_v4 = vld [vmem:[#allocation143_spill] sm:$0xff] }
 0x923   :  { %v4482_v59 = vmul.f32 %v4466_v43, %v1762_v57  ;;  %v8037_v2 = vadd.f32 0.0001, %v4481_v11  ;;  %v8042_v38 = vsel %vm75_vm2, %v10447_v37, %v1496_v16  ;;  %3270 = vperm.xlu0 %4793, %v3088_v51   ;;  %v10449_v8 = vrot.slane %v7958_v28, 7  ;;  %v10455_v16 = vld [vmem:[#allocation113_spill] sm:$0xff] }
 0x924   :  { %10441 = vst [vmem:[#allocation39_spill] sm:$0xff] %v8026_v32  ;;  %v8033_v6 = vsel %vm830_vm3, %v10443_v12, %v10442_v20  ;;  %10445 = vst [vmem:[#allocation49_spill] sm:$0xff] %v8035_v21  ;;  %v10450_v49 = vrot.slane %v7958_v28, 1  ;;  %v8056_v57 = vsel %vm75_vm2, %v10452_v15, %v1498_v63  ;;  %v4561_v43 = vadd.f32 %v7999_v1, %v7885_v9  ;;  %v10461_v15 = vld [vmem:[#allocation177_spill] sm:$0xff]  ;;  %v10481_v28 = vld [vmem:[#allocation195_spill] sm:$0xff] }
 0x925   :  { %10444 = vst [vmem:[#allocation41_spill] sm:$0xff] %v8033_v6  ;;  %10446 = vst [vmem:[#allocation24_spill] sm:$0xff] %v8037_v2  ;;  %v8061_v11 = vmul.f32 %v1761_v25, %v7835_v22  ;;  %v8066_v51 = vsel %vm75_vm2, %v10455_v16, %v1500_v61  ;;  %v3091_v12 = vadd.f32 %v7183_v13, %v6554_v34  ;;  %v10457_v25 = vld [vmem:[#allocation162_spill] sm:$0xff]  ;;  %v10462_v22 = vld [vmem:[#allocation196_spill] sm:$0xff]  ;;  %v8116_v2 = vpop.permute.xlu0 %4001 }
 0x926   :  { %10448 = vst [vmem:[#allocation69_spill] sm:$0xff] %v8042_v38  ;;  %v8051_v20 = vsel %vm830_vm3, %v10450_v49, %v10449_v8  ;;  %10453 = vst [vmem:[#allocation50_spill] sm:$0xff] %v8056_v57  ;;  %v3250_v63 = vsel %vm74_vm1, %v7255_v52, %v7289_v53  ;;  %v4562_v37 = vadd.f32 %v8013_v36, %v7918_v7  ;;  %v10458_v49 = vld [vmem:[#allocation146_spill] sm:$0xff]  ;;  %v10464_v13 = vld [vmem:[#allocation145_spill] sm:$0xff] }
 0x927   :  { %10451 = vst [vmem:[#allocation129_spill] sm:$0xff] %v8051_v20  ;;  %10454 = vst [vmem:[#allocation25_spill] sm:$0xff] %v8061_v11  ;;  %v2354_v61 = vsel %vm74_vm1, %v10458_v49, %v10457_v25  ;;  %v8085_v34 = vsel %vm75_vm2, %v7325_v39, %v3250_v63  ;;  %v10459_v52 = vld [vmem:[#allocation114_spill] sm:$0xff]  ;;  %v3249_v25 = vsel %vm74_vm1, %v10462_v22, %v7287_v58  ;;  %3285 = vperm.xlu0 %4793, %v3091_v12   ;;  %v10463_v49 = vld [vmem:[#allocation161_spill] sm:$0xff] }
 0x928   :  { %10456 = vst [vmem:[#allocation42_spill] sm:$0xff] %v8066_v51  ;;  %v8091_v53 = vsel %vm75_vm2, %v10459_v52, %v1502_v55  ;;  %v2450_v16 = vsel %vm75_vm2, %v10461_v15, %v2354_v61  ;;  %v2353_v55 = vsel %vm74_vm1, %v10464_v13, %v10463_v49  ;;  %v10465_v52 = vld [vmem:[#allocation202_spill] sm:$0xff]  ;;  %v10466_v15 = vld [vmem:[#allocation176_spill] sm:$0xff]  ;;  %v10467_v12 = vld [vmem:[#allocation123_spill] sm:$0xff]  ;;  %v3395_v63 = vrot.slane %v8085_v34, 7 }
 0x929   :  { %10460 = vst [vmem:[#allocation57_spill] sm:$0xff] %v8091_v53  ;;  %v3345_v8 = vsel %vm75_vm2, %v10465_v52, %v3249_v25  ;;  %v2449_v58 = vsel %vm75_vm2, %v10466_v15, %v2353_v55  ;;  %v10468_v22 = vld [vmem:[#allocation190_spill] sm:$0xff]  ;;  %v8118_v21 = vpop.permute.xlu1 %4006  ;;  %v8120_v13 = vadd.f32 0.0001, %v4482_v59  ;;  %v2499_v52 = vrot.slane %v2450_v16, 7  ;;  %v10489_v6 = vld [vmem:[#allocation160_spill] sm:$0xff] }
 0x92a   :  { %v3093_v39 = vadd.f32 %v10468_v22, %v10467_v12  ;;  %10469 = vst [vmem:[#allocation21_spill] sm:$0xff] %v8118_v21  ;;  %v3368_v61 = vrot.slane %v3345_v8, 1  ;;  %v3394_v11 = vrot.slane %v3345_v8, 7  ;;  %v8124_v20 = vadd.f32 0.0001, %v4561_v43  ;;  %v10493_v32 = vld [vmem:[#allocation147_spill] sm:$0xff] }
 0x92b   :  { %10470 = vst [vmem:[#allocation54_spill] sm:$0xff] %v8120_v13  ;;  %v8126_v55 = vadd.f32 0.0001, %v4562_v37  ;;  %v10471_v15 = vrot.slane %v8042_v38, 7  ;;  %v10472_v12 = vrot.slane %v8042_v38, 1  ;;  %v10474_v59 = vrot.slane %v8056_v57, 7 }
 0x92c   :  { %3295 = vperm.xlu0 %4793, %v3093_v39   ;;  %v10475_v49 = vrot.slane %v8056_v57, 1  ;;  %v2472_v13 = vrot.slane %v2449_v58, 1  ;;  %v2498_v43 = vrot.slane %v2449_v58, 7  ;;  %v10477_v37 = vrot.slane %v8066_v51, 7  ;;  %v10480_v38 = vld [vmem:[#allocation127_spill] sm:$0xff] }
 0x92d   :  { %v8133_v22 = vsel %vm830_vm3, %v10472_v12, %v10471_v15  ;;  %v10478_v39 = vrot.slane %v8066_v51, 1  ;;  %v3095_v15 = vadd.f32 %v10481_v28, %v10480_v38  ;;  %v3396_v12 = vsel %vm781_vm4, %v3394_v11, %v3395_v63  ;;  %v8153_v57 = vpop.permute.xlu1 %4011 }
 0x92e   :  { %10473 = vst [vmem:[#allocation124_spill] sm:$0xff] %v8133_v22  ;;  %v8140_v25 = vsel %vm830_vm3, %v10475_v49, %v10474_v59  ;;  %v3441_v22 = vrot.slane %v8085_v34, 1  ;;  %10482 = vst [vmem:[#allocation76_spill] sm:$0xff] %v8153_v57  ;;  %v8155_v49 = vpop.permute.xlu0 %4016  ;;  %v10484_v59 = vrot.slane %v8091_v53, 7  ;;  %v2500_v38 = vsel %vm781_vm4, %v2498_v43, %v2499_v52 }
 0x92f   :  { %10476 = vst [vmem:[#allocation43_spill] sm:$0xff] %v8140_v25  ;;  %v8147_v21 = vsel %vm830_vm3, %v10478_v39, %v10477_v37  ;;  %10483 = vst [vmem:[#allocation93_spill] sm:$0xff] %v8155_v49  ;;  %v10485_v25 = vrot.slane %v8091_v53, 1  ;;  %v10487_v37 = vld [vmem:[#allocation159_spill] sm:$0xff]  ;;  %v10488_v39 = vld [vmem:[#allocation142_spill] sm:$0xff]  ;;  %v8173_v57 = vsel %vm74_vm1, %v10490_v4, %v10489_v6 }
 0x930   :  { %10479 = vst [vmem:[#allocation92_spill] sm:$0xff] %v8147_v21  ;;  %v2351_v28 = vsel %vm74_vm1, %v10488_v39, %v10487_v37  ;;  %v2545_v21 = vrot.slane %v2450_v16, 1  ;;  %10491 = vst [vmem:[#allocation51_spill] sm:$0xff] %v8173_v57  ;;  %v10492_v49 = vld [vmem:[#allocation163_spill] sm:$0xff]  ;;  %v3432_v37 = vsel %vm781_vm4, %v3368_v61, %v3394_v11  ;;  %3305 = vperm.xlu0 %4793, %v3095_v15   ;;  %v10496_v39 = vld [vmem:[#allocation164_spill] sm:$0xff] }
 0x931   :  { %v8162_v51 = vsel %vm830_vm3, %v10485_v25, %v10484_v59  ;;  %v8179_v25 = vsel %vm74_vm1, %v10493_v32, %v10492_v49  ;;  %v10495_v59 = vld [vmem:[#allocation175_spill] sm:$0xff]  ;;  %v10497_v53 = vld [vmem:[#allocation148_spill] sm:$0xff]  ;;  %v10498_v6 = vld [vmem:[#allocation165_spill] sm:$0xff]  ;;  %v2536_v32 = vsel %vm781_vm4, %v2472_v13, %v2498_v43  ;;  %v3490_v49 = vadd.f32 %v3396_v12, %v8085_v34 }
 0x932   :  { %10486 = vst [vmem:[#allocation77_spill] sm:$0xff] %v8162_v51  ;;  %10494 = vst [vmem:[#allocation26_spill] sm:$0xff] %v8179_v25  ;;  %v8184_v51 = vsel %vm75_vm2, %v10495_v59, %v2351_v28  ;;  %v2356_v4 = vsel %vm74_vm1, %v10497_v53, %v10496_v39  ;;  %v10499_v57 = vld [vmem:[#allocation149_spill] sm:$0xff]  ;;  %v10501_v28 = vld [vmem:[#allocation166_spill] sm:$0xff]  ;;  %v2594_v15 = vadd.f32 %v2500_v38, %v2450_v16  ;;  %v8206_v39 = vpop.permute.xlu1 %4021  ;;  %v8208_v45 = vpop.permute.xlu0 %4026 }
 0x933   :  { %v8195_v0 = vsel %vm74_vm1, %v10499_v57, %v10498_v6  ;;  %v10502_v59 = vld [vmem:[#allocation150_spill] sm:$0xff]  ;;  %v10503_v25 = vld [vmem:[#allocation120_spill] sm:$0xff]  ;;  %v3442_v53 = vsel %vm830_vm3, %v3368_v61, %v3441_v22  ;;  %10505 = vst [vmem:[#allocation108_spill] sm:$0xff] %v8206_v39  ;;  %v2546_v34 = vsel %vm830_vm3, %v2472_v13, %v2545_v21  ;;  %v3489_v12 = vadd.f32 %v3432_v37, %v3345_v8  ;;  %v10506_v6 = vld [vmem:[#allocation167_spill] sm:$0xff] }
 0x934   :  { %10500 = vst [vmem:[#allocation107_spill] sm:$0xff] %v8195_v0  ;;  %v2358_v11 = vsel %vm74_vm1, %v10502_v59, %v10501_v28  ;;  %v3097_v62 = vadd.f32 %v10504_v19, %v10503_v25  ;;  %v10507_v0 = vld [vmem:[#allocation151_spill] sm:$0xff]  ;;  %v10509_v19 = vld [vmem:[#allocation168_spill] sm:$0xff]  ;;  %v2593_v25 = vadd.f32 %v2536_v32, %v2449_v58  ;;  %v3480_v28 = vsel %vm830_vm3, %v3441_v22, %v3395_v63  ;;  %v10511_v57 = vld [vmem:[#allocation178_spill] sm:$0xff] }
 0x935   :  { %v8217_v16 = vsel %vm74_vm1, %v10507_v0, %v10506_v6  ;;  %v10510_v38 = vld [vmem:[#allocation152_spill] sm:$0xff]  ;;  %v2584_v59 = vsel %vm830_vm3, %v2545_v21, %v2499_v52  ;;  %v8228_v8 = vsel %vm75_vm2, %v10511_v57, %v2356_v4  ;;  %v3505_v13 = vadd.f32 %v3489_v12, %v3442_v53  ;;  %v10513_v0 = vld [vmem:[#allocation169_spill] sm:$0xff]  ;;  %v10519_v52 = vld [vmem:[#allocation170_spill] sm:$0xff] }
 0x936   :  { %10508 = vst [vmem:[#allocation52_spill] sm:$0xff] %v8217_v16  ;;  %v2360_v61 = vsel %vm74_vm1, %v10510_v38, %v10509_v19  ;;  %3315 = vperm.xlu0 %4793, %v3097_v62   ;;  %10512 = vst [vmem:[#allocation27_spill] sm:$0xff] %v8228_v8  ;;  %v3506_v37 = vadd.f32 %v3490_v49, %v3480_v28  ;;  %v10514_v6 = vld [vmem:[#allocation153_spill] sm:$0xff]  ;;  %v2609_v19 = vadd.f32 %v2593_v25, %v2546_v34  ;;  %v10517_v63 = vld [vmem:[#allocation188_spill] sm:$0xff]  ;;  %v8238_v22 = vpop.permute.xlu1 %4031  ;;  %v8240_v21 = vpop.permute.xlu0 %4036 }
 0x937   :  { %v8234_v43 = vsel %vm74_vm1, %v10514_v6, %v10513_v0  ;;  %v2610_v58 = vadd.f32 %v2594_v15, %v2584_v59  ;;  %v10516_v32 = vld [vmem:[#allocation125_spill] sm:$0xff]  ;;  %10518 = vst [vmem:[#allocation59_spill] sm:$0xff] %v8238_v22  ;;  %v10520_v4 = vld [vmem:[#allocation154_spill] sm:$0xff]  ;;  %v10521_v53 = vld [vmem:[#allocation172_spill] sm:$0xff]  ;;  %v10525_v25 = vrot.slane %v8184_v51, 7  ;;  %v10526_v28 = vrot.slane %v8184_v51, 1 }
 0x938   :  { %10515 = vst [vmem:[#allocation38_spill] sm:$0xff] %v8234_v43  ;;  %v3099_v62 = vadd.f32 %v10517_v63, %v10516_v32  ;;  %v2362_v49 = vsel %vm74_vm1, %v10520_v4, %v10519_v52  ;;  %v10522_v57 = vld [vmem:[#allocation156_spill] sm:$0xff]  ;;  %v10523_v38 = vld [vmem:[#allocation174_spill] sm:$0xff]  ;;  %v10527_v32 = vld [vmem:[#allocation179_spill] sm:$0xff] }
 0x939   :  { %v2364_v12 = vsel %vm74_vm1, %v10522_v57, %v10521_v53  ;;  %v10524_v34 = vld [vmem:[#allocation158_spill] sm:$0xff]  ;;  %v2535_v59 = vsel %vm781_vm4, %v10526_v28, %v10525_v25  ;;  %v8264_v63 = vsel %vm75_vm2, %v10527_v32, %v2358_v11  ;;  %v10529_v52 = vld [vmem:[#allocation180_spill] sm:$0xff]  ;;  %v10531_v53 = vld [vmem:[#allocation181_spill] sm:$0xff]  ;;  %v3521_v25 = vmul.f32 0.11111111, %v3505_v13 }
 0x93a   :  { %v2366_v15 = vsel %vm74_vm1, %v10524_v34, %v10523_v38  ;;  %10528 = vst [vmem:[#allocation28_spill] sm:$0xff] %v8264_v63  ;;  %v8269_v4 = vsel %vm75_vm2, %v10529_v52, %v2360_v61  ;;  %3325 = vperm.xlu0 %4793, %v3099_v62   ;;  %v8274_v57 = vsel %vm75_vm2, %v10531_v53, %v2362_v49  ;;  %v10533_v38 = vld [vmem:[#allocation182_spill] sm:$0xff]  ;;  %v3522_v28 = vmul.f32 0.11111111, %v3506_v37  ;;  %v10535_v6 = vld [vmem:[#allocation183_spill] sm:$0xff]  ;;  %v10537_v62 = vld [vmem:[#allocation12_spill] sm:$0xff]  ;;  %v8288_v22 = vpop.permute.xlu1 %4041  ;;  %v8290_v49 = vpop.permute.xlu0 %4046 }
 0x93b   :  { %10530 = vst [vmem:[#allocation53_spill] sm:$0xff] %v8269_v4  ;;  %10532 = vst [vmem:[#allocation130_spill] sm:$0xff] %v8274_v57  ;;  %v8279_v34 = vsel %vm75_vm2, %v10533_v38, %v2364_v12  ;;  %v2625_v11 = vmul.f32 0.11111111, %v2609_v19  ;;  %v2626_v32 = vmul.f32 0.11111111, %v2610_v58  ;;  %v8284_v61 = vsel %vm75_vm2, %v10535_v6, %v2366_v15 }
 0x93c   :  { %10534 = vst [vmem:[#allocation44_spill] sm:$0xff] %v8279_v34  ;;  %10536 = vst [vmem:[#allocation45_spill] sm:$0xff] %v8284_v61  ;;  %v10538_v52 = vld [vmem:[#allocation186_spill] sm:$0xff]  ;;  %v3554_v12 = vsub.f32 %v3522_v28, %v8013_v36  ;;  %v10540_v13 = vld [vmem:[#allocation171_spill] sm:$0xff] }
 0x93d   :  { %v3101_v0 = vadd.f32 %v10538_v52, %v10537_v62  ;;  %10539 = vst [vmem:[#allocation46_spill] sm:$0xff] %v8288_v22  ;;  %v3553_v52 = vsub.f32 %v3521_v25, %v7999_v1  ;;  %v10541_v53 = vld [vmem:[#allocation155_spill] sm:$0xff]  ;;  %v10543_v58 = vld [vmem:[#allocation173_spill] sm:$0xff]  ;;  %v10546_v62 = vrot.slane %v8228_v8, 7  ;;  %v10547_v1 = vrot.slane %v8228_v8, 1  ;;  %v10553_v38 = vld [vmem:[#allocation116_spill] sm:$0xff] }
 0x93e   :  { %v8308_v19 = vsel %vm74_vm1, %v10541_v53, %v10540_v13  ;;  %v10544_v37 = vld [vmem:[#allocation157_spill] sm:$0xff]  ;;  %v8326_v25 = vpop.permute.xlu1 %4051  ;;  %v8328_v28 = vpop.permute.xlu0 %4056  ;;  %v2657_v53 = vsub.f32 %v2625_v11, %v7885_v9  ;;  %v2658_v13 = vsub.f32 %v2626_v32, %v7918_v7  ;;  %v10554_v15 = vld [vmem:[#allocation192_spill] sm:$0xff]  ;;  %v10558_v7 = vrot.slane %v8274_v57, 7  ;;  %v10570_v39 = vld [vmem:[#allocation191_spill] sm:$0xff] }
 0x93f   :  { %3335 = vperm.xlu0 %4793, %v3101_v0   ;;  %10542 = vst [vmem:[#allocation68_spill] sm:$0xff] %v8308_v19  ;;  %v8314_v6 = vsel %vm74_vm1, %v10544_v37, %v10543_v58  ;;  %v8317_v0 = vadd.f32 %v2535_v59, %v8184_v51  ;;  %v8324_v36 = vsel %vm830_vm3, %v10547_v1, %v10546_v62  ;;  %10549 = vst [vmem:[#allocation29_spill] sm:$0xff] %v8326_v25 }
 0x940   :  { %10545 = vst [vmem:[#allocation132_spill] sm:$0xff] %v8314_v6  ;;  %10548 = vst [vmem:[#allocation35_spill] sm:$0xff] %v8324_v36  ;;  %v10550_v37 = vrot.slane %v8264_v63, 7  ;;  %v10551_v59 = vrot.slane %v8264_v63, 1  ;;  %v3247_v62 = vsel %vm74_vm1, %v10554_v15, %v10553_v38  ;;  %v10555_v1 = vrot.slane %v8269_v4, 7  ;;  %v10564_v38 = vld [vmem:[#allocation201_spill] sm:$0xff] }
 0x941   :  { %v10556_v25 = vrot.slane %v8269_v4, 1  ;;  %v10559_v11 = vrot.slane %v8274_v57, 1  ;;  %v8367_v22 = vsel %vm75_vm2, %v10564_v38, %v3247_v62  ;;  %v10572_v62 = vld [vmem:[#allocation128_spill] sm:$0xff]  ;;  %v10573_v38 = vld [vmem:[#allocation185_spill] sm:$0xff]  ;;  %v10575_v6 = vld [vmem:[#allocation131_spill] sm:$0xff] }
 0x942   :  { %v8337_v58 = vsel %vm830_vm3, %v10551_v59, %v10550_v37  ;;  %v10561_v37 = vrot.slane %v8279_v34, 7  ;;  %v10562_v59 = vrot.slane %v8279_v34, 1  ;;  %10565 = vst [vmem:[#allocation90_spill] sm:$0xff] %v8367_v22  ;;  %v10699_v4 = vld [vmem:[#allocation22_spill] sm:$0xff]  ;;  %v10700_v63 = vld [vmem:[#allocation39_spill] sm:$0xff] }
 0x943   :  { %10552 = vst [vmem:[#allocation65_spill] sm:$0xff] %v8337_v58  ;;  %v8348_v9 = vsel %vm830_vm3, %v10556_v25, %v10555_v1  ;;  %v8355_v32 = vsel %vm830_vm3, %v10559_v11, %v10558_v7  ;;  %4097 = vrot.lane.b32.xlu0 %v7591_v27, %s4959_s24  ;;  %v10566_v25 = vrot.slane %v8284_v61, 7  ;;  %v10567_v1 = vrot.slane %v8284_v61, 1  ;;  %v10569_v11 = vld [vmem:[#allocation118_spill] sm:$0xff] }
 0x944   :  { %10557 = vst [vmem:[#allocation135_spill] sm:$0xff] %v8348_v9  ;;  %10560 = vst [vmem:[#allocation60_spill] sm:$0xff] %v8355_v32  ;;  %v8362_v15 = vsel %vm830_vm3, %v10562_v59, %v10561_v37  ;;  %v8382_v37 = vsel %vm74_vm1, %v10570_v39, %v10569_v11  ;;  %v4593_v59 = vadd.f32 %v3553_v52, %v2657_v53  ;;  %v10576_v32 = vld [vmem:[#allocation189_spill] sm:$0xff]  ;;  %v8404_v52 = vpop.permute.xlu0 %4066  ;;  %v10581_v53 = vld [vmem:[#allocation134_spill] sm:$0xff] }
 0x945   :  { %10563 = vst [vmem:[#allocation31_spill] sm:$0xff] %v8362_v15  ;;  %v8376_v7 = vsel %vm830_vm3, %v10567_v1, %v10566_v25  ;;  %10571 = vst [vmem:[#allocation61_spill] sm:$0xff] %v8382_v37  ;;  %v4594_v15 = vadd.f32 %v3554_v12, %v2658_v13  ;;  %v8388_v27 = vsel %vm74_vm1, %v10573_v38, %v10572_v62  ;;  %v10577_v1 = vld [vmem:[#allocation133_spill] sm:$0xff]  ;;  %v8402_v12 = vpop.permute.xlu1 %4061  ;;  %v10582_v13 = vld [vmem:[#allocation194_spill] sm:$0xff] }
 0x946   :  { %10568 = vst [vmem:[#allocation74_spill] sm:$0xff] %v8376_v7  ;;  %10574 = vst [vmem:[#allocation32_spill] sm:$0xff] %v8388_v27  ;;  %v3252_v25 = vsel %vm74_vm1, %v10576_v32, %v10575_v6  ;;  %v10578_v7 = vld [vmem:[#allocation187_spill] sm:$0xff]  ;;  %v3984_v39 = vadd.f32 %v7631_v24, %v7203_v30  ;;  %v3254_v11 = vsel %vm74_vm1, %v10582_v13, %v10581_v53  ;;  %v10583_v62 = vld [vmem:[#allocation136_spill] sm:$0xff]  ;;  %v4609_v38 = vadd.f32 0.0009, %v4593_v59 }
 0x947   :  { %v8398_v61 = vsel %vm74_vm1, %v10578_v7, %v10577_v1  ;;  %10580 = vst [vmem:[#allocation70_spill] sm:$0xff] %v8402_v12  ;;  %v10584_v6 = vld [vmem:[#allocation193_spill] sm:$0xff]  ;;  %v10586_v30 = vld [vmem:[#allocation138_spill] sm:$0xff]  ;;  %v10588_v12 = vld [vmem:[#allocation139_spill] sm:$0xff] }
 0x948   :  { %10579 = vst [vmem:[#allocation106_spill] sm:$0xff] %v8398_v61  ;;  %v8414_v32 = vsel %vm74_vm1, %v10584_v6, %v10583_v62  ;;  %v10587_v24 = vld [vmem:[#allocation197_spill] sm:$0xff]  ;;  %v10589_v61 = vld [vmem:[#allocation126_spill] sm:$0xff]  ;;  %v10593_v6 = vld [vmem:[#allocation203_spill] sm:$0xff]  ;;  %4166 = vperm.xlu0 %4793, %v3984_v39  }
 0x949   :  { %10585 = vst [vmem:[#allocation137_spill] sm:$0xff] %v8414_v32  ;;  %v3256_v1 = vsel %vm74_vm1, %v10587_v24, %v10586_v30  ;;  %v8426_v53 = vsel %vm74_vm1, %v10589_v61, %v10588_v12  ;;  %v10591_v13 = vld [vmem:[#allocation141_spill] sm:$0xff]  ;;  %v8435_v7 = vsel %vm75_vm2, %v10593_v6, %v3252_v25  ;;  %v4610_v32 = vadd.f32 0.0009, %v4594_v15  ;;  %v10595_v30 = vld [vmem:[#allocation204_spill] sm:$0xff]  ;;  %v10602_v6 = vld [vmem:[#allocation122_spill] sm:$0xff] }
 0x94a   :  { %10590 = vst [vmem:[#allocation62_spill] sm:$0xff] %v8426_v53  ;;  %v10592_v27 = vld [vmem:[#allocation121_spill] sm:$0xff]  ;;  %10594 = vst [vmem:[#allocation33_spill] sm:$0xff] %v8435_v7  ;;  %v8440_v24 = vsel %vm75_vm2, %v10595_v30, %v3254_v11  ;;  %v10599_v53 = vld [vmem:[#allocation198_spill] sm:$0xff]  ;;  %v3987_v11 = vadd.f32 %v7708_v42, %v7145_v17  ;;  %v8464_v30 = vpop.permute.xlu0 %4076  ;;  %v3989_v17 = vadd.f32 %v7758_v31, %v7154_v26  ;;  %v10619_v31 = vrot.slane %v8435_v7, 1 }
 0x94b   :  { %v3258_v62 = vsel %vm74_vm1, %v10592_v27, %v10591_v13  ;;  %10596 = vst [vmem:[#allocation63_spill] sm:$0xff] %v8440_v24  ;;  %v10597_v61 = vld [vmem:[#allocation205_spill] sm:$0xff]  ;;  %v10600_v27 = vld [vmem:[#allocation119_spill] sm:$0xff]  ;;  %v10601_v25 = vld [vmem:[#allocation200_spill] sm:$0xff] }
 0x94c   :  { %v8445_v12 = vsel %vm75_vm2, %v10597_v61, %v3256_v1  ;;  %v3260_v13 = vsel %vm74_vm1, %v10600_v27, %v10599_v53  ;;  %v3262_v15 = vsel %vm74_vm1, %v10602_v6, %v10601_v25  ;;  %v10603_v59 = vld [vmem:[#allocation206_spill] sm:$0xff]  ;;  %v8462_v1 = vpop.permute.xlu1 %4071  ;;  %v10606_v61 = vrot.slane %v8367_v22, 7  ;;  %v10608_v37 = vld [vmem:[#allocation207_spill] sm:$0xff]  ;;  %4181 = vperm.xlu0 %4793, %v3987_v11  }
 0x94d   :  { %10598 = vst [vmem:[#allocation34_spill] sm:$0xff] %v8445_v12  ;;  %v8458_v39 = vsel %vm75_vm2, %v10603_v59, %v3258_v62  ;;  %10605 = vst [vmem:[#allocation79_spill] sm:$0xff] %v8462_v1  ;;  %v10607_v53 = vrot.slane %v8367_v22, 1  ;;  %v9898_v25 = vrot.slane %v8435_v7, 7  ;;  %v8476_v62 = vsel %vm75_vm2, %v10608_v37, %v3260_v13  ;;  %v10610_v1 = vld [vmem:[#allocation208_spill] sm:$0xff]  ;;  %v10613_v11 = vld [vmem:[#allocation115_spill] sm:$0xff] }
 0x94e   :  { %10604 = vst [vmem:[#allocation95_spill] sm:$0xff] %v8458_v39  ;;  %10609 = vst [vmem:[#allocation109_spill] sm:$0xff] %v8476_v62  ;;  %v8484_v34 = vsel %vm75_vm2, %v10610_v1, %v3262_v15  ;;  %v9899_v6 = vrot.slane %v8445_v12, 1  ;;  %v9900_v37 = vrot.slane %v8458_v39, 7  ;;  %v10612_v1 = vld [vmem:[#allocation144_spill] sm:$0xff]  ;;  %v661_v13 = vpop.permute.xlu0 %660 }
 0x94f   :  { %v3431_v27 = vsel %vm781_vm4, %v10607_v53, %v10606_v61  ;;  %10611 = vst [vmem:[#allocation64_spill] sm:$0xff] %v8484_v34  ;;  %v4625_v61 = vmul.f32 %v4609_v38, %v8124_v20  ;;  %v4626_v53 = vmul.f32 %v4610_v32, %v8126_v55  ;;  %v8499_v20 = vsel %vm74_vm1, %v10613_v11, %v10612_v1  ;;  %v10615_v55 = vld [vmem:[#allocation199_spill] sm:$0xff]  ;;  %v10616_v32 = vld [vmem:[#allocation117_spill] sm:$0xff] }
 0x950   :  { %v4096_v15 = vpop.permute.xlu1 %4095  ;;  %10614 = vst [vmem:[#allocation36_spill] sm:$0xff] %v8499_v20  ;;  %v8505_v38 = vsel %vm74_vm1, %v10616_v32, %v10615_v55  ;;  %v8510_v26 = vadd.f32 %v3431_v27, %v8367_v22  ;;  %v8517_v1 = vsel %vm830_vm3, %v10619_v31, %v9898_v25  ;;  %v10621_v11 = vrot.slane %v8440_v24, 7  ;;  %4191 = vperm.xlu0 %4793, %v3989_v17   ;;  %v10636_v20 = vld [vmem:[#allocation210_spill] sm:$0xff] }
 0x951   :  { %10617 = vst [vmem:[#allocation66_spill] sm:$0xff] %v8505_v38  ;;  %10620 = vst [vmem:[#allocation91_spill] sm:$0xff] %v8517_v1  ;;  %v10622_v55 = vrot.slane %v8440_v24, 1  ;;  %v734_v59 = vsel %vm75_vm2, %v661_v13, %v7812_v14  ;;  %4795 = vrcp.f32 %v4625_v61  ;;  %v10624_v27 = vrot.slane %v8445_v12, 7  ;;  %v10645_v12 = vld [vmem:[#allocation220_spill] sm:$0xff]  ;;  %v10684_v24 = vld [vmem:[#allocation13_spill] sm:$0xff] }
 0x952   :  { %10618 = vst [vmem:[#allocation37_spill] sm:$0xff] %v8510_v26  ;;  %v783_v25 = vrot.slane %v734_v59, 7  ;;  %v831_v42 = vrot.slane %v734_v59, 1  ;;  %4797 = vrcp.f32 %v4626_v53  ;;  %v10628_v14 = vrot.slane %v8476_v62, 7 }
 0x953   :  { %v8524_v32 = vsel %vm830_vm3, %v10622_v55, %v10621_v11  ;;  %v8534_v31 = vsel %vm830_vm3, %v9899_v6, %v10624_v27  ;;  %v10626_v11 = vrot.slane %v8458_v39, 1  ;;  %v10629_v17 = vrot.slane %v8476_v62, 1  ;;  %v10637_v39 = vld [vmem:[#allocation217_spill] sm:$0xff] }
 0x954   :  { %10623 = vst [vmem:[#allocation75_spill] sm:$0xff] %v8524_v32  ;;  %10625 = vst [vmem:[#allocation97_spill] sm:$0xff] %v8534_v31  ;;  %v3991_v13 = vadd.f32 %v7802_v54, %v7163_v47  ;;  %v4162_v27 = vpop.permute.xlu1 %4161  ;;  %v10631_v53 = vrot.slane %v8484_v34, 7  ;;  %v10632_v6 = vrot.slane %v8484_v34, 1  ;;  %v3747_v62 = vadd.f32 %v10637_v39, %v10636_v20  ;;  %v10639_v47 = vld [vmem:[#allocation211_spill] sm:$0xff]  ;;  %v10640_v54 = vld [vmem:[#allocation218_spill] sm:$0xff] }
 0x955   :  { %v8541_v55 = vsel %vm830_vm3, %v10626_v11, %v9900_v37  ;;  %v8548_v61 = vsel %vm830_vm3, %v10629_v17, %v10628_v14  ;;  %v10634_v11 = vld [vmem:[#allocation209_spill] sm:$0xff]  ;;  %v10635_v37 = vld [vmem:[#allocation216_spill] sm:$0xff]  ;;  %v10638_v14 = vrot.slane %v7768_v56, 7  ;;  %v3749_v31 = vadd.f32 %v10640_v54, %v10639_v47  ;;  %v10643_v39 = vld [vmem:[#allocation219_spill] sm:$0xff] }
 0x956   :  { %10627 = vst [vmem:[#allocation81_spill] sm:$0xff] %v8541_v55  ;;  %10630 = vst [vmem:[#allocation94_spill] sm:$0xff] %v8548_v61  ;;  %v8557_v38 = vsel %vm830_vm3, %v10632_v6, %v10631_v53  ;;  %v3745_v55 = vadd.f32 %v10635_v37, %v10634_v11  ;;  %v676_v61 = vpop.permute.xlu0 %675  ;;  %v4143_v34 = vsel %vm74_vm1, %v8116_v2, %v4096_v15  ;;  %v10641_v6 = vrot.slane %v7768_v56, 1  ;;  %v10642_v11 = vld [vmem:[#allocation212_spill] sm:$0xff]  ;;  %v10647_v15 = vld [vmem:[#allocation214_spill] sm:$0xff] }
 0x957   :  { %10633 = vst [vmem:[#allocation78_spill] sm:$0xff] %v8557_v38  ;;  %v784_v17 = vsel %vm781_vm4, %v10638_v14, %v783_v25  ;;  %4201 = vperm.xlu0 %4793, %v3991_v13   ;;  %v3751_v20 = vadd.f32 %v10643_v39, %v10642_v11  ;;  %v10644_v38 = vld [vmem:[#allocation213_spill] sm:$0xff]  ;;  %v8580_v32 = vsel %vm75_vm2, %v4162_v27, %v4143_v34  ;;  %v10649_v54 = vld [vmem:[#allocation215_spill] sm:$0xff] }
 0x958   :  { %v832_v53 = vsel %vm830_vm3, %v10641_v6, %v831_v42  ;;  %v880_v37 = vadd.f32 %v784_v17, %v734_v59  ;;  %v3753_v14 = vadd.f32 %v10645_v12, %v10644_v38  ;;  %10646 = vst [vmem:[#allocation110_spill] sm:$0xff] %v8580_v32  ;;  %v737_v2 = vsel %vm75_vm2, %v676_v61, %v7875_v46  ;;  %v10648_v56 = vld [vmem:[#allocation221_spill] sm:$0xff]  ;;  %v10650_v59 = vld [vmem:[#allocation222_spill] sm:$0xff]  ;;  %v8591_v11 = vpop.permute.xlu1 %4171  ;;  %v10652_v12 = vld [vmem:[#allocation223_spill] sm:$0xff] }
 0x959   :  { %v3755_v47 = vadd.f32 %v10648_v56, %v10647_v15  ;;  %v3757_v13 = vadd.f32 %v10650_v59, %v10649_v54  ;;  %v3993_v17 = vadd.f32 %v7881_v35, %v7172_v3  ;;  %v759_v6 = vrot.slane %v737_v2, 1  ;;  %10651 = vst [vmem:[#allocation56_spill] sm:$0xff] %v8591_v11 }
 0x95a   :  { %v8594_v38 = vadd.f32 %v10652_v12, %v3745_v55  ;;  %v871_v34 = vsel %vm830_vm3, %v831_v42, %v783_v25  ;;  %v895_v27 = vadd.f32 %v7862_v41, %v832_v53  ;;  %v788_v46 = vrot.slane %v737_v2, 7  ;;  %v686_v61 = vpop.permute.xlu0 %685  ;;  %v10654_v53 = vld [vmem:[#allocation224_spill] sm:$0xff] }
 0x95b   :  { %v896_v39 = vadd.f32 %v880_v37, %v871_v34  ;;  %v739_v3 = vsel %vm75_vm2, %v686_v61, %v7891_v40  ;;  %4211 = vperm.xlu0 %4793, %v3993_v17   ;;  %v10653_v35 = vrot.slane %v7700_v23, 7  ;;  %v8608_v54 = vadd.f32 %v10654_v53, %v3747_v62  ;;  %v10655_v37 = vld [vmem:[#allocation225_spill] sm:$0xff]  ;;  %v10656_v17 = vld [vmem:[#allocation226_spill] sm:$0xff] }
 0x95c   :  { %v824_v25 = vsel %vm781_vm4, %v759_v6, %v788_v46  ;;  %v760_v42 = vrot.slane %v739_v3, 1  ;;  %v791_v41 = vrot.slane %v739_v3, 7  ;;  %v8611_v59 = vadd.f32 %v10655_v37, %v3749_v31  ;;  %v8615_v40 = vpop.permute.xlu1 %4176  ;;  %v10658_v31 = vld [vmem:[#allocation227_spill] sm:$0xff] }
 0x95d   :  { %v790_v55 = vsel %vm781_vm4, %v788_v46, %v10653_v35  ;;  %v3995_v12 = vadd.f32 %v7962_v29, %v7181_v44  ;;  %v883_v34 = vadd.f32 %v824_v25, %v737_v2  ;;  %v8618_v61 = vadd.f32 %v10656_v17, %v3751_v20 }
 0x95e   :  { %v884_v35 = vadd.f32 %v790_v55, %v7700_v23  ;;  %v10657_v46 = vrot.slane %v7721_v10, 7  ;;  %v825_v62 = vsel %vm781_vm4, %v760_v42, %v791_v41  ;;  %v696_v53 = vpop.permute.xlu0 %695  ;;  %v8626_v37 = vadd.f32 %v10658_v31, %v3753_v14 }
 0x95f   :  { %v8628_v56 = vmul.f32 0.11111111, %v895_v27  ;;  %v885_v44 = vadd.f32 %v825_v62, %v739_v3  ;;  %4221 = vperm.xlu0 %4793, %v3995_v12   ;;  %v8631_v20 = vmul.f32 0.11111111, %v896_v39  ;;  %v10661_v2 = vrot.slane %v8580_v32, 7  ;;  %v8644_v27 = vpop.eup %4795 }
 0x960   :  { %v793_v15 = vsel %vm781_vm4, %v791_v41, %v10657_v46  ;;  %v10662_v55 = vrot.slane %v8580_v32, 1  ;;  %v10663_v41 = vrot.slane %v7700_v23, 1  ;;  %v741_v14 = vsel %vm75_vm2, %v696_v53, %v7906_v5  ;;  %10664 = vst [vmem:[#allocation80_spill] sm:$0xff] %v8644_v27  ;;  %v8654_v23 = vpop.permute.xlu1 %4186 }
 0x961   :  { %10659 = vst [vmem:[#allocation140_spill] sm:$0xff] %v8628_v56  ;;  %v886_v29 = vadd.f32 %v793_v15, %v7721_v10  ;;  %10660 = vst [vmem:[#allocation96_spill] sm:$0xff] %v8631_v20  ;;  %v10665_v15 = vld [vmem:[#allocation228_spill] sm:$0xff]  ;;  %v3997_v39 = vadd.f32 %v8044_v18, %v7192_v33  ;;  %v10666_v46 = vrot.slane %v7721_v10, 1  ;;  %v900_v31 = vadd.f32 %v884_v35, %v7826_v48  ;;  %v10670_v48 = vld [vmem:[#allocation14_spill] sm:$0xff] }
 0x962   :  { %v4327_v25 = vsel %vm781_vm4, %v10662_v55, %v10661_v2  ;;  %v836_v17 = vsel %vm830_vm3, %v759_v6, %v10663_v41  ;;  %v8647_v3 = vadd.f32 %v10665_v15, %v3755_v47  ;;  %v8656_v6 = vpop.eup %4797  ;;  %v761_v53 = vrot.slane %v741_v14, 1  ;;  %v706_v55 = vpop.permute.xlu0 %705  ;;  %v10668_v47 = vld [vmem:[#allocation229_spill] sm:$0xff] }
 0x963   :  { %v899_v12 = vadd.f32 %v883_v34, %v836_v17  ;;  %v838_v62 = vsel %vm830_vm3, %v760_v42, %v10666_v46  ;;  %10667 = vst [vmem:[#allocation98_spill] sm:$0xff] %v8656_v6  ;;  %v794_v2 = vrot.slane %v741_v14, 7  ;;  %v8660_v41 = vadd.f32 %v10668_v47, %v3757_v13  ;;  %4231 = vperm.xlu0 %4793, %v3997_v39   ;;  %v10672_v13 = vld [vmem:[#allocation55_spill] sm:$0xff] }
 0x964   :  { %v901_v5 = vadd.f32 %v885_v44, %v838_v62  ;;  %v8663_v33 = vmul.f32 2.0, %v8628_v56  ;;  %v8666_v10 = vadd.f32 %v4327_v25, %v8580_v32  ;;  %v902_v18 = vadd.f32 %v886_v29, %v7833_v50  ;;  %v8682_v50 = vpop.permute.xlu1 %4196 }
 0x965   :  { %v8670_v42 = vmul.f32 2.0, %v8631_v20  ;;  %v10671_v34 = vrot.slane %v10670_v48, 7  ;;  %v826_v44 = vsel %vm781_vm4, %v761_v53, %v794_v2  ;;  %v743_v17 = vsel %vm75_vm2, %v706_v55, %v10672_v13  ;;  %v10674_v55 = vld [vmem:[#allocation71_spill] sm:$0xff] }
 0x966   :  { %10669 = vst [vmem:[#allocation82_spill] sm:$0xff] %v8666_v10  ;;  %v8679_v15 = vmul.f32 0.11111111, %v899_v12  ;;  %v887_v25 = vadd.f32 %v826_v44, %v741_v14  ;;  %v8686_v29 = vmul.f32 %v8628_v56, %v8628_v56  ;;  %v8688_v39 = vmul.f32 0.11111111, %v900_v31  ;;  %v10676_v44 = vld [vmem:[#allocation15_spill] sm:$0xff] }
 0x967   :  { %v796_v35 = vsel %vm781_vm4, %v794_v2, %v10671_v34  ;;  %v8690_v62 = vmul.f32 0.11111111, %v901_v5  ;;  %v762_v2 = vrot.slane %v743_v17, 1  ;;  %v797_v47 = vrot.slane %v743_v17, 7  ;;  %v716_v34 = vpop.permute.xlu0 %715  ;;  %4099 = vrot.lane.b32.xlu0 %v8594_v38, %s4959_s24 }
 0x968   :  { %v888_v46 = vadd.f32 %v796_v35, %v10670_v48  ;;  %v8692_v6 = vmul.f32 0.11111111, %v902_v18  ;;  %v10673_v12 = vrot.slane %v10670_v48, 1  ;;  %v745_v35 = vsel %vm75_vm2, %v716_v34, %v10674_v55  ;;  %v8715_v11 = vpop.permute.xlu1 %4206 }
 0x969   :  { %v8704_v31 = vmul.f32 %v8631_v20, %v8631_v20  ;;  %v10677_v13 = vrot.slane %v10676_v44, 7  ;;  %v827_v48 = vsel %vm781_vm4, %v762_v2, %v797_v47  ;;  %v763_v27 = vrot.slane %v745_v35, 1 }
 0x96a   :  { %v840_v14 = vsel %vm830_vm3, %v761_v53, %v10673_v12  ;;  %v8711_v53 = vmul.f32 2.0, %v8679_v15  ;;  %v10678_v12 = vld [vmem:[#allocation18_spill] sm:$0xff]  ;;  %v889_v55 = vadd.f32 %v827_v48, %v743_v17  ;;  %v8718_v10 = vmul.f32 2.0, %v8688_v39 }
 0x96b   :  { %10675 = vst [vmem:[#allocation99_spill] sm:$0xff] %v8704_v31  ;;  %v903_v5 = vadd.f32 %v887_v25, %v840_v14  ;;  %v799_v18 = vsel %vm781_vm4, %v797_v47, %v10677_v13  ;;  %v904_v34 = vadd.f32 %v888_v46, %v10678_v12  ;;  %v8721_v25 = vmul.f32 2.0, %v8690_v62  ;;  %v726_v32 = vpop.permute.xlu0 %725  ;;  %v10680_v46 = vld [vmem:[#allocation19_spill] sm:$0xff]  ;;  %4103 = vrot.lane.b32.xlu0 %v8608_v54, %s4959_s24 }
 0x96c   :  { %v890_v38 = vadd.f32 %v799_v18, %v10676_v44  ;;  %v10679_v14 = vrot.slane %v10676_v44, 1  ;;  %v800_v13 = vrot.slane %v745_v35, 7  ;;  %v8727_v20 = vmul.f32 2.0, %v8692_v6  ;;  %v10682_v44 = vld [vmem:[#allocation16_spill] sm:$0xff] }
 0x96d   :  { %v8734_v48 = vmul.f32 %v8679_v15, %v8679_v15  ;;  %v8736_v12 = vmul.f32 0.11111111, %v903_v5  ;;  %v10683_v56 = vrot.slane %v10682_v44, 7  ;;  %v8752_v5 = vmul.f32 %v8688_v39, %v8688_v39 }
 0x96e   :  { %v842_v47 = vsel %vm830_vm3, %v762_v2, %v10679_v14  ;;  %v906_v18 = vadd.f32 %v890_v38, %v10680_v46  ;;  %v828_v14 = vsel %vm781_vm4, %v763_v27, %v800_v13  ;;  %v8745_v38 = vmul.f32 0.11111111, %v904_v34  ;;  %v8748_v46 = vpop.permute.xlu1 %4216  ;;  %v10687_v34 = vld [vmem:[#allocation20_spill] sm:$0xff] }
 0x96f   :  { %v905_v17 = vadd.f32 %v889_v55, %v842_v47  ;;  %10681 = vst [vmem:[#allocation83_spill] sm:$0xff] %v8734_v48  ;;  %v802_v2 = vsel %vm781_vm4, %v800_v13, %v10683_v56  ;;  %v747_v55 = vsel %vm75_vm2, %v726_v32, %v10684_v24  ;;  %v891_v47 = vadd.f32 %v828_v14, %v745_v35  ;;  %v1511_v24 = vpop.permute.xlu0 %1510 }
 0x970   :  { %v892_v54 = vadd.f32 %v802_v2, %v10682_v44  ;;  %10685 = vst [vmem:[#allocation100_spill] sm:$0xff] %v8752_v5  ;;  %v10686_v56 = vrot.slane %v10682_v44, 1  ;;  %v764_v7 = vrot.slane %v747_v55, 1  ;;  %v803_v26 = vrot.slane %v747_v55, 7  ;;  %4107 = vrot.lane.b32.xlu0 %v8611_v59, %s4959_s24  ;;  %v10689_v44 = vld [vmem:[#allocation47_spill] sm:$0xff]  ;;  %v10691_v59 = vld [vmem:[#allocation17_spill] sm:$0xff] }
 0x971   :  { %v8754_v1 = vmul.f32 0.11111111, %v905_v17  ;;  %v8759_v32 = vmul.f32 0.11111111, %v906_v18  ;;  %v8766_v14 = vmul.f32 %v8690_v62, %v8690_v62  ;;  %v8769_v17 = vmul.f32 2.0, %v8736_v12 }
 0x972   :  { %v844_v13 = vsel %vm830_vm3, %v763_v27, %v10686_v56  ;;  %v908_v2 = vadd.f32 %v892_v54, %v10687_v34  ;;  %v829_v27 = vsel %vm781_vm4, %v764_v7, %v803_v26  ;;  %v1584_v18 = vsel %vm75_vm2, %v1511_v24, %v10689_v44  ;;  %v8785_v34 = vpop.permute.xlu1 %4226 }
 0x973   :  { %v907_v35 = vadd.f32 %v891_v47, %v844_v13  ;;  %10688 = vst [vmem:[#allocation84_spill] sm:$0xff] %v8766_v14  ;;  %v8777_v47 = vmul.f32 %v8692_v6, %v8692_v6  ;;  %v8780_v54 = vmul.f32 2.0, %v8745_v38  ;;  %v10692_v56 = vrot.slane %v10691_v59, 7  ;;  %v1526_v19 = vpop.permute.xlu0 %1525 }
 0x974   :  { %v8789_v22 = vmul.f32 %v8736_v12, %v8736_v12  ;;  %v8793_v24 = vmul.f32 %v8745_v38, %v8745_v38  ;;  %v8796_v44 = vmul.f32 2.0, %v8754_v1  ;;  %v1632_v14 = vrot.slane %v1584_v18, 7  ;;  %4111 = vrot.lane.b32.xlu0 %v8618_v61, %s4959_s24 }
 0x975   :  { %10690 = vst [vmem:[#allocation101_spill] sm:$0xff] %v8777_v47  ;;  %v805_v13 = vsel %vm781_vm4, %v803_v26, %v10692_v56  ;;  %v893_v47 = vadd.f32 %v829_v27, %v747_v55  ;;  %v1679_v9 = vrot.slane %v1584_v18, 1  ;;  %v8799_v57 = vmul.f32 2.0, %v8759_v32  ;;  %v10696_v55 = vld [vmem:[#allocation11_spill] sm:$0xff] }
 0x976   :  { %10693 = vst [vmem:[#allocation85_spill] sm:$0xff] %v8789_v22  ;;  %10694 = vst [vmem:[#allocation102_spill] sm:$0xff] %v8793_v24  ;;  %v8801_v26 = vmul.f32 0.11111111, %v907_v35  ;;  %v8803_v56 = vmul.f32 0.11111111, %v908_v2  ;;  %v894_v24 = vadd.f32 %v805_v13, %v10691_v59  ;;  %v1587_v2 = vsel %vm75_vm2, %v1526_v19, %v10699_v4 }
 0x977   :  { %v10695_v22 = vrot.slane %v10691_v59, 1  ;;  %v10697_v27 = vrot.slane %v10696_v55, 7  ;;  %v10698_v48 = vrot.slane %v10696_v55, 1  ;;  %v8825_v61 = vmul.f32 %v8754_v1, %v8754_v1  ;;  %v1536_v36 = vpop.permute.xlu0 %1535 }
 0x978   :  { %v8829_v59 = vmul.f32 %v8759_v32, %v8759_v32  ;;  %v1609_v55 = vrot.slane %v1587_v2, 1  ;;  %v8833_v4 = vmul.f32 2.0, %v8801_v26  ;;  %4115 = vrot.lane.b32.xlu0 %v8626_v37, %s4959_s24 }
 0x979   :  { %v846_v58 = vsel %vm830_vm3, %v764_v7, %v10695_v22  ;;  %v1633_v5 = vsel %vm781_vm4, %v10697_v27, %v1632_v14  ;;  %v1680_v35 = vsel %vm830_vm3, %v10698_v48, %v1679_v9  ;;  %v8821_v7 = vpop.permute.xlu1 %4236  ;;  %10702 = vst [vmem:[#allocation103_spill] sm:$0xff] %v8825_v61  ;;  %v1719_v48 = vsel %vm830_vm3, %v1679_v9, %v1632_v14 }
 0x97a   :  { %v1728_v43 = vadd.f32 %v1633_v5, %v1584_v18  ;;  %v1743_v22 = vadd.f32 %v10700_v63, %v1680_v35  ;;  %10701 = vst [vmem:[#allocation86_spill] sm:$0xff] %v8821_v7  ;;  %10703 = vst [vmem:[#allocation87_spill] sm:$0xff] %v8829_v59  ;;  %v909_v13 = vadd.f32 %v893_v47, %v846_v58  ;;  %v1637_v27 = vrot.slane %v1587_v2, 7  ;;  %v10705_v18 = vld [vmem:[#allocation72_spill] sm:$0xff]  ;;  %v10706_v58 = vld [vmem:[#allocation67_spill] sm:$0xff] }
 0x97b   :  { %v8836_v63 = vmul.f32 2.0, %v8803_v56  ;;  %v910_v35 = vadd.f32 %v894_v24, %v10705_v18  ;;  %v10707_v47 = vrot.slane %v10706_v58, 7  ;;  %v10708_v59 = vld [vmem:[#allocation30_spill] sm:$0xff]  ;;  %v10710_v18 = vrot.slane %v10706_v58, 1  ;;  %v1546_v31 = vpop.permute.xlu0 %1545 }
 0x97c   :  { %v1744_v19 = vadd.f32 %v1728_v43, %v1719_v48  ;;  %v8838_v5 = vmul.f32 0.11111111, %v1743_v22  ;;  %v1673_v14 = vsel %vm781_vm4, %v1609_v55, %v1637_v27  ;;  %v1589_v61 = vsel %vm75_vm2, %v1536_v36, %v10708_v59  ;;  %4119 = vrot.lane.b32.xlu0 %v8647_v3, %s4959_s24 }
 0x97d   :  { %v1639_v9 = vsel %vm781_vm4, %v1637_v27, %v10707_v47  ;;  %v1731_v22 = vadd.f32 %v1673_v14, %v1587_v2  ;;  %v4102_v48 = vpop.permute.xlu1 %4101  ;;  %v8855_v24 = vmul.f32 0.11111111, %v909_v13  ;;  %v1684_v47 = vsel %vm830_vm3, %v1609_v55, %v10710_v18 }
 0x97e   :  { %10704 = vst [vmem:[#allocation104_spill] sm:$0xff] %v8838_v5  ;;  %v8850_v16 = vmul.f32 0.11111111, %v1744_v19  ;;  %v4479_v43 = vmul.f32 %v8663_v33, %v8838_v5  ;;  %v1732_v37 = vadd.f32 %v1639_v9, %v10706_v58  ;;  %v1610_v27 = vrot.slane %v1589_v61, 1  ;;  %v10711_v19 = vld [vmem:[#allocation41_spill] sm:$0xff]  ;;  %v10713_v58 = vld [vmem:[#allocation58_spill] sm:$0xff] }
 0x97f   :  { %v1640_v7 = vrot.slane %v1589_v61, 7  ;;  %v1747_v59 = vadd.f32 %v1731_v22, %v1684_v47  ;;  %v10712_v33 = vld [vmem:[#allocation93_spill] sm:$0xff]  ;;  %v8868_v13 = vmul.f32 0.11111111, %v910_v35  ;;  %v10714_v55 = vrot.slane %v10713_v58, 7 }
 0x980   :  { %10709 = vst [vmem:[#allocation88_spill] sm:$0xff] %v8850_v16  ;;  %v4480_v36 = vmul.f32 %v8670_v42, %v8850_v16  ;;  %v1748_v8 = vadd.f32 %v1732_v37, %v10711_v19  ;;  %v4146_v2 = vsel %vm74_vm1, %v10712_v33, %v4102_v48  ;;  %v8876_v42 = vmul.f32 %v8801_v26, %v8801_v26 }
 0x981   :  { %v1642_v9 = vsel %vm781_vm4, %v1640_v7, %v10714_v55  ;;  %v1674_v14 = vsel %vm781_vm4, %v1610_v27, %v1640_v7  ;;  %v8878_v22 = vmul.f32 0.11111111, %v1747_v59  ;;  %v4106_v18 = vpop.permute.xlu1 %4105  ;;  %v8884_v3 = vmul.f32 %v8803_v56, %v8803_v56  ;;  %v10717_v59 = vld [vmem:[#allocation40_spill] sm:$0xff]  ;;  %4123 = vrot.lane.b32.xlu0 %v8660_v41, %s4959_s24 }
 0x982   :  { %v8880_v37 = vmul.f32 0.11111111, %v1748_v8  ;;  %v1733_v48 = vadd.f32 %v1674_v14, %v1589_v61  ;;  %v10715_v35 = vrot.slane %v10713_v58, 1  ;;  %v1734_v7 = vadd.f32 %v1642_v9, %v10713_v58  ;;  %v1556_v61 = vpop.permute.xlu0 %1555  ;;  %v10720_v58 = vld [vmem:[#allocation129_spill] sm:$0xff] }
 0x983   :  { %v8893_v19 = vsel %vm75_vm2, %v8615_v40, %v4146_v2  ;;  %v1591_v8 = vsel %vm75_vm2, %v1546_v31, %v10717_v59  ;;  %v8900_v33 = vmul.f32 %v8878_v22, %v8679_v15  ;;  %v8913_v31 = vmul.f32 2.0, %v8855_v24 }
 0x984   :  { %v1686_v47 = vsel %vm830_vm3, %v1610_v27, %v10715_v35  ;;  %10716 = vst [vmem:[#allocation105_spill] sm:$0xff] %v8893_v19  ;;  %v8904_v55 = vmul.f32 %v8880_v37, %v8688_v39  ;;  %v4483_v27 = vmul.f32 %v8711_v53, %v8878_v22  ;;  %v4484_v40 = vmul.f32 %v8718_v10, %v8880_v37 }
 0x985   :  { %10718 = vst [vmem:[#allocation89_spill] sm:$0xff] %v8900_v33  ;;  %v1749_v2 = vadd.f32 %v1733_v48, %v1686_v47  ;;  %v1750_v15 = vadd.f32 %v1734_v7, %v10720_v58  ;;  %v1611_v9 = vrot.slane %v1591_v8, 1  ;;  %v8917_v14 = vmul.f32 2.0, %v8868_v13  ;;  %v4110_v59 = vpop.permute.xlu1 %4109  ;;  %v10726_v7 = vld [vmem:[#allocation69_spill] sm:$0xff] }
 0x986   :  { %10719 = vst [vmem:[#allocation111_spill] sm:$0xff] %v8904_v55  ;;  %v1643_v35 = vrot.slane %v1591_v8, 7  ;;  %v8921_v10 = vadd.f32 0.0001, %v4479_v43  ;;  %v1566_v33 = vpop.permute.xlu0 %1565  ;;  %v8929_v48 = vmul.f32 %v8855_v24, %v8855_v24  ;;  %v8931_v47 = vadd.f32 0.0001, %v4480_v36 }
 0x987   :  { %v8923_v55 = vmul.f32 0.11111111, %v1749_v2  ;;  %v8925_v41 = vmul.f32 0.11111111, %v1750_v15  ;;  %v10727_v58 = vrot.slane %v10726_v7, 7  ;;  %v4148_v43 = vsel %vm74_vm1, %v8208_v45, %v4106_v18 }
 0x988   :  { %10721 = vst [vmem:[#allocation112_spill] sm:$0xff] %v8921_v10  ;;  %10724 = vst [vmem:[#allocation146_spill] sm:$0xff] %v8929_v48  ;;  %v1675_v53 = vsel %vm781_vm4, %v1611_v9, %v1643_v35  ;;  %v10736_v48 = vld [vmem:[#allocation124_spill] sm:$0xff] }
 0x989   :  { %10722 = vst [vmem:[#allocation113_spill] sm:$0xff] %v8923_v55  ;;  %10723 = vst [vmem:[#allocation162_spill] sm:$0xff] %v8925_v41  ;;  %v1645_v39 = vsel %vm781_vm4, %v1643_v35, %v10727_v58  ;;  %v8942_v2 = vmul.f32 %v8923_v55, %v8690_v62  ;;  %v8946_v15 = vmul.f32 %v8925_v41, %v8692_v6  ;;  %v10730_v35 = vrot.slane %v8893_v19, 7 }
 0x98a   :  { %10725 = vst [vmem:[#allocation114_spill] sm:$0xff] %v8931_v47  ;;  %v4485_v36 = vmul.f32 %v8721_v25, %v8923_v55  ;;  %v4486_v58 = vmul.f32 %v8727_v20, %v8925_v41  ;;  %v10731_v47 = vrot.slane %v8893_v19, 1  ;;  %v1735_v18 = vadd.f32 %v1675_v53, %v1591_v8  ;;  %v1576_v55 = vpop.permute.xlu0 %1575 }
 0x98b   :  { %10728 = vst [vmem:[#allocation177_spill] sm:$0xff] %v8942_v2  ;;  %10729 = vst [vmem:[#allocation196_spill] sm:$0xff] %v8946_v15  ;;  %v1736_v62 = vadd.f32 %v1645_v39, %v10726_v7  ;;  %v10733_v2 = vld [vmem:[#allocation48_spill] sm:$0xff]  ;;  %v8963_v15 = vadd.f32 0.0001, %v4483_v27  ;;  %v10735_v25 = vrot.slane %v10726_v7, 1  ;;  %v8972_v8 = vsel %vm75_vm2, %v8654_v23, %v4148_v43  ;;  %v4114_v27 = vpop.permute.xlu1 %4113 }
 0x98c   :  { %v8957_v45 = vsel %vm830_vm3, %v10731_v47, %v10730_v35  ;;  %v1593_v6 = vsel %vm75_vm2, %v1556_v61, %v10733_v2  ;;  %10737 = vst [vmem:[#allocation202_spill] sm:$0xff] %v8972_v8  ;;  %v10738_v39 = vld [vmem:[#allocation23_spill] sm:$0xff]  ;;  %v8977_v53 = vadd.f32 0.0001, %v4484_v40  ;;  %v10740_v7 = vld [vmem:[#allocation50_spill] sm:$0xff] }
 0x98d   :  { %10732 = vst [vmem:[#allocation161_spill] sm:$0xff] %v8957_v45  ;;  %10734 = vst [vmem:[#allocation145_spill] sm:$0xff] %v8963_v15  ;;  %v1688_v20 = vsel %vm830_vm3, %v1611_v9, %v10735_v25  ;;  %v1612_v10 = vrot.slane %v1593_v6, 1  ;;  %v1646_v41 = vrot.slane %v1593_v6, 7  ;;  %v1752_v47 = vadd.f32 %v1736_v62, %v10736_v48 }
 0x98e   :  { %v1751_v19 = vadd.f32 %v1735_v18, %v1688_v20  ;;  %v1595_v61 = vsel %vm75_vm2, %v1566_v33, %v10738_v39  ;;  %10739 = vst [vmem:[#allocation176_spill] sm:$0xff] %v8977_v53  ;;  %v10741_v9 = vrot.slane %v10740_v7, 7  ;;  %v4150_v48 = vsel %vm74_vm1, %v8240_v21, %v4110_v59  ;;  %v10820_v53 = vld [vmem:[#allocation132_spill] sm:$0xff] }
 0x98f   :  { %v1676_v35 = vsel %vm781_vm4, %v1612_v10, %v1646_v41  ;;  %v8988_v23 = vmul.f32 0.11111111, %v1752_v47  ;;  %v10742_v62 = vrot.slane %v10740_v7, 1  ;;  %v1613_v20 = vrot.slane %v1595_v61, 1  ;;  %v10745_v47 = vld [vmem:[#allocation43_spill] sm:$0xff] }
 0x990   :  { %v1648_v2 = vsel %vm781_vm4, %v1646_v41, %v10741_v9  ;;  %v8986_v18 = vmul.f32 0.11111111, %v1751_v19  ;;  %v1737_v43 = vadd.f32 %v1676_v35, %v1593_v6  ;;  %v1649_v39 = vrot.slane %v1595_v61, 7  ;;  %v2375_v41 = vpop.permute.xlu0 %2374 }
 0x991   :  { %v1738_v33 = vadd.f32 %v1648_v2, %v10740_v7  ;;  %v1690_v25 = vsel %vm830_vm3, %v1612_v10, %v10742_v62  ;;  %v9001_v21 = vmul.f32 %v8988_v23, %v8745_v38  ;;  %v4488_v59 = vmul.f32 %v8780_v54, %v8988_v23 }
 0x992   :  { %v8997_v9 = vmul.f32 %v8986_v18, %v8736_v12  ;;  %v4487_v19 = vmul.f32 %v8769_v17, %v8986_v18  ;;  %v1753_v6 = vadd.f32 %v1737_v43, %v1690_v25  ;;  %v9011_v7 = vsel %vm75_vm2, %v8682_v50, %v4150_v48  ;;  %v10747_v12 = vld [vmem:[#allocation42_spill] sm:$0xff]  ;;  %v4118_v43 = vpop.permute.xlu1 %4117  ;;  %v10752_v17 = vld [vmem:[#allocation73_spill] sm:$0xff] }
 0x993   :  { %10744 = vst [vmem:[#allocation190_spill] sm:$0xff] %v9001_v21  ;;  %v1754_v10 = vadd.f32 %v1738_v33, %v10745_v47  ;;  %10746 = vst [vmem:[#allocation127_spill] sm:$0xff] %v9011_v7  ;;  %v10748_v2 = vrot.slane %v10747_v12, 7  ;;  %v9016_v38 = vadd.f32 0.0001, %v4485_v36  ;;  %v1677_v54 = vsel %vm781_vm4, %v1613_v20, %v1649_v39  ;;  %v10807_v21 = vld [vmem:[#allocation130_spill] sm:$0xff] }
 0x994   :  { %10743 = vst [vmem:[#allocation123_spill] sm:$0xff] %v8997_v9  ;;  %v9018_v62 = vadd.f32 0.0001, %v4486_v58  ;;  %v9022_v25 = vmul.f32 0.11111111, %v1753_v6  ;;  %v1739_v47 = vadd.f32 %v1677_v54, %v1595_v61  ;;  %v2390_v48 = vpop.permute.xlu0 %2389  ;;  %v9941_v40 = vrot.slane %v9011_v7, 7 }
 0x995   :  { %v1651_v35 = vsel %vm781_vm4, %v1649_v39, %v10748_v2  ;;  %10749 = vst [vmem:[#allocation195_spill] sm:$0xff] %v9016_v38  ;;  %v9024_v33 = vmul.f32 0.11111111, %v1754_v10  ;;  %v10751_v58 = vrot.slane %v10747_v12, 1  ;;  %v1597_v39 = vsel %vm75_vm2, %v1576_v55, %v10752_v17  ;;  %v10756_v17 = vld [vmem:[#allocation51_spill] sm:$0xff] }
 0x996   :  { %10750 = vst [vmem:[#allocation159_spill] sm:$0xff] %v9018_v62  ;;  %v1740_v50 = vadd.f32 %v1651_v35, %v10747_v12  ;;  %v9037_v6 = vmul.f32 %v9022_v25, %v8754_v1  ;;  %v4489_v10 = vmul.f32 %v8796_v44, %v9022_v25  ;;  %v4152_v55 = vsel %vm74_vm1, %v8290_v49, %v4114_v27  ;;  %v10816_v62 = vld [vmem:[#allocation85_spill] sm:$0xff] }
 0x997   :  { %v1692_v2 = vsel %vm830_vm3, %v1613_v20, %v10751_v58  ;;  %v9041_v61 = vmul.f32 %v9024_v33, %v8759_v32  ;;  %v4490_v12 = vmul.f32 %v8799_v57, %v9024_v33  ;;  %v10755_v20 = vld [vmem:[#allocation92_spill] sm:$0xff]  ;;  %v2448_v1 = vsel %vm75_vm2, %v2375_v41, %v10756_v17 }
 0x998   :  { %10753 = vst [vmem:[#allocation142_spill] sm:$0xff] %v9037_v6  ;;  %v1755_v35 = vadd.f32 %v1739_v47, %v1692_v2  ;;  %v1756_v54 = vadd.f32 %v1740_v50, %v10755_v20  ;;  %v9054_v58 = vadd.f32 0.0001, %v4487_v19  ;;  %v9056_v32 = vadd.f32 0.0001, %v4488_v59  ;;  %v2400_v50 = vpop.permute.xlu0 %2399  ;;  %v4122_v2 = vpop.permute.xlu1 %4121 }
 0x999   :  { %10754 = vst [vmem:[#allocation160_spill] sm:$0xff] %v9041_v61  ;;  %v10759_v44 = vrot.slane %v8972_v8, 7  ;;  %v10760_v36 = vrot.slane %v8972_v8, 1  ;;  %v1614_v47 = vrot.slane %v1597_v39, 1  ;;  %v10762_v49 = vrot.slane %v9011_v7, 1  ;;  %v10830_v8 = vld [vmem:[#allocation74_spill] sm:$0xff] }
 0x99a   :  { %10757 = vst [vmem:[#allocation143_spill] sm:$0xff] %v9054_v58  ;;  %10758 = vst [vmem:[#allocation163_spill] sm:$0xff] %v9056_v32  ;;  %v9072_v41 = vmul.f32 0.11111111, %v1755_v35  ;;  %v9074_v19 = vmul.f32 0.11111111, %v1756_v54  ;;  %v4154_v20 = vsel %vm74_vm1, %v8328_v28, %v4118_v43 }
 0x99b   :  { %v9063_v57 = vsel %vm830_vm3, %v10760_v36, %v10759_v44  ;;  %v9070_v27 = vsel %vm830_vm3, %v10762_v49, %v9941_v40  ;;  %v1652_v59 = vrot.slane %v1597_v39, 7  ;;  %v9079_v36 = vsel %vm75_vm2, %v8715_v11, %v4152_v55  ;;  %v10770_v43 = vld [vmem:[#allocation57_spill] sm:$0xff]  ;;  %v10803_v32 = vld [vmem:[#allocation83_spill] sm:$0xff] }
 0x99c   :  { %10761 = vst [vmem:[#allocation147_spill] sm:$0xff] %v9063_v57  ;;  %10763 = vst [vmem:[#allocation175_spill] sm:$0xff] %v9070_v27  ;;  %v2496_v17 = vrot.slane %v2448_v1, 7  ;;  %v2543_v44 = vrot.slane %v2448_v1, 1  ;;  %v9086_v49 = vmul.f32 %v9072_v41, %v8801_v26  ;;  %v9090_v35 = vmul.f32 %v9074_v19, %v8803_v56  ;;  %v2410_v61 = vpop.permute.xlu0 %2409 }
 0x99d   :  { %10764 = vst [vmem:[#allocation164_spill] sm:$0xff] %v9079_v36  ;;  %v4491_v54 = vmul.f32 %v8833_v4, %v9072_v41  ;;  %v9096_v11 = vmul.f32 %v8836_v63, %v9074_v19  ;;  %v9098_v55 = vadd.f32 0.0001, %v4489_v10  ;;  %v9100_v28 = vadd.f32 0.0001, %v4490_v12 }
 0x99e   :  { %10765 = vst [vmem:[#allocation148_spill] sm:$0xff] %v9086_v49  ;;  %10766 = vst [vmem:[#allocation165_spill] sm:$0xff] %v9090_v35  ;;  %v10771_v40 = vrot.slane %v10770_v43, 7  ;;  %v1678_v49 = vsel %vm781_vm4, %v1614_v47, %v1652_v59  ;;  %v9111_v63 = vsel %vm75_vm2, %v8748_v46, %v4154_v20  ;;  %v10773_v12 = vrot.slane %v10770_v43, 1  ;;  %v4126_v20 = vpop.permute.xlu1 %4125 }
 0x99f   :  { %10767 = vst [vmem:[#allocation149_spill] sm:$0xff] %v9096_v11  ;;  %10768 = vst [vmem:[#allocation166_spill] sm:$0xff] %v9098_v55  ;;  %v1741_v35 = vadd.f32 %v1678_v49, %v1597_v39  ;;  %v10775_v56 = vrot.slane %v8184_v51, 1  ;;  %v9942_v10 = vrot.slane %v9111_v63, 7 }
 0x9a0   :  { %10769 = vst [vmem:[#allocation150_spill] sm:$0xff] %v9100_v28  ;;  %v1654_v26 = vsel %vm781_vm4, %v1652_v59, %v10771_v40  ;;  %10772 = vst [vmem:[#allocation120_spill] sm:$0xff] %v9111_v63  ;;  %v1694_v11 = vsel %vm830_vm3, %v1614_v47, %v10773_v12  ;;  %v10774_v40 = vrot.slane %v8184_v51, 7  ;;  %v4156_v47 = vsel %vm74_vm1, %v8404_v52, %v4122_v2  ;;  %v10777_v12 = vld [vmem:[#allocation26_spill] sm:$0xff] }
 0x9a1   :  { %v1742_v4 = vadd.f32 %v1654_v26, %v10770_v43  ;;  %v2544_v39 = vsel %vm830_vm3, %v10775_v56, %v2543_v44  ;;  %v1757_v49 = vadd.f32 %v1741_v35, %v1694_v11  ;;  %v10776_v26 = vld [vmem:[#allocation77_spill] sm:$0xff]  ;;  %v2583_v43 = vsel %vm830_vm3, %v2543_v44, %v2496_v17  ;;  %v2420_v56 = vpop.permute.xlu0 %2419 }
 0x9a2   :  { %v2497_v59 = vsel %vm781_vm4, %v10774_v40, %v2496_v17  ;;  %v2607_v46 = vadd.f32 %v8317_v0, %v2544_v39  ;;  %v2451_v51 = vsel %vm75_vm2, %v2390_v48, %v10777_v12  ;;  %v4158_v52 = vsel %vm74_vm1, %v8464_v30, %v4126_v20  ;;  %v10788_v20 = vld [vmem:[#allocation27_spill] sm:$0xff] }
 0x9a3   :  { %v1758_v28 = vadd.f32 %v1742_v4, %v10776_v26  ;;  %v2592_v55 = vadd.f32 %v2497_v59, %v2448_v1  ;;  %v9133_v35 = vmul.f32 0.11111111, %v1757_v49  ;;  %v9943_v4 = vrot.slane %v9111_v63, 1  ;;  %v10783_v59 = vld [vmem:[#allocation107_spill] sm:$0xff]  ;;  %v10809_v63 = vld [vmem:[#allocation68_spill] sm:$0xff] }
 0x9a4   :  { %v9137_v0 = vmul.f32 0.11111111, %v2607_v46  ;;  %v2473_v40 = vrot.slane %v2451_v51, 1  ;;  %v2501_v17 = vrot.slane %v2451_v51, 7  ;;  %v2453_v39 = vsel %vm75_vm2, %v2400_v50, %v10783_v59  ;;  %v10792_v59 = vld [vmem:[#allocation86_spill] sm:$0xff] }
 0x9a5   :  { %v9135_v11 = vmul.f32 0.11111111, %v1758_v28  ;;  %v2608_v1 = vadd.f32 %v2592_v55, %v2583_v43  ;;  %v9145_v2 = vmul.f32 %v9133_v35, %v8855_v24  ;;  %v9153_v44 = vmul.f32 %v8913_v31, %v9133_v35  ;;  %v2430_v31 = vpop.permute.xlu0 %2429 }
 0x9a6   :  { %v9166_v24 = vsel %vm75_vm2, %v8785_v34, %v4156_v47  ;;  %v9171_v49 = vadd.f32 0.0001, %v4491_v54  ;;  %v10786_v26 = vrot.slane %v9079_v36, 1  ;;  %v10789_v43 = vrot.slane %v10788_v20, 7  ;;  %v10791_v54 = vld [vmem:[#allocation99_spill] sm:$0xff]  ;;  %v10795_v47 = vld [vmem:[#allocation52_spill] sm:$0xff] }
 0x9a7   :  { %10778 = vst [vmem:[#allocation184_spill] sm:$0xff] %v9145_v2  ;;  %v9149_v48 = vmul.f32 %v9135_v11, %v8868_v13  ;;  %10780 = vst [vmem:[#allocation151_spill] sm:$0xff] %v9153_v44  ;;  %v9157_v55 = vmul.f32 %v8917_v14, %v9135_v11  ;;  %v9159_v28 = vmul.f32 0.11111111, %v2608_v1  ;;  %v10785_v14 = vrot.slane %v9079_v36, 7 }
 0x9a8   :  { %10782 = vst [vmem:[#allocation152_spill] sm:$0xff] %v9166_v24  ;;  %10784 = vst [vmem:[#allocation178_spill] sm:$0xff] %v9171_v49  ;;  %v2503_v12 = vsel %vm781_vm4, %v2501_v17, %v10789_v43  ;;  %v2537_v34 = vsel %vm781_vm4, %v2473_v40, %v2501_v17  ;;  %v9189_v50 = vsel %vm830_vm3, %v9943_v4, %v9942_v10  ;;  %v10794_v17 = vrot.slane %v10788_v20, 1 }
 0x9a9   :  { %10779 = vst [vmem:[#allocation167_spill] sm:$0xff] %v9149_v48  ;;  %10781 = vst [vmem:[#allocation168_spill] sm:$0xff] %v9157_v55  ;;  %v9178_v46 = vsel %vm830_vm3, %v10786_v26, %v10785_v14  ;;  %v2595_v1 = vadd.f32 %v2537_v34, %v2451_v51  ;;  %v9196_v14 = vsel %vm75_vm2, %v10792_v59, %v4158_v52  ;;  %v2474_v55 = vrot.slane %v2453_v39, 1  ;;  %v2440_v34 = vpop.permute.xlu0 %2439  ;;  %v10796_v52 = vld [vmem:[#allocation35_spill] sm:$0xff]  ;;  %v10797_v48 = vld [vmem:[#allocation28_spill] sm:$0xff] }
 0x9aa   :  { %10787 = vst [vmem:[#allocation169_spill] sm:$0xff] %v9178_v46  ;;  %10790 = vst [vmem:[#allocation153_spill] sm:$0xff] %v9189_v50  ;;  %v2548_v43 = vsel %vm830_vm3, %v2473_v40, %v10794_v17  ;;  %v2596_v30 = vadd.f32 %v2503_v12, %v10788_v20  ;;  %v2504_v44 = vrot.slane %v2453_v39, 7  ;;  %v2455_v51 = vsel %vm75_vm2, %v2410_v61, %v10795_v47  ;;  %v10799_v40 = vld [vmem:[#allocation38_spill] sm:$0xff] }
 0x9ab   :  { %10793 = vst [vmem:[#allocation125_spill] sm:$0xff] %v9196_v14  ;;  %v2611_v4 = vadd.f32 %v2595_v1, %v2548_v43  ;;  %v10798_v26 = vrot.slane %v10797_v48, 1  ;;  %v2475_v49 = vrot.slane %v2455_v51, 1  ;;  %v2457_v20 = vsel %vm75_vm2, %v2420_v56, %v10799_v40 }
 0x9ac   :  { %v2612_v59 = vadd.f32 %v2596_v30, %v10796_v52  ;;  %v10800_v1 = vrot.slane %v10797_v48, 7  ;;  %v2538_v61 = vsel %vm781_vm4, %v2474_v55, %v2504_v44  ;;  %v2507_v47 = vrot.slane %v2455_v51, 7 }
 0x9ad   :  { %v2550_v2 = vsel %vm830_vm3, %v2474_v55, %v10798_v26  ;;  %v9214_v12 = vmul.f32 0.11111111, %v2611_v4  ;;  %v2597_v30 = vadd.f32 %v2538_v61, %v2453_v39  ;;  %v10801_v26 = vld [vmem:[#allocation53_spill] sm:$0xff]  ;;  %v3271_v55 = vpop.permute.xlu0 %3270  ;;  %v2510_v50 = vrot.slane %v2457_v20, 7 }
 0x9ae   :  { %v2506_v17 = vsel %vm781_vm4, %v2504_v44, %v10800_v1  ;;  %v9220_v43 = vmul.f32 0.11111111, %v2612_v59  ;;  %v10802_v10 = vrot.slane %v10801_v26, 1  ;;  %v10804_v4 = vrot.slane %v10801_v26, 7  ;;  %v10805_v59 = vld [vmem:[#allocation100_spill] sm:$0xff] }
 0x9af   :  { %v2598_v52 = vadd.f32 %v2506_v17, %v10797_v48  ;;  %v2539_v1 = vsel %vm781_vm4, %v2475_v49, %v2507_v47  ;;  %v2476_v44 = vrot.slane %v2457_v20, 1  ;;  %v2613_v61 = vadd.f32 %v2597_v30, %v2550_v2  ;;  %v10806_v48 = vld [vmem:[#allocation65_spill] sm:$0xff]  ;;  %v10810_v30 = vld [vmem:[#allocation135_spill] sm:$0xff] }
 0x9b0   :  { %v2552_v6 = vsel %vm830_vm3, %v2475_v49, %v10802_v10  ;;  %v2509_v40 = vsel %vm781_vm4, %v2507_v47, %v10804_v4  ;;  %v2599_v58 = vadd.f32 %v2539_v1, %v2455_v51  ;;  %v10808_v56 = vrot.slane %v10807_v21, 1 }
 0x9b1   :  { %v2614_v17 = vadd.f32 %v2598_v52, %v10806_v48  ;;  %v2600_v10 = vadd.f32 %v2509_v40, %v10801_v26  ;;  %v2459_v49 = vsel %vm75_vm2, %v2430_v31, %v10809_v63  ;;  %v9242_v47 = vmul.f32 0.11111111, %v2613_v61  ;;  %v10812_v48 = vld [vmem:[#allocation84_spill] sm:$0xff]  ;;  %v10813_v63 = vld [vmem:[#allocation101_spill] sm:$0xff] }
 0x9b2   :  { %v2554_v9 = vsel %vm830_vm3, %v2476_v44, %v10808_v56  ;;  %v2615_v39 = vadd.f32 %v2599_v58, %v2552_v6  ;;  %v2477_v2 = vrot.slane %v2459_v49, 1  ;;  %v10811_v51 = vrot.slane %v10807_v21, 7  ;;  %v3286_v56 = vpop.permute.xlu0 %3285 }
 0x9b3   :  { %v9244_v4 = vmul.f32 0.11111111, %v2614_v17  ;;  %v2616_v52 = vadd.f32 %v2600_v10, %v10810_v30  ;;  %v2540_v40 = vsel %vm781_vm4, %v2476_v44, %v2510_v50  ;;  %v2513_v1 = vrot.slane %v2459_v49, 7  ;;  %v10814_v10 = vld [vmem:[#allocation44_spill] sm:$0xff] }
 0x9b4   :  { %v2512_v26 = vsel %vm781_vm4, %v2510_v50, %v10811_v51  ;;  %v9255_v61 = vmul.f32 0.11111111, %v2615_v39  ;;  %v2601_v6 = vadd.f32 %v2540_v40, %v2457_v20  ;;  %v10815_v30 = vrot.slane %v10814_v10, 7  ;;  %v10817_v39 = vld [vmem:[#allocation102_spill] sm:$0xff] }
 0x9b5   :  { %v9257_v58 = vmul.f32 0.11111111, %v2616_v52  ;;  %v2602_v17 = vadd.f32 %v2512_v26, %v10807_v21  ;;  %v2541_v50 = vsel %vm781_vm4, %v2477_v2, %v2513_v1  ;;  %v10818_v52 = vld [vmem:[#allocation60_spill] sm:$0xff]  ;;  %v10819_v21 = vrot.slane %v10814_v10, 1 }
 0x9b6   :  { %v2515_v51 = vsel %vm781_vm4, %v2513_v1, %v10815_v30  ;;  %v2617_v38 = vadd.f32 %v2601_v6, %v2554_v9  ;;  %v2603_v31 = vadd.f32 %v2541_v50, %v2459_v49  ;;  %v9274_v36 = vpop.permute.xlu0 %3295  ;;  %v2461_v9 = vsel %vm75_vm2, %v2440_v34, %v10820_v53  ;;  %v10824_v34 = vld [vmem:[#allocation87_spill] sm:$0xff] }
 0x9b7   :  { %v2618_v40 = vadd.f32 %v2602_v17, %v10818_v52  ;;  %v2556_v26 = vsel %vm830_vm3, %v2477_v2, %v10819_v21  ;;  %v2604_v30 = vadd.f32 %v2515_v51, %v10814_v10  ;;  %v3535_v49 = vmul.f32 %v8838_v5, %v8838_v5  ;;  %v10821_v17 = vld [vmem:[#allocation31_spill] sm:$0xff] }
 0x9b8   :  { %v9276_v1 = vmul.f32 0.11111111, %v2617_v38  ;;  %v2619_v44 = vadd.f32 %v2603_v31, %v2556_v26  ;;  %v2478_v52 = vrot.slane %v2461_v9, 1  ;;  %v2516_v2 = vrot.slane %v2461_v9, 7  ;;  %v10822_v21 = vld [vmem:[#allocation103_spill] sm:$0xff]  ;;  %v10826_v26 = vld [vmem:[#allocation45_spill] sm:$0xff] }
 0x9b9   :  { %v9283_v6 = vmul.f32 0.11111111, %v2618_v40  ;;  %v2620_v50 = vadd.f32 %v2604_v30, %v10821_v17  ;;  %v9292_v38 = vmul.f32 %v8850_v16, %v8850_v16  ;;  %v4559_v53 = vadd.f32 %v3535_v49, %v8686_v29 }
 0x9ba   :  { %v9288_v51 = vmul.f32 0.11111111, %v2619_v44  ;;  %v10827_v30 = vrot.slane %v10826_v26, 7  ;;  %v2542_v20 = vsel %vm781_vm4, %v2478_v52, %v2516_v2  ;;  %v9303_v10 = vpop.permute.xlu0 %3305  ;;  %v10828_v31 = vrot.slane %v10826_v26, 1 }
 0x9bb   :  { %v9297_v40 = vmul.f32 0.11111111, %v2620_v50  ;;  %v2605_v15 = vadd.f32 %v2542_v20, %v2461_v9 }
 0x9bc   :  { %10823 = vst [vmem:[#allocation188_spill] sm:$0xff] %v9288_v51  ;;  %v2518_v17 = vsel %vm781_vm4, %v2516_v2, %v10827_v30  ;;  %v2558_v7 = vsel %vm830_vm3, %v2478_v52, %v10828_v31  ;;  %v4560_v2 = vadd.f32 %v9292_v38, %v10791_v54  ;;  %v10829_v30 = vld [vmem:[#allocation61_spill] sm:$0xff]  ;;  %v9330_v52 = vmul.f32 %v8880_v37, %v8880_v37  ;;  %v10832_v31 = vld [vmem:[#allocation32_spill] sm:$0xff] }
 0x9bd   :  { %10825 = vst [vmem:[#allocation170_spill] sm:$0xff] %v9297_v40  ;;  %v2606_v27 = vadd.f32 %v2518_v17, %v10826_v26  ;;  %v3344_v44 = vsel %vm75_vm2, %v3271_v55, %v10829_v30  ;;  %v2621_v57 = vadd.f32 %v2605_v15, %v2558_v7  ;;  %v9322_v17 = vmul.f32 %v8868_v13, %v8868_v13  ;;  %v10835_v13 = vld [vmem:[#allocation90_spill] sm:$0xff]  ;;  %v10838_v40 = vld [vmem:[#allocation37_spill] sm:$0xff] }
 0x9be   :  { %v3392_v20 = vrot.slane %v3344_v44, 7  ;;  %v3439_v9 = vrot.slane %v3344_v44, 1  ;;  %v9326_v26 = vmul.f32 %v8878_v22, %v8878_v22  ;;  %v3347_v15 = vsel %vm75_vm2, %v3286_v56, %v10832_v31  ;;  %v9335_v7 = vpop.permute.xlu0 %3315 }
 0x9bf   :  { %v2622_v46 = vadd.f32 %v2606_v27, %v10830_v8  ;;  %10831 = vst [vmem:[#allocation154_spill] sm:$0xff] %v9322_v17  ;;  %v9337_v8 = vmul.f32 0.11111111, %v2621_v57  ;;  %v10836_v55 = vrot.slane %v10835_v13, 7  ;;  %v10837_v22 = vrot.slane %v10835_v13, 1  ;;  %v10839_v57 = vld [vmem:[#allocation146_spill] sm:$0xff] }
 0x9c0   :  { %v3479_v37 = vsel %vm830_vm3, %v3439_v9, %v3392_v20  ;;  %v4563_v56 = vadd.f32 %v9326_v26, %v10803_v32  ;;  %v3369_v13 = vrot.slane %v3347_v15, 1  ;;  %v10844_v31 = vrot.slane %v9196_v14, 1 }
 0x9c1   :  { %10833 = vst [vmem:[#allocation172_spill] sm:$0xff] %v9337_v8  ;;  %v9339_v27 = vmul.f32 0.11111111, %v2622_v46  ;;  %v3393_v30 = vsel %vm781_vm4, %v10836_v55, %v3392_v20  ;;  %v3440_v50 = vsel %vm830_vm3, %v10837_v22, %v3439_v9  ;;  %v4564_v55 = vadd.f32 %v9330_v52, %v10805_v59  ;;  %v10846_v8 = vld [vmem:[#allocation33_spill] sm:$0xff] }
 0x9c2   :  { %v3488_v45 = vadd.f32 %v3393_v30, %v3344_v44  ;;  %v3503_v51 = vadd.f32 %v10838_v40, %v3440_v50  ;;  %v10840_v22 = vrot.slane %v9166_v24, 7  ;;  %v10841_v20 = vrot.slane %v9166_v24, 1  ;;  %v9364_v30 = vpop.permute.xlu0 %3325  ;;  %v10848_v24 = vld [vmem:[#allocation113_spill] sm:$0xff] }
 0x9c3   :  { %10834 = vst [vmem:[#allocation156_spill] sm:$0xff] %v9339_v27  ;;  %v3397_v9 = vrot.slane %v3347_v15, 7  ;;  %v10843_v46 = vrot.slane %v9196_v14, 7  ;;  %v10847_v16 = vrot.slane %v10846_v8, 1 }
 0x9c4   :  { %v9362_v44 = vsel %vm830_vm3, %v10841_v20, %v10840_v22  ;;  %v3504_v40 = vadd.f32 %v3488_v45, %v3479_v37  ;;  %v3519_v50 = vmul.f32 0.11111111, %v3503_v51  ;;  %v9378_v22 = vmul.f32 %v10848_v24, %v10848_v24  ;;  %v10849_v45 = vld [vmem:[#allocation162_spill] sm:$0xff] }
 0x9c5   :  { %10842 = vst [vmem:[#allocation174_spill] sm:$0xff] %v9362_v44  ;;  %v9371_v27 = vsel %vm830_vm3, %v10844_v31, %v10843_v46  ;;  %v3444_v5 = vsel %vm830_vm3, %v3369_v13, %v10847_v16  ;;  %v9382_v51 = vmul.f32 %v10849_v45, %v10849_v45  ;;  %v10850_v44 = vrot.slane %v10846_v8, 7 }
 0x9c6   :  { %10845 = vst [vmem:[#allocation158_spill] sm:$0xff] %v9371_v27  ;;  %v3520_v37 = vmul.f32 0.11111111, %v3504_v40  ;;  %v3551_v20 = vsub.f32 %v3519_v50, %v3535_v49  ;;  %v3433_v46 = vsel %vm781_vm4, %v3369_v13, %v3397_v9  ;;  %v4565_v16 = vadd.f32 %v9378_v22, %v10812_v48  ;;  %v10852_v50 = vld [vmem:[#allocation106_spill] sm:$0xff] }
 0x9c7   :  { %v3399_v14 = vsel %vm781_vm4, %v3397_v9, %v10850_v44  ;;  %v3491_v31 = vadd.f32 %v3433_v46, %v3347_v15  ;;  %v4566_v24 = vadd.f32 %v9382_v51, %v10813_v63  ;;  %v10851_v49 = vsub.f32 %v9137_v0, %v8686_v29  ;;  %v9405_v15 = vpop.permute.xlu0 %3335  ;;  %v10853_v46 = vld [vmem:[#allocation91_spill] sm:$0xff] }
 0x9c8   :  { %v3492_v27 = vadd.f32 %v3399_v14, %v10846_v8  ;;  %v3552_v45 = vsub.f32 %v3520_v37, %v9292_v38  ;;  %v3349_v13 = vsel %vm75_vm2, %v9274_v36, %v10852_v50  ;;  %v9403_v14 = vmul.f32 %v8986_v18, %v8986_v18 }
 0x9c9   :  { %v4591_v40 = vadd.f32 %v3551_v20, %v10851_v49  ;;  %v4575_v8 = vadd.f32 0.0001, %v4559_v53  ;;  %v4576_v44 = vadd.f32 0.0001, %v4560_v2  ;;  %v3507_v9 = vadd.f32 %v3491_v31, %v3444_v5  ;;  %v10855_v31 = vld [vmem:[#allocation63_spill] sm:$0xff] }
 0x9ca   :  { %v3508_v38 = vadd.f32 %v3492_v27, %v10853_v46  ;;  %v10854_v29 = vsub.f32 %v9159_v28, %v10791_v54  ;;  %v3370_v20 = vrot.slane %v3349_v13, 1  ;;  %v3400_v49 = vrot.slane %v3349_v13, 7 }
 0x9cb   :  { %v4607_v37 = vadd.f32 0.0009, %v4591_v40  ;;  %v3523_v17 = vmul.f32 0.11111111, %v3507_v9  ;;  %v9413_v18 = vmul.f32 %v8988_v23, %v8988_v23  ;;  %v4567_v53 = vadd.f32 %v9403_v14, %v10816_v62  ;;  %v9421_v54 = vpop.permute.xlu0 %4097 }
 0x9cc   :  { %v4592_v0 = vadd.f32 %v3552_v45, %v10854_v29  ;;  %v3524_v36 = vmul.f32 0.11111111, %v3508_v38  ;;  %v10856_v27 = vrot.slane %v10855_v31, 7  ;;  %v3434_v28 = vsel %vm781_vm4, %v3370_v20, %v3400_v49 }
 0x9cd   :  { %v4623_v5 = vmul.f32 %v4607_v37, %v4575_v8  ;;  %v4579_v45 = vadd.f32 0.0001, %v4563_v56  ;;  %v3555_v40 = vsub.f32 %v3523_v17, %v9326_v26  ;;  %v3493_v23 = vadd.f32 %v3434_v28, %v3349_v13 }
 0x9ce   :  { %v4608_v2 = vadd.f32 0.0009, %v4592_v0  ;;  %v3402_v50 = vsel %vm781_vm4, %v3400_v49, %v10856_v27  ;;  %v3556_v9 = vsub.f32 %v3524_v36, %v9330_v52  ;;  %v10857_v38 = vrot.slane %v10855_v31, 1  ;;  %v10860_v36 = vld [vmem:[#allocation75_spill] sm:$0xff] }
 0x9cf   :  { %v3494_v8 = vadd.f32 %v3402_v50, %v10855_v31  ;;  %v4568_v0 = vadd.f32 %v9413_v18, %v10817_v39  ;;  %v4580_v37 = vadd.f32 0.0001, %v4564_v55  ;;  %v10858_v49 = vsub.f32 %v9214_v12, %v10803_v32  ;;  %v9442_v27 = vpop.permute.xlu0 %4166 }
 0x9d0   :  { %v4624_v46 = vmul.f32 %v4608_v2, %v4576_v44  ;;  %v3446_v29 = vsel %vm830_vm3, %v3370_v20, %v10857_v38  ;;  %v10859_v17 = vsub.f32 %v9220_v43, %v10805_v59  ;;  %v4581_v13 = vadd.f32 0.0001, %v4565_v16  ;;  %v10861_v20 = vld [vmem:[#allocation137_spill] sm:$0xff]  ;;  %v10862_v38 = vld [vmem:[#allocation34_spill] sm:$0xff] }
 0x9d1   :  { %v4595_v56 = vadd.f32 %v3555_v40, %v10858_v49  ;;  %v3509_v52 = vadd.f32 %v3493_v23, %v3446_v29  ;;  %v4582_v44 = vadd.f32 0.0001, %v4566_v24  ;;  %v3510_v2 = vadd.f32 %v3494_v8, %v10860_v36 }
 0x9d2   :  { %v4596_v26 = vadd.f32 %v3556_v9, %v10859_v17  ;;  %v3351_v31 = vsel %vm75_vm2, %v9303_v10, %v10861_v20  ;;  %v9446_v12 = vmul.f32 %v9022_v25, %v9022_v25  ;;  %v9450_v24 = vmul.f32 %v9024_v33, %v9024_v33 }
 0x9d3   :  { %v4611_v55 = vadd.f32 0.0009, %v4595_v56  ;;  %v3525_v32 = vmul.f32 0.11111111, %v3509_v52  ;;  %v3526_v43 = vmul.f32 0.11111111, %v3510_v2  ;;  %4799 = vrcp.f32 %v4623_v5  ;;  %v9460_v49 = vpop.permute.xlu0 %4181 }
 0x9d4   :  { %v4612_v50 = vadd.f32 0.0009, %v4596_v26  ;;  %v3371_v59 = vrot.slane %v3351_v31, 1  ;;  %v3403_v16 = vrot.slane %v3351_v31, 7  ;;  %v4569_v9 = vadd.f32 %v9446_v12, %v10822_v21 }
 0x9d5   :  { %v4627_v28 = vmul.f32 %v4611_v55, %v4579_v45  ;;  %v3557_v10 = vsub.f32 %v3525_v32, %v9378_v22  ;;  %v3558_v23 = vsub.f32 %v3526_v43, %v9382_v51  ;;  %v10863_v25 = vrot.slane %v10862_v38, 7 }
 0x9d6   :  { %v4628_v40 = vmul.f32 %v4612_v50, %v4580_v37  ;;  %v3435_v8 = vsel %vm781_vm4, %v3371_v59, %v3403_v16  ;;  %v10864_v33 = vsub.f32 %v9242_v47, %v10812_v48  ;;  %v4583_v37 = vadd.f32 0.0001, %v4567_v53  ;;  %v10867_v47 = vld [vmem:[#allocation97_spill] sm:$0xff]  ;;  %v10868_v53 = vld [vmem:[#allocation62_spill] sm:$0xff] }
 0x9d7   :  { %v3405_v29 = vsel %vm781_vm4, %v3403_v16, %v10863_v25  ;;  %v3495_v22 = vadd.f32 %v3435_v8, %v3351_v31  ;;  %4801 = vrcp.f32 %v4624_v46  ;;  %v10865_v51 = vsub.f32 %v9244_v4, %v10813_v63  ;;  %v9479_v55 = vpop.permute.xlu0 %4191 }
 0x9d8   :  { %v4597_v45 = vadd.f32 %v3557_v10, %v10864_v33  ;;  %v3496_v56 = vadd.f32 %v3405_v29, %v10862_v38  ;;  %v10866_v17 = vrot.slane %v10862_v38, 1  ;;  %v4570_v52 = vadd.f32 %v9450_v24, %v10824_v34  ;;  %v10869_v10 = vld [vmem:[#allocation95_spill] sm:$0xff] }
 0x9d9   :  { %v4598_v5 = vadd.f32 %v3558_v23, %v10865_v51  ;;  %v3353_v46 = vsel %vm75_vm2, %v9335_v7, %v10868_v53  ;;  %v4584_v31 = vadd.f32 0.0001, %v4568_v0  ;;  %4803 = vrcp.f32 %v4627_v28 }
 0x9da   :  { %v3448_v26 = vsel %vm830_vm3, %v3371_v59, %v10866_v17  ;;  %v4613_v36 = vadd.f32 0.0009, %v4597_v45  ;;  %v3512_v48 = vadd.f32 %v3496_v56, %v10867_v47  ;;  %v3372_v4 = vrot.slane %v3353_v46, 1  ;;  %v10874_v56 = vld [vmem:[#allocation36_spill] sm:$0xff] }
 0x9db   :  { %v3511_v2 = vadd.f32 %v3495_v22, %v3448_v26  ;;  %v4614_v20 = vadd.f32 0.0009, %v4598_v5  ;;  %v3406_v63 = vrot.slane %v3353_v46, 7  ;;  %v9483_v59 = vmul.f32 %v9072_v41, %v9072_v41  ;;  %v9501_v33 = vpop.permute.xlu0 %4201  ;;  %v10875_v5 = vld [vmem:[#allocation81_spill] sm:$0xff] }
 0x9dc   :  { %v4629_v50 = vmul.f32 %v4613_v36, %v4581_v13  ;;  %v3528_v43 = vmul.f32 0.11111111, %v3512_v48  ;;  %v10870_v23 = vrot.slane %v10869_v10, 7  ;;  %4805 = vrcp.f32 %v4628_v40 }
 0x9dd   :  { %v3527_v32 = vmul.f32 0.11111111, %v3511_v2  ;;  %v4630_v16 = vmul.f32 %v4614_v20, %v4582_v44  ;;  %v3436_v7 = vsel %vm781_vm4, %v3372_v4, %v3406_v63  ;;  %v10871_v29 = vrot.slane %v10869_v10, 1 }
 0x9de   :  { %v3408_v38 = vsel %vm781_vm4, %v3406_v63, %v10870_v23  ;;  %v3560_v25 = vsub.f32 %v3528_v43, %v9413_v18  ;;  %v3497_v13 = vadd.f32 %v3436_v7, %v3353_v46  ;;  %v9497_v44 = vmul.f32 %v9074_v19, %v9074_v19 }
 0x9df   :  { %v3559_v0 = vsub.f32 %v3527_v32, %v9403_v14  ;;  %v3450_v8 = vsel %vm830_vm3, %v3372_v4, %v10871_v29  ;;  %v3498_v41 = vadd.f32 %v3408_v38, %v10869_v10  ;;  %v4571_v28 = vadd.f32 %v9483_v59, %v8876_v42  ;;  %v9520_v53 = vpop.permute.xlu0 %4211 }
 0x9e0   :  { %v10872_v14 = vsub.f32 %v9255_v61, %v10816_v62  ;;  %v10873_v40 = vsub.f32 %v9257_v58, %v10817_v39  ;;  %v3513_v22 = vadd.f32 %v3497_v13, %v3450_v8  ;;  %v3355_v19 = vsel %vm75_vm2, %v9364_v30, %v10874_v56  ;;  %v9522_v30 = vpop.eup %4799 }
 0x9e1   :  { %v4585_v51 = vadd.f32 0.0001, %v4569_v9  ;;  %v3514_v17 = vadd.f32 %v3498_v41, %v10875_v5  ;;  %v4572_v26 = vadd.f32 %v9497_v44, %v8884_v3  ;;  %v3373_v36 = vrot.slane %v3355_v19, 1  ;;  %v10883_v41 = vld [vmem:[#allocation66_spill] sm:$0xff] }
 0x9e2   :  { %v4599_v18 = vadd.f32 %v3559_v0, %v10872_v14  ;;  %v4600_v45 = vadd.f32 %v3560_v25, %v10873_v40  ;;  %v3529_v61 = vmul.f32 0.11111111, %v3513_v22  ;;  %v9518_v58 = vmul.f32 %v9133_v35, %v9133_v35  ;;  %v10876_v35 = vld [vmem:[#allocation109_spill] sm:$0xff]  ;;  %v10881_v25 = vld [vmem:[#allocation154_spill] sm:$0xff] }
 0x9e3   :  { %4807 = vrcp.f32 %v4629_v50  ;;  %v4586_v39 = vadd.f32 0.0001, %v4570_v52  ;;  %v3530_v47 = vmul.f32 0.11111111, %v3514_v17  ;;  %v3409_v48 = vrot.slane %v3355_v19, 7  ;;  %v10884_v17 = vld [vmem:[#allocation64_spill] sm:$0xff] }
 0x9e4   :  { %v4615_v2 = vadd.f32 0.0009, %v4599_v18  ;;  %v4616_v62 = vadd.f32 0.0009, %v4600_v45  ;;  %v3561_v20 = vsub.f32 %v3529_v61, %v9446_v12  ;;  %v9527_v4 = vmul.f32 %v9135_v11, %v9135_v11  ;;  %v9536_v10 = vpop.eup %4801 }
 0x9e5   :  { %v3562_v63 = vsub.f32 %v3530_v47, %v9450_v24  ;;  %v10877_v32 = vrot.slane %v10876_v35, 7  ;;  %v3437_v50 = vsel %vm781_vm4, %v3373_v36, %v3409_v48  ;;  %v4573_v43 = vadd.f32 %v9518_v58, %v10839_v57 }
 0x9e6   :  { %v4631_v9 = vmul.f32 %v4615_v2, %v4583_v37  ;;  %v4632_v46 = vmul.f32 %v4616_v62, %v4584_v31  ;;  %4809 = vrcp.f32 %v4630_v16  ;;  %v10878_v12 = vsub.f32 %v9276_v1, %v10822_v21  ;;  %v9550_v16 = vpop.permute.xlu0 %4221  ;;  %v10882_v21 = vld [vmem:[#allocation94_spill] sm:$0xff]  ;;  %v9557_v40 = vpop.eup %4803 }
 0x9e7   :  { %v3411_v52 = vsel %vm781_vm4, %v3409_v48, %v10877_v32  ;;  %v3499_v11 = vadd.f32 %v3437_v50, %v3355_v19  ;;  %v10879_v24 = vsub.f32 %v9283_v6, %v10824_v34  ;;  %v4587_v38 = vadd.f32 0.0001, %v4571_v28  ;;  %v10890_v32 = vld [vmem:[#allocation96_spill] sm:$0xff] }
 0x9e8   :  { %v4601_v37 = vadd.f32 %v3561_v20, %v10878_v12  ;;  %v3500_v31 = vadd.f32 %v3411_v52, %v10876_v35  ;;  %v10880_v7 = vrot.slane %v10876_v35, 1  ;;  %v4574_v13 = vadd.f32 %v9527_v4, %v10881_v25  ;;  %v10888_v20 = vld [vmem:[#allocation140_spill] sm:$0xff] }
 0x9e9   :  { %v4602_v23 = vadd.f32 %v3562_v63, %v10879_v24  ;;  %v3357_v6 = vsel %vm75_vm2, %v9405_v15, %v10883_v41  ;;  %v4588_v28 = vadd.f32 0.0001, %v4572_v26  ;;  %4811 = vrcp.f32 %v4631_v9  ;;  %v9559_v19 = vpop.eup %4805  ;;  %v10889_v63 = vld [vmem:[#allocation104_spill] sm:$0xff] }
 0x9ea   :  { %v3452_v0 = vsel %vm830_vm3, %v3373_v36, %v10880_v7  ;;  %v4617_v29 = vadd.f32 0.0009, %v4601_v37  ;;  %v3516_v8 = vadd.f32 %v3500_v31, %v10882_v21  ;;  %v3374_v14 = vrot.slane %v3357_v6, 1  ;;  %v9565_v62 = vpop.permute.xlu0 %4231  ;;  %v10891_v52 = vld [vmem:[#allocation88_spill] sm:$0xff]  ;;  %v10894_v37 = vld [vmem:[#allocation170_spill] sm:$0xff] }
 0x9eb   :  { %v3515_v1 = vadd.f32 %v3499_v11, %v3452_v0  ;;  %v4618_v34 = vadd.f32 0.0009, %v4602_v23  ;;  %v3412_v18 = vrot.slane %v3357_v6, 7  ;;  %4813 = vrcp.f32 %v4632_v46  ;;  %v10892_v50 = vld [vmem:[#allocation188_spill] sm:$0xff]  ;;  %v10896_v7 = vld [vmem:[#allocation78_spill] sm:$0xff] }
 0x9ec   :  { %v4633_v45 = vmul.f32 %v4617_v29, %v4585_v51  ;;  %v3532_v56 = vmul.f32 0.11111111, %v3516_v8  ;;  %v10885_v36 = vrot.slane %v10884_v17, 7  ;;  %v10886_v51 = vld [vmem:[#allocation21_spill] sm:$0xff]  ;;  %v4431_v35 = vmul.f32 %v10889_v63, %v10888_v20  ;;  %v10903_v20 = vld [vmem:[#allocation172_spill] sm:$0xff] }
 0x9ed   :  { %v3531_v22 = vmul.f32 0.11111111, %v3515_v1  ;;  %v4634_v5 = vmul.f32 %v4618_v34, %v4586_v39  ;;  %v3438_v15 = vsel %vm781_vm4, %v3374_v14, %v3412_v18  ;;  %v4144_v48 = vsel %vm74_vm1, %v10886_v51, %v9421_v54  ;;  %v10897_v34 = vld [vmem:[#allocation76_spill] sm:$0xff]  ;;  %v10901_v51 = vld [vmem:[#allocation82_spill] sm:$0xff] }
 0x9ee   :  { %v3414_v2 = vsel %vm781_vm4, %v3412_v18, %v10885_v36  ;;  %v3564_v61 = vsub.f32 %v3532_v56, %v9497_v44  ;;  %v3501_v47 = vadd.f32 %v3438_v15, %v3357_v6  ;;  %v10887_v39 = vrot.slane %v10884_v17, 1  ;;  %v4100_v21 = vpop.permute.xlu0 %4099 }
 0x9ef   :  { %v3563_v26 = vsub.f32 %v3531_v22, %v9483_v59  ;;  %v3502_v46 = vadd.f32 %v3414_v2, %v10884_v17  ;;  %v4432_v59 = vmul.f32 %v10891_v52, %v10890_v32  ;;  %v10893_v44 = vsub.f32 %v10892_v50, %v8876_v42  ;;  %v10898_v22 = vld [vmem:[#allocation110_spill] sm:$0xff]  ;;  %v10905_v32 = vld [vmem:[#allocation156_spill] sm:$0xff] }
 0x9f0   :  { %v3454_v9 = vsel %vm830_vm3, %v3374_v14, %v10887_v39  ;;  %v10895_v11 = vsub.f32 %v10894_v37, %v8884_v3  ;;  %v4240_v24 = vsel %vm75_vm2, %v9442_v27, %v4144_v48  ;;  %v4589_v23 = vadd.f32 0.0001, %v4573_v43  ;;  %v9591_v8 = vpop.eup %4807  ;;  %v10902_v39 = vld [vmem:[#allocation56_spill] sm:$0xff] }
 0x9f1   :  { %v4603_v12 = vadd.f32 %v3563_v26, %v10893_v44  ;;  %v3517_v31 = vadd.f32 %v3501_v47, %v3454_v9  ;;  %v3518_v0 = vadd.f32 %v3502_v46, %v10896_v7  ;;  %v4288_v29 = vrot.slane %v4240_v24, 7 }
 0x9f2   :  { %v4604_v54 = vadd.f32 %v3564_v61, %v10895_v11  ;;  %v4335_v1 = vrot.slane %v4240_v24, 1  ;;  %v4145_v3 = vsel %vm74_vm1, %v10897_v34, %v4100_v21  ;;  %v4590_v14 = vadd.f32 0.0001, %v4574_v13  ;;  %v4104_v46 = vpop.permute.xlu0 %4103  ;;  %v10907_v11 = vld [vmem:[#allocation105_spill] sm:$0xff] }
 0x9f3   :  { %v4619_v41 = vadd.f32 0.0009, %v4603_v12  ;;  %v3533_v6 = vmul.f32 0.11111111, %v3517_v31  ;;  %v3534_v18 = vmul.f32 0.11111111, %v3518_v0  ;;  %v9603_v61 = vpop.eup %4809  ;;  %v4241_v9 = vsel %vm75_vm2, %v10902_v39, %v4145_v3 }
 0x9f4   :  { %v4620_v42 = vadd.f32 0.0009, %v4604_v54  ;;  %v10899_v56 = vrot.slane %v10898_v22, 7  ;;  %v10900_v43 = vrot.slane %v10898_v22, 1  ;;  %v4375_v13 = vsel %vm830_vm3, %v4335_v1, %v4288_v29  ;;  %v10911_v22 = vld [vmem:[#allocation59_spill] sm:$0xff]  ;;  %v10914_v39 = vld [vmem:[#allocation202_spill] sm:$0xff] }
 0x9f5   :  { %v4635_v36 = vmul.f32 %v4619_v41, %v4587_v38  ;;  %v3565_v15 = vsub.f32 %v3533_v6, %v9518_v58  ;;  %v3566_v47 = vsub.f32 %v3534_v18, %v9527_v4  ;;  %4815 = vrcp.f32 %v4633_v45  ;;  %v10909_v45 = vld [vmem:[#allocation108_spill] sm:$0xff] }
 0x9f6   :  { %v4289_v27 = vsel %vm781_vm4, %v10899_v56, %v4288_v29  ;;  %v4336_v17 = vsel %vm830_vm3, %v10900_v43, %v4335_v1  ;;  %v4636_v2 = vmul.f32 %v4620_v42, %v4588_v28  ;;  %v10904_v38 = vsub.f32 %v10903_v20, %v10839_v57  ;;  %v4108_v1 = vpop.permute.xlu0 %4107 }
 0x9f7   :  { %v4384_v26 = vadd.f32 %v4289_v27, %v4240_v24  ;;  %v4399_v48 = vadd.f32 %v10901_v51, %v4336_v17  ;;  %v4264_v63 = vrot.slane %v4241_v9, 1  ;;  %4817 = vrcp.f32 %v4634_v5  ;;  %v9623_v24 = vpop.eup %4811  ;;  %v10913_v51 = vld [vmem:[#allocation112_spill] sm:$0xff] }
 0x9f8   :  { %v4605_v28 = vadd.f32 %v3565_v15, %v10904_v38  ;;  %v10906_v4 = vsub.f32 %v10905_v32, %v10881_v25  ;;  %v4290_v44 = vrot.slane %v4241_v9, 7  ;;  %v10908_v54 = vrot.slane %v10907_v11, 1  ;;  %v9629_v21 = vpop.eup %4813  ;;  %v10917_v38 = vld [vmem:[#allocation114_spill] sm:$0xff]  ;;  %v10919_v32 = vld [vmem:[#allocation49_spill] sm:$0xff] }
 0x9f9   :  { %v4400_v58 = vadd.f32 %v4384_v26, %v4375_v13  ;;  %v4415_v50 = vmul.f32 0.11111111, %v4399_v48  ;;  %v4147_v57 = vsel %vm74_vm1, %v10909_v45, %v4104_v46  ;;  %v10910_v0 = vrot.slane %v10907_v11, 7 }
 0x9fa   :  { %v4606_v52 = vadd.f32 %v3566_v47, %v10906_v4  ;;  %v4621_v12 = vadd.f32 0.0009, %v4605_v28  ;;  %v4338_v31 = vsel %vm830_vm3, %v4264_v63, %v10908_v54  ;;  %v4328_v29 = vsel %vm781_vm4, %v4264_v63, %v4290_v44 }
 0x9fb   :  { %v4416_v37 = vmul.f32 0.11111111, %v4400_v58  ;;  %v4447_v5 = vsub.f32 %v4415_v50, %v4431_v35  ;;  %v4292_v25 = vsel %vm781_vm4, %v4290_v44, %v10910_v0  ;;  %v4385_v6 = vadd.f32 %v4328_v29, %v4241_v9  ;;  %v10918_v58 = vld [vmem:[#allocation25_spill] sm:$0xff]  ;;  %v10921_v0 = vld [vmem:[#allocation127_spill] sm:$0xff] }
 0x9fc   :  { %v4622_v7 = vadd.f32 0.0009, %v4606_v52  ;;  %v9631_v41 = vmul.f32 %v4621_v12, %v4589_v23  ;;  %v4386_v34 = vadd.f32 %v4292_v25, %v10907_v11  ;;  %v4243_v35 = vsel %vm75_vm2, %v9460_v49, %v4147_v57  ;;  %v10912_v23 = vld [vmem:[#allocation161_spill] sm:$0xff] }
 0x9fd   :  { %v4448_v42 = vsub.f32 %v4416_v37, %v4432_v59  ;;  %v4511_v18 = vmul.f32 2.0, %v4447_v5  ;;  %v4149_v56 = vsel %vm74_vm1, %v10911_v22, %v4108_v1  ;;  %4819 = vrcp.f32 %v4635_v36 }
 0x9fe   :  { %v9634_v3 = vmul.f32 %v4622_v7, %v4590_v14  ;;  %v4401_v43 = vadd.f32 %v4385_v6, %v4338_v31  ;;  %v4402_v17 = vadd.f32 %v4386_v34, %v10912_v23  ;;  %4821 = vrcp.f32 %v4636_v2  ;;  %v10920_v7 = vld [vmem:[#allocation147_spill] sm:$0xff]  ;;  %v10924_v23 = vld [vmem:[#allocation24_spill] sm:$0xff] }
 0x9ff   :  { %v4512_v27 = vmul.f32 2.0, %v4448_v42  ;;  %v4527_v59 = vadd.f32 0.0009, %v4511_v18  ;;  %v4265_v15 = vrot.slane %v4243_v35, 1  ;;  %v4293_v26 = vrot.slane %v4243_v35, 7 }
 0xa00   :  { %v4417_v47 = vmul.f32 0.11111111, %v4401_v43  ;;  %v4418_v13 = vmul.f32 0.11111111, %v4402_v17  ;;  %v4245_v49 = vsel %vm75_vm2, %v9479_v55, %v4149_v56  ;;  %v10915_v9 = vrot.slane %v10914_v39, 7 }
 0xa01   :  { %v4528_v14 = vadd.f32 0.0009, %v4512_v27  ;;  %v4543_v48 = vmul.f32 %v4527_v59, %v10913_v51  ;;  %v4329_v46 = vsel %vm781_vm4, %v4265_v15, %v4293_v26  ;;  %v10916_v2 = vrot.slane %v10914_v39, 1  ;;  %v10925_v59 = vld [vmem:[#allocation54_spill] sm:$0xff]  ;;  %v10927_v51 = vld [vmem:[#allocation111_spill] sm:$0xff] }
 0xa02   :  { %v4295_v36 = vsel %vm781_vm4, %v4293_v26, %v10915_v9  ;;  %v4449_v63 = vsub.f32 %v4417_v47, %v10918_v58  ;;  %v4450_v4 = vsub.f32 %v4418_v13, %v10919_v32  ;;  %v4387_v55 = vadd.f32 %v4329_v46, %v4243_v35  ;;  %v9660_v45 = vpop.eup %4815  ;;  %v10926_v47 = vld [vmem:[#allocation89_spill] sm:$0xff] }
 0xa03   :  { %v4340_v20 = vsel %vm830_vm3, %v4265_v15, %v10916_v2  ;;  %v4544_v28 = vmul.f32 %v4528_v14, %v10917_v38  ;;  %v4640_v52 = vmul.f32 %v9522_v30, %v4543_v48  ;;  %v4388_v50 = vadd.f32 %v4295_v36, %v10914_v39  ;;  %v10928_v36 = vld [vmem:[#allocation80_spill] sm:$0xff]  ;;  %v10929_v2 = vld [vmem:[#allocation98_spill] sm:$0xff]  ;;  %v10930_v38 = vld [vmem:[#allocation175_spill] sm:$0xff] }
 0xa04   :  { %v4266_v44 = vrot.slane %v4245_v49, 1  ;;  %v4296_v12 = vrot.slane %v4245_v49, 7  ;;  %v4513_v11 = vmul.f32 2.0, %v4449_v63  ;;  %v4514_v54 = vmul.f32 2.0, %v4450_v4  ;;  %v9667_v1 = vpop.eup %4817 }
 0xa05   :  { %v4642_v37 = vmul.f32 %v9536_v10, %v4544_v28  ;;  %v4403_v31 = vadd.f32 %v4387_v55, %v4340_v20  ;;  %v4671_v57 = vsub.f32 1.0, %v4640_v52  ;;  %v4404_v5 = vadd.f32 %v4388_v50, %v10920_v7  ;;  %v4112_v28 = vpop.permute.xlu0 %4111  ;;  %v10932_v7 = vld [vmem:[#allocation46_spill] sm:$0xff] }
 0xa06   :  { %v10922_v25 = vrot.slane %v10921_v0, 7  ;;  %v4330_v30 = vsel %vm781_vm4, %v4266_v44, %v4296_v12  ;;  %v4529_v6 = vadd.f32 0.0009, %v4513_v11  ;;  %v4530_v34 = vadd.f32 0.0009, %v4514_v54 }
 0xa07   :  { %v4672_v42 = vsub.f32 1.0, %v4642_v37  ;;  %v10923_v10 = vrot.slane %v10921_v0, 1  ;;  %v4687_v35 = vmul.f32 0.5, %v4671_v57  ;;  %v4419_v22 = vmul.f32 0.11111111, %v4403_v31  ;;  %v10931_v31 = vld [vmem:[#allocation177_spill] sm:$0xff] }
 0xa08   :  { %v4298_v29 = vsel %vm781_vm4, %v4296_v12, %v10922_v25  ;;  %v4420_v56 = vmul.f32 0.11111111, %v4404_v5  ;;  %v4389_v27 = vadd.f32 %v4330_v30, %v4245_v49  ;;  %v4545_v17 = vmul.f32 %v4529_v6, %v10924_v23  ;;  %v10934_v6 = vld [vmem:[#allocation145_spill] sm:$0xff] }
 0xa09   :  { %v4342_v18 = vsel %vm830_vm3, %v4266_v44, %v10923_v10  ;;  %v4688_v43 = vmul.f32 0.5, %v4672_v42  ;;  %v4546_v15 = vmul.f32 %v4530_v34, %v10925_v59  ;;  %v4390_v26 = vadd.f32 %v4298_v29, %v10921_v0  ;;  %v10933_v29 = vld [vmem:[#allocation196_spill] sm:$0xff] }
 0xa0a   :  { %v4703_v14 = vmax.f32 %v4687_v35, 0.0  ;;  %v4451_v13 = vsub.f32 %v4419_v22, %v10926_v47  ;;  %v4452_v48 = vsub.f32 %v4420_v56, %v10927_v51  ;;  %v4405_v39 = vadd.f32 %v4389_v27, %v4342_v18  ;;  %v9680_v58 = vpop.eup %4819  ;;  %v10935_v10 = vld [vmem:[#allocation176_spill] sm:$0xff] }
 0xa0b   :  { %v4704_v9 = vmax.f32 %v4688_v43, 0.0  ;;  %v4644_v46 = vmul.f32 %v10928_v36, %v4545_v17  ;;  %v4646_v20 = vmul.f32 %v10929_v2, %v4546_v15  ;;  %v4406_v49 = vadd.f32 %v4390_v26, %v10930_v38  ;;  %v9682_v52 = vpop.eup %4821  ;;  %v4116_v17 = vpop.permute.xlu0 %4115  ;;  %v10939_v2 = vld [vmem:[#allocation195_spill] sm:$0xff] }
 0xa0c   :  { %v4719_v63 = vmin.f32 %v4703_v14, 1.0  ;;  %v4515_v32 = vmul.f32 2.0, %v4451_v13  ;;  %v4516_v4 = vmul.f32 2.0, %v4452_v48  ;;  %v4421_v55 = vmul.f32 0.11111111, %v4405_v39  ;;  %v10936_v14 = vld [vmem:[#allocation164_spill] sm:$0xff] }
 0xa0d   :  { %v4720_v50 = vmin.f32 %v4704_v9, 1.0  ;;  %v4673_v44 = vsub.f32 1.0, %v4644_v46  ;;  %v4674_v12 = vsub.f32 1.0, %v4646_v20  ;;  %v4422_v37 = vmul.f32 0.11111111, %v4406_v49 }
 0xa0e   :  { %4736 = vst.msk [vmem:[#allocation7] sm:$0xff] %vm4735_vm5, %v4719_v63  ;;  %v4531_v11 = vadd.f32 0.0009, %v4515_v32  ;;  %v4532_v54 = vadd.f32 0.0009, %v4516_v4  ;;  %v4453_v57 = vsub.f32 %v4421_v55, %v10931_v31  ;;  %v4151_v5 = vsel %vm74_vm1, %v10932_v7, %v4112_v28  ;;  %v10941_v63 = vld [vmem:[#allocation29_spill] sm:$0xff] }
 0xa0f   :  { %4737 = vst.msk [vmem:[#allocation7 + $0x8] sm:$0xff] %vm4735_vm5, %v4720_v50  ;;  %v4689_v0 = vmul.f32 0.5, %v4673_v44  ;;  %v4690_v25 = vmul.f32 0.5, %v4674_v12  ;;  %v4454_v30 = vsub.f32 %v4422_v37, %v10933_v29  ;;  %v4247_v42 = vsel %vm75_vm2, %v9501_v33, %v4151_v5 }
 0xa10   :  { %v4547_v34 = vmul.f32 %v4531_v11, %v10934_v6  ;;  %v4548_v18 = vmul.f32 %v4532_v54, %v10935_v10  ;;  %v4517_v35 = vmul.f32 2.0, %v4453_v57  ;;  %v4267_v22 = vrot.slane %v4247_v42, 1  ;;  %v10942_v11 = vld [vmem:[#allocation169_spill] sm:$0xff]  ;;  %v4120_v57 = vpop.permute.xlu0 %4119  ;;  %v10943_v6 = vld [vmem:[#allocation120_spill] sm:$0xff] }
 0xa11   :  { %v4705_v56 = vmax.f32 %v4689_v0, 0.0  ;;  %v4706_v27 = vmax.f32 %v4690_v25, 0.0  ;;  %v4518_v43 = vmul.f32 2.0, %v4454_v30  ;;  %v4299_v23 = vrot.slane %v4247_v42, 7 }
 0xa12   :  { %v4648_v59 = vmul.f32 %v9557_v40, %v4547_v34  ;;  %v4650_v15 = vmul.f32 %v9559_v19, %v4548_v18  ;;  %v4533_v26 = vadd.f32 0.0009, %v4517_v35  ;;  %v10937_v47 = vrot.slane %v10936_v14, 1  ;;  %v10940_v19 = vld [vmem:[#allocation159_spill] sm:$0xff] }
 0xa13   :  { %v4721_v13 = vmin.f32 %v4705_v56, 1.0  ;;  %v4722_v51 = vmin.f32 %v4706_v27, 1.0  ;;  %v4534_v48 = vadd.f32 0.0009, %v4518_v43  ;;  %v10938_v39 = vrot.slane %v10936_v14, 7  ;;  %v10946_v56 = vld [vmem:[#allocation123_spill] sm:$0xff] }
 0xa14   :  { %v4344_v33 = vsel %vm830_vm3, %v4267_v22, %v10937_v47  ;;  %v4675_v36 = vsub.f32 1.0, %v4648_v59  ;;  %v4676_v46 = vsub.f32 1.0, %v4650_v15  ;;  %v4549_v20 = vmul.f32 %v4533_v26, %v10939_v2  ;;  %v10947_v43 = vld [vmem:[#allocation190_spill] sm:$0xff] }
 0xa15   :  { %v4301_v9 = vsel %vm781_vm4, %v4299_v23, %v10938_v39  ;;  %v4331_v40 = vsel %vm781_vm4, %v4267_v22, %v4299_v23  ;;  %4738 = vst.msk [vmem:[#allocation7 + $0x10] sm:$0xff] %vm4735_vm5, %v4721_v13  ;;  %4739 = vst.msk [vmem:[#allocation7 + $0x18] sm:$0xff] %vm4735_vm5, %v4722_v51  ;;  %v4550_v38 = vmul.f32 %v4534_v48, %v10940_v19  ;;  %v4124_v39 = vpop.permute.xlu0 %4123  ;;  %4823 = vrcp.f32 %v9631_v41 }
 0xa16   :  { %v4391_v49 = vadd.f32 %v4331_v40, %v4247_v42  ;;  %v4392_v28 = vadd.f32 %v4301_v9, %v10936_v14  ;;  %v4153_v32 = vsel %vm74_vm1, %v10941_v63, %v4116_v17  ;;  %v4691_v4 = vmul.f32 0.5, %v4675_v36  ;;  %v10948_v14 = vld [vmem:[#allocation70_spill] sm:$0xff] }
 0xa17   :  { %v4692_v55 = vmul.f32 0.5, %v4676_v46  ;;  %v4652_v50 = vmul.f32 %v9591_v8, %v4549_v20  ;;  %v4249_v44 = vsel %vm75_vm2, %v9520_v53, %v4153_v32  ;;  %v4654_v12 = vmul.f32 %v9603_v61, %v4550_v38  ;;  %v10949_v46 = vld [vmem:[#allocation153_spill] sm:$0xff]  ;;  %v10950_v32 = vld [vmem:[#allocation79_spill] sm:$0xff] }
 0xa18   :  { %v4407_v37 = vadd.f32 %v4391_v49, %v4344_v33  ;;  %v4408_v54 = vadd.f32 %v4392_v28, %v10942_v11  ;;  %v4268_v31 = vrot.slane %v4249_v44, 1  ;;  %v4707_v7 = vmax.f32 %v4691_v4, 0.0  ;;  %v10951_v4 = vld [vmem:[#allocation143_spill] sm:$0xff] }
 0xa19   :  { %v4708_v5 = vmax.f32 %v4692_v55, 0.0  ;;  %v4677_v0 = vsub.f32 1.0, %v4652_v50  ;;  %v4302_v25 = vrot.slane %v4249_v44, 7  ;;  %v4678_v29 = vsub.f32 1.0, %v4654_v12  ;;  %v10952_v50 = vld [vmem:[#allocation163_spill] sm:$0xff]  ;;  %v10953_v12 = vld [vmem:[#allocation152_spill] sm:$0xff] }
 0xa1a   :  { %v4423_v30 = vmul.f32 0.11111111, %v4407_v37  ;;  %v4424_v42 = vmul.f32 0.11111111, %v4408_v54  ;;  %v10944_v8 = vrot.slane %v10943_v6, 1  ;;  %v4723_v10 = vmin.f32 %v4707_v7, 1.0 }
 0xa1b   :  { %v4724_v53 = vmin.f32 %v4708_v5, 1.0  ;;  %v4693_v18 = vmul.f32 0.5, %v4677_v0  ;;  %v10945_v61 = vrot.slane %v10943_v6, 7  ;;  %v4694_v22 = vmul.f32 0.5, %v4678_v29  ;;  %v10955_v54 = vld [vmem:[#allocation142_spill] sm:$0xff] }
 0xa1c   :  { %v4346_v34 = vsel %vm830_vm3, %v4268_v31, %v10944_v8  ;;  %v4455_v27 = vsub.f32 %v4423_v30, %v10946_v56  ;;  %v4456_v23 = vsub.f32 %v4424_v42, %v10947_v43  ;;  %v4332_v17 = vsel %vm781_vm4, %v4268_v31, %v4302_v25  ;;  %4740 = vst.msk [vmem:[#allocation7 + $0x20] sm:$0xff] %vm4735_vm5, %v4723_v10 }
 0xa1d   :  { %v4304_v35 = vsel %vm781_vm4, %v4302_v25, %v10945_v61  ;;  %4741 = vst.msk [vmem:[#allocation7 + $0x28] sm:$0xff] %vm4735_vm5, %v4724_v53  ;;  %v4709_v59 = vmax.f32 %v4693_v18, 0.0  ;;  %v4393_v15 = vadd.f32 %v4332_v17, %v4249_v44  ;;  %v4155_v47 = vsel %vm74_vm1, %v10948_v14, %v4120_v57  ;;  %v10956_v57 = vld [vmem:[#allocation160_spill] sm:$0xff]  ;;  %v10958_v53 = vld [vmem:[#allocation174_spill] sm:$0xff] }
 0xa1e   :  { %v4394_v26 = vadd.f32 %v4304_v35, %v10943_v6  ;;  %v4710_v33 = vmax.f32 %v4694_v22, 0.0  ;;  %v4519_v13 = vmul.f32 2.0, %v4455_v27  ;;  %v4520_v51 = vmul.f32 2.0, %v4456_v23  ;;  %v10962_v14 = vld [vmem:[#allocation150_spill] sm:$0xff] }
 0xa1f   :  { %v4251_v48 = vsel %vm75_vm2, %v9550_v16, %v4155_v47  ;;  %v4725_v9 = vmin.f32 %v4709_v59, 1.0  ;;  %v4409_v36 = vadd.f32 %v4393_v15, %v4346_v34  ;;  %v4157_v16 = vsel %vm74_vm1, %v10950_v32, %v4124_v39  ;;  %v10959_v59 = vld [vmem:[#allocation125_spill] sm:$0xff]  ;;  %v10961_v15 = vld [vmem:[#allocation166_spill] sm:$0xff] }
 0xa20   :  { %v4410_v2 = vadd.f32 %v4394_v26, %v10949_v46  ;;  %v4269_v20 = vrot.slane %v4251_v48, 1  ;;  %v4726_v40 = vmin.f32 %v4710_v33, 1.0  ;;  %v4535_v19 = vadd.f32 0.0009, %v4519_v13  ;;  %v10963_v33 = vld [vmem:[#allocation148_spill] sm:$0xff]  ;;  %v10964_v39 = vld [vmem:[#allocation165_spill] sm:$0xff] }
 0xa21   :  { %v4536_v38 = vadd.f32 0.0009, %v4520_v51  ;;  %v4305_v49 = vrot.slane %v4251_v48, 7  ;;  %4742 = vst.msk [vmem:[#allocation7 + $0x30] sm:$0xff] %vm4735_vm5, %v4725_v9  ;;  %v4425_v28 = vmul.f32 0.11111111, %v4409_v36  ;;  %v4253_v6 = vsel %vm75_vm2, %v9565_v62, %v4157_v16 }
 0xa22   :  { %v4426_v63 = vmul.f32 0.11111111, %v4410_v2  ;;  %4743 = vst.msk [vmem:[#allocation7 + $0x38] sm:$0xff] %vm4735_vm5, %v4726_v40  ;;  %v4551_v55 = vmul.f32 %v4535_v19, %v10951_v4  ;;  %v10954_v37 = vrot.slane %v10953_v12, 7  ;;  %v10957_v30 = vrot.slane %v10953_v12, 1 }
 0xa23   :  { %v4552_v44 = vmul.f32 %v4536_v38, %v10952_v50  ;;  %v4333_v41 = vsel %vm781_vm4, %v4269_v20, %v4305_v49  ;;  %v4457_v31 = vsub.f32 %v4425_v28, %v10955_v54  ;;  %v4270_v22 = vrot.slane %v4253_v6, 1  ;;  %v4824_v50 = vpop.eup %4823  ;;  %v10968_v54 = vld [vmem:[#allocation178_spill] sm:$0xff] }
 0xa24   :  { %v4307_v11 = vsel %vm781_vm4, %v4305_v49, %v10954_v37  ;;  %v4458_v7 = vsub.f32 %v4426_v63, %v10956_v57  ;;  %v4395_v5 = vadd.f32 %v4333_v41, %v4251_v48  ;;  %v4656_v25 = vmul.f32 %v9623_v24, %v4551_v55 }
 0xa25   :  { %v4396_v0 = vadd.f32 %v4307_v11, %v10953_v12  ;;  %v4658_v29 = vmul.f32 %v9629_v21, %v4552_v44  ;;  %v4348_v42 = vsel %vm830_vm3, %v4269_v20, %v10957_v30  ;;  %v4521_v8 = vmul.f32 2.0, %v4457_v31  ;;  %v10966_v44 = vld [vmem:[#allocation149_spill] sm:$0xff]  ;;  %v10969_v30 = vld [vmem:[#allocation184_spill] sm:$0xff] }
 0xa26   :  { %v4522_v34 = vmul.f32 2.0, %v4458_v7  ;;  %v4411_v10 = vadd.f32 %v4395_v5, %v4348_v42  ;;  %v4679_v61 = vsub.f32 1.0, %v4656_v25  ;;  %v4308_v56 = vrot.slane %v4253_v6, 7 }
 0xa27   :  { %v4412_v18 = vadd.f32 %v4396_v0, %v10958_v53  ;;  %v4680_v35 = vsub.f32 1.0, %v4658_v29  ;;  %4825 = vrcp.f32 %v9634_v3  ;;  %v4537_v24 = vadd.f32 0.0009, %v4521_v8  ;;  %v10970_v8 = vld [vmem:[#allocation167_spill] sm:$0xff] }
 0xa28   :  { %v4538_v21 = vadd.f32 0.0009, %v4522_v34  ;;  %v4427_v27 = vmul.f32 0.11111111, %v4411_v10  ;;  %v4695_v43 = vmul.f32 0.5, %v4679_v61  ;;  %v10960_v60 = vrot.slane %v10959_v59, 7 }
 0xa29   :  { %v4696_v23 = vmul.f32 0.5, %v4680_v35  ;;  %v4428_v17 = vmul.f32 0.11111111, %v4412_v18  ;;  %v4553_v26 = vmul.f32 %v4537_v24, %v10961_v15  ;;  %v4334_v51 = vsel %vm781_vm4, %v4270_v22, %v4308_v56  ;;  %v10971_v24 = vld [vmem:[#allocation151_spill] sm:$0xff] }
 0xa2a   :  { %v4310_v62 = vsel %vm781_vm4, %v4308_v56, %v10960_v60  ;;  %v4554_v47 = vmul.f32 %v4538_v21, %v10962_v14  ;;  %v4459_v13 = vsub.f32 %v4427_v27, %v10963_v33  ;;  %v4711_v48 = vmax.f32 %v4695_v43, 0.0  ;;  %v10972_v43 = vld [vmem:[#allocation168_spill] sm:$0xff] }
 0xa2b   :  { %v4712_v3 = vmax.f32 %v4696_v23, 0.0  ;;  %v4460_v9 = vsub.f32 %v4428_v17, %v10964_v39  ;;  %v10965_v36 = vrot.slane %v10959_v59, 1  ;;  %v4660_v2 = vmul.f32 %v9660_v45, %v4553_v26 }
 0xa2c   :  { %v4662_v20 = vmul.f32 %v9667_v1, %v4554_v47  ;;  %v4523_v40 = vmul.f32 2.0, %v4459_v13  ;;  %v4397_v19 = vadd.f32 %v4334_v51, %v4253_v6  ;;  %v4727_v38 = vmin.f32 %v4711_v48, 1.0  ;;  %v10967_v1 = vld [vmem:[#allocation158_spill] sm:$0xff] }
 0xa2d   :  { %v4350_v46 = vsel %vm830_vm3, %v4270_v22, %v10965_v36  ;;  %v4728_v49 = vmin.f32 %v4712_v3, 1.0  ;;  %v4524_v28 = vmul.f32 2.0, %v4460_v9  ;;  %v4398_v63 = vadd.f32 %v4310_v62, %v10959_v59 }
 0xa2e   :  { %v4681_v32 = vsub.f32 1.0, %v4660_v2  ;;  %v4682_v16 = vsub.f32 1.0, %v4662_v20  ;;  %v4539_v4 = vadd.f32 0.0009, %v4523_v40  ;;  %v4413_v55 = vadd.f32 %v4397_v19, %v4350_v46  ;;  %4744 = vst.msk [vmem:[#allocation7 + $0x40] sm:$0xff] %vm4735_vm5, %v4727_v38 }
 0xa2f   :  { %v4508_v12 = vadd.f32 0.0001, %v10966_v44  ;;  %4745 = vst.msk [vmem:[#allocation7 + $0x48] sm:$0xff] %vm4735_vm5, %v4728_v49  ;;  %v4540_v45 = vadd.f32 0.0009, %v4524_v28  ;;  %v4414_v37 = vadd.f32 %v4398_v63, %v10967_v1 }
 0xa30   :  { %v4697_v11 = vmul.f32 0.5, %v4681_v32  ;;  %v4698_v41 = vmul.f32 0.5, %v4682_v16  ;;  %v4555_v31 = vmul.f32 %v4539_v4, %v10968_v54  ;;  %v4429_v57 = vmul.f32 0.11111111, %v4413_v55 }
 0xa31   :  { %v4556_v7 = vmul.f32 %v4540_v45, %v4508_v12  ;;  %v4430_v5 = vmul.f32 0.11111111, %v4414_v37  ;;  %v4509_v21 = vadd.f32 0.0001, %v10971_v24  ;;  %v4510_v23 = vadd.f32 0.0001, %v10972_v43 }
 0xa32   :  { %v4713_v0 = vmax.f32 %v4697_v11, 0.0  ;;  %v4714_v25 = vmax.f32 %v4698_v41, 0.0  ;;  %v4664_v29 = vmul.f32 %v9680_v58, %v4555_v31  ;;  %v4461_v42 = vsub.f32 %v4429_v57, %v10969_v30 }
 0xa33   :  { %v4666_v6 = vmul.f32 %v9682_v52, %v4556_v7  ;;  %v4462_v34 = vsub.f32 %v4430_v5, %v10970_v8 }
 0xa34   :  { %v4729_v10 = vmin.f32 %v4713_v0, 1.0  ;;  %v4730_v53 = vmin.f32 %v4714_v25, 1.0  ;;  %v4683_v18 = vsub.f32 1.0, %v4664_v29  ;;  %v4525_v61 = vmul.f32 2.0, %v4461_v42  ;;  %v4826_v35 = vpop.eup %4825 }
 0xa35   :  { %v4684_v22 = vsub.f32 1.0, %v4666_v6  ;;  %v4526_v56 = vmul.f32 2.0, %v4462_v34 }
 0xa36   :  { %4746 = vst.msk [vmem:[#allocation7 + $0x50] sm:$0xff] %vm4735_vm5, %v4729_v10  ;;  %4747 = vst.msk [vmem:[#allocation7 + $0x58] sm:$0xff] %vm4735_vm5, %v4730_v53  ;;  %v4699_v58 = vmul.f32 0.5, %v4683_v18  ;;  %v4541_v27 = vadd.f32 0.0009, %v4525_v61 }
 0xa37   :  { %v4700_v52 = vmul.f32 0.5, %v4684_v22  ;;  %v4542_v17 = vadd.f32 0.0009, %v4526_v56 }
 0xa38   :  { %v4715_v59 = vmax.f32 %v4699_v58, 0.0  ;;  %v4557_v60 = vmul.f32 %v4541_v27, %v4509_v21 }
 0xa39   :  { %v4716_v62 = vmax.f32 %v4700_v52, 0.0  ;;  %v4558_v15 = vmul.f32 %v4542_v17, %v4510_v23 }
 0xa3a   :  { %v4731_v26 = vmin.f32 %v4715_v59, 1.0  ;;  %v4668_v14 = vmul.f32 %v4824_v50, %v4557_v60 }
 0xa3b   :  { %v4732_v47 = vmin.f32 %v4716_v62, 1.0  ;;  %v4670_v33 = vmul.f32 %v4826_v35, %v4558_v15 }
 0xa3c   :  { %4748 = vst.msk [vmem:[#allocation7 + $0x60] sm:$0xff] %vm4735_vm5, %v4731_v26  ;;  %v4685_v13 = vsub.f32 1.0, %v4668_v14 }
 0xa3d   :  { %4749 = vst.msk [vmem:[#allocation7 + $0x68] sm:$0xff] %vm4735_vm5, %v4732_v47  ;;  %v4686_v51 = vsub.f32 1.0, %v4670_v33 }
 0xa3e   :  { %v4701_v48 = vmul.f32 0.5, %v4685_v13 }
 0xa3f   :  { %v4702_v3 = vmul.f32 0.5, %v4686_v51 }
 0xa40   :  { %v4717_v39 = vmax.f32 %v4701_v48, 0.0 }
 0xa41   :  { %v4718_v9 = vmax.f32 %v4702_v3, 0.0 }
 0xa42   :  { %v4733_v36 = vmin.f32 %v4717_v39, 1.0 }
 0xa43   :  { %v4734_v46 = vmin.f32 %v4718_v9, 1.0 }
 0xa44   :  { %4750 = vst.msk [vmem:[#allocation7 + $0x70] sm:$0xff] %vm4735_vm5, %v4733_v36 }
 0xa45   :  { %4751 = vst.msk [vmem:[#allocation7 + $0x78] sm:$0xff] %vm4735_vm5, %v4734_v46 }
 0xa46   :  { %4933 = shalt.err (!%p4930_p0)
}
 0xa47   :  { %4763 = dma.vmem_to_hbm [thread:$0]  %s4758_s26, 2048, %s9802_s2, [#allocation4], %s4949_s12, %s4949_s12, %s4950_s13  }
 0xa48   :  { %4946 = dma.done.wait [#allocation4], 2048  }
 0xa49   :  { %4947 = vsyncadd [#allocation4], 4294965248 }
 0xa4a   :  { %4767 = vsyncpa [#allocation3], 1 }
 0xa4b   :  { %4768 = vsyncpa [#allocation6], 1 }
 0xa4c   :  { %4769 = vsyncpa [#allocation4], 1 }

</bundles_post_ra>
